<compile_context>
chip_gen: v6e
topology: v6e:2x2x1
jax: 0.10.0
libtpu: 0.0.40
codegen_flags: <defaults>
</compile_context>

<pallas_src>
import functools

import jax
import jax.numpy as jnp
from jax import lax
from jax.experimental import pallas as pl
from jax.experimental.pallas import tpu as pltpu


# ----------------------------------------------------------------------------
# Encoder layer kernel: grid = (direction,), full time loop inside the kernel.
# ----------------------------------------------------------------------------
def _enc_layer_kernel(x_ref, wih_ref, whh_ref, bih_ref, bhh_ref,
                      ys_ref, gi_ref, *, H, S):
    d = pl.program_id(0)                                   # 0 = fwd, 1 = bwd
    B = x_ref.shape[1]
    Din = x_ref.shape[2]

    # Input projection for all S timesteps in ONE fat MXU pass (8x better row
    # utilization than S per-step (B,Din) matmuls), stored to VMEM scratch so
    # the recurrence can index it at a dynamic time step.
    x_all = x_ref[...].reshape(S * B, Din)
    gi_all = jnp.dot(x_all, wih_ref[...],
                     preferred_element_type=jnp.float32) + bih_ref[...]
    gi_ref[...] = gi_all.reshape(S, B, 3 * H)

    whh = whh_ref[...]
    bhh = bhh_ref[...]

    # TODO(synk): with toy H=32 the gate slices / (B,H) stores are not
    #             lane-aligned; real configs should use H % 128 == 0.
    def step(t, h):
        t_eff = t + d * (S - 1 - 2 * t)                    # fwd: t, bwd: S-1-t
        gi = gi_ref[t_eff]                                 # (B, 3H)
        gh = jnp.dot(h, whh, preferred_element_type=jnp.float32) + bhh
        r = jax.nn.sigmoid(gi[:, 0:H] + gh[:, 0:H])
        z = jax.nn.sigmoid(gi[:, H:2 * H] + gh[:, H:2 * H])
        n = jnp.tanh(gi[:, 2 * H:3 * H] + r * gh[:, 2 * H:3 * H])
        h_new = (1.0 - z) * n + z * h
        ys_ref[t_eff] = h_new                              # natural time order
        return h_new

    lax.fori_loop(0, S, step, jnp.zeros((B, H), jnp.float32), unroll=True)


def encoder_layer(x, wih, whh, bih, bhh):
    """x: (S, B, Din); weights stacked per direction (dir 0 = fwd, 1 = bwd).

    Returns ys: (2, S, B, H) with both directions' output sequences in
    natural time order (output at t == hidden after consuming t).
    """
    S, B, Din = x.shape
    H = whh.shape[-2]

    kernel = functools.partial(_enc_layer_kernel, H=H, S=S)
    return pl.pallas_call(
        kernel,
        out_shape=jax.ShapeDtypeStruct((2, S, B, H), jnp.float32),
        grid=(2,),
        in_specs=[
            pl.BlockSpec((S, B, Din), lambda d: (0, 0, 0)),        # x, resident
            pl.BlockSpec((None, Din, 3 * H), lambda d: (d, 0, 0)),  # per-dir W
            pl.BlockSpec((None, H, 3 * H), lambda d: (d, 0, 0)),
            pl.BlockSpec((None, 1, 3 * H), lambda d: (d, 0, 0)),
            pl.BlockSpec((None, 1, 3 * H), lambda d: (d, 0, 0)),
        ],
        out_specs=pl.BlockSpec((None, S, B, H), lambda d: (d, 0, 0, 0)),
        scratch_shapes=[pltpu.VMEM((S, B, 3 * H), jnp.float32)],   # precomputed gi
        compiler_params=pltpu.CompilerParams(
            dimension_semantics=("parallel",)),                     # 2 TCs on v7x
    )(x, wih, whh, bih, bhh)


# ----------------------------------------------------------------------------
# Decoder kernel: whole greedy decode loop in ONE gridless pallas_call.
# ----------------------------------------------------------------------------
def _decoder_kernel(enc_ref, emb_ref, h0_ref, w_ref, b_ref,
                    wah_ref, wae_ref, va_ref,
                    wch_ref, wcc_ref, bc_ref, wo_ref, bo_ref,
                    out_ref, *, n_layers, H, T, sos):
    B, S, _ = enc_ref.shape
    Vp = emb_ref.shape[0]

    # ---- step-invariant work hoisted above the decode loop ----
    enc = enc_ref[...]                                               # (B, S, H)
    e_proj = jnp.dot(enc.reshape(B * S, H), wae_ref[...],
                     preferred_element_type=jnp.float32).reshape(B, S, H)
    emb = emb_ref[...]
    wah = wah_ref[...]
    va = va_ref[...]
    wch = wch_ref[...]
    wcc = wcc_ref[...]
    bc = bc_ref[...]
    wo = wo_ref[...]
    bo = bo_ref[...]
    iota_v = lax.broadcasted_iota(jnp.int32, (B, Vp), 1)

    hs0 = tuple(h0_ref[l] for l in range(n_layers))
    ws = tuple(w_ref[l] for l in range(n_layers))                    # (2H, 4H)
    bs = tuple(b_ref[l] for l in range(n_layers))                    # (1, 4H)
    idx0 = jnp.full((B, 1), sos, dtype=jnp.int32)

    def step(t, carry):
        idx, hs = carry
        # Embedding lookup via one-hot matmul (token ids never leave the kernel).
        # TODO(synk): switch to an index gather once the vocab is non-toy.
        onehot = (iota_v == idx).astype(jnp.float32)
        x = jnp.dot(onehot, emb, preferred_element_type=jnp.float32)  # (B, H)

        # Stacked GRU layers, ih/hh fused into ONE matmul per layer:
        # columns are [r | z | gi_n | gh_n], bias pre-summed for r/z.
        new_hs = []
        for l in range(n_layers):
            h = hs[l]
            g = jnp.dot(jnp.concatenate([x, h], axis=-1), ws[l],
                        preferred_element_type=jnp.float32) + bs[l]   # (B, 4H)
            r = jax.nn.sigmoid(g[:, 0:H])
            z = jax.nn.sigmoid(g[:, H:2 * H])
            n = jnp.tanh(g[:, 2 * H:3 * H] + r * g[:, 3 * H:4 * H])
            h = (1.0 - z) * n + z * h
            new_hs.append(h)
            x = h

        # ---- Luong "concat" attention (e_proj precomputed above) ----
        h_proj = jnp.dot(x, wah, preferred_element_type=jnp.float32)  # (B, H)
        energy = jnp.tanh(e_proj + h_proj[:, None, :])                # (B, S, H)
        scores = jnp.sum(energy * va[None, :, :], axis=-1)            # (B, S)
        m = jnp.max(scores, axis=-1, keepdims=True)
        p = jnp.exp(scores - m)
        attn_w = p * pl.reciprocal(jnp.sum(p, axis=-1, keepdims=True),
                                   approx=True)                       # (B, S)
        context = jnp.sum(attn_w[:, :, None] * enc, axis=1)           # (B, H)

        # ---- output head ----
        concat_out = jnp.tanh(
            jnp.dot(x, wch, preferred_element_type=jnp.float32)
            + jnp.dot(context, wcc, preferred_element_type=jnp.float32)
            + bc)                                                     # (B, H)
        logits = jnp.dot(concat_out, wo,
                         preferred_element_type=jnp.float32) + bo     # (B, Vp)

        # Greedy feedback from the LOGITS (argmax(logits) == argmax(probs)),
        # so the softmax below stays off the serial token-feedback chain.
        lmax = jnp.max(logits, axis=-1, keepdims=True)
        idx_next = jnp.min(jnp.where(logits == lmax, iota_v, Vp),
                           axis=-1, keepdims=True).astype(jnp.int32)

        le = jnp.exp(logits - lmax)
        probs = le / jnp.sum(le, axis=-1, keepdims=True)              # exact
        out_ref[t] = probs                                            # (B, Vp)
        return idx_next, tuple(new_hs)

    lax.fori_loop(0, T, step, (idx0, hs0), unroll=True)


def decoder_decode(enc_out, emb_p, h0, dec_w, dec_b, attn, T, sos):
    B, S, H = enc_out.shape
    L = dec_w.shape[0]
    Vp = emb_p.shape[0]

    args = (enc_out, emb_p, h0, dec_w, dec_b,
            attn['wa_h'], attn['wa_e'], attn['va'],
            attn['wc_h'], attn['wc_c'], attn['bc'], attn['wo'], attn['bo'])

    vmem = pl.BlockSpec(memory_space=pltpu.MemorySpace.VMEM)
    kernel = functools.partial(_decoder_kernel, n_layers=int(L), H=H,
                               T=int(T), sos=int(sos))
    return pl.pallas_call(
        kernel,
        out_shape=jax.ShapeDtypeStruct((T, B, Vp), jnp.float32),
        in_specs=[vmem] * len(args),
        out_specs=vmem,
    )(*args)                                                          # (T, B, Vp)


# ----------------------------------------------------------------------------
# Forward (matches Seq2Seq.forward with teacher_forcing_ratio = 0.0, eval mode)
# ----------------------------------------------------------------------------
def _round_up(x, m):
    return (x + m - 1) // m * m


@functools.partial(jax.jit, static_argnames=('sos',))
def seq2seq_forward(params, src, tgt, src_lengths, sos=0):
    del src_lengths  # TODO(synk): pack_padded_sequence / source-length masking not reproduced
    B0, S = src.shape
    T = tgt.shape[1]
    V, H = params['enc_emb'].shape

    # Sublane-pad batch to a multiple of 8 (padded rows sliced off at the end).
    B = max(8, _round_up(B0, 8))
    src_p = jnp.pad(src, ((0, B - B0), (0, 0)))

    # --- encoder (bidirectional stacked GRU; directions summed for outputs) ---
    emb = jnp.take(params['enc_emb'], src_p, axis=0)          # (B, S, H)
    x = jnp.transpose(emb, (1, 0, 2))                         # (S, B, H)
    fwd_finals = []
    ys = None
    for layer in params['enc_layers']:
        ys = encoder_layer(x, layer['wih'], layer['whh'],
                           layer['bih'], layer['bhh'])        # (2, S, B, H)
        fwd_finals.append(ys[0, S - 1])                       # fwd final hidden (B, H)
        x = jnp.concatenate([ys[0], ys[1]], axis=-1)          # (S, B, 2H)
    enc_outputs = jnp.transpose(ys[0] + ys[1], (1, 0, 2))     # (B, S, H)
    # h_n.view(n_layers, n_dirs, B, H)[:, 0] == fwd final hidden of each layer.
    dec_h0 = jnp.stack(fwd_finals, axis=0)                    # (L, B, H)

    # Lane-pad the vocab dim to a multiple of 128 (padded logits -> -1e30, f32).
    Vp = max(128, _round_up(V, 128))
    emb_p = jnp.pad(params['dec_emb'], ((0, Vp - V), (0, 0)))
    a = params['attn']
    attn_p = dict(a,
                  wo=jnp.pad(a['wo'], ((0, 0), (0, Vp - V))),
                  bo=jnp.pad(a['bo'], ((0, 0), (0, Vp - V)), constant_values=-1e30))

    # Fuse decoder GRU ih/hh weights: [x||h] @ (2H, 4H), columns [r|z|gi_n|gh_n].
    wih, whh = params['dec_wih'], params['dec_whh']           # (L, H, 3H)
    bih, bhh = params['dec_bih'], params['dec_bhh']           # (L, 1, 3H)
    L = wih.shape[0]
    zeros_w = jnp.zeros((L, H, H), jnp.float32)
    w_top = jnp.concatenate([wih[..., 0:H], wih[..., H:2 * H],
                             wih[..., 2 * H:3 * H], zeros_w], axis=-1)
    w_bot = jnp.concatenate([whh[..., 0:H], whh[..., H:2 * H],
                             zeros_w, whh[..., 2 * H:3 * H]], axis=-1)
    dec_w = jnp.concatenate([w_top, w_bot], axis=1)           # (L, 2H, 4H)
    dec_b = jnp.concatenate([bih[..., 0:H] + bhh[..., 0:H],
                             bih[..., H:2 * H] + bhh[..., H:2 * H],
                             bih[..., 2 * H:3 * H],
                             bhh[..., 2 * H:3 * H]], axis=-1)  # (L, 1, 4H)

    probs = decoder_decode(enc_outputs, emb_p, dec_h0,
                           dec_w, dec_b, attn_p, T, sos)      # (T, B, Vp)
    probs = jnp.transpose(probs, (1, 0, 2))                   # (B, T, Vp)
    return probs[:B0, :, :V]


# ----------------------------------------------------------------------------
# Deterministic parameter init (shapes follow the PyTorch module's __init__)
# ----------------------------------------------------------------------------
def _uniform(key, shape, bound):
    return jax.random.uniform(key, shape, jnp.float32, -bound, bound)


def _init_gru_dir(key, in_dim, H):
    bound = 1.0 / float(H) ** 0.5
    k1, k2, k3, k4 = jax.random.split(key, 4)
    return (_uniform(k1, (in_dim, 3 * H), bound),
            _uniform(k2, (H, 3 * H), bound),
            _uniform(k3, (1, 3 * H), bound),
            _uniform(k4, (1, 3 * H), bound))


def init_params(key, vocab_size, hidden_size, n_layers):
    V, H, L = vocab_size, hidden_size, n_layers
    keys = jax.random.split(key, 4 * L + 4)
    ki = iter(keys)
    bound = 1.0 / float(H) ** 0.5

    enc_layers = []
    for l in range(L):
        in_dim = H if l == 0 else 2 * H
        f = _init_gru_dir(next(ki), in_dim, H)
        b = _init_gru_dir(next(ki), in_dim, H)
        enc_layers.append(dict(wih=jnp.stack([f[0], b[0]]),
                               whh=jnp.stack([f[1], b[1]]),
                               bih=jnp.stack([f[2], b[2]]),
                               bhh=jnp.stack([f[3], b[3]])))

    dec = [_init_gru_dir(next(ki), H, H) for _ in range(L)]
    dec_wih = jnp.stack([d[0] for d in dec])
    dec_whh = jnp.stack([d[1] for d in dec])
    dec_bih = jnp.stack([d[2] for d in dec])
    dec_bhh = jnp.stack([d[3] for d in dec])

    k_attn = jax.random.split(next(ki), 8)
    attn = dict(
        wa_h=_uniform(k_attn[0], (H, H), bound),
        wa_e=_uniform(k_attn[1], (H, H), bound),
        va=_uniform(k_attn[2], (1, H), bound),   # row layout: VPU mul + lane reduce
        wc_h=_uniform(k_attn[3], (H, H), bound),
        wc_c=_uniform(k_attn[4], (H, H), bound),
        bc=_uniform(k_attn[5], (1, H), bound),
        wo=_uniform(k_attn[6], (H, V), bound),
        bo=_uniform(k_attn[7], (1, V), bound),
    )
    return dict(
        enc_emb=jax.random.normal(next(ki), (V, H), jnp.float32) * 0.1,
        dec_emb=jax.random.normal(next(ki), (V, H), jnp.float32) * 0.1,
        enc_layers=enc_layers,
        dec_wih=dec_wih, dec_whh=dec_whh, dec_bih=dec_bih, dec_bhh=dec_bhh,
        attn=attn,
    )


# ----------------------------------------------------------------------------
if __name__ == "__main__":
    B, S, T = 2, 8, 5          # batch, source length, target length (max_len)
    V, H, L = 16, 32, 2        # vocab_size, hidden_size, n_layers

    root = jax.random.PRNGKey(0)
    k_params, k_src, k_tgt = jax.random.split(root, 3)

    params = init_params(k_params, V, H, L)
    src = jax.random.randint(k_src, (B, S), 0, V, dtype=jnp.int32)
    tgt = jax.random.randint(k_tgt, (B, T), 0, V, dtype=jnp.int32)
    src_lengths = jnp.full((B,), S, dtype=jnp.int32)

    out = seq2seq_forward(params, src, tgt, src_lengths, sos=0)
    out = jax.block_until_ready(out)

    assert out.shape == (B, T, V), out.shape
    assert out.dtype == jnp.float32
    assert bool(jnp.all(jnp.isfinite(out)))
    # each step's decoder output is a softmax distribution over the vocab
    assert bool(jnp.allclose(jnp.sum(out, axis=-1), 1.0, atol=1e-4))
    print("KERNEL_OK")
</pallas_src>

<mosaic_0001>
module attributes {stable_mosaic.version = 11 : i64} {
  func.func @_enc_layer_kernel(%arg0: i32, %arg1: memref<8x8x32xf32, #tpu.memory_space<vmem>>, %arg2: memref<1x32x96xf32, #tpu.memory_space<vmem>>, %arg3: memref<1x32x96xf32, #tpu.memory_space<vmem>>, %arg4: memref<1x1x96xf32, #tpu.memory_space<vmem>>, %arg5: memref<1x1x96xf32, #tpu.memory_space<vmem>>, %arg6: memref<1x8x8x32xf32, #tpu.memory_space<vmem>>, %arg7: memref<8x8x96xf32, #tpu.memory_space<vmem>>) attributes {dimension_semantics = [#tpu.dimension_semantics<parallel>], iteration_bounds = array<i64: 2>, scalar_prefetch = 0 : i64, scratch_operands = 1 : i64, tpu.core_type = #tpu.core_type<tc>, window_params = [{pipeline_mode = #tpu.pipeline_mode<synchronous>, transform_indices = @transform_0, window_bounds = array<i64: 8, 8, 32>}, {transform_indices = @transform_1, window_bounds = array<i64: 1, 32, 96>}, {transform_indices = @transform_2, window_bounds = array<i64: 1, 32, 96>}, {transform_indices = @transform_3, window_bounds = array<i64: 1, 1, 96>}, {transform_indices = @transform_4, window_bounds = array<i64: 1, 1, 96>}, {transform_indices = @transform_5, window_bounds = array<i64: 1, 8, 8, 32>}]} {
    %c0 = arith.constant 0 : index
    %c0_0 = arith.constant 0 : index
    %c0_1 = arith.constant 0 : index
    %0 = vector.load %arg1[%c0, %c0_0, %c0_1] : memref<8x8x32xf32, #tpu.memory_space<vmem>>, vector<8x8x32xf32>
    %1 = vector.shape_cast %0 : vector<8x8x32xf32> to vector<64x32xf32>
    %c0_2 = arith.constant 0 : index
    %c0_3 = arith.constant 0 : index
    %c0_4 = arith.constant 0 : index
    %2 = vector.load %arg2[%c0_2, %c0_3, %c0_4] : memref<1x32x96xf32, #tpu.memory_space<vmem>>, vector<1x32x96xf32>
    %3 = vector.shape_cast %2 : vector<1x32x96xf32> to vector<32x96xf32>
    %cst = arith.constant dense<0.000000e+00> : vector<64x96xf32>
    %4 = tpu.matmul %1, %3, %cst {dimension_numbers = #tpu.dot_dimension_numbers<[1], [0], [0], [1], [0, 0, 1, 1], [], []>} : vector<64x32xf32>, vector<32x96xf32>, vector<64x96xf32> -> vector<64x96xf32>
    %c0_5 = arith.constant 0 : index
    %c0_6 = arith.constant 0 : index
    %c0_7 = arith.constant 0 : index
    %5 = vector.load %arg4[%c0_5, %c0_6, %c0_7] : memref<1x1x96xf32, #tpu.memory_space<vmem>>, vector<1x1x96xf32>
    %6 = vector.shape_cast %5 : vector<1x1x96xf32> to vector<1x96xf32>
    %7 = vector.broadcast %6 : vector<1x96xf32> to vector<64x96xf32>
    %8 = arith.addf %4, %7 : vector<64x96xf32>
    %9 = vector.shape_cast %8 : vector<64x96xf32> to vector<8x8x96xf32>
    %c0_8 = arith.constant 0 : index
    %c0_9 = arith.constant 0 : index
    %c0_10 = arith.constant 0 : index
    %10 = vector.load %arg7[%c0_8, %c0_9, %c0_10] : memref<8x8x96xf32, #tpu.memory_space<vmem>>, vector<8x8x96xf32>
    tpu.vector_store %arg7[%c0_8, %c0_9, %c0_10], %9 {strides = array<i32>} : memref<8x8x96xf32, #tpu.memory_space<vmem>>, vector<8x8x96xf32>,
    %c0_11 = arith.constant 0 : index
    %c0_12 = arith.constant 0 : index
    %c0_13 = arith.constant 0 : index
    %11 = vector.load %arg3[%c0_11, %c0_12, %c0_13] : memref<1x32x96xf32, #tpu.memory_space<vmem>>, vector<1x32x96xf32>
    %12 = vector.shape_cast %11 : vector<1x32x96xf32> to vector<32x96xf32>
    %c0_14 = arith.constant 0 : index
    %c0_15 = arith.constant 0 : index
    %c0_16 = arith.constant 0 : index
    %13 = vector.load %arg5[%c0_14, %c0_15, %c0_16] : memref<1x1x96xf32, #tpu.memory_space<vmem>>, vector<1x1x96xf32>
    %14 = vector.shape_cast %13 : vector<1x1x96xf32> to vector<1x96xf32>
    %cst_17 = arith.constant 0.000000e+00 : f32
    %15 = vector.broadcast %cst_17 : f32 to vector<8x32xf32>
    %c0_i32 = arith.constant 0 : i32
    %c2_i32 = arith.constant 2 : i32
    %16 = arith.muli %c2_i32, %c0_i32 : i32
    %c7_i32 = arith.constant 7 : i32
    %17 = arith.subi %c7_i32, %16 : i32
    %18 = arith.muli %arg0, %17 : i32
    %19 = arith.addi %c0_i32, %18 : i32
    %20 = arith.index_cast %19 : i32 to index
    %c0_18 = arith.constant 0 : index
    %c0_19 = arith.constant 0 : index
    %21 = vector.load %arg7[%20, %c0_18, %c0_19] : memref<8x8x96xf32, #tpu.memory_space<vmem>>, vector<1x8x96xf32>
    %22 = vector.shape_cast %21 : vector<1x8x96xf32> to vector<8x96xf32>
    %cst_20 = arith.constant dense<0.000000e+00> : vector<8x96xf32>
    %23 = tpu.matmul %15, %12, %cst_20 {dimension_numbers = #tpu.dot_dimension_numbers<[1], [0], [0], [1], [0, 0, 1, 1], [], []>} : vector<8x32xf32>, vector<32x96xf32>, vector<8x96xf32> -> vector<8x96xf32>
    %24 = vector.broadcast %14 : vector<1x96xf32> to vector<8x96xf32>
    %25 = arith.addf %23, %24 : vector<8x96xf32>
    %26 = vector.extract_strided_slice %22 {offsets = [0, 0], sizes = [8, 32], strides = [1, 1]} : vector<8x96xf32> to vector<8x32xf32>
    %27 = vector.extract_strided_slice %25 {offsets = [0, 0], sizes = [8, 32], strides = [1, 1]} : vector<8x96xf32> to vector<8x32xf32>
    %28 = arith.addf %26, %27 : vector<8x32xf32>
    %29 = arith.negf %28 : vector<8x32xf32>
    %30 = math.exp %29 : vector<8x32xf32>
    %cst_21 = arith.constant 1.000000e+00 : f32
    %31 = vector.broadcast %cst_21 : f32 to vector<8x32xf32>
    %32 = arith.addf %31, %30 : vector<8x32xf32>
    %33 = arith.divf %31, %32 : vector<8x32xf32>
    %34 = vector.extract_strided_slice %22 {offsets = [0, 32], sizes = [8, 32], strides = [1, 1]} : vector<8x96xf32> to vector<8x32xf32>
    %35 = vector.extract_strided_slice %25 {offsets = [0, 32], sizes = [8, 32], strides = [1, 1]} : vector<8x96xf32> to vector<8x32xf32>
    %36 = arith.addf %34, %35 : vector<8x32xf32>
    %37 = arith.negf %36 : vector<8x32xf32>
    %38 = math.exp %37 : vector<8x32xf32>
    %cst_22 = arith.constant 1.000000e+00 : f32
    %39 = vector.broadcast %cst_22 : f32 to vector<8x32xf32>
    %40 = arith.addf %39, %38 : vector<8x32xf32>
    %41 = arith.divf %39, %40 : vector<8x32xf32>
    %42 = vector.extract_strided_slice %22 {offsets = [0, 64], sizes = [8, 32], strides = [1, 1]} : vector<8x96xf32> to vector<8x32xf32>
    %43 = vector.extract_strided_slice %25 {offsets = [0, 64], sizes = [8, 32], strides = [1, 1]} : vector<8x96xf32> to vector<8x32xf32>
    %44 = arith.mulf %33, %43 : vector<8x32xf32>
    %45 = arith.addf %42, %44 : vector<8x32xf32>
    %46 = math.tanh %45 : vector<8x32xf32>
    %cst_23 = arith.constant 1.000000e+00 : f32
    %47 = vector.broadcast %cst_23 : f32 to vector<8x32xf32>
    %48 = arith.subf %47, %41 : vector<8x32xf32>
    %49 = arith.mulf %48, %46 : vector<8x32xf32>
    %50 = arith.mulf %41, %15 : vector<8x32xf32>
    %51 = arith.addf %49, %50 : vector<8x32xf32>
    %c0_24 = arith.constant 0 : index
    %52 = arith.index_cast %19 : i32 to index
    %c0_25 = arith.constant 0 : index
    %c0_26 = arith.constant 0 : index
    %53 = vector.load %arg6[%c0_24, %52, %c0_25, %c0_26] : memref<1x8x8x32xf32, #tpu.memory_space<vmem>>, vector<1x1x8x32xf32>
    %54 = vector.shape_cast %53 : vector<1x1x8x32xf32> to vector<8x32xf32>
    %55 = vector.shape_cast %51 : vector<8x32xf32> to vector<1x1x8x32xf32>
    tpu.vector_store %arg6[%c0_24, %52, %c0_25, %c0_26], %55 {strides = array<i32>} : memref<1x8x8x32xf32, #tpu.memory_space<vmem>>, vector<1x1x8x32xf32>,
    %c1_i32 = arith.constant 1 : i32
    %c2_i32_27 = arith.constant 2 : i32
    %56 = arith.muli %c2_i32_27, %c1_i32 : i32
    %c7_i32_28 = arith.constant 7 : i32
    %57 = arith.subi %c7_i32_28, %56 : i32
    %58 = arith.muli %arg0, %57 : i32
    %59 = arith.addi %c1_i32, %58 : i32
    %60 = arith.index_cast %59 : i32 to index
    %c0_29 = arith.constant 0 : index
    %c0_30 = arith.constant 0 : index
    %61 = vector.load %arg7[%60, %c0_29, %c0_30] : memref<8x8x96xf32, #tpu.memory_space<vmem>>, vector<1x8x96xf32>
    %62 = vector.shape_cast %61 : vector<1x8x96xf32> to vector<8x96xf32>
    %cst_31 = arith.constant dense<0.000000e+00> : vector<8x96xf32>
    %63 = tpu.matmul %51, %12, %cst_31 {dimension_numbers = #tpu.dot_dimension_numbers<[1], [0], [0], [1], [0, 0, 1, 1], [], []>} : vector<8x32xf32>, vector<32x96xf32>, vector<8x96xf32> -> vector<8x96xf32>
    %64 = vector.broadcast %14 : vector<1x96xf32> to vector<8x96xf32>
    %65 = arith.addf %63, %64 : vector<8x96xf32>
    %66 = vector.extract_strided_slice %62 {offsets = [0, 0], sizes = [8, 32], strides = [1, 1]} : vector<8x96xf32> to vector<8x32xf32>
    %67 = vector.extract_strided_slice %65 {offsets = [0, 0], sizes = [8, 32], strides = [1, 1]} : vector<8x96xf32> to vector<8x32xf32>
    %68 = arith.addf %66, %67 : vector<8x32xf32>
    %69 = arith.negf %68 : vector<8x32xf32>
    %70 = math.exp %69 : vector<8x32xf32>
    %cst_32 = arith.constant 1.000000e+00 : f32
    %71 = vector.broadcast %cst_32 : f32 to vector<8x32xf32>
    %72 = arith.addf %71, %70 : vector<8x32xf32>
    %73 = arith.divf %71, %72 : vector<8x32xf32>
    %74 = vector.extract_strided_slice %62 {offsets = [0, 32], sizes = [8, 32], strides = [1, 1]} : vector<8x96xf32> to vector<8x32xf32>
    %75 = vector.extract_strided_slice %65 {offsets = [0, 32], sizes = [8, 32], strides = [1, 1]} : vector<8x96xf32> to vector<8x32xf32>
    %76 = arith.addf %74, %75 : vector<8x32xf32>
    %77 = arith.negf %76 : vector<8x32xf32>
    %78 = math.exp %77 : vector<8x32xf32>
    %cst_33 = arith.constant 1.000000e+00 : f32
    %79 = vector.broadcast %cst_33 : f32 to vector<8x32xf32>
    %80 = arith.addf %79, %78 : vector<8x32xf32>
    %81 = arith.divf %79, %80 : vector<8x32xf32>
    %82 = vector.extract_strided_slice %62 {offsets = [0, 64], sizes = [8, 32], strides = [1, 1]} : vector<8x96xf32> to vector<8x32xf32>
    %83 = vector.extract_strided_slice %65 {offsets = [0, 64], sizes = [8, 32], strides = [1, 1]} : vector<8x96xf32> to vector<8x32xf32>
    %84 = arith.mulf %73, %83 : vector<8x32xf32>
    %85 = arith.addf %82, %84 : vector<8x32xf32>
    %86 = math.tanh %85 : vector<8x32xf32>
    %cst_34 = arith.constant 1.000000e+00 : f32
    %87 = vector.broadcast %cst_34 : f32 to vector<8x32xf32>
    %88 = arith.subf %87, %81 : vector<8x32xf32>
    %89 = arith.mulf %88, %86 : vector<8x32xf32>
    %90 = arith.mulf %81, %51 : vector<8x32xf32>
    %91 = arith.addf %89, %90 : vector<8x32xf32>
    %c0_35 = arith.constant 0 : index
    %92 = arith.index_cast %59 : i32 to index
    %c0_36 = arith.constant 0 : index
    %c0_37 = arith.constant 0 : index
    %93 = vector.load %arg6[%c0_35, %92, %c0_36, %c0_37] : memref<1x8x8x32xf32, #tpu.memory_space<vmem>>, vector<1x1x8x32xf32>
    %94 = vector.shape_cast %93 : vector<1x1x8x32xf32> to vector<8x32xf32>
    %95 = vector.shape_cast %91 : vector<8x32xf32> to vector<1x1x8x32xf32>
    tpu.vector_store %arg6[%c0_35, %92, %c0_36, %c0_37], %95 {strides = array<i32>} : memref<1x8x8x32xf32, #tpu.memory_space<vmem>>, vector<1x1x8x32xf32>,
    %c2_i32_38 = arith.constant 2 : i32
    %c2_i32_39 = arith.constant 2 : i32
    %96 = arith.muli %c2_i32_39, %c2_i32_38 : i32
    %c7_i32_40 = arith.constant 7 : i32
    %97 = arith.subi %c7_i32_40, %96 : i32
    %98 = arith.muli %arg0, %97 : i32
    %99 = arith.addi %c2_i32_38, %98 : i32
    %100 = arith.index_cast %99 : i32 to index
    %c0_41 = arith.constant 0 : index
    %c0_42 = arith.constant 0 : index
    %101 = vector.load %arg7[%100, %c0_41, %c0_42] : memref<8x8x96xf32, #tpu.memory_space<vmem>>, vector<1x8x96xf32>
    %102 = vector.shape_cast %101 : vector<1x8x96xf32> to vector<8x96xf32>
    %cst_43 = arith.constant dense<0.000000e+00> : vector<8x96xf32>
    %103 = tpu.matmul %91, %12, %cst_43 {dimension_numbers = #tpu.dot_dimension_numbers<[1], [0], [0], [1], [0, 0, 1, 1], [], []>} : vector<8x32xf32>, vector<32x96xf32>, vector<8x96xf32> -> vector<8x96xf32>
    %104 = vector.broadcast %14 : vector<1x96xf32> to vector<8x96xf32>
    %105 = arith.addf %103, %104 : vector<8x96xf32>
    %106 = vector.extract_strided_slice %102 {offsets = [0, 0], sizes = [8, 32], strides = [1, 1]} : vector<8x96xf32> to vector<8x32xf32>
    %107 = vector.extract_strided_slice %105 {offsets = [0, 0], sizes = [8, 32], strides = [1, 1]} : vector<8x96xf32> to vector<8x32xf32>
    %108 = arith.addf %106, %107 : vector<8x32xf32>
    %109 = arith.negf %108 : vector<8x32xf32>
    %110 = math.exp %109 : vector<8x32xf32>
    %cst_44 = arith.constant 1.000000e+00 : f32
    %111 = vector.broadcast %cst_44 : f32 to vector<8x32xf32>
    %112 = arith.addf %111, %110 : vector<8x32xf32>
    %113 = arith.divf %111, %112 : vector<8x32xf32>
    %114 = vector.extract_strided_slice %102 {offsets = [0, 32], sizes = [8, 32], strides = [1, 1]} : vector<8x96xf32> to vector<8x32xf32>
    %115 = vector.extract_strided_slice %105 {offsets = [0, 32], sizes = [8, 32], strides = [1, 1]} : vector<8x96xf32> to vector<8x32xf32>
    %116 = arith.addf %114, %115 : vector<8x32xf32>
    %117 = arith.negf %116 : vector<8x32xf32>
    %118 = math.exp %117 : vector<8x32xf32>
    %cst_45 = arith.constant 1.000000e+00 : f32
    %119 = vector.broadcast %cst_45 : f32 to vector<8x32xf32>
    %120 = arith.addf %119, %118 : vector<8x32xf32>
    %121 = arith.divf %119, %120 : vector<8x32xf32>
    %122 = vector.extract_strided_slice %102 {offsets = [0, 64], sizes = [8, 32], strides = [1, 1]} : vector<8x96xf32> to vector<8x32xf32>
    %123 = vector.extract_strided_slice %105 {offsets = [0, 64], sizes = [8, 32], strides = [1, 1]} : vector<8x96xf32> to vector<8x32xf32>
    %124 = arith.mulf %113, %123 : vector<8x32xf32>
    %125 = arith.addf %122, %124 : vector<8x32xf32>
    %126 = math.tanh %125 : vector<8x32xf32>
    %cst_46 = arith.constant 1.000000e+00 : f32
    %127 = vector.broadcast %cst_46 : f32 to vector<8x32xf32>
    %128 = arith.subf %127, %121 : vector<8x32xf32>
    %129 = arith.mulf %128, %126 : vector<8x32xf32>
    %130 = arith.mulf %121, %91 : vector<8x32xf32>
    %131 = arith.addf %129, %130 : vector<8x32xf32>
    %c0_47 = arith.constant 0 : index
    %132 = arith.index_cast %99 : i32 to index
    %c0_48 = arith.constant 0 : index
    %c0_49 = arith.constant 0 : index
    %133 = vector.load %arg6[%c0_47, %132, %c0_48, %c0_49] : memref<1x8x8x32xf32, #tpu.memory_space<vmem>>, vector<1x1x8x32xf32>
    %134 = vector.shape_cast %133 : vector<1x1x8x32xf32> to vector<8x32xf32>
    %135 = vector.shape_cast %131 : vector<8x32xf32> to vector<1x1x8x32xf32>
    tpu.vector_store %arg6[%c0_47, %132, %c0_48, %c0_49], %135 {strides = array<i32>} : memref<1x8x8x32xf32, #tpu.memory_space<vmem>>, vector<1x1x8x32xf32>,
    %c3_i32 = arith.constant 3 : i32
    %c2_i32_50 = arith.constant 2 : i32
    %136 = arith.muli %c2_i32_50, %c3_i32 : i32
    %c7_i32_51 = arith.constant 7 : i32
    %137 = arith.subi %c7_i32_51, %136 : i32
    %138 = arith.muli %arg0, %137 : i32
    %139 = arith.addi %c3_i32, %138 : i32
    %140 = arith.index_cast %139 : i32 to index
    %c0_52 = arith.constant 0 : index
    %c0_53 = arith.constant 0 : index
    %141 = vector.load %arg7[%140, %c0_52, %c0_53] : memref<8x8x96xf32, #tpu.memory_space<vmem>>, vector<1x8x96xf32>
    %142 = vector.shape_cast %141 : vector<1x8x96xf32> to vector<8x96xf32>
    %cst_54 = arith.constant dense<0.000000e+00> : vector<8x96xf32>
    %143 = tpu.matmul %131, %12, %cst_54 {dimension_numbers = #tpu.dot_dimension_numbers<[1], [0], [0], [1], [0, 0, 1, 1], [], []>} : vector<8x32xf32>, vector<32x96xf32>, vector<8x96xf32> -> vector<8x96xf32>
    %144 = vector.broadcast %14 : vector<1x96xf32> to vector<8x96xf32>
    %145 = arith.addf %143, %144 : vector<8x96xf32>
    %146 = vector.extract_strided_slice %142 {offsets = [0, 0], sizes = [8, 32], strides = [1, 1]} : vector<8x96xf32> to vector<8x32xf32>
    %147 = vector.extract_strided_slice %145 {offsets = [0, 0], sizes = [8, 32], strides = [1, 1]} : vector<8x96xf32> to vector<8x32xf32>
    %148 = arith.addf %146, %147 : vector<8x32xf32>
    %149 = arith.negf %148 : vector<8x32xf32>
    %150 = math.exp %149 : vector<8x32xf32>
    %cst_55 = arith.constant 1.000000e+00 : f32
    %151 = vector.broadcast %cst_55 : f32 to vector<8x32xf32>
    %152 = arith.addf %151, %150 : vector<8x32xf32>
    %153 = arith.divf %151, %152 : vector<8x32xf32>
    %154 = vector.extract_strided_slice %142 {offsets = [0, 32], sizes = [8, 32], strides = [1, 1]} : vector<8x96xf32> to vector<8x32xf32>
    %155 = vector.extract_strided_slice %145 {offsets = [0, 32], sizes = [8, 32], strides = [1, 1]} : vector<8x96xf32> to vector<8x32xf32>
    %156 = arith.addf %154, %155 : vector<8x32xf32>
    %157 = arith.negf %156 : vector<8x32xf32>
    %158 = math.exp %157 : vector<8x32xf32>
    %cst_56 = arith.constant 1.000000e+00 : f32
    %159 = vector.broadcast %cst_56 : f32 to vector<8x32xf32>
    %160 = arith.addf %159, %158 : vector<8x32xf32>
    %161 = arith.divf %159, %160 : vector<8x32xf32>
    %162 = vector.extract_strided_slice %142 {offsets = [0, 64], sizes = [8, 32], strides = [1, 1]} : vector<8x96xf32> to vector<8x32xf32>
    %163 = vector.extract_strided_slice %145 {offsets = [0, 64], sizes = [8, 32], strides = [1, 1]} : vector<8x96xf32> to vector<8x32xf32>
    %164 = arith.mulf %153, %163 : vector<8x32xf32>
    %165 = arith.addf %162, %164 : vector<8x32xf32>
    %166 = math.tanh %165 : vector<8x32xf32>
    %cst_57 = arith.constant 1.000000e+00 : f32
    %167 = vector.broadcast %cst_57 : f32 to vector<8x32xf32>
    %168 = arith.subf %167, %161 : vector<8x32xf32>
    %169 = arith.mulf %168, %166 : vector<8x32xf32>
    %170 = arith.mulf %161, %131 : vector<8x32xf32>
    %171 = arith.addf %169, %170 : vector<8x32xf32>
    %c0_58 = arith.constant 0 : index
    %172 = arith.index_cast %139 : i32 to index
    %c0_59 = arith.constant 0 : index
    %c0_60 = arith.constant 0 : index
    %173 = vector.load %arg6[%c0_58, %172, %c0_59, %c0_60] : memref<1x8x8x32xf32, #tpu.memory_space<vmem>>, vector<1x1x8x32xf32>
    %174 = vector.shape_cast %173 : vector<1x1x8x32xf32> to vector<8x32xf32>
    %175 = vector.shape_cast %171 : vector<8x32xf32> to vector<1x1x8x32xf32>
    tpu.vector_store %arg6[%c0_58, %172, %c0_59, %c0_60], %175 {strides = array<i32>} : memref<1x8x8x32xf32, #tpu.memory_space<vmem>>, vector<1x1x8x32xf32>,
    %c4_i32 = arith.constant 4 : i32
    %c2_i32_61 = arith.constant 2 : i32
    %176 = arith.muli %c2_i32_61, %c4_i32 : i32
    %c7_i32_62 = arith.constant 7 : i32
    %177 = arith.subi %c7_i32_62, %176 : i32
    %178 = arith.muli %arg0, %177 : i32
    %179 = arith.addi %c4_i32, %178 : i32
    %180 = arith.index_cast %179 : i32 to index
    %c0_63 = arith.constant 0 : index
    %c0_64 = arith.constant 0 : index
    %181 = vector.load %arg7[%180, %c0_63, %c0_64] : memref<8x8x96xf32, #tpu.memory_space<vmem>>, vector<1x8x96xf32>
    %182 = vector.shape_cast %181 : vector<1x8x96xf32> to vector<8x96xf32>
    %cst_65 = arith.constant dense<0.000000e+00> : vector<8x96xf32>
    %183 = tpu.matmul %171, %12, %cst_65 {dimension_numbers = #tpu.dot_dimension_numbers<[1], [0], [0], [1], [0, 0, 1, 1], [], []>} : vector<8x32xf32>, vector<32x96xf32>, vector<8x96xf32> -> vector<8x96xf32>
    %184 = vector.broadcast %14 : vector<1x96xf32> to vector<8x96xf32>
    %185 = arith.addf %183, %184 : vector<8x96xf32>
    %186 = vector.extract_strided_slice %182 {offsets = [0, 0], sizes = [8, 32], strides = [1, 1]} : vector<8x96xf32> to vector<8x32xf32>
    %187 = vector.extract_strided_slice %185 {offsets = [0, 0], sizes = [8, 32], strides = [1, 1]} : vector<8x96xf32> to vector<8x32xf32>
    %188 = arith.addf %186, %187 : vector<8x32xf32>
    %189 = arith.negf %188 : vector<8x32xf32>
    %190 = math.exp %189 : vector<8x32xf32>
    %cst_66 = arith.constant 1.000000e+00 : f32
    %191 = vector.broadcast %cst_66 : f32 to vector<8x32xf32>
    %192 = arith.addf %191, %190 : vector<8x32xf32>
    %193 = arith.divf %191, %192 : vector<8x32xf32>
    %194 = vector.extract_strided_slice %182 {offsets = [0, 32], sizes = [8, 32], strides = [1, 1]} : vector<8x96xf32> to vector<8x32xf32>
    %195 = vector.extract_strided_slice %185 {offsets = [0, 32], sizes = [8, 32], strides = [1, 1]} : vector<8x96xf32> to vector<8x32xf32>
    %196 = arith.addf %194, %195 : vector<8x32xf32>
    %197 = arith.negf %196 : vector<8x32xf32>
    %198 = math.exp %197 : vector<8x32xf32>
    %cst_67 = arith.constant 1.000000e+00 : f32
    %199 = vector.broadcast %cst_67 : f32 to vector<8x32xf32>
    %200 = arith.addf %199, %198 : vector<8x32xf32>
    %201 = arith.divf %199, %200 : vector<8x32xf32>
    %202 = vector.extract_strided_slice %182 {offsets = [0, 64], sizes = [8, 32], strides = [1, 1]} : vector<8x96xf32> to vector<8x32xf32>
    %203 = vector.extract_strided_slice %185 {offsets = [0, 64], sizes = [8, 32], strides = [1, 1]} : vector<8x96xf32> to vector<8x32xf32>
    %204 = arith.mulf %193, %203 : vector<8x32xf32>
    %205 = arith.addf %202, %204 : vector<8x32xf32>
    %206 = math.tanh %205 : vector<8x32xf32>
    %cst_68 = arith.constant 1.000000e+00 : f32
    %207 = vector.broadcast %cst_68 : f32 to vector<8x32xf32>
    %208 = arith.subf %207, %201 : vector<8x32xf32>
    %209 = arith.mulf %208, %206 : vector<8x32xf32>
    %210 = arith.mulf %201, %171 : vector<8x32xf32>
    %211 = arith.addf %209, %210 : vector<8x32xf32>
    %c0_69 = arith.constant 0 : index
    %212 = arith.index_cast %179 : i32 to index
    %c0_70 = arith.constant 0 : index
    %c0_71 = arith.constant 0 : index
    %213 = vector.load %arg6[%c0_69, %212, %c0_70, %c0_71] : memref<1x8x8x32xf32, #tpu.memory_space<vmem>>, vector<1x1x8x32xf32>
    %214 = vector.shape_cast %213 : vector<1x1x8x32xf32> to vector<8x32xf32>
    %215 = vector.shape_cast %211 : vector<8x32xf32> to vector<1x1x8x32xf32>
    tpu.vector_store %arg6[%c0_69, %212, %c0_70, %c0_71], %215 {strides = array<i32>} : memref<1x8x8x32xf32, #tpu.memory_space<vmem>>, vector<1x1x8x32xf32>,
    %c5_i32 = arith.constant 5 : i32
    %c2_i32_72 = arith.constant 2 : i32
    %216 = arith.muli %c2_i32_72, %c5_i32 : i32
    %c7_i32_73 = arith.constant 7 : i32
    %217 = arith.subi %c7_i32_73, %216 : i32
    %218 = arith.muli %arg0, %217 : i32
    %219 = arith.addi %c5_i32, %218 : i32
    %220 = arith.index_cast %219 : i32 to index
    %c0_74 = arith.constant 0 : index
    %c0_75 = arith.constant 0 : index
    %221 = vector.load %arg7[%220, %c0_74, %c0_75] : memref<8x8x96xf32, #tpu.memory_space<vmem>>, vector<1x8x96xf32>
    %222 = vector.shape_cast %221 : vector<1x8x96xf32> to vector<8x96xf32>
    %cst_76 = arith.constant dense<0.000000e+00> : vector<8x96xf32>
    %223 = tpu.matmul %211, %12, %cst_76 {dimension_numbers = #tpu.dot_dimension_numbers<[1], [0], [0], [1], [0, 0, 1, 1], [], []>} : vector<8x32xf32>, vector<32x96xf32>, vector<8x96xf32> -> vector<8x96xf32>
    %224 = vector.broadcast %14 : vector<1x96xf32> to vector<8x96xf32>
    %225 = arith.addf %223, %224 : vector<8x96xf32>
    %226 = vector.extract_strided_slice %222 {offsets = [0, 0], sizes = [8, 32], strides = [1, 1]} : vector<8x96xf32> to vector<8x32xf32>
    %227 = vector.extract_strided_slice %225 {offsets = [0, 0], sizes = [8, 32], strides = [1, 1]} : vector<8x96xf32> to vector<8x32xf32>
    %228 = arith.addf %226, %227 : vector<8x32xf32>
    %229 = arith.negf %228 : vector<8x32xf32>
    %230 = math.exp %229 : vector<8x32xf32>
    %cst_77 = arith.constant 1.000000e+00 : f32
    %231 = vector.broadcast %cst_77 : f32 to vector<8x32xf32>
    %232 = arith.addf %231, %230 : vector<8x32xf32>
    %233 = arith.divf %231, %232 : vector<8x32xf32>
    %234 = vector.extract_strided_slice %222 {offsets = [0, 32], sizes = [8, 32], strides = [1, 1]} : vector<8x96xf32> to vector<8x32xf32>
    %235 = vector.extract_strided_slice %225 {offsets = [0, 32], sizes = [8, 32], strides = [1, 1]} : vector<8x96xf32> to vector<8x32xf32>
    %236 = arith.addf %234, %235 : vector<8x32xf32>
    %237 = arith.negf %236 : vector<8x32xf32>
    %238 = math.exp %237 : vector<8x32xf32>
    %cst_78 = arith.constant 1.000000e+00 : f32
    %239 = vector.broadcast %cst_78 : f32 to vector<8x32xf32>
    %240 = arith.addf %239, %238 : vector<8x32xf32>
    %241 = arith.divf %239, %240 : vector<8x32xf32>
    %242 = vector.extract_strided_slice %222 {offsets = [0, 64], sizes = [8, 32], strides = [1, 1]} : vector<8x96xf32> to vector<8x32xf32>
    %243 = vector.extract_strided_slice %225 {offsets = [0, 64], sizes = [8, 32], strides = [1, 1]} : vector<8x96xf32> to vector<8x32xf32>
    %244 = arith.mulf %233, %243 : vector<8x32xf32>
    %245 = arith.addf %242, %244 : vector<8x32xf32>
    %246 = math.tanh %245 : vector<8x32xf32>
    %cst_79 = arith.constant 1.000000e+00 : f32
    %247 = vector.broadcast %cst_79 : f32 to vector<8x32xf32>
    %248 = arith.subf %247, %241 : vector<8x32xf32>
    %249 = arith.mulf %248, %246 : vector<8x32xf32>
    %250 = arith.mulf %241, %211 : vector<8x32xf32>
    %251 = arith.addf %249, %250 : vector<8x32xf32>
    %c0_80 = arith.constant 0 : index
    %252 = arith.index_cast %219 : i32 to index
    %c0_81 = arith.constant 0 : index
    %c0_82 = arith.constant 0 : index
    %253 = vector.load %arg6[%c0_80, %252, %c0_81, %c0_82] : memref<1x8x8x32xf32, #tpu.memory_space<vmem>>, vector<1x1x8x32xf32>
    %254 = vector.shape_cast %253 : vector<1x1x8x32xf32> to vector<8x32xf32>
    %255 = vector.shape_cast %251 : vector<8x32xf32> to vector<1x1x8x32xf32>
    tpu.vector_store %arg6[%c0_80, %252, %c0_81, %c0_82], %255 {strides = array<i32>} : memref<1x8x8x32xf32, #tpu.memory_space<vmem>>, vector<1x1x8x32xf32>,
    %c6_i32 = arith.constant 6 : i32
    %c2_i32_83 = arith.constant 2 : i32
    %256 = arith.muli %c2_i32_83, %c6_i32 : i32
    %c7_i32_84 = arith.constant 7 : i32
    %257 = arith.subi %c7_i32_84, %256 : i32
    %258 = arith.muli %arg0, %257 : i32
    %259 = arith.addi %c6_i32, %258 : i32
    %260 = arith.index_cast %259 : i32 to index
    %c0_85 = arith.constant 0 : index
    %c0_86 = arith.constant 0 : index
    %261 = vector.load %arg7[%260, %c0_85, %c0_86] : memref<8x8x96xf32, #tpu.memory_space<vmem>>, vector<1x8x96xf32>
    %262 = vector.shape_cast %261 : vector<1x8x96xf32> to vector<8x96xf32>
    %cst_87 = arith.constant dense<0.000000e+00> : vector<8x96xf32>
    %263 = tpu.matmul %251, %12, %cst_87 {dimension_numbers = #tpu.dot_dimension_numbers<[1], [0], [0], [1], [0, 0, 1, 1], [], []>} : vector<8x32xf32>, vector<32x96xf32>, vector<8x96xf32> -> vector<8x96xf32>
    %264 = vector.broadcast %14 : vector<1x96xf32> to vector<8x96xf32>
    %265 = arith.addf %263, %264 : vector<8x96xf32>
    %266 = vector.extract_strided_slice %262 {offsets = [0, 0], sizes = [8, 32], strides = [1, 1]} : vector<8x96xf32> to vector<8x32xf32>
    %267 = vector.extract_strided_slice %265 {offsets = [0, 0], sizes = [8, 32], strides = [1, 1]} : vector<8x96xf32> to vector<8x32xf32>
    %268 = arith.addf %266, %267 : vector<8x32xf32>
    %269 = arith.negf %268 : vector<8x32xf32>
    %270 = math.exp %269 : vector<8x32xf32>
    %cst_88 = arith.constant 1.000000e+00 : f32
    %271 = vector.broadcast %cst_88 : f32 to vector<8x32xf32>
    %272 = arith.addf %271, %270 : vector<8x32xf32>
    %273 = arith.divf %271, %272 : vector<8x32xf32>
    %274 = vector.extract_strided_slice %262 {offsets = [0, 32], sizes = [8, 32], strides = [1, 1]} : vector<8x96xf32> to vector<8x32xf32>
    %275 = vector.extract_strided_slice %265 {offsets = [0, 32], sizes = [8, 32], strides = [1, 1]} : vector<8x96xf32> to vector<8x32xf32>
    %276 = arith.addf %274, %275 : vector<8x32xf32>
    %277 = arith.negf %276 : vector<8x32xf32>
    %278 = math.exp %277 : vector<8x32xf32>
    %cst_89 = arith.constant 1.000000e+00 : f32
    %279 = vector.broadcast %cst_89 : f32 to vector<8x32xf32>
    %280 = arith.addf %279, %278 : vector<8x32xf32>
    %281 = arith.divf %279, %280 : vector<8x32xf32>
    %282 = vector.extract_strided_slice %262 {offsets = [0, 64], sizes = [8, 32], strides = [1, 1]} : vector<8x96xf32> to vector<8x32xf32>
    %283 = vector.extract_strided_slice %265 {offsets = [0, 64], sizes = [8, 32], strides = [1, 1]} : vector<8x96xf32> to vector<8x32xf32>
    %284 = arith.mulf %273, %283 : vector<8x32xf32>
    %285 = arith.addf %282, %284 : vector<8x32xf32>
    %286 = math.tanh %285 : vector<8x32xf32>
    %cst_90 = arith.constant 1.000000e+00 : f32
    %287 = vector.broadcast %cst_90 : f32 to vector<8x32xf32>
    %288 = arith.subf %287, %281 : vector<8x32xf32>
    %289 = arith.mulf %288, %286 : vector<8x32xf32>
    %290 = arith.mulf %281, %251 : vector<8x32xf32>
    %291 = arith.addf %289, %290 : vector<8x32xf32>
    %c0_91 = arith.constant 0 : index
    %292 = arith.index_cast %259 : i32 to index
    %c0_92 = arith.constant 0 : index
    %c0_93 = arith.constant 0 : index
    %293 = vector.load %arg6[%c0_91, %292, %c0_92, %c0_93] : memref<1x8x8x32xf32, #tpu.memory_space<vmem>>, vector<1x1x8x32xf32>
    %294 = vector.shape_cast %293 : vector<1x1x8x32xf32> to vector<8x32xf32>
    %295 = vector.shape_cast %291 : vector<8x32xf32> to vector<1x1x8x32xf32>
    tpu.vector_store %arg6[%c0_91, %292, %c0_92, %c0_93], %295 {strides = array<i32>} : memref<1x8x8x32xf32, #tpu.memory_space<vmem>>, vector<1x1x8x32xf32>,
    %c7_i32_94 = arith.constant 7 : i32
    %c2_i32_95 = arith.constant 2 : i32
    %296 = arith.muli %c2_i32_95, %c7_i32_94 : i32
    %c7_i32_96 = arith.constant 7 : i32
    %297 = arith.subi %c7_i32_96, %296 : i32
    %298 = arith.muli %arg0, %297 : i32
    %299 = arith.addi %c7_i32_94, %298 : i32
    %300 = arith.index_cast %299 : i32 to index
    %c0_97 = arith.constant 0 : index
    %c0_98 = arith.constant 0 : index
    %301 = vector.load %arg7[%300, %c0_97, %c0_98] : memref<8x8x96xf32, #tpu.memory_space<vmem>>, vector<1x8x96xf32>
    %302 = vector.shape_cast %301 : vector<1x8x96xf32> to vector<8x96xf32>
    %cst_99 = arith.constant dense<0.000000e+00> : vector<8x96xf32>
    %303 = tpu.matmul %291, %12, %cst_99 {dimension_numbers = #tpu.dot_dimension_numbers<[1], [0], [0], [1], [0, 0, 1, 1], [], []>} : vector<8x32xf32>, vector<32x96xf32>, vector<8x96xf32> -> vector<8x96xf32>
    %304 = vector.broadcast %14 : vector<1x96xf32> to vector<8x96xf32>
    %305 = arith.addf %303, %304 : vector<8x96xf32>
    %306 = vector.extract_strided_slice %302 {offsets = [0, 0], sizes = [8, 32], strides = [1, 1]} : vector<8x96xf32> to vector<8x32xf32>
    %307 = vector.extract_strided_slice %305 {offsets = [0, 0], sizes = [8, 32], strides = [1, 1]} : vector<8x96xf32> to vector<8x32xf32>
    %308 = arith.addf %306, %307 : vector<8x32xf32>
    %309 = arith.negf %308 : vector<8x32xf32>
    %310 = math.exp %309 : vector<8x32xf32>
    %cst_100 = arith.constant 1.000000e+00 : f32
    %311 = vector.broadcast %cst_100 : f32 to vector<8x32xf32>
    %312 = arith.addf %311, %310 : vector<8x32xf32>
    %313 = arith.divf %311, %312 : vector<8x32xf32>
    %314 = vector.extract_strided_slice %302 {offsets = [0, 32], sizes = [8, 32], strides = [1, 1]} : vector<8x96xf32> to vector<8x32xf32>
    %315 = vector.extract_strided_slice %305 {offsets = [0, 32], sizes = [8, 32], strides = [1, 1]} : vector<8x96xf32> to vector<8x32xf32>
    %316 = arith.addf %314, %315 : vector<8x32xf32>
    %317 = arith.negf %316 : vector<8x32xf32>
    %318 = math.exp %317 : vector<8x32xf32>
    %cst_101 = arith.constant 1.000000e+00 : f32
    %319 = vector.broadcast %cst_101 : f32 to vector<8x32xf32>
    %320 = arith.addf %319, %318 : vector<8x32xf32>
    %321 = arith.divf %319, %320 : vector<8x32xf32>
    %322 = vector.extract_strided_slice %302 {offsets = [0, 64], sizes = [8, 32], strides = [1, 1]} : vector<8x96xf32> to vector<8x32xf32>
    %323 = vector.extract_strided_slice %305 {offsets = [0, 64], sizes = [8, 32], strides = [1, 1]} : vector<8x96xf32> to vector<8x32xf32>
    %324 = arith.mulf %313, %323 : vector<8x32xf32>
    %325 = arith.addf %322, %324 : vector<8x32xf32>
    %326 = math.tanh %325 : vector<8x32xf32>
    %cst_102 = arith.constant 1.000000e+00 : f32
    %327 = vector.broadcast %cst_102 : f32 to vector<8x32xf32>
    %328 = arith.subf %327, %321 : vector<8x32xf32>
    %329 = arith.mulf %328, %326 : vector<8x32xf32>
    %330 = arith.mulf %321, %291 : vector<8x32xf32>
    %331 = arith.addf %329, %330 : vector<8x32xf32>
    %c0_103 = arith.constant 0 : index
    %332 = arith.index_cast %299 : i32 to index
    %c0_104 = arith.constant 0 : index
    %c0_105 = arith.constant 0 : index
    %333 = vector.load %arg6[%c0_103, %332, %c0_104, %c0_105] : memref<1x8x8x32xf32, #tpu.memory_space<vmem>>, vector<1x1x8x32xf32>
    %334 = vector.shape_cast %333 : vector<1x1x8x32xf32> to vector<8x32xf32>
    %335 = vector.shape_cast %331 : vector<8x32xf32> to vector<1x1x8x32xf32>
    tpu.vector_store %arg6[%c0_103, %332, %c0_104, %c0_105], %335 {strides = array<i32>} : memref<1x8x8x32xf32, #tpu.memory_space<vmem>>, vector<1x1x8x32xf32>,
    %c8_i32 = arith.constant 8 : i32
    return
  }
  func.func @transform_0(%arg0: i32) -> (i32, i32, i32) {
    %c0_i32 = arith.constant 0 : i32
    %c0_i32_0 = arith.constant 0 : i32
    %c0_i32_1 = arith.constant 0 : i32
    %c0_i32_2 = arith.constant 0 : i32
    return %c0_i32, %c0_i32_0, %c0_i32_1 : i32, i32, i32
  }
  func.func @transform_1(%arg0: i32) -> (i32, i32, i32) {
    %c0_i32 = arith.constant 0 : i32
    %c0_i32_0 = arith.constant 0 : i32
    %c0_i32_1 = arith.constant 0 : i32
    return %arg0, %c0_i32, %c0_i32_0 : i32, i32, i32
  }
  func.func @transform_2(%arg0: i32) -> (i32, i32, i32) {
    %c0_i32 = arith.constant 0 : i32
    %c0_i32_0 = arith.constant 0 : i32
    %c0_i32_1 = arith.constant 0 : i32
    return %arg0, %c0_i32, %c0_i32_0 : i32, i32, i32
  }
  func.func @transform_3(%arg0: i32) -> (i32, i32, i32) {
    %c0_i32 = arith.constant 0 : i32
    %c0_i32_0 = arith.constant 0 : i32
    %c0_i32_1 = arith.constant 0 : i32
    return %arg0, %c0_i32, %c0_i32_0 : i32, i32, i32
  }
  func.func @transform_4(%arg0: i32) -> (i32, i32, i32) {
    %c0_i32 = arith.constant 0 : i32
    %c0_i32_0 = arith.constant 0 : i32
    %c0_i32_1 = arith.constant 0 : i32
    return %arg0, %c0_i32, %c0_i32_0 : i32, i32, i32
  }
  func.func @transform_5(%arg0: i32) -> (i32, i32, i32, i32) {
    %c0_i32 = arith.constant 0 : i32
    %c0_i32_0 = arith.constant 0 : i32
    %c0_i32_1 = arith.constant 0 : i32
    %c0_i32_2 = arith.constant 0 : i32
    return %arg0, %c0_i32, %c0_i32_0, %c0_i32_1 : i32, i32, i32, i32
  }
}

module attributes {stable_mosaic.version = 11 : i64} {
  func.func @_enc_layer_kernel(%arg0: i32, %arg1: memref<8x8x64xf32, #tpu.memory_space<vmem>>, %arg2: memref<1x64x96xf32, #tpu.memory_space<vmem>>, %arg3: memref<1x32x96xf32, #tpu.memory_space<vmem>>, %arg4: memref<1x1x96xf32, #tpu.memory_space<vmem>>, %arg5: memref<1x1x96xf32, #tpu.memory_space<vmem>>, %arg6: memref<1x8x8x32xf32, #tpu.memory_space<vmem>>, %arg7: memref<8x8x96xf32, #tpu.memory_space<vmem>>) attributes {dimension_semantics = [#tpu.dimension_semantics<parallel>], iteration_bounds = array<i64: 2>, scalar_prefetch = 0 : i64, scratch_operands = 1 : i64, tpu.core_type = #tpu.core_type<tc>, window_params = [{pipeline_mode = #tpu.pipeline_mode<synchronous>, transform_indices = @transform_0, window_bounds = array<i64: 8, 8, 64>}, {transform_indices = @transform_1, window_bounds = array<i64: 1, 64, 96>}, {transform_indices = @transform_2, window_bounds = array<i64: 1, 32, 96>}, {transform_indices = @transform_3, window_bounds = array<i64: 1, 1, 96>}, {transform_indices = @transform_4, window_bounds = array<i64: 1, 1, 96>}, {transform_indices = @transform_5, window_bounds = array<i64: 1, 8, 8, 32>}]} {
    %c0 = arith.constant 0 : index
    %c0_0 = arith.constant 0 : index
    %c0_1 = arith.constant 0 : index
    %0 = vector.load %arg1[%c0, %c0_0, %c0_1] : memref<8x8x64xf32, #tpu.memory_space<vmem>>, vector<8x8x64xf32>
    %1 = vector.shape_cast %0 : vector<8x8x64xf32> to vector<64x64xf32>
    %c0_2 = arith.constant 0 : index
    %c0_3 = arith.constant 0 : index
    %c0_4 = arith.constant 0 : index
    %2 = vector.load %arg2[%c0_2, %c0_3, %c0_4] : memref<1x64x96xf32, #tpu.memory_space<vmem>>, vector<1x64x96xf32>
    %3 = vector.shape_cast %2 : vector<1x64x96xf32> to vector<64x96xf32>
    %cst = arith.constant dense<0.000000e+00> : vector<64x96xf32>
    %4 = tpu.matmul %1, %3, %cst {dimension_numbers = #tpu.dot_dimension_numbers<[1], [0], [0], [1], [0, 0, 1, 1], [], []>} : vector<64x64xf32>, vector<64x96xf32>, vector<64x96xf32> -> vector<64x96xf32>
    %c0_5 = arith.constant 0 : index
    %c0_6 = arith.constant 0 : index
    %c0_7 = arith.constant 0 : index
    %5 = vector.load %arg4[%c0_5, %c0_6, %c0_7] : memref<1x1x96xf32, #tpu.memory_space<vmem>>, vector<1x1x96xf32>
    %6 = vector.shape_cast %5 : vector<1x1x96xf32> to vector<1x96xf32>
    %7 = vector.broadcast %6 : vector<1x96xf32> to vector<64x96xf32>
    %8 = arith.addf %4, %7 : vector<64x96xf32>
    %9 = vector.shape_cast %8 : vector<64x96xf32> to vector<8x8x96xf32>
    %c0_8 = arith.constant 0 : index
    %c0_9 = arith.constant 0 : index
    %c0_10 = arith.constant 0 : index
    %10 = vector.load %arg7[%c0_8, %c0_9, %c0_10] : memref<8x8x96xf32, #tpu.memory_space<vmem>>, vector<8x8x96xf32>
    tpu.vector_store %arg7[%c0_8, %c0_9, %c0_10], %9 {strides = array<i32>} : memref<8x8x96xf32, #tpu.memory_space<vmem>>, vector<8x8x96xf32>,
    %c0_11 = arith.constant 0 : index
    %c0_12 = arith.constant 0 : index
    %c0_13 = arith.constant 0 : index
    %11 = vector.load %arg3[%c0_11, %c0_12, %c0_13] : memref<1x32x96xf32, #tpu.memory_space<vmem>>, vector<1x32x96xf32>
    %12 = vector.shape_cast %11 : vector<1x32x96xf32> to vector<32x96xf32>
    %c0_14 = arith.constant 0 : index
    %c0_15 = arith.constant 0 : index
    %c0_16 = arith.constant 0 : index
    %13 = vector.load %arg5[%c0_14, %c0_15, %c0_16] : memref<1x1x96xf32, #tpu.memory_space<vmem>>, vector<1x1x96xf32>
    %14 = vector.shape_cast %13 : vector<1x1x96xf32> to vector<1x96xf32>
    %cst_17 = arith.constant 0.000000e+00 : f32
    %15 = vector.broadcast %cst_17 : f32 to vector<8x32xf32>
    %c0_i32 = arith.constant 0 : i32
    %c2_i32 = arith.constant 2 : i32
    %16 = arith.muli %c2_i32, %c0_i32 : i32
    %c7_i32 = arith.constant 7 : i32
    %17 = arith.subi %c7_i32, %16 : i32
    %18 = arith.muli %arg0, %17 : i32
    %19 = arith.addi %c0_i32, %18 : i32
    %20 = arith.index_cast %19 : i32 to index
    %c0_18 = arith.constant 0 : index
    %c0_19 = arith.constant 0 : index
    %21 = vector.load %arg7[%20, %c0_18, %c0_19] : memref<8x8x96xf32, #tpu.memory_space<vmem>>, vector<1x8x96xf32>
    %22 = vector.shape_cast %21 : vector<1x8x96xf32> to vector<8x96xf32>
    %cst_20 = arith.constant dense<0.000000e+00> : vector<8x96xf32>
    %23 = tpu.matmul %15, %12, %cst_20 {dimension_numbers = #tpu.dot_dimension_numbers<[1], [0], [0], [1], [0, 0, 1, 1], [], []>} : vector<8x32xf32>, vector<32x96xf32>, vector<8x96xf32> -> vector<8x96xf32>
    %24 = vector.broadcast %14 : vector<1x96xf32> to vector<8x96xf32>
    %25 = arith.addf %23, %24 : vector<8x96xf32>
    %26 = vector.extract_strided_slice %22 {offsets = [0, 0], sizes = [8, 32], strides = [1, 1]} : vector<8x96xf32> to vector<8x32xf32>
    %27 = vector.extract_strided_slice %25 {offsets = [0, 0], sizes = [8, 32], strides = [1, 1]} : vector<8x96xf32> to vector<8x32xf32>
    %28 = arith.addf %26, %27 : vector<8x32xf32>
    %29 = arith.negf %28 : vector<8x32xf32>
    %30 = math.exp %29 : vector<8x32xf32>
    %cst_21 = arith.constant 1.000000e+00 : f32
    %31 = vector.broadcast %cst_21 : f32 to vector<8x32xf32>
    %32 = arith.addf %31, %30 : vector<8x32xf32>
    %33 = arith.divf %31, %32 : vector<8x32xf32>
    %34 = vector.extract_strided_slice %22 {offsets = [0, 32], sizes = [8, 32], strides = [1, 1]} : vector<8x96xf32> to vector<8x32xf32>
    %35 = vector.extract_strided_slice %25 {offsets = [0, 32], sizes = [8, 32], strides = [1, 1]} : vector<8x96xf32> to vector<8x32xf32>
    %36 = arith.addf %34, %35 : vector<8x32xf32>
    %37 = arith.negf %36 : vector<8x32xf32>
    %38 = math.exp %37 : vector<8x32xf32>
    %cst_22 = arith.constant 1.000000e+00 : f32
    %39 = vector.broadcast %cst_22 : f32 to vector<8x32xf32>
    %40 = arith.addf %39, %38 : vector<8x32xf32>
    %41 = arith.divf %39, %40 : vector<8x32xf32>
    %42 = vector.extract_strided_slice %22 {offsets = [0, 64], sizes = [8, 32], strides = [1, 1]} : vector<8x96xf32> to vector<8x32xf32>
    %43 = vector.extract_strided_slice %25 {offsets = [0, 64], sizes = [8, 32], strides = [1, 1]} : vector<8x96xf32> to vector<8x32xf32>
    %44 = arith.mulf %33, %43 : vector<8x32xf32>
    %45 = arith.addf %42, %44 : vector<8x32xf32>
    %46 = math.tanh %45 : vector<8x32xf32>
    %cst_23 = arith.constant 1.000000e+00 : f32
    %47 = vector.broadcast %cst_23 : f32 to vector<8x32xf32>
    %48 = arith.subf %47, %41 : vector<8x32xf32>
    %49 = arith.mulf %48, %46 : vector<8x32xf32>
    %50 = arith.mulf %41, %15 : vector<8x32xf32>
    %51 = arith.addf %49, %50 : vector<8x32xf32>
    %c0_24 = arith.constant 0 : index
    %52 = arith.index_cast %19 : i32 to index
    %c0_25 = arith.constant 0 : index
    %c0_26 = arith.constant 0 : index
    %53 = vector.load %arg6[%c0_24, %52, %c0_25, %c0_26] : memref<1x8x8x32xf32, #tpu.memory_space<vmem>>, vector<1x1x8x32xf32>
    %54 = vector.shape_cast %53 : vector<1x1x8x32xf32> to vector<8x32xf32>
    %55 = vector.shape_cast %51 : vector<8x32xf32> to vector<1x1x8x32xf32>
    tpu.vector_store %arg6[%c0_24, %52, %c0_25, %c0_26], %55 {strides = array<i32>} : memref<1x8x8x32xf32, #tpu.memory_space<vmem>>, vector<1x1x8x32xf32>,
    %c1_i32 = arith.constant 1 : i32
    %c2_i32_27 = arith.constant 2 : i32
    %56 = arith.muli %c2_i32_27, %c1_i32 : i32
    %c7_i32_28 = arith.constant 7 : i32
    %57 = arith.subi %c7_i32_28, %56 : i32
    %58 = arith.muli %arg0, %57 : i32
    %59 = arith.addi %c1_i32, %58 : i32
    %60 = arith.index_cast %59 : i32 to index
    %c0_29 = arith.constant 0 : index
    %c0_30 = arith.constant 0 : index
    %61 = vector.load %arg7[%60, %c0_29, %c0_30] : memref<8x8x96xf32, #tpu.memory_space<vmem>>, vector<1x8x96xf32>
    %62 = vector.shape_cast %61 : vector<1x8x96xf32> to vector<8x96xf32>
    %cst_31 = arith.constant dense<0.000000e+00> : vector<8x96xf32>
    %63 = tpu.matmul %51, %12, %cst_31 {dimension_numbers = #tpu.dot_dimension_numbers<[1], [0], [0], [1], [0, 0, 1, 1], [], []>} : vector<8x32xf32>, vector<32x96xf32>, vector<8x96xf32> -> vector<8x96xf32>
    %64 = vector.broadcast %14 : vector<1x96xf32> to vector<8x96xf32>
    %65 = arith.addf %63, %64 : vector<8x96xf32>
    %66 = vector.extract_strided_slice %62 {offsets = [0, 0], sizes = [8, 32], strides = [1, 1]} : vector<8x96xf32> to vector<8x32xf32>
    %67 = vector.extract_strided_slice %65 {offsets = [0, 0], sizes = [8, 32], strides = [1, 1]} : vector<8x96xf32> to vector<8x32xf32>
    %68 = arith.addf %66, %67 : vector<8x32xf32>
    %69 = arith.negf %68 : vector<8x32xf32>
    %70 = math.exp %69 : vector<8x32xf32>
    %cst_32 = arith.constant 1.000000e+00 : f32
    %71 = vector.broadcast %cst_32 : f32 to vector<8x32xf32>
    %72 = arith.addf %71, %70 : vector<8x32xf32>
    %73 = arith.divf %71, %72 : vector<8x32xf32>
    %74 = vector.extract_strided_slice %62 {offsets = [0, 32], sizes = [8, 32], strides = [1, 1]} : vector<8x96xf32> to vector<8x32xf32>
    %75 = vector.extract_strided_slice %65 {offsets = [0, 32], sizes = [8, 32], strides = [1, 1]} : vector<8x96xf32> to vector<8x32xf32>
    %76 = arith.addf %74, %75 : vector<8x32xf32>
    %77 = arith.negf %76 : vector<8x32xf32>
    %78 = math.exp %77 : vector<8x32xf32>
    %cst_33 = arith.constant 1.000000e+00 : f32
    %79 = vector.broadcast %cst_33 : f32 to vector<8x32xf32>
    %80 = arith.addf %79, %78 : vector<8x32xf32>
    %81 = arith.divf %79, %80 : vector<8x32xf32>
    %82 = vector.extract_strided_slice %62 {offsets = [0, 64], sizes = [8, 32], strides = [1, 1]} : vector<8x96xf32> to vector<8x32xf32>
    %83 = vector.extract_strided_slice %65 {offsets = [0, 64], sizes = [8, 32], strides = [1, 1]} : vector<8x96xf32> to vector<8x32xf32>
    %84 = arith.mulf %73, %83 : vector<8x32xf32>
    %85 = arith.addf %82, %84 : vector<8x32xf32>
    %86 = math.tanh %85 : vector<8x32xf32>
    %cst_34 = arith.constant 1.000000e+00 : f32
    %87 = vector.broadcast %cst_34 : f32 to vector<8x32xf32>
    %88 = arith.subf %87, %81 : vector<8x32xf32>
    %89 = arith.mulf %88, %86 : vector<8x32xf32>
    %90 = arith.mulf %81, %51 : vector<8x32xf32>
    %91 = arith.addf %89, %90 : vector<8x32xf32>
    %c0_35 = arith.constant 0 : index
    %92 = arith.index_cast %59 : i32 to index
    %c0_36 = arith.constant 0 : index
    %c0_37 = arith.constant 0 : index
    %93 = vector.load %arg6[%c0_35, %92, %c0_36, %c0_37] : memref<1x8x8x32xf32, #tpu.memory_space<vmem>>, vector<1x1x8x32xf32>
    %94 = vector.shape_cast %93 : vector<1x1x8x32xf32> to vector<8x32xf32>
    %95 = vector.shape_cast %91 : vector<8x32xf32> to vector<1x1x8x32xf32>
    tpu.vector_store %arg6[%c0_35, %92, %c0_36, %c0_37], %95 {strides = array<i32>} : memref<1x8x8x32xf32, #tpu.memory_space<vmem>>, vector<1x1x8x32xf32>,
    %c2_i32_38 = arith.constant 2 : i32
    %c2_i32_39 = arith.constant 2 : i32
    %96 = arith.muli %c2_i32_39, %c2_i32_38 : i32
    %c7_i32_40 = arith.constant 7 : i32
    %97 = arith.subi %c7_i32_40, %96 : i32
    %98 = arith.muli %arg0, %97 : i32
    %99 = arith.addi %c2_i32_38, %98 : i32
    %100 = arith.index_cast %99 : i32 to index
    %c0_41 = arith.constant 0 : index
    %c0_42 = arith.constant 0 : index
    %101 = vector.load %arg7[%100, %c0_41, %c0_42] : memref<8x8x96xf32, #tpu.memory_space<vmem>>, vector<1x8x96xf32>
    %102 = vector.shape_cast %101 : vector<1x8x96xf32> to vector<8x96xf32>
    %cst_43 = arith.constant dense<0.000000e+00> : vector<8x96xf32>
    %103 = tpu.matmul %91, %12, %cst_43 {dimension_numbers = #tpu.dot_dimension_numbers<[1], [0], [0], [1], [0, 0, 1, 1], [], []>} : vector<8x32xf32>, vector<32x96xf32>, vector<8x96xf32> -> vector<8x96xf32>
    %104 = vector.broadcast %14 : vector<1x96xf32> to vector<8x96xf32>
    %105 = arith.addf %103, %104 : vector<8x96xf32>
    %106 = vector.extract_strided_slice %102 {offsets = [0, 0], sizes = [8, 32], strides = [1, 1]} : vector<8x96xf32> to vector<8x32xf32>
    %107 = vector.extract_strided_slice %105 {offsets = [0, 0], sizes = [8, 32], strides = [1, 1]} : vector<8x96xf32> to vector<8x32xf32>
    %108 = arith.addf %106, %107 : vector<8x32xf32>
    %109 = arith.negf %108 : vector<8x32xf32>
    %110 = math.exp %109 : vector<8x32xf32>
    %cst_44 = arith.constant 1.000000e+00 : f32
    %111 = vector.broadcast %cst_44 : f32 to vector<8x32xf32>
    %112 = arith.addf %111, %110 : vector<8x32xf32>
    %113 = arith.divf %111, %112 : vector<8x32xf32>
    %114 = vector.extract_strided_slice %102 {offsets = [0, 32], sizes = [8, 32], strides = [1, 1]} : vector<8x96xf32> to vector<8x32xf32>
    %115 = vector.extract_strided_slice %105 {offsets = [0, 32], sizes = [8, 32], strides = [1, 1]} : vector<8x96xf32> to vector<8x32xf32>
    %116 = arith.addf %114, %115 : vector<8x32xf32>
    %117 = arith.negf %116 : vector<8x32xf32>
    %118 = math.exp %117 : vector<8x32xf32>
    %cst_45 = arith.constant 1.000000e+00 : f32
    %119 = vector.broadcast %cst_45 : f32 to vector<8x32xf32>
    %120 = arith.addf %119, %118 : vector<8x32xf32>
    %121 = arith.divf %119, %120 : vector<8x32xf32>
    %122 = vector.extract_strided_slice %102 {offsets = [0, 64], sizes = [8, 32], strides = [1, 1]} : vector<8x96xf32> to vector<8x32xf32>
    %123 = vector.extract_strided_slice %105 {offsets = [0, 64], sizes = [8, 32], strides = [1, 1]} : vector<8x96xf32> to vector<8x32xf32>
    %124 = arith.mulf %113, %123 : vector<8x32xf32>
    %125 = arith.addf %122, %124 : vector<8x32xf32>
    %126 = math.tanh %125 : vector<8x32xf32>
    %cst_46 = arith.constant 1.000000e+00 : f32
    %127 = vector.broadcast %cst_46 : f32 to vector<8x32xf32>
    %128 = arith.subf %127, %121 : vector<8x32xf32>
    %129 = arith.mulf %128, %126 : vector<8x32xf32>
    %130 = arith.mulf %121, %91 : vector<8x32xf32>
    %131 = arith.addf %129, %130 : vector<8x32xf32>
    %c0_47 = arith.constant 0 : index
    %132 = arith.index_cast %99 : i32 to index
    %c0_48 = arith.constant 0 : index
    %c0_49 = arith.constant 0 : index
    %133 = vector.load %arg6[%c0_47, %132, %c0_48, %c0_49] : memref<1x8x8x32xf32, #tpu.memory_space<vmem>>, vector<1x1x8x32xf32>
    %134 = vector.shape_cast %133 : vector<1x1x8x32xf32> to vector<8x32xf32>
    %135 = vector.shape_cast %131 : vector<8x32xf32> to vector<1x1x8x32xf32>
    tpu.vector_store %arg6[%c0_47, %132, %c0_48, %c0_49], %135 {strides = array<i32>} : memref<1x8x8x32xf32, #tpu.memory_space<vmem>>, vector<1x1x8x32xf32>,
    %c3_i32 = arith.constant 3 : i32
    %c2_i32_50 = arith.constant 2 : i32
    %136 = arith.muli %c2_i32_50, %c3_i32 : i32
    %c7_i32_51 = arith.constant 7 : i32
    %137 = arith.subi %c7_i32_51, %136 : i32
    %138 = arith.muli %arg0, %137 : i32
    %139 = arith.addi %c3_i32, %138 : i32
    %140 = arith.index_cast %139 : i32 to index
    %c0_52 = arith.constant 0 : index
    %c0_53 = arith.constant 0 : index
    %141 = vector.load %arg7[%140, %c0_52, %c0_53] : memref<8x8x96xf32, #tpu.memory_space<vmem>>, vector<1x8x96xf32>
    %142 = vector.shape_cast %141 : vector<1x8x96xf32> to vector<8x96xf32>
    %cst_54 = arith.constant dense<0.000000e+00> : vector<8x96xf32>
    %143 = tpu.matmul %131, %12, %cst_54 {dimension_numbers = #tpu.dot_dimension_numbers<[1], [0], [0], [1], [0, 0, 1, 1], [], []>} : vector<8x32xf32>, vector<32x96xf32>, vector<8x96xf32> -> vector<8x96xf32>
    %144 = vector.broadcast %14 : vector<1x96xf32> to vector<8x96xf32>
    %145 = arith.addf %143, %144 : vector<8x96xf32>
    %146 = vector.extract_strided_slice %142 {offsets = [0, 0], sizes = [8, 32], strides = [1, 1]} : vector<8x96xf32> to vector<8x32xf32>
    %147 = vector.extract_strided_slice %145 {offsets = [0, 0], sizes = [8, 32], strides = [1, 1]} : vector<8x96xf32> to vector<8x32xf32>
    %148 = arith.addf %146, %147 : vector<8x32xf32>
    %149 = arith.negf %148 : vector<8x32xf32>
    %150 = math.exp %149 : vector<8x32xf32>
    %cst_55 = arith.constant 1.000000e+00 : f32
    %151 = vector.broadcast %cst_55 : f32 to vector<8x32xf32>
    %152 = arith.addf %151, %150 : vector<8x32xf32>
    %153 = arith.divf %151, %152 : vector<8x32xf32>
    %154 = vector.extract_strided_slice %142 {offsets = [0, 32], sizes = [8, 32], strides = [1, 1]} : vector<8x96xf32> to vector<8x32xf32>
    %155 = vector.extract_strided_slice %145 {offsets = [0, 32], sizes = [8, 32], strides = [1, 1]} : vector<8x96xf32> to vector<8x32xf32>
    %156 = arith.addf %154, %155 : vector<8x32xf32>
    %157 = arith.negf %156 : vector<8x32xf32>
    %158 = math.exp %157 : vector<8x32xf32>
    %cst_56 = arith.constant 1.000000e+00 : f32
    %159 = vector.broadcast %cst_56 : f32 to vector<8x32xf32>
    %160 = arith.addf %159, %158 : vector<8x32xf32>
    %161 = arith.divf %159, %160 : vector<8x32xf32>
    %162 = vector.extract_strided_slice %142 {offsets = [0, 64], sizes = [8, 32], strides = [1, 1]} : vector<8x96xf32> to vector<8x32xf32>
    %163 = vector.extract_strided_slice %145 {offsets = [0, 64], sizes = [8, 32], strides = [1, 1]} : vector<8x96xf32> to vector<8x32xf32>
    %164 = arith.mulf %153, %163 : vector<8x32xf32>
    %165 = arith.addf %162, %164 : vector<8x32xf32>
    %166 = math.tanh %165 : vector<8x32xf32>
    %cst_57 = arith.constant 1.000000e+00 : f32
    %167 = vector.broadcast %cst_57 : f32 to vector<8x32xf32>
    %168 = arith.subf %167, %161 : vector<8x32xf32>
    %169 = arith.mulf %168, %166 : vector<8x32xf32>
    %170 = arith.mulf %161, %131 : vector<8x32xf32>
    %171 = arith.addf %169, %170 : vector<8x32xf32>
    %c0_58 = arith.constant 0 : index
    %172 = arith.index_cast %139 : i32 to index
    %c0_59 = arith.constant 0 : index
    %c0_60 = arith.constant 0 : index
    %173 = vector.load %arg6[%c0_58, %172, %c0_59, %c0_60] : memref<1x8x8x32xf32, #tpu.memory_space<vmem>>, vector<1x1x8x32xf32>
    %174 = vector.shape_cast %173 : vector<1x1x8x32xf32> to vector<8x32xf32>
    %175 = vector.shape_cast %171 : vector<8x32xf32> to vector<1x1x8x32xf32>
    tpu.vector_store %arg6[%c0_58, %172, %c0_59, %c0_60], %175 {strides = array<i32>} : memref<1x8x8x32xf32, #tpu.memory_space<vmem>>, vector<1x1x8x32xf32>,
    %c4_i32 = arith.constant 4 : i32
    %c2_i32_61 = arith.constant 2 : i32
    %176 = arith.muli %c2_i32_61, %c4_i32 : i32
    %c7_i32_62 = arith.constant 7 : i32
    %177 = arith.subi %c7_i32_62, %176 : i32
    %178 = arith.muli %arg0, %177 : i32
    %179 = arith.addi %c4_i32, %178 : i32
    %180 = arith.index_cast %179 : i32 to index
    %c0_63 = arith.constant 0 : index
    %c0_64 = arith.constant 0 : index
    %181 = vector.load %arg7[%180, %c0_63, %c0_64] : memref<8x8x96xf32, #tpu.memory_space<vmem>>, vector<1x8x96xf32>
    %182 = vector.shape_cast %181 : vector<1x8x96xf32> to vector<8x96xf32>
    %cst_65 = arith.constant dense<0.000000e+00> : vector<8x96xf32>
    %183 = tpu.matmul %171, %12, %cst_65 {dimension_numbers = #tpu.dot_dimension_numbers<[1], [0], [0], [1], [0, 0, 1, 1], [], []>} : vector<8x32xf32>, vector<32x96xf32>, vector<8x96xf32> -> vector<8x96xf32>
    %184 = vector.broadcast %14 : vector<1x96xf32> to vector<8x96xf32>
    %185 = arith.addf %183, %184 : vector<8x96xf32>
    %186 = vector.extract_strided_slice %182 {offsets = [0, 0], sizes = [8, 32], strides = [1, 1]} : vector<8x96xf32> to vector<8x32xf32>
    %187 = vector.extract_strided_slice %185 {offsets = [0, 0], sizes = [8, 32], strides = [1, 1]} : vector<8x96xf32> to vector<8x32xf32>
    %188 = arith.addf %186, %187 : vector<8x32xf32>
    %189 = arith.negf %188 : vector<8x32xf32>
    %190 = math.exp %189 : vector<8x32xf32>
    %cst_66 = arith.constant 1.000000e+00 : f32
    %191 = vector.broadcast %cst_66 : f32 to vector<8x32xf32>
    %192 = arith.addf %191, %190 : vector<8x32xf32>
    %193 = arith.divf %191, %192 : vector<8x32xf32>
    %194 = vector.extract_strided_slice %182 {offsets = [0, 32], sizes = [8, 32], strides = [1, 1]} : vector<8x96xf32> to vector<8x32xf32>
    %195 = vector.extract_strided_slice %185 {offsets = [0, 32], sizes = [8, 32], strides = [1, 1]} : vector<8x96xf32> to vector<8x32xf32>
    %196 = arith.addf %194, %195 : vector<8x32xf32>
    %197 = arith.negf %196 : vector<8x32xf32>
    %198 = math.exp %197 : vector<8x32xf32>
    %cst_67 = arith.constant 1.000000e+00 : f32
    %199 = vector.broadcast %cst_67 : f32 to vector<8x32xf32>
    %200 = arith.addf %199, %198 : vector<8x32xf32>
    %201 = arith.divf %199, %200 : vector<8x32xf32>
    %202 = vector.extract_strided_slice %182 {offsets = [0, 64], sizes = [8, 32], strides = [1, 1]} : vector<8x96xf32> to vector<8x32xf32>
    %203 = vector.extract_strided_slice %185 {offsets = [0, 64], sizes = [8, 32], strides = [1, 1]} : vector<8x96xf32> to vector<8x32xf32>
    %204 = arith.mulf %193, %203 : vector<8x32xf32>
    %205 = arith.addf %202, %204 : vector<8x32xf32>
    %206 = math.tanh %205 : vector<8x32xf32>
    %cst_68 = arith.constant 1.000000e+00 : f32
    %207 = vector.broadcast %cst_68 : f32 to vector<8x32xf32>
    %208 = arith.subf %207, %201 : vector<8x32xf32>
    %209 = arith.mulf %208, %206 : vector<8x32xf32>
    %210 = arith.mulf %201, %171 : vector<8x32xf32>
    %211 = arith.addf %209, %210 : vector<8x32xf32>
    %c0_69 = arith.constant 0 : index
    %212 = arith.index_cast %179 : i32 to index
    %c0_70 = arith.constant 0 : index
    %c0_71 = arith.constant 0 : index
    %213 = vector.load %arg6[%c0_69, %212, %c0_70, %c0_71] : memref<1x8x8x32xf32, #tpu.memory_space<vmem>>, vector<1x1x8x32xf32>
    %214 = vector.shape_cast %213 : vector<1x1x8x32xf32> to vector<8x32xf32>
    %215 = vector.shape_cast %211 : vector<8x32xf32> to vector<1x1x8x32xf32>
    tpu.vector_store %arg6[%c0_69, %212, %c0_70, %c0_71], %215 {strides = array<i32>} : memref<1x8x8x32xf32, #tpu.memory_space<vmem>>, vector<1x1x8x32xf32>,
    %c5_i32 = arith.constant 5 : i32
    %c2_i32_72 = arith.constant 2 : i32
    %216 = arith.muli %c2_i32_72, %c5_i32 : i32
    %c7_i32_73 = arith.constant 7 : i32
    %217 = arith.subi %c7_i32_73, %216 : i32
    %218 = arith.muli %arg0, %217 : i32
    %219 = arith.addi %c5_i32, %218 : i32
    %220 = arith.index_cast %219 : i32 to index
    %c0_74 = arith.constant 0 : index
    %c0_75 = arith.constant 0 : index
    %221 = vector.load %arg7[%220, %c0_74, %c0_75] : memref<8x8x96xf32, #tpu.memory_space<vmem>>, vector<1x8x96xf32>
    %222 = vector.shape_cast %221 : vector<1x8x96xf32> to vector<8x96xf32>
    %cst_76 = arith.constant dense<0.000000e+00> : vector<8x96xf32>
    %223 = tpu.matmul %211, %12, %cst_76 {dimension_numbers = #tpu.dot_dimension_numbers<[1], [0], [0], [1], [0, 0, 1, 1], [], []>} : vector<8x32xf32>, vector<32x96xf32>, vector<8x96xf32> -> vector<8x96xf32>
    %224 = vector.broadcast %14 : vector<1x96xf32> to vector<8x96xf32>
    %225 = arith.addf %223, %224 : vector<8x96xf32>
    %226 = vector.extract_strided_slice %222 {offsets = [0, 0], sizes = [8, 32], strides = [1, 1]} : vector<8x96xf32> to vector<8x32xf32>
    %227 = vector.extract_strided_slice %225 {offsets = [0, 0], sizes = [8, 32], strides = [1, 1]} : vector<8x96xf32> to vector<8x32xf32>
    %228 = arith.addf %226, %227 : vector<8x32xf32>
    %229 = arith.negf %228 : vector<8x32xf32>
    %230 = math.exp %229 : vector<8x32xf32>
    %cst_77 = arith.constant 1.000000e+00 : f32
    %231 = vector.broadcast %cst_77 : f32 to vector<8x32xf32>
    %232 = arith.addf %231, %230 : vector<8x32xf32>
    %233 = arith.divf %231, %232 : vector<8x32xf32>
    %234 = vector.extract_strided_slice %222 {offsets = [0, 32], sizes = [8, 32], strides = [1, 1]} : vector<8x96xf32> to vector<8x32xf32>
    %235 = vector.extract_strided_slice %225 {offsets = [0, 32], sizes = [8, 32], strides = [1, 1]} : vector<8x96xf32> to vector<8x32xf32>
    %236 = arith.addf %234, %235 : vector<8x32xf32>
    %237 = arith.negf %236 : vector<8x32xf32>
    %238 = math.exp %237 : vector<8x32xf32>
    %cst_78 = arith.constant 1.000000e+00 : f32
    %239 = vector.broadcast %cst_78 : f32 to vector<8x32xf32>
    %240 = arith.addf %239, %238 : vector<8x32xf32>
    %241 = arith.divf %239, %240 : vector<8x32xf32>
    %242 = vector.extract_strided_slice %222 {offsets = [0, 64], sizes = [8, 32], strides = [1, 1]} : vector<8x96xf32> to vector<8x32xf32>
    %243 = vector.extract_strided_slice %225 {offsets = [0, 64], sizes = [8, 32], strides = [1, 1]} : vector<8x96xf32> to vector<8x32xf32>
    %244 = arith.mulf %233, %243 : vector<8x32xf32>
    %245 = arith.addf %242, %244 : vector<8x32xf32>
    %246 = math.tanh %245 : vector<8x32xf32>
    %cst_79 = arith.constant 1.000000e+00 : f32
    %247 = vector.broadcast %cst_79 : f32 to vector<8x32xf32>
    %248 = arith.subf %247, %241 : vector<8x32xf32>
    %249 = arith.mulf %248, %246 : vector<8x32xf32>
    %250 = arith.mulf %241, %211 : vector<8x32xf32>
    %251 = arith.addf %249, %250 : vector<8x32xf32>
    %c0_80 = arith.constant 0 : index
    %252 = arith.index_cast %219 : i32 to index
    %c0_81 = arith.constant 0 : index
    %c0_82 = arith.constant 0 : index
    %253 = vector.load %arg6[%c0_80, %252, %c0_81, %c0_82] : memref<1x8x8x32xf32, #tpu.memory_space<vmem>>, vector<1x1x8x32xf32>
    %254 = vector.shape_cast %253 : vector<1x1x8x32xf32> to vector<8x32xf32>
    %255 = vector.shape_cast %251 : vector<8x32xf32> to vector<1x1x8x32xf32>
    tpu.vector_store %arg6[%c0_80, %252, %c0_81, %c0_82], %255 {strides = array<i32>} : memref<1x8x8x32xf32, #tpu.memory_space<vmem>>, vector<1x1x8x32xf32>,
    %c6_i32 = arith.constant 6 : i32
    %c2_i32_83 = arith.constant 2 : i32
    %256 = arith.muli %c2_i32_83, %c6_i32 : i32
    %c7_i32_84 = arith.constant 7 : i32
    %257 = arith.subi %c7_i32_84, %256 : i32
    %258 = arith.muli %arg0, %257 : i32
    %259 = arith.addi %c6_i32, %258 : i32
    %260 = arith.index_cast %259 : i32 to index
    %c0_85 = arith.constant 0 : index
    %c0_86 = arith.constant 0 : index
    %261 = vector.load %arg7[%260, %c0_85, %c0_86] : memref<8x8x96xf32, #tpu.memory_space<vmem>>, vector<1x8x96xf32>
    %262 = vector.shape_cast %261 : vector<1x8x96xf32> to vector<8x96xf32>
    %cst_87 = arith.constant dense<0.000000e+00> : vector<8x96xf32>
    %263 = tpu.matmul %251, %12, %cst_87 {dimension_numbers = #tpu.dot_dimension_numbers<[1], [0], [0], [1], [0, 0, 1, 1], [], []>} : vector<8x32xf32>, vector<32x96xf32>, vector<8x96xf32> -> vector<8x96xf32>
    %264 = vector.broadcast %14 : vector<1x96xf32> to vector<8x96xf32>
    %265 = arith.addf %263, %264 : vector<8x96xf32>
    %266 = vector.extract_strided_slice %262 {offsets = [0, 0], sizes = [8, 32], strides = [1, 1]} : vector<8x96xf32> to vector<8x32xf32>
    %267 = vector.extract_strided_slice %265 {offsets = [0, 0], sizes = [8, 32], strides = [1, 1]} : vector<8x96xf32> to vector<8x32xf32>
    %268 = arith.addf %266, %267 : vector<8x32xf32>
    %269 = arith.negf %268 : vector<8x32xf32>
    %270 = math.exp %269 : vector<8x32xf32>
    %cst_88 = arith.constant 1.000000e+00 : f32
    %271 = vector.broadcast %cst_88 : f32 to vector<8x32xf32>
    %272 = arith.addf %271, %270 : vector<8x32xf32>
    %273 = arith.divf %271, %272 : vector<8x32xf32>
    %274 = vector.extract_strided_slice %262 {offsets = [0, 32], sizes = [8, 32], strides = [1, 1]} : vector<8x96xf32> to vector<8x32xf32>
    %275 = vector.extract_strided_slice %265 {offsets = [0, 32], sizes = [8, 32], strides = [1, 1]} : vector<8x96xf32> to vector<8x32xf32>
    %276 = arith.addf %274, %275 : vector<8x32xf32>
    %277 = arith.negf %276 : vector<8x32xf32>
    %278 = math.exp %277 : vector<8x32xf32>
    %cst_89 = arith.constant 1.000000e+00 : f32
    %279 = vector.broadcast %cst_89 : f32 to vector<8x32xf32>
    %280 = arith.addf %279, %278 : vector<8x32xf32>
    %281 = arith.divf %279, %280 : vector<8x32xf32>
    %282 = vector.extract_strided_slice %262 {offsets = [0, 64], sizes = [8, 32], strides = [1, 1]} : vector<8x96xf32> to vector<8x32xf32>
    %283 = vector.extract_strided_slice %265 {offsets = [0, 64], sizes = [8, 32], strides = [1, 1]} : vector<8x96xf32> to vector<8x32xf32>
    %284 = arith.mulf %273, %283 : vector<8x32xf32>
    %285 = arith.addf %282, %284 : vector<8x32xf32>
    %286 = math.tanh %285 : vector<8x32xf32>
    %cst_90 = arith.constant 1.000000e+00 : f32
    %287 = vector.broadcast %cst_90 : f32 to vector<8x32xf32>
    %288 = arith.subf %287, %281 : vector<8x32xf32>
    %289 = arith.mulf %288, %286 : vector<8x32xf32>
    %290 = arith.mulf %281, %251 : vector<8x32xf32>
    %291 = arith.addf %289, %290 : vector<8x32xf32>
    %c0_91 = arith.constant 0 : index
    %292 = arith.index_cast %259 : i32 to index
    %c0_92 = arith.constant 0 : index
    %c0_93 = arith.constant 0 : index
    %293 = vector.load %arg6[%c0_91, %292, %c0_92, %c0_93] : memref<1x8x8x32xf32, #tpu.memory_space<vmem>>, vector<1x1x8x32xf32>
    %294 = vector.shape_cast %293 : vector<1x1x8x32xf32> to vector<8x32xf32>
    %295 = vector.shape_cast %291 : vector<8x32xf32> to vector<1x1x8x32xf32>
    tpu.vector_store %arg6[%c0_91, %292, %c0_92, %c0_93], %295 {strides = array<i32>} : memref<1x8x8x32xf32, #tpu.memory_space<vmem>>, vector<1x1x8x32xf32>,
    %c7_i32_94 = arith.constant 7 : i32
    %c2_i32_95 = arith.constant 2 : i32
    %296 = arith.muli %c2_i32_95, %c7_i32_94 : i32
    %c7_i32_96 = arith.constant 7 : i32
    %297 = arith.subi %c7_i32_96, %296 : i32
    %298 = arith.muli %arg0, %297 : i32
    %299 = arith.addi %c7_i32_94, %298 : i32
    %300 = arith.index_cast %299 : i32 to index
    %c0_97 = arith.constant 0 : index
    %c0_98 = arith.constant 0 : index
    %301 = vector.load %arg7[%300, %c0_97, %c0_98] : memref<8x8x96xf32, #tpu.memory_space<vmem>>, vector<1x8x96xf32>
    %302 = vector.shape_cast %301 : vector<1x8x96xf32> to vector<8x96xf32>
    %cst_99 = arith.constant dense<0.000000e+00> : vector<8x96xf32>
    %303 = tpu.matmul %291, %12, %cst_99 {dimension_numbers = #tpu.dot_dimension_numbers<[1], [0], [0], [1], [0, 0, 1, 1], [], []>} : vector<8x32xf32>, vector<32x96xf32>, vector<8x96xf32> -> vector<8x96xf32>
    %304 = vector.broadcast %14 : vector<1x96xf32> to vector<8x96xf32>
    %305 = arith.addf %303, %304 : vector<8x96xf32>
    %306 = vector.extract_strided_slice %302 {offsets = [0, 0], sizes = [8, 32], strides = [1, 1]} : vector<8x96xf32> to vector<8x32xf32>
    %307 = vector.extract_strided_slice %305 {offsets = [0, 0], sizes = [8, 32], strides = [1, 1]} : vector<8x96xf32> to vector<8x32xf32>
    %308 = arith.addf %306, %307 : vector<8x32xf32>
    %309 = arith.negf %308 : vector<8x32xf32>
    %310 = math.exp %309 : vector<8x32xf32>
    %cst_100 = arith.constant 1.000000e+00 : f32
    %311 = vector.broadcast %cst_100 : f32 to vector<8x32xf32>
    %312 = arith.addf %311, %310 : vector<8x32xf32>
    %313 = arith.divf %311, %312 : vector<8x32xf32>
    %314 = vector.extract_strided_slice %302 {offsets = [0, 32], sizes = [8, 32], strides = [1, 1]} : vector<8x96xf32> to vector<8x32xf32>
    %315 = vector.extract_strided_slice %305 {offsets = [0, 32], sizes = [8, 32], strides = [1, 1]} : vector<8x96xf32> to vector<8x32xf32>
    %316 = arith.addf %314, %315 : vector<8x32xf32>
    %317 = arith.negf %316 : vector<8x32xf32>
    %318 = math.exp %317 : vector<8x32xf32>
    %cst_101 = arith.constant 1.000000e+00 : f32
    %319 = vector.broadcast %cst_101 : f32 to vector<8x32xf32>
    %320 = arith.addf %319, %318 : vector<8x32xf32>
    %321 = arith.divf %319, %320 : vector<8x32xf32>
    %322 = vector.extract_strided_slice %302 {offsets = [0, 64], sizes = [8, 32], strides = [1, 1]} : vector<8x96xf32> to vector<8x32xf32>
    %323 = vector.extract_strided_slice %305 {offsets = [0, 64], sizes = [8, 32], strides = [1, 1]} : vector<8x96xf32> to vector<8x32xf32>
    %324 = arith.mulf %313, %323 : vector<8x32xf32>
    %325 = arith.addf %322, %324 : vector<8x32xf32>
    %326 = math.tanh %325 : vector<8x32xf32>
    %cst_102 = arith.constant 1.000000e+00 : f32
    %327 = vector.broadcast %cst_102 : f32 to vector<8x32xf32>
    %328 = arith.subf %327, %321 : vector<8x32xf32>
    %329 = arith.mulf %328, %326 : vector<8x32xf32>
    %330 = arith.mulf %321, %291 : vector<8x32xf32>
    %331 = arith.addf %329, %330 : vector<8x32xf32>
    %c0_103 = arith.constant 0 : index
    %332 = arith.index_cast %299 : i32 to index
    %c0_104 = arith.constant 0 : index
    %c0_105 = arith.constant 0 : index
    %333 = vector.load %arg6[%c0_103, %332, %c0_104, %c0_105] : memref<1x8x8x32xf32, #tpu.memory_space<vmem>>, vector<1x1x8x32xf32>
    %334 = vector.shape_cast %333 : vector<1x1x8x32xf32> to vector<8x32xf32>
    %335 = vector.shape_cast %331 : vector<8x32xf32> to vector<1x1x8x32xf32>
    tpu.vector_store %arg6[%c0_103, %332, %c0_104, %c0_105], %335 {strides = array<i32>} : memref<1x8x8x32xf32, #tpu.memory_space<vmem>>, vector<1x1x8x32xf32>,
    %c8_i32 = arith.constant 8 : i32
    return
  }
  func.func @transform_0(%arg0: i32) -> (i32, i32, i32) {
    %c0_i32 = arith.constant 0 : i32
    %c0_i32_0 = arith.constant 0 : i32
    %c0_i32_1 = arith.constant 0 : i32
    %c0_i32_2 = arith.constant 0 : i32
    return %c0_i32, %c0_i32_0, %c0_i32_1 : i32, i32, i32
  }
  func.func @transform_1(%arg0: i32) -> (i32, i32, i32) {
    %c0_i32 = arith.constant 0 : i32
    %c0_i32_0 = arith.constant 0 : i32
    %c0_i32_1 = arith.constant 0 : i32
    return %arg0, %c0_i32, %c0_i32_0 : i32, i32, i32
  }
  func.func @transform_2(%arg0: i32) -> (i32, i32, i32) {
    %c0_i32 = arith.constant 0 : i32
    %c0_i32_0 = arith.constant 0 : i32
    %c0_i32_1 = arith.constant 0 : i32
    return %arg0, %c0_i32, %c0_i32_0 : i32, i32, i32
  }
  func.func @transform_3(%arg0: i32) -> (i32, i32, i32) {
    %c0_i32 = arith.constant 0 : i32
    %c0_i32_0 = arith.constant 0 : i32
    %c0_i32_1 = arith.constant 0 : i32
    return %arg0, %c0_i32, %c0_i32_0 : i32, i32, i32
  }
  func.func @transform_4(%arg0: i32) -> (i32, i32, i32) {
    %c0_i32 = arith.constant 0 : i32
    %c0_i32_0 = arith.constant 0 : i32
    %c0_i32_1 = arith.constant 0 : i32
    return %arg0, %c0_i32, %c0_i32_0 : i32, i32, i32
  }
  func.func @transform_5(%arg0: i32) -> (i32, i32, i32, i32) {
    %c0_i32 = arith.constant 0 : i32
    %c0_i32_0 = arith.constant 0 : i32
    %c0_i32_1 = arith.constant 0 : i32
    %c0_i32_2 = arith.constant 0 : i32
    return %arg0, %c0_i32, %c0_i32_0, %c0_i32_1 : i32, i32, i32, i32
  }
}

module attributes {stable_mosaic.version = 11 : i64} {
  func.func @_decoder_kernel(%arg0: memref<8x8x32xf32, #tpu.memory_space<vmem>>, %arg1: memref<128x32xf32, #tpu.memory_space<vmem>>, %arg2: memref<2x8x32xf32, #tpu.memory_space<vmem>>, %arg3: memref<2x64x128xf32, #tpu.memory_space<vmem>>, %arg4: memref<2x1x128xf32, #tpu.memory_space<vmem>>, %arg5: memref<32x32xf32, #tpu.memory_space<vmem>>, %arg6: memref<32x32xf32, #tpu.memory_space<vmem>>, %arg7: memref<1x32xf32, #tpu.memory_space<vmem>>, %arg8: memref<32x32xf32, #tpu.memory_space<vmem>>, %arg9: memref<32x32xf32, #tpu.memory_space<vmem>>, %arg10: memref<1x32xf32, #tpu.memory_space<vmem>>, %arg11: memref<32x128xf32, #tpu.memory_space<vmem>>, %arg12: memref<1x128xf32, #tpu.memory_space<vmem>>, %arg13: memref<5x8x128xf32, #tpu.memory_space<vmem>>) attributes {dimension_semantics = [], scalar_prefetch = 0 : i64, scratch_operands = 0 : i64, tpu.core_type = #tpu.core_type<tc>} {
    %c0 = arith.constant 0 : index
    %c0_0 = arith.constant 0 : index
    %c0_1 = arith.constant 0 : index
    %0 = vector.load %arg0[%c0, %c0_0, %c0_1] : memref<8x8x32xf32, #tpu.memory_space<vmem>>, vector<8x8x32xf32>
    %1 = vector.shape_cast %0 : vector<8x8x32xf32> to vector<64x32xf32>
    %c0_2 = arith.constant 0 : index
    %c0_3 = arith.constant 0 : index
    %2 = vector.load %arg6[%c0_2, %c0_3] : memref<32x32xf32, #tpu.memory_space<vmem>>, vector<32x32xf32>
    %cst = arith.constant dense<0.000000e+00> : vector<64x32xf32>
    %3 = tpu.matmul %1, %2, %cst {dimension_numbers = #tpu.dot_dimension_numbers<[1], [0], [0], [1], [0, 0, 1, 1], [], []>} : vector<64x32xf32>, vector<32x32xf32>, vector<64x32xf32> -> vector<64x32xf32>
    %4 = vector.shape_cast %3 : vector<64x32xf32> to vector<8x8x32xf32>
    %c0_4 = arith.constant 0 : index
    %c0_5 = arith.constant 0 : index
    %5 = vector.load %arg1[%c0_4, %c0_5] : memref<128x32xf32, #tpu.memory_space<vmem>>, vector<128x32xf32>
    %c0_6 = arith.constant 0 : index
    %c0_7 = arith.constant 0 : index
    %6 = vector.load %arg5[%c0_6, %c0_7] : memref<32x32xf32, #tpu.memory_space<vmem>>, vector<32x32xf32>
    %c0_8 = arith.constant 0 : index
    %c0_9 = arith.constant 0 : index
    %7 = vector.load %arg7[%c0_8, %c0_9] : memref<1x32xf32, #tpu.memory_space<vmem>>, vector<1x32xf32>
    %c0_10 = arith.constant 0 : index
    %c0_11 = arith.constant 0 : index
    %8 = vector.load %arg8[%c0_10, %c0_11] : memref<32x32xf32, #tpu.memory_space<vmem>>, vector<32x32xf32>
    %c0_12 = arith.constant 0 : index
    %c0_13 = arith.constant 0 : index
    %9 = vector.load %arg9[%c0_12, %c0_13] : memref<32x32xf32, #tpu.memory_space<vmem>>, vector<32x32xf32>
    %c0_14 = arith.constant 0 : index
    %c0_15 = arith.constant 0 : index
    %10 = vector.load %arg10[%c0_14, %c0_15] : memref<1x32xf32, #tpu.memory_space<vmem>>, vector<1x32xf32>
    %c0_16 = arith.constant 0 : index
    %c0_17 = arith.constant 0 : index
    %11 = vector.load %arg11[%c0_16, %c0_17] : memref<32x128xf32, #tpu.memory_space<vmem>>, vector<32x128xf32>
    %c0_18 = arith.constant 0 : index
    %c0_19 = arith.constant 0 : index
    %12 = vector.load %arg12[%c0_18, %c0_19] : memref<1x128xf32, #tpu.memory_space<vmem>>, vector<1x128xf32>
    %13 = tpu.iota {dimensions = array<i32: 1>} : vector<8x128xi32>
    %c0_20 = arith.constant 0 : index
    %c0_21 = arith.constant 0 : index
    %c0_22 = arith.constant 0 : index
    %14 = vector.load %arg2[%c0_20, %c0_21, %c0_22] : memref<2x8x32xf32, #tpu.memory_space<vmem>>, vector<1x8x32xf32>
    %15 = vector.shape_cast %14 : vector<1x8x32xf32> to vector<8x32xf32>
    %c1 = arith.constant 1 : index
    %c0_23 = arith.constant 0 : index
    %c0_24 = arith.constant 0 : index
    %16 = vector.load %arg2[%c1, %c0_23, %c0_24] : memref<2x8x32xf32, #tpu.memory_space<vmem>>, vector<1x8x32xf32>
    %17 = vector.shape_cast %16 : vector<1x8x32xf32> to vector<8x32xf32>
    %c0_25 = arith.constant 0 : index
    %c0_26 = arith.constant 0 : index
    %c0_27 = arith.constant 0 : index
    %18 = vector.load %arg3[%c0_25, %c0_26, %c0_27] : memref<2x64x128xf32, #tpu.memory_space<vmem>>, vector<1x64x128xf32>
    %19 = vector.shape_cast %18 : vector<1x64x128xf32> to vector<64x128xf32>
    %c1_28 = arith.constant 1 : index
    %c0_29 = arith.constant 0 : index
    %c0_30 = arith.constant 0 : index
    %20 = vector.load %arg3[%c1_28, %c0_29, %c0_30] : memref<2x64x128xf32, #tpu.memory_space<vmem>>, vector<1x64x128xf32>
    %21 = vector.shape_cast %20 : vector<1x64x128xf32> to vector<64x128xf32>
    %c0_31 = arith.constant 0 : index
    %c0_32 = arith.constant 0 : index
    %c0_33 = arith.constant 0 : index
    %22 = vector.load %arg4[%c0_31, %c0_32, %c0_33] : memref<2x1x128xf32, #tpu.memory_space<vmem>>, vector<1x1x128xf32>
    %23 = vector.shape_cast %22 : vector<1x1x128xf32> to vector<1x128xf32>
    %c1_34 = arith.constant 1 : index
    %c0_35 = arith.constant 0 : index
    %c0_36 = arith.constant 0 : index
    %24 = vector.load %arg4[%c1_34, %c0_35, %c0_36] : memref<2x1x128xf32, #tpu.memory_space<vmem>>, vector<1x1x128xf32>
    %25 = vector.shape_cast %24 : vector<1x1x128xf32> to vector<1x128xf32>
    %c0_i32 = arith.constant 0 : i32
    %26 = vector.broadcast %c0_i32 : i32 to vector<8x1xi32>
    %c0_i32_37 = arith.constant 0 : i32
    %27 = vector.broadcast %26 : vector<8x1xi32> to vector<8x128xi32>
    %28 = arith.cmpi eq, %13, %27 : vector<8x128xi32>
    %29 = arith.extui %28 : vector<8x128xi1> to vector<8x128xi32>
    %30 = arith.sitofp %29 : vector<8x128xi32> to vector<8x128xf32>
    %cst_38 = arith.constant dense<0.000000e+00> : vector<8x32xf32>
    %31 = tpu.matmul %30, %5, %cst_38 {dimension_numbers = #tpu.dot_dimension_numbers<[1], [0], [0], [1], [0, 0, 1, 1], [], []>} : vector<8x128xf32>, vector<128x32xf32>, vector<8x32xf32> -> vector<8x32xf32>
    %32 = tpu.concatenate %31, %15 in 1 : vector<8x32xf32>, vector<8x32xf32> -> vector<8x64xf32>
    %cst_39 = arith.constant dense<0.000000e+00> : vector<8x128xf32>
    %33 = tpu.matmul %32, %19, %cst_39 {dimension_numbers = #tpu.dot_dimension_numbers<[1], [0], [0], [1], [0, 0, 1, 1], [], []>} : vector<8x64xf32>, vector<64x128xf32>, vector<8x128xf32> -> vector<8x128xf32>
    %34 = vector.broadcast %23 : vector<1x128xf32> to vector<8x128xf32>
    %35 = arith.addf %33, %34 : vector<8x128xf32>
    %36 = vector.extract_strided_slice %35 {offsets = [0, 0], sizes = [8, 32], strides = [1, 1]} : vector<8x128xf32> to vector<8x32xf32>
    %37 = arith.negf %36 : vector<8x32xf32>
    %38 = math.exp %37 : vector<8x32xf32>
    %cst_40 = arith.constant 1.000000e+00 : f32
    %39 = vector.broadcast %cst_40 : f32 to vector<8x32xf32>
    %40 = arith.addf %39, %38 : vector<8x32xf32>
    %41 = arith.divf %39, %40 : vector<8x32xf32>
    %42 = vector.extract_strided_slice %35 {offsets = [0, 32], sizes = [8, 32], strides = [1, 1]} : vector<8x128xf32> to vector<8x32xf32>
    %43 = arith.negf %42 : vector<8x32xf32>
    %44 = math.exp %43 : vector<8x32xf32>
    %cst_41 = arith.constant 1.000000e+00 : f32
    %45 = vector.broadcast %cst_41 : f32 to vector<8x32xf32>
    %46 = arith.addf %45, %44 : vector<8x32xf32>
    %47 = arith.divf %45, %46 : vector<8x32xf32>
    %48 = vector.extract_strided_slice %35 {offsets = [0, 64], sizes = [8, 32], strides = [1, 1]} : vector<8x128xf32> to vector<8x32xf32>
    %49 = vector.extract_strided_slice %35 {offsets = [0, 96], sizes = [8, 32], strides = [1, 1]} : vector<8x128xf32> to vector<8x32xf32>
    %50 = arith.mulf %41, %49 : vector<8x32xf32>
    %51 = arith.addf %48, %50 : vector<8x32xf32>
    %52 = math.tanh %51 : vector<8x32xf32>
    %cst_42 = arith.constant 1.000000e+00 : f32
    %53 = vector.broadcast %cst_42 : f32 to vector<8x32xf32>
    %54 = arith.subf %53, %47 : vector<8x32xf32>
    %55 = arith.mulf %54, %52 : vector<8x32xf32>
    %56 = arith.mulf %47, %15 : vector<8x32xf32>
    %57 = arith.addf %55, %56 : vector<8x32xf32>
    %58 = tpu.concatenate %57, %17 in 1 : vector<8x32xf32>, vector<8x32xf32> -> vector<8x64xf32>
    %cst_43 = arith.constant dense<0.000000e+00> : vector<8x128xf32>
    %59 = tpu.matmul %58, %21, %cst_43 {dimension_numbers = #tpu.dot_dimension_numbers<[1], [0], [0], [1], [0, 0, 1, 1], [], []>} : vector<8x64xf32>, vector<64x128xf32>, vector<8x128xf32> -> vector<8x128xf32>
    %60 = vector.broadcast %25 : vector<1x128xf32> to vector<8x128xf32>
    %61 = arith.addf %59, %60 : vector<8x128xf32>
    %62 = vector.extract_strided_slice %61 {offsets = [0, 0], sizes = [8, 32], strides = [1, 1]} : vector<8x128xf32> to vector<8x32xf32>
    %63 = arith.negf %62 : vector<8x32xf32>
    %64 = math.exp %63 : vector<8x32xf32>
    %cst_44 = arith.constant 1.000000e+00 : f32
    %65 = vector.broadcast %cst_44 : f32 to vector<8x32xf32>
    %66 = arith.addf %65, %64 : vector<8x32xf32>
    %67 = arith.divf %65, %66 : vector<8x32xf32>
    %68 = vector.extract_strided_slice %61 {offsets = [0, 32], sizes = [8, 32], strides = [1, 1]} : vector<8x128xf32> to vector<8x32xf32>
    %69 = arith.negf %68 : vector<8x32xf32>
    %70 = math.exp %69 : vector<8x32xf32>
    %cst_45 = arith.constant 1.000000e+00 : f32
    %71 = vector.broadcast %cst_45 : f32 to vector<8x32xf32>
    %72 = arith.addf %71, %70 : vector<8x32xf32>
    %73 = arith.divf %71, %72 : vector<8x32xf32>
    %74 = vector.extract_strided_slice %61 {offsets = [0, 64], sizes = [8, 32], strides = [1, 1]} : vector<8x128xf32> to vector<8x32xf32>
    %75 = vector.extract_strided_slice %61 {offsets = [0, 96], sizes = [8, 32], strides = [1, 1]} : vector<8x128xf32> to vector<8x32xf32>
    %76 = arith.mulf %67, %75 : vector<8x32xf32>
    %77 = arith.addf %74, %76 : vector<8x32xf32>
    %78 = math.tanh %77 : vector<8x32xf32>
    %cst_46 = arith.constant 1.000000e+00 : f32
    %79 = vector.broadcast %cst_46 : f32 to vector<8x32xf32>
    %80 = arith.subf %79, %73 : vector<8x32xf32>
    %81 = arith.mulf %80, %78 : vector<8x32xf32>
    %82 = arith.mulf %73, %17 : vector<8x32xf32>
    %83 = arith.addf %81, %82 : vector<8x32xf32>
    %cst_47 = arith.constant dense<0.000000e+00> : vector<8x32xf32>
    %84 = tpu.matmul %83, %6, %cst_47 {dimension_numbers = #tpu.dot_dimension_numbers<[1], [0], [0], [1], [0, 0, 1, 1], [], []>} : vector<8x32xf32>, vector<32x32xf32>, vector<8x32xf32> -> vector<8x32xf32>
    %85 = vector.shape_cast %84 : vector<8x32xf32> to vector<8x1x32xf32>
    %86 = vector.broadcast %85 : vector<8x1x32xf32> to vector<8x8x32xf32>
    %87 = arith.addf %4, %86 : vector<8x8x32xf32>
    %88 = math.tanh %87 : vector<8x8x32xf32>
    %89 = vector.shape_cast %7 : vector<1x32xf32> to vector<1x1x32xf32>
    %90 = vector.broadcast %89 : vector<1x1x32xf32> to vector<8x8x32xf32>
    %91 = arith.mulf %88, %90 : vector<8x8x32xf32>
    %cst_48 = arith.constant dense<0.000000e+00> : vector<8x8xf32>
    %92 = vector.multi_reduction <add>, %91, %cst_48 [2] : vector<8x8x32xf32> to vector<8x8xf32>
    %cst_49 = arith.constant dense<0xFF800000> : vector<8xf32>
    %93 = vector.multi_reduction <maximumf>, %92, %cst_49 [1] : vector<8x8xf32> to vector<8xf32>
    %94 = vector.shape_cast %93 : vector<8xf32> to vector<8x1xf32>
    %95 = vector.broadcast %94 : vector<8x1xf32> to vector<8x8xf32>
    %96 = arith.subf %92, %95 : vector<8x8xf32>
    %97 = math.exp %96 : vector<8x8xf32>
    %cst_50 = arith.constant dense<0.000000e+00> : vector<8xf32>
    %98 = vector.multi_reduction <add>, %97, %cst_50 [1] : vector<8x8xf32> to vector<8xf32>
    %99 = vector.shape_cast %98 : vector<8xf32> to vector<8x1xf32>
    %100 = tpu.reciprocal %99 {approx = true} : vector<8x1xf32> -> vector<8x1xf32>
    %101 = vector.broadcast %100 : vector<8x1xf32> to vector<8x8xf32>
    %102 = arith.mulf %97, %101 : vector<8x8xf32>
    %103 = vector.shape_cast %102 : vector<8x8xf32> to vector<8x8x1xf32>
    %104 = vector.broadcast %103 : vector<8x8x1xf32> to vector<8x8x32xf32>
    %105 = arith.mulf %104, %0 : vector<8x8x32xf32>
    %cst_51 = arith.constant dense<0.000000e+00> : vector<8x32xf32>
    %106 = vector.multi_reduction <add>, %105, %cst_51 [1] : vector<8x8x32xf32> to vector<8x32xf32>
    %cst_52 = arith.constant dense<0.000000e+00> : vector<8x32xf32>
    %107 = tpu.matmul %83, %8, %cst_52 {dimension_numbers = #tpu.dot_dimension_numbers<[1], [0], [0], [1], [0, 0, 1, 1], [], []>} : vector<8x32xf32>, vector<32x32xf32>, vector<8x32xf32> -> vector<8x32xf32>
    %cst_53 = arith.constant dense<0.000000e+00> : vector<8x32xf32>
    %108 = tpu.matmul %106, %9, %cst_53 {dimension_numbers = #tpu.dot_dimension_numbers<[1], [0], [0], [1], [0, 0, 1, 1], [], []>} : vector<8x32xf32>, vector<32x32xf32>, vector<8x32xf32> -> vector<8x32xf32>
    %109 = arith.addf %107, %108 : vector<8x32xf32>
    %110 = vector.broadcast %10 : vector<1x32xf32> to vector<8x32xf32>
    %111 = arith.addf %109, %110 : vector<8x32xf32>
    %112 = math.tanh %111 : vector<8x32xf32>
    %cst_54 = arith.constant dense<0.000000e+00> : vector<8x128xf32>
    %113 = tpu.matmul %112, %11, %cst_54 {dimension_numbers = #tpu.dot_dimension_numbers<[1], [0], [0], [1], [0, 0, 1, 1], [], []>} : vector<8x32xf32>, vector<32x128xf32>, vector<8x128xf32> -> vector<8x128xf32>
    %114 = vector.broadcast %12 : vector<1x128xf32> to vector<8x128xf32>
    %115 = arith.addf %113, %114 : vector<8x128xf32>
    %cst_55 = arith.constant dense<0xFF800000> : vector<8xf32>
    %116 = vector.multi_reduction <maximumf>, %115, %cst_55 [1] : vector<8x128xf32> to vector<8xf32>
    %117 = vector.shape_cast %116 : vector<8xf32> to vector<8x1xf32>
    %118 = vector.broadcast %117 : vector<8x1xf32> to vector<8x128xf32>
    %119 = arith.cmpf oeq, %115, %118 : vector<8x128xf32>
    %c128_i32 = arith.constant 128 : i32
    %120 = vector.broadcast %c128_i32 : i32 to vector<8x128xi32>
    %121 = arith.select %119, %13, %120 : vector<8x128xi1>, vector<8x128xi32>
    %cst_56 = arith.constant dense<2147483647> : vector<8xi32>
    %122 = vector.multi_reduction <minsi>, %121, %cst_56 [1] : vector<8x128xi32> to vector<8xi32>
    %123 = vector.shape_cast %122 : vector<8xi32> to vector<8x1xi32>
    %124 = vector.broadcast %117 : vector<8x1xf32> to vector<8x128xf32>
    %125 = arith.subf %115, %124 : vector<8x128xf32>
    %126 = math.exp %125 : vector<8x128xf32>
    %cst_57 = arith.constant dense<0.000000e+00> : vector<8xf32>
    %127 = vector.multi_reduction <add>, %126, %cst_57 [1] : vector<8x128xf32> to vector<8xf32>
    %128 = vector.shape_cast %127 : vector<8xf32> to vector<8x1xf32>
    %129 = vector.broadcast %128 : vector<8x1xf32> to vector<8x128xf32>
    %130 = arith.divf %126, %129 : vector<8x128xf32>
    %131 = arith.index_cast %c0_i32_37 : i32 to index
    %c0_58 = arith.constant 0 : index
    %c0_59 = arith.constant 0 : index
    %132 = vector.load %arg13[%131, %c0_58, %c0_59] : memref<5x8x128xf32, #tpu.memory_space<vmem>>, vector<1x8x128xf32>
    %133 = vector.shape_cast %132 : vector<1x8x128xf32> to vector<8x128xf32>
    %134 = vector.shape_cast %130 : vector<8x128xf32> to vector<1x8x128xf32>
    tpu.vector_store %arg13[%131, %c0_58, %c0_59], %134 {strides = array<i32>} : memref<5x8x128xf32, #tpu.memory_space<vmem>>, vector<1x8x128xf32>,
    %c1_i32 = arith.constant 1 : i32
    %135 = vector.broadcast %123 : vector<8x1xi32> to vector<8x128xi32>
    %136 = arith.cmpi eq, %13, %135 : vector<8x128xi32>
    %137 = arith.extui %136 : vector<8x128xi1> to vector<8x128xi32>
    %138 = arith.sitofp %137 : vector<8x128xi32> to vector<8x128xf32>
    %cst_60 = arith.constant dense<0.000000e+00> : vector<8x32xf32>
    %139 = tpu.matmul %138, %5, %cst_60 {dimension_numbers = #tpu.dot_dimension_numbers<[1], [0], [0], [1], [0, 0, 1, 1], [], []>} : vector<8x128xf32>, vector<128x32xf32>, vector<8x32xf32> -> vector<8x32xf32>
    %140 = tpu.concatenate %139, %57 in 1 : vector<8x32xf32>, vector<8x32xf32> -> vector<8x64xf32>
    %cst_61 = arith.constant dense<0.000000e+00> : vector<8x128xf32>
    %141 = tpu.matmul %140, %19, %cst_61 {dimension_numbers = #tpu.dot_dimension_numbers<[1], [0], [0], [1], [0, 0, 1, 1], [], []>} : vector<8x64xf32>, vector<64x128xf32>, vector<8x128xf32> -> vector<8x128xf32>
    %142 = vector.broadcast %23 : vector<1x128xf32> to vector<8x128xf32>
    %143 = arith.addf %141, %142 : vector<8x128xf32>
    %144 = vector.extract_strided_slice %143 {offsets = [0, 0], sizes = [8, 32], strides = [1, 1]} : vector<8x128xf32> to vector<8x32xf32>
    %145 = arith.negf %144 : vector<8x32xf32>
    %146 = math.exp %145 : vector<8x32xf32>
    %cst_62 = arith.constant 1.000000e+00 : f32
    %147 = vector.broadcast %cst_62 : f32 to vector<8x32xf32>
    %148 = arith.addf %147, %146 : vector<8x32xf32>
    %149 = arith.divf %147, %148 : vector<8x32xf32>
    %150 = vector.extract_strided_slice %143 {offsets = [0, 32], sizes = [8, 32], strides = [1, 1]} : vector<8x128xf32> to vector<8x32xf32>
    %151 = arith.negf %150 : vector<8x32xf32>
    %152 = math.exp %151 : vector<8x32xf32>
    %cst_63 = arith.constant 1.000000e+00 : f32
    %153 = vector.broadcast %cst_63 : f32 to vector<8x32xf32>
    %154 = arith.addf %153, %152 : vector<8x32xf32>
    %155 = arith.divf %153, %154 : vector<8x32xf32>
    %156 = vector.extract_strided_slice %143 {offsets = [0, 64], sizes = [8, 32], strides = [1, 1]} : vector<8x128xf32> to vector<8x32xf32>
    %157 = vector.extract_strided_slice %143 {offsets = [0, 96], sizes = [8, 32], strides = [1, 1]} : vector<8x128xf32> to vector<8x32xf32>
    %158 = arith.mulf %149, %157 : vector<8x32xf32>
    %159 = arith.addf %156, %158 : vector<8x32xf32>
    %160 = math.tanh %159 : vector<8x32xf32>
    %cst_64 = arith.constant 1.000000e+00 : f32
    %161 = vector.broadcast %cst_64 : f32 to vector<8x32xf32>
    %162 = arith.subf %161, %155 : vector<8x32xf32>
    %163 = arith.mulf %162, %160 : vector<8x32xf32>
    %164 = arith.mulf %155, %57 : vector<8x32xf32>
    %165 = arith.addf %163, %164 : vector<8x32xf32>
    %166 = tpu.concatenate %165, %83 in 1 : vector<8x32xf32>, vector<8x32xf32> -> vector<8x64xf32>
    %cst_65 = arith.constant dense<0.000000e+00> : vector<8x128xf32>
    %167 = tpu.matmul %166, %21, %cst_65 {dimension_numbers = #tpu.dot_dimension_numbers<[1], [0], [0], [1], [0, 0, 1, 1], [], []>} : vector<8x64xf32>, vector<64x128xf32>, vector<8x128xf32> -> vector<8x128xf32>
    %168 = vector.broadcast %25 : vector<1x128xf32> to vector<8x128xf32>
    %169 = arith.addf %167, %168 : vector<8x128xf32>
    %170 = vector.extract_strided_slice %169 {offsets = [0, 0], sizes = [8, 32], strides = [1, 1]} : vector<8x128xf32> to vector<8x32xf32>
    %171 = arith.negf %170 : vector<8x32xf32>
    %172 = math.exp %171 : vector<8x32xf32>
    %cst_66 = arith.constant 1.000000e+00 : f32
    %173 = vector.broadcast %cst_66 : f32 to vector<8x32xf32>
    %174 = arith.addf %173, %172 : vector<8x32xf32>
    %175 = arith.divf %173, %174 : vector<8x32xf32>
    %176 = vector.extract_strided_slice %169 {offsets = [0, 32], sizes = [8, 32], strides = [1, 1]} : vector<8x128xf32> to vector<8x32xf32>
    %177 = arith.negf %176 : vector<8x32xf32>
    %178 = math.exp %177 : vector<8x32xf32>
    %cst_67 = arith.constant 1.000000e+00 : f32
    %179 = vector.broadcast %cst_67 : f32 to vector<8x32xf32>
    %180 = arith.addf %179, %178 : vector<8x32xf32>
    %181 = arith.divf %179, %180 : vector<8x32xf32>
    %182 = vector.extract_strided_slice %169 {offsets = [0, 64], sizes = [8, 32], strides = [1, 1]} : vector<8x128xf32> to vector<8x32xf32>
    %183 = vector.extract_strided_slice %169 {offsets = [0, 96], sizes = [8, 32], strides = [1, 1]} : vector<8x128xf32> to vector<8x32xf32>
    %184 = arith.mulf %175, %183 : vector<8x32xf32>
    %185 = arith.addf %182, %184 : vector<8x32xf32>
    %186 = math.tanh %185 : vector<8x32xf32>
    %cst_68 = arith.constant 1.000000e+00 : f32
    %187 = vector.broadcast %cst_68 : f32 to vector<8x32xf32>
    %188 = arith.subf %187, %181 : vector<8x32xf32>
    %189 = arith.mulf %188, %186 : vector<8x32xf32>
    %190 = arith.mulf %181, %83 : vector<8x32xf32>
    %191 = arith.addf %189, %190 : vector<8x32xf32>
    %cst_69 = arith.constant dense<0.000000e+00> : vector<8x32xf32>
    %192 = tpu.matmul %191, %6, %cst_69 {dimension_numbers = #tpu.dot_dimension_numbers<[1], [0], [0], [1], [0, 0, 1, 1], [], []>} : vector<8x32xf32>, vector<32x32xf32>, vector<8x32xf32> -> vector<8x32xf32>
    %193 = vector.shape_cast %192 : vector<8x32xf32> to vector<8x1x32xf32>
    %194 = vector.broadcast %193 : vector<8x1x32xf32> to vector<8x8x32xf32>
    %195 = arith.addf %4, %194 : vector<8x8x32xf32>
    %196 = math.tanh %195 : vector<8x8x32xf32>
    %197 = vector.shape_cast %7 : vector<1x32xf32> to vector<1x1x32xf32>
    %198 = vector.broadcast %197 : vector<1x1x32xf32> to vector<8x8x32xf32>
    %199 = arith.mulf %196, %198 : vector<8x8x32xf32>
    %cst_70 = arith.constant dense<0.000000e+00> : vector<8x8xf32>
    %200 = vector.multi_reduction <add>, %199, %cst_70 [2] : vector<8x8x32xf32> to vector<8x8xf32>
    %cst_71 = arith.constant dense<0xFF800000> : vector<8xf32>
    %201 = vector.multi_reduction <maximumf>, %200, %cst_71 [1] : vector<8x8xf32> to vector<8xf32>
    %202 = vector.shape_cast %201 : vector<8xf32> to vector<8x1xf32>
    %203 = vector.broadcast %202 : vector<8x1xf32> to vector<8x8xf32>
    %204 = arith.subf %200, %203 : vector<8x8xf32>
    %205 = math.exp %204 : vector<8x8xf32>
    %cst_72 = arith.constant dense<0.000000e+00> : vector<8xf32>
    %206 = vector.multi_reduction <add>, %205, %cst_72 [1] : vector<8x8xf32> to vector<8xf32>
    %207 = vector.shape_cast %206 : vector<8xf32> to vector<8x1xf32>
    %208 = tpu.reciprocal %207 {approx = true} : vector<8x1xf32> -> vector<8x1xf32>
    %209 = vector.broadcast %208 : vector<8x1xf32> to vector<8x8xf32>
    %210 = arith.mulf %205, %209 : vector<8x8xf32>
    %211 = vector.shape_cast %210 : vector<8x8xf32> to vector<8x8x1xf32>
    %212 = vector.broadcast %211 : vector<8x8x1xf32> to vector<8x8x32xf32>
    %213 = arith.mulf %212, %0 : vector<8x8x32xf32>
    %cst_73 = arith.constant dense<0.000000e+00> : vector<8x32xf32>
    %214 = vector.multi_reduction <add>, %213, %cst_73 [1] : vector<8x8x32xf32> to vector<8x32xf32>
    %cst_74 = arith.constant dense<0.000000e+00> : vector<8x32xf32>
    %215 = tpu.matmul %191, %8, %cst_74 {dimension_numbers = #tpu.dot_dimension_numbers<[1], [0], [0], [1], [0, 0, 1, 1], [], []>} : vector<8x32xf32>, vector<32x32xf32>, vector<8x32xf32> -> vector<8x32xf32>
    %cst_75 = arith.constant dense<0.000000e+00> : vector<8x32xf32>
    %216 = tpu.matmul %214, %9, %cst_75 {dimension_numbers = #tpu.dot_dimension_numbers<[1], [0], [0], [1], [0, 0, 1, 1], [], []>} : vector<8x32xf32>, vector<32x32xf32>, vector<8x32xf32> -> vector<8x32xf32>
    %217 = arith.addf %215, %216 : vector<8x32xf32>
    %218 = vector.broadcast %10 : vector<1x32xf32> to vector<8x32xf32>
    %219 = arith.addf %217, %218 : vector<8x32xf32>
    %220 = math.tanh %219 : vector<8x32xf32>
    %cst_76 = arith.constant dense<0.000000e+00> : vector<8x128xf32>
    %221 = tpu.matmul %220, %11, %cst_76 {dimension_numbers = #tpu.dot_dimension_numbers<[1], [0], [0], [1], [0, 0, 1, 1], [], []>} : vector<8x32xf32>, vector<32x128xf32>, vector<8x128xf32> -> vector<8x128xf32>
    %222 = vector.broadcast %12 : vector<1x128xf32> to vector<8x128xf32>
    %223 = arith.addf %221, %222 : vector<8x128xf32>
    %cst_77 = arith.constant dense<0xFF800000> : vector<8xf32>
    %224 = vector.multi_reduction <maximumf>, %223, %cst_77 [1] : vector<8x128xf32> to vector<8xf32>
    %225 = vector.shape_cast %224 : vector<8xf32> to vector<8x1xf32>
    %226 = vector.broadcast %225 : vector<8x1xf32> to vector<8x128xf32>
    %227 = arith.cmpf oeq, %223, %226 : vector<8x128xf32>
    %c128_i32_78 = arith.constant 128 : i32
    %228 = vector.broadcast %c128_i32_78 : i32 to vector<8x128xi32>
    %229 = arith.select %227, %13, %228 : vector<8x128xi1>, vector<8x128xi32>
    %cst_79 = arith.constant dense<2147483647> : vector<8xi32>
    %230 = vector.multi_reduction <minsi>, %229, %cst_79 [1] : vector<8x128xi32> to vector<8xi32>
    %231 = vector.shape_cast %230 : vector<8xi32> to vector<8x1xi32>
    %232 = vector.broadcast %225 : vector<8x1xf32> to vector<8x128xf32>
    %233 = arith.subf %223, %232 : vector<8x128xf32>
    %234 = math.exp %233 : vector<8x128xf32>
    %cst_80 = arith.constant dense<0.000000e+00> : vector<8xf32>
    %235 = vector.multi_reduction <add>, %234, %cst_80 [1] : vector<8x128xf32> to vector<8xf32>
    %236 = vector.shape_cast %235 : vector<8xf32> to vector<8x1xf32>
    %237 = vector.broadcast %236 : vector<8x1xf32> to vector<8x128xf32>
    %238 = arith.divf %234, %237 : vector<8x128xf32>
    %239 = arith.index_cast %c1_i32 : i32 to index
    %c0_81 = arith.constant 0 : index
    %c0_82 = arith.constant 0 : index
    %240 = vector.load %arg13[%239, %c0_81, %c0_82] : memref<5x8x128xf32, #tpu.memory_space<vmem>>, vector<1x8x128xf32>
    %241 = vector.shape_cast %240 : vector<1x8x128xf32> to vector<8x128xf32>
    %242 = vector.shape_cast %238 : vector<8x128xf32> to vector<1x8x128xf32>
    tpu.vector_store %arg13[%239, %c0_81, %c0_82], %242 {strides = array<i32>} : memref<5x8x128xf32, #tpu.memory_space<vmem>>, vector<1x8x128xf32>,
    %c2_i32 = arith.constant 2 : i32
    %243 = vector.broadcast %231 : vector<8x1xi32> to vector<8x128xi32>
    %244 = arith.cmpi eq, %13, %243 : vector<8x128xi32>
    %245 = arith.extui %244 : vector<8x128xi1> to vector<8x128xi32>
    %246 = arith.sitofp %245 : vector<8x128xi32> to vector<8x128xf32>
    %cst_83 = arith.constant dense<0.000000e+00> : vector<8x32xf32>
    %247 = tpu.matmul %246, %5, %cst_83 {dimension_numbers = #tpu.dot_dimension_numbers<[1], [0], [0], [1], [0, 0, 1, 1], [], []>} : vector<8x128xf32>, vector<128x32xf32>, vector<8x32xf32> -> vector<8x32xf32>
    %248 = tpu.concatenate %247, %165 in 1 : vector<8x32xf32>, vector<8x32xf32> -> vector<8x64xf32>
    %cst_84 = arith.constant dense<0.000000e+00> : vector<8x128xf32>
    %249 = tpu.matmul %248, %19, %cst_84 {dimension_numbers = #tpu.dot_dimension_numbers<[1], [0], [0], [1], [0, 0, 1, 1], [], []>} : vector<8x64xf32>, vector<64x128xf32>, vector<8x128xf32> -> vector<8x128xf32>
    %250 = vector.broadcast %23 : vector<1x128xf32> to vector<8x128xf32>
    %251 = arith.addf %249, %250 : vector<8x128xf32>
    %252 = vector.extract_strided_slice %251 {offsets = [0, 0], sizes = [8, 32], strides = [1, 1]} : vector<8x128xf32> to vector<8x32xf32>
    %253 = arith.negf %252 : vector<8x32xf32>
    %254 = math.exp %253 : vector<8x32xf32>
    %cst_85 = arith.constant 1.000000e+00 : f32
    %255 = vector.broadcast %cst_85 : f32 to vector<8x32xf32>
    %256 = arith.addf %255, %254 : vector<8x32xf32>
    %257 = arith.divf %255, %256 : vector<8x32xf32>
    %258 = vector.extract_strided_slice %251 {offsets = [0, 32], sizes = [8, 32], strides = [1, 1]} : vector<8x128xf32> to vector<8x32xf32>
    %259 = arith.negf %258 : vector<8x32xf32>
    %260 = math.exp %259 : vector<8x32xf32>
    %cst_86 = arith.constant 1.000000e+00 : f32
    %261 = vector.broadcast %cst_86 : f32 to vector<8x32xf32>
    %262 = arith.addf %261, %260 : vector<8x32xf32>
    %263 = arith.divf %261, %262 : vector<8x32xf32>
    %264 = vector.extract_strided_slice %251 {offsets = [0, 64], sizes = [8, 32], strides = [1, 1]} : vector<8x128xf32> to vector<8x32xf32>
    %265 = vector.extract_strided_slice %251 {offsets = [0, 96], sizes = [8, 32], strides = [1, 1]} : vector<8x128xf32> to vector<8x32xf32>
    %266 = arith.mulf %257, %265 : vector<8x32xf32>
    %267 = arith.addf %264, %266 : vector<8x32xf32>
    %268 = math.tanh %267 : vector<8x32xf32>
    %cst_87 = arith.constant 1.000000e+00 : f32
    %269 = vector.broadcast %cst_87 : f32 to vector<8x32xf32>
    %270 = arith.subf %269, %263 : vector<8x32xf32>
    %271 = arith.mulf %270, %268 : vector<8x32xf32>
    %272 = arith.mulf %263, %165 : vector<8x32xf32>
    %273 = arith.addf %271, %272 : vector<8x32xf32>
    %274 = tpu.concatenate %273, %191 in 1 : vector<8x32xf32>, vector<8x32xf32> -> vector<8x64xf32>
    %cst_88 = arith.constant dense<0.000000e+00> : vector<8x128xf32>
    %275 = tpu.matmul %274, %21, %cst_88 {dimension_numbers = #tpu.dot_dimension_numbers<[1], [0], [0], [1], [0, 0, 1, 1], [], []>} : vector<8x64xf32>, vector<64x128xf32>, vector<8x128xf32> -> vector<8x128xf32>
    %276 = vector.broadcast %25 : vector<1x128xf32> to vector<8x128xf32>
    %277 = arith.addf %275, %276 : vector<8x128xf32>
    %278 = vector.extract_strided_slice %277 {offsets = [0, 0], sizes = [8, 32], strides = [1, 1]} : vector<8x128xf32> to vector<8x32xf32>
    %279 = arith.negf %278 : vector<8x32xf32>
    %280 = math.exp %279 : vector<8x32xf32>
    %cst_89 = arith.constant 1.000000e+00 : f32
    %281 = vector.broadcast %cst_89 : f32 to vector<8x32xf32>
    %282 = arith.addf %281, %280 : vector<8x32xf32>
    %283 = arith.divf %281, %282 : vector<8x32xf32>
    %284 = vector.extract_strided_slice %277 {offsets = [0, 32], sizes = [8, 32], strides = [1, 1]} : vector<8x128xf32> to vector<8x32xf32>
    %285 = arith.negf %284 : vector<8x32xf32>
    %286 = math.exp %285 : vector<8x32xf32>
    %cst_90 = arith.constant 1.000000e+00 : f32
    %287 = vector.broadcast %cst_90 : f32 to vector<8x32xf32>
    %288 = arith.addf %287, %286 : vector<8x32xf32>
    %289 = arith.divf %287, %288 : vector<8x32xf32>
    %290 = vector.extract_strided_slice %277 {offsets = [0, 64], sizes = [8, 32], strides = [1, 1]} : vector<8x128xf32> to vector<8x32xf32>
    %291 = vector.extract_strided_slice %277 {offsets = [0, 96], sizes = [8, 32], strides = [1, 1]} : vector<8x128xf32> to vector<8x32xf32>
    %292 = arith.mulf %283, %291 : vector<8x32xf32>
    %293 = arith.addf %290, %292 : vector<8x32xf32>
    %294 = math.tanh %293 : vector<8x32xf32>
    %cst_91 = arith.constant 1.000000e+00 : f32
    %295 = vector.broadcast %cst_91 : f32 to vector<8x32xf32>
    %296 = arith.subf %295, %289 : vector<8x32xf32>
    %297 = arith.mulf %296, %294 : vector<8x32xf32>
    %298 = arith.mulf %289, %191 : vector<8x32xf32>
    %299 = arith.addf %297, %298 : vector<8x32xf32>
    %cst_92 = arith.constant dense<0.000000e+00> : vector<8x32xf32>
    %300 = tpu.matmul %299, %6, %cst_92 {dimension_numbers = #tpu.dot_dimension_numbers<[1], [0], [0], [1], [0, 0, 1, 1], [], []>} : vector<8x32xf32>, vector<32x32xf32>, vector<8x32xf32> -> vector<8x32xf32>
    %301 = vector.shape_cast %300 : vector<8x32xf32> to vector<8x1x32xf32>
    %302 = vector.broadcast %301 : vector<8x1x32xf32> to vector<8x8x32xf32>
    %303 = arith.addf %4, %302 : vector<8x8x32xf32>
    %304 = math.tanh %303 : vector<8x8x32xf32>
    %305 = vector.shape_cast %7 : vector<1x32xf32> to vector<1x1x32xf32>
    %306 = vector.broadcast %305 : vector<1x1x32xf32> to vector<8x8x32xf32>
    %307 = arith.mulf %304, %306 : vector<8x8x32xf32>
    %cst_93 = arith.constant dense<0.000000e+00> : vector<8x8xf32>
    %308 = vector.multi_reduction <add>, %307, %cst_93 [2] : vector<8x8x32xf32> to vector<8x8xf32>
    %cst_94 = arith.constant dense<0xFF800000> : vector<8xf32>
    %309 = vector.multi_reduction <maximumf>, %308, %cst_94 [1] : vector<8x8xf32> to vector<8xf32>
    %310 = vector.shape_cast %309 : vector<8xf32> to vector<8x1xf32>
    %311 = vector.broadcast %310 : vector<8x1xf32> to vector<8x8xf32>
    %312 = arith.subf %308, %311 : vector<8x8xf32>
    %313 = math.exp %312 : vector<8x8xf32>
    %cst_95 = arith.constant dense<0.000000e+00> : vector<8xf32>
    %314 = vector.multi_reduction <add>, %313, %cst_95 [1] : vector<8x8xf32> to vector<8xf32>
    %315 = vector.shape_cast %314 : vector<8xf32> to vector<8x1xf32>
    %316 = tpu.reciprocal %315 {approx = true} : vector<8x1xf32> -> vector<8x1xf32>
    %317 = vector.broadcast %316 : vector<8x1xf32> to vector<8x8xf32>
    %318 = arith.mulf %313, %317 : vector<8x8xf32>
    %319 = vector.shape_cast %318 : vector<8x8xf32> to vector<8x8x1xf32>
    %320 = vector.broadcast %319 : vector<8x8x1xf32> to vector<8x8x32xf32>
    %321 = arith.mulf %320, %0 : vector<8x8x32xf32>
    %cst_96 = arith.constant dense<0.000000e+00> : vector<8x32xf32>
    %322 = vector.multi_reduction <add>, %321, %cst_96 [1] : vector<8x8x32xf32> to vector<8x32xf32>
    %cst_97 = arith.constant dense<0.000000e+00> : vector<8x32xf32>
    %323 = tpu.matmul %299, %8, %cst_97 {dimension_numbers = #tpu.dot_dimension_numbers<[1], [0], [0], [1], [0, 0, 1, 1], [], []>} : vector<8x32xf32>, vector<32x32xf32>, vector<8x32xf32> -> vector<8x32xf32>
    %cst_98 = arith.constant dense<0.000000e+00> : vector<8x32xf32>
    %324 = tpu.matmul %322, %9, %cst_98 {dimension_numbers = #tpu.dot_dimension_numbers<[1], [0], [0], [1], [0, 0, 1, 1], [], []>} : vector<8x32xf32>, vector<32x32xf32>, vector<8x32xf32> -> vector<8x32xf32>
    %325 = arith.addf %323, %324 : vector<8x32xf32>
    %326 = vector.broadcast %10 : vector<1x32xf32> to vector<8x32xf32>
    %327 = arith.addf %325, %326 : vector<8x32xf32>
    %328 = math.tanh %327 : vector<8x32xf32>
    %cst_99 = arith.constant dense<0.000000e+00> : vector<8x128xf32>
    %329 = tpu.matmul %328, %11, %cst_99 {dimension_numbers = #tpu.dot_dimension_numbers<[1], [0], [0], [1], [0, 0, 1, 1], [], []>} : vector<8x32xf32>, vector<32x128xf32>, vector<8x128xf32> -> vector<8x128xf32>
    %330 = vector.broadcast %12 : vector<1x128xf32> to vector<8x128xf32>
    %331 = arith.addf %329, %330 : vector<8x128xf32>
    %cst_100 = arith.constant dense<0xFF800000> : vector<8xf32>
    %332 = vector.multi_reduction <maximumf>, %331, %cst_100 [1] : vector<8x128xf32> to vector<8xf32>
    %333 = vector.shape_cast %332 : vector<8xf32> to vector<8x1xf32>
    %334 = vector.broadcast %333 : vector<8x1xf32> to vector<8x128xf32>
    %335 = arith.cmpf oeq, %331, %334 : vector<8x128xf32>
    %c128_i32_101 = arith.constant 128 : i32
    %336 = vector.broadcast %c128_i32_101 : i32 to vector<8x128xi32>
    %337 = arith.select %335, %13, %336 : vector<8x128xi1>, vector<8x128xi32>
    %cst_102 = arith.constant dense<2147483647> : vector<8xi32>
    %338 = vector.multi_reduction <minsi>, %337, %cst_102 [1] : vector<8x128xi32> to vector<8xi32>
    %339 = vector.shape_cast %338 : vector<8xi32> to vector<8x1xi32>
    %340 = vector.broadcast %333 : vector<8x1xf32> to vector<8x128xf32>
    %341 = arith.subf %331, %340 : vector<8x128xf32>
    %342 = math.exp %341 : vector<8x128xf32>
    %cst_103 = arith.constant dense<0.000000e+00> : vector<8xf32>
    %343 = vector.multi_reduction <add>, %342, %cst_103 [1] : vector<8x128xf32> to vector<8xf32>
    %344 = vector.shape_cast %343 : vector<8xf32> to vector<8x1xf32>
    %345 = vector.broadcast %344 : vector<8x1xf32> to vector<8x128xf32>
    %346 = arith.divf %342, %345 : vector<8x128xf32>
    %347 = arith.index_cast %c2_i32 : i32 to index
    %c0_104 = arith.constant 0 : index
    %c0_105 = arith.constant 0 : index
    %348 = vector.load %arg13[%347, %c0_104, %c0_105] : memref<5x8x128xf32, #tpu.memory_space<vmem>>, vector<1x8x128xf32>
    %349 = vector.shape_cast %348 : vector<1x8x128xf32> to vector<8x128xf32>
    %350 = vector.shape_cast %346 : vector<8x128xf32> to vector<1x8x128xf32>
    tpu.vector_store %arg13[%347, %c0_104, %c0_105], %350 {strides = array<i32>} : memref<5x8x128xf32, #tpu.memory_space<vmem>>, vector<1x8x128xf32>,
    %c3_i32 = arith.constant 3 : i32
    %351 = vector.broadcast %339 : vector<8x1xi32> to vector<8x128xi32>
    %352 = arith.cmpi eq, %13, %351 : vector<8x128xi32>
    %353 = arith.extui %352 : vector<8x128xi1> to vector<8x128xi32>
    %354 = arith.sitofp %353 : vector<8x128xi32> to vector<8x128xf32>
    %cst_106 = arith.constant dense<0.000000e+00> : vector<8x32xf32>
    %355 = tpu.matmul %354, %5, %cst_106 {dimension_numbers = #tpu.dot_dimension_numbers<[1], [0], [0], [1], [0, 0, 1, 1], [], []>} : vector<8x128xf32>, vector<128x32xf32>, vector<8x32xf32> -> vector<8x32xf32>
    %356 = tpu.concatenate %355, %273 in 1 : vector<8x32xf32>, vector<8x32xf32> -> vector<8x64xf32>
    %cst_107 = arith.constant dense<0.000000e+00> : vector<8x128xf32>
    %357 = tpu.matmul %356, %19, %cst_107 {dimension_numbers = #tpu.dot_dimension_numbers<[1], [0], [0], [1], [0, 0, 1, 1], [], []>} : vector<8x64xf32>, vector<64x128xf32>, vector<8x128xf32> -> vector<8x128xf32>
    %358 = vector.broadcast %23 : vector<1x128xf32> to vector<8x128xf32>
    %359 = arith.addf %357, %358 : vector<8x128xf32>
    %360 = vector.extract_strided_slice %359 {offsets = [0, 0], sizes = [8, 32], strides = [1, 1]} : vector<8x128xf32> to vector<8x32xf32>
    %361 = arith.negf %360 : vector<8x32xf32>
    %362 = math.exp %361 : vector<8x32xf32>
    %cst_108 = arith.constant 1.000000e+00 : f32
    %363 = vector.broadcast %cst_108 : f32 to vector<8x32xf32>
    %364 = arith.addf %363, %362 : vector<8x32xf32>
    %365 = arith.divf %363, %364 : vector<8x32xf32>
    %366 = vector.extract_strided_slice %359 {offsets = [0, 32], sizes = [8, 32], strides = [1, 1]} : vector<8x128xf32> to vector<8x32xf32>
    %367 = arith.negf %366 : vector<8x32xf32>
    %368 = math.exp %367 : vector<8x32xf32>
    %cst_109 = arith.constant 1.000000e+00 : f32
    %369 = vector.broadcast %cst_109 : f32 to vector<8x32xf32>
    %370 = arith.addf %369, %368 : vector<8x32xf32>
    %371 = arith.divf %369, %370 : vector<8x32xf32>
    %372 = vector.extract_strided_slice %359 {offsets = [0, 64], sizes = [8, 32], strides = [1, 1]} : vector<8x128xf32> to vector<8x32xf32>
    %373 = vector.extract_strided_slice %359 {offsets = [0, 96], sizes = [8, 32], strides = [1, 1]} : vector<8x128xf32> to vector<8x32xf32>
    %374 = arith.mulf %365, %373 : vector<8x32xf32>
    %375 = arith.addf %372, %374 : vector<8x32xf32>
    %376 = math.tanh %375 : vector<8x32xf32>
    %cst_110 = arith.constant 1.000000e+00 : f32
    %377 = vector.broadcast %cst_110 : f32 to vector<8x32xf32>
    %378 = arith.subf %377, %371 : vector<8x32xf32>
    %379 = arith.mulf %378, %376 : vector<8x32xf32>
    %380 = arith.mulf %371, %273 : vector<8x32xf32>
    %381 = arith.addf %379, %380 : vector<8x32xf32>
    %382 = tpu.concatenate %381, %299 in 1 : vector<8x32xf32>, vector<8x32xf32> -> vector<8x64xf32>
    %cst_111 = arith.constant dense<0.000000e+00> : vector<8x128xf32>
    %383 = tpu.matmul %382, %21, %cst_111 {dimension_numbers = #tpu.dot_dimension_numbers<[1], [0], [0], [1], [0, 0, 1, 1], [], []>} : vector<8x64xf32>, vector<64x128xf32>, vector<8x128xf32> -> vector<8x128xf32>
    %384 = vector.broadcast %25 : vector<1x128xf32> to vector<8x128xf32>
    %385 = arith.addf %383, %384 : vector<8x128xf32>
    %386 = vector.extract_strided_slice %385 {offsets = [0, 0], sizes = [8, 32], strides = [1, 1]} : vector<8x128xf32> to vector<8x32xf32>
    %387 = arith.negf %386 : vector<8x32xf32>
    %388 = math.exp %387 : vector<8x32xf32>
    %cst_112 = arith.constant 1.000000e+00 : f32
    %389 = vector.broadcast %cst_112 : f32 to vector<8x32xf32>
    %390 = arith.addf %389, %388 : vector<8x32xf32>
    %391 = arith.divf %389, %390 : vector<8x32xf32>
    %392 = vector.extract_strided_slice %385 {offsets = [0, 32], sizes = [8, 32], strides = [1, 1]} : vector<8x128xf32> to vector<8x32xf32>
    %393 = arith.negf %392 : vector<8x32xf32>
    %394 = math.exp %393 : vector<8x32xf32>
    %cst_113 = arith.constant 1.000000e+00 : f32
    %395 = vector.broadcast %cst_113 : f32 to vector<8x32xf32>
    %396 = arith.addf %395, %394 : vector<8x32xf32>
    %397 = arith.divf %395, %396 : vector<8x32xf32>
    %398 = vector.extract_strided_slice %385 {offsets = [0, 64], sizes = [8, 32], strides = [1, 1]} : vector<8x128xf32> to vector<8x32xf32>
    %399 = vector.extract_strided_slice %385 {offsets = [0, 96], sizes = [8, 32], strides = [1, 1]} : vector<8x128xf32> to vector<8x32xf32>
    %400 = arith.mulf %391, %399 : vector<8x32xf32>
    %401 = arith.addf %398, %400 : vector<8x32xf32>
    %402 = math.tanh %401 : vector<8x32xf32>
    %cst_114 = arith.constant 1.000000e+00 : f32
    %403 = vector.broadcast %cst_114 : f32 to vector<8x32xf32>
    %404 = arith.subf %403, %397 : vector<8x32xf32>
    %405 = arith.mulf %404, %402 : vector<8x32xf32>
    %406 = arith.mulf %397, %299 : vector<8x32xf32>
    %407 = arith.addf %405, %406 : vector<8x32xf32>
    %cst_115 = arith.constant dense<0.000000e+00> : vector<8x32xf32>
    %408 = tpu.matmul %407, %6, %cst_115 {dimension_numbers = #tpu.dot_dimension_numbers<[1], [0], [0], [1], [0, 0, 1, 1], [], []>} : vector<8x32xf32>, vector<32x32xf32>, vector<8x32xf32> -> vector<8x32xf32>
    %409 = vector.shape_cast %408 : vector<8x32xf32> to vector<8x1x32xf32>
    %410 = vector.broadcast %409 : vector<8x1x32xf32> to vector<8x8x32xf32>
    %411 = arith.addf %4, %410 : vector<8x8x32xf32>
    %412 = math.tanh %411 : vector<8x8x32xf32>
    %413 = vector.shape_cast %7 : vector<1x32xf32> to vector<1x1x32xf32>
    %414 = vector.broadcast %413 : vector<1x1x32xf32> to vector<8x8x32xf32>
    %415 = arith.mulf %412, %414 : vector<8x8x32xf32>
    %cst_116 = arith.constant dense<0.000000e+00> : vector<8x8xf32>
    %416 = vector.multi_reduction <add>, %415, %cst_116 [2] : vector<8x8x32xf32> to vector<8x8xf32>
    %cst_117 = arith.constant dense<0xFF800000> : vector<8xf32>
    %417 = vector.multi_reduction <maximumf>, %416, %cst_117 [1] : vector<8x8xf32> to vector<8xf32>
    %418 = vector.shape_cast %417 : vector<8xf32> to vector<8x1xf32>
    %419 = vector.broadcast %418 : vector<8x1xf32> to vector<8x8xf32>
    %420 = arith.subf %416, %419 : vector<8x8xf32>
    %421 = math.exp %420 : vector<8x8xf32>
    %cst_118 = arith.constant dense<0.000000e+00> : vector<8xf32>
    %422 = vector.multi_reduction <add>, %421, %cst_118 [1] : vector<8x8xf32> to vector<8xf32>
    %423 = vector.shape_cast %422 : vector<8xf32> to vector<8x1xf32>
    %424 = tpu.reciprocal %423 {approx = true} : vector<8x1xf32> -> vector<8x1xf32>
    %425 = vector.broadcast %424 : vector<8x1xf32> to vector<8x8xf32>
    %426 = arith.mulf %421, %425 : vector<8x8xf32>
    %427 = vector.shape_cast %426 : vector<8x8xf32> to vector<8x8x1xf32>
    %428 = vector.broadcast %427 : vector<8x8x1xf32> to vector<8x8x32xf32>
    %429 = arith.mulf %428, %0 : vector<8x8x32xf32>
    %cst_119 = arith.constant dense<0.000000e+00> : vector<8x32xf32>
    %430 = vector.multi_reduction <add>, %429, %cst_119 [1] : vector<8x8x32xf32> to vector<8x32xf32>
    %cst_120 = arith.constant dense<0.000000e+00> : vector<8x32xf32>
    %431 = tpu.matmul %407, %8, %cst_120 {dimension_numbers = #tpu.dot_dimension_numbers<[1], [0], [0], [1], [0, 0, 1, 1], [], []>} : vector<8x32xf32>, vector<32x32xf32>, vector<8x32xf32> -> vector<8x32xf32>
    %cst_121 = arith.constant dense<0.000000e+00> : vector<8x32xf32>
    %432 = tpu.matmul %430, %9, %cst_121 {dimension_numbers = #tpu.dot_dimension_numbers<[1], [0], [0], [1], [0, 0, 1, 1], [], []>} : vector<8x32xf32>, vector<32x32xf32>, vector<8x32xf32> -> vector<8x32xf32>
    %433 = arith.addf %431, %432 : vector<8x32xf32>
    %434 = vector.broadcast %10 : vector<1x32xf32> to vector<8x32xf32>
    %435 = arith.addf %433, %434 : vector<8x32xf32>
    %436 = math.tanh %435 : vector<8x32xf32>
    %cst_122 = arith.constant dense<0.000000e+00> : vector<8x128xf32>
    %437 = tpu.matmul %436, %11, %cst_122 {dimension_numbers = #tpu.dot_dimension_numbers<[1], [0], [0], [1], [0, 0, 1, 1], [], []>} : vector<8x32xf32>, vector<32x128xf32>, vector<8x128xf32> -> vector<8x128xf32>
    %438 = vector.broadcast %12 : vector<1x128xf32> to vector<8x128xf32>
    %439 = arith.addf %437, %438 : vector<8x128xf32>
    %cst_123 = arith.constant dense<0xFF800000> : vector<8xf32>
    %440 = vector.multi_reduction <maximumf>, %439, %cst_123 [1] : vector<8x128xf32> to vector<8xf32>
    %441 = vector.shape_cast %440 : vector<8xf32> to vector<8x1xf32>
    %442 = vector.broadcast %441 : vector<8x1xf32> to vector<8x128xf32>
    %443 = arith.cmpf oeq, %439, %442 : vector<8x128xf32>
    %c128_i32_124 = arith.constant 128 : i32
    %444 = vector.broadcast %c128_i32_124 : i32 to vector<8x128xi32>
    %445 = arith.select %443, %13, %444 : vector<8x128xi1>, vector<8x128xi32>
    %cst_125 = arith.constant dense<2147483647> : vector<8xi32>
    %446 = vector.multi_reduction <minsi>, %445, %cst_125 [1] : vector<8x128xi32> to vector<8xi32>
    %447 = vector.shape_cast %446 : vector<8xi32> to vector<8x1xi32>
    %448 = vector.broadcast %441 : vector<8x1xf32> to vector<8x128xf32>
    %449 = arith.subf %439, %448 : vector<8x128xf32>
    %450 = math.exp %449 : vector<8x128xf32>
    %cst_126 = arith.constant dense<0.000000e+00> : vector<8xf32>
    %451 = vector.multi_reduction <add>, %450, %cst_126 [1] : vector<8x128xf32> to vector<8xf32>
    %452 = vector.shape_cast %451 : vector<8xf32> to vector<8x1xf32>
    %453 = vector.broadcast %452 : vector<8x1xf32> to vector<8x128xf32>
    %454 = arith.divf %450, %453 : vector<8x128xf32>
    %455 = arith.index_cast %c3_i32 : i32 to index
    %c0_127 = arith.constant 0 : index
    %c0_128 = arith.constant 0 : index
    %456 = vector.load %arg13[%455, %c0_127, %c0_128] : memref<5x8x128xf32, #tpu.memory_space<vmem>>, vector<1x8x128xf32>
    %457 = vector.shape_cast %456 : vector<1x8x128xf32> to vector<8x128xf32>
    %458 = vector.shape_cast %454 : vector<8x128xf32> to vector<1x8x128xf32>
    tpu.vector_store %arg13[%455, %c0_127, %c0_128], %458 {strides = array<i32>} : memref<5x8x128xf32, #tpu.memory_space<vmem>>, vector<1x8x128xf32>,
    %c4_i32 = arith.constant 4 : i32
    %459 = vector.broadcast %447 : vector<8x1xi32> to vector<8x128xi32>
    %460 = arith.cmpi eq, %13, %459 : vector<8x128xi32>
    %461 = arith.extui %460 : vector<8x128xi1> to vector<8x128xi32>
    %462 = arith.sitofp %461 : vector<8x128xi32> to vector<8x128xf32>
    %cst_129 = arith.constant dense<0.000000e+00> : vector<8x32xf32>
    %463 = tpu.matmul %462, %5, %cst_129 {dimension_numbers = #tpu.dot_dimension_numbers<[1], [0], [0], [1], [0, 0, 1, 1], [], []>} : vector<8x128xf32>, vector<128x32xf32>, vector<8x32xf32> -> vector<8x32xf32>
    %464 = tpu.concatenate %463, %381 in 1 : vector<8x32xf32>, vector<8x32xf32> -> vector<8x64xf32>
    %cst_130 = arith.constant dense<0.000000e+00> : vector<8x128xf32>
    %465 = tpu.matmul %464, %19, %cst_130 {dimension_numbers = #tpu.dot_dimension_numbers<[1], [0], [0], [1], [0, 0, 1, 1], [], []>} : vector<8x64xf32>, vector<64x128xf32>, vector<8x128xf32> -> vector<8x128xf32>
    %466 = vector.broadcast %23 : vector<1x128xf32> to vector<8x128xf32>
    %467 = arith.addf %465, %466 : vector<8x128xf32>
    %468 = vector.extract_strided_slice %467 {offsets = [0, 0], sizes = [8, 32], strides = [1, 1]} : vector<8x128xf32> to vector<8x32xf32>
    %469 = arith.negf %468 : vector<8x32xf32>
    %470 = math.exp %469 : vector<8x32xf32>
    %cst_131 = arith.constant 1.000000e+00 : f32
    %471 = vector.broadcast %cst_131 : f32 to vector<8x32xf32>
    %472 = arith.addf %471, %470 : vector<8x32xf32>
    %473 = arith.divf %471, %472 : vector<8x32xf32>
    %474 = vector.extract_strided_slice %467 {offsets = [0, 32], sizes = [8, 32], strides = [1, 1]} : vector<8x128xf32> to vector<8x32xf32>
    %475 = arith.negf %474 : vector<8x32xf32>
    %476 = math.exp %475 : vector<8x32xf32>
    %cst_132 = arith.constant 1.000000e+00 : f32
    %477 = vector.broadcast %cst_132 : f32 to vector<8x32xf32>
    %478 = arith.addf %477, %476 : vector<8x32xf32>
    %479 = arith.divf %477, %478 : vector<8x32xf32>
    %480 = vector.extract_strided_slice %467 {offsets = [0, 64], sizes = [8, 32], strides = [1, 1]} : vector<8x128xf32> to vector<8x32xf32>
    %481 = vector.extract_strided_slice %467 {offsets = [0, 96], sizes = [8, 32], strides = [1, 1]} : vector<8x128xf32> to vector<8x32xf32>
    %482 = arith.mulf %473, %481 : vector<8x32xf32>
    %483 = arith.addf %480, %482 : vector<8x32xf32>
    %484 = math.tanh %483 : vector<8x32xf32>
    %cst_133 = arith.constant 1.000000e+00 : f32
    %485 = vector.broadcast %cst_133 : f32 to vector<8x32xf32>
    %486 = arith.subf %485, %479 : vector<8x32xf32>
    %487 = arith.mulf %486, %484 : vector<8x32xf32>
    %488 = arith.mulf %479, %381 : vector<8x32xf32>
    %489 = arith.addf %487, %488 : vector<8x32xf32>
    %490 = tpu.concatenate %489, %407 in 1 : vector<8x32xf32>, vector<8x32xf32> -> vector<8x64xf32>
    %cst_134 = arith.constant dense<0.000000e+00> : vector<8x128xf32>
    %491 = tpu.matmul %490, %21, %cst_134 {dimension_numbers = #tpu.dot_dimension_numbers<[1], [0], [0], [1], [0, 0, 1, 1], [], []>} : vector<8x64xf32>, vector<64x128xf32>, vector<8x128xf32> -> vector<8x128xf32>
    %492 = vector.broadcast %25 : vector<1x128xf32> to vector<8x128xf32>
    %493 = arith.addf %491, %492 : vector<8x128xf32>
    %494 = vector.extract_strided_slice %493 {offsets = [0, 0], sizes = [8, 32], strides = [1, 1]} : vector<8x128xf32> to vector<8x32xf32>
    %495 = arith.negf %494 : vector<8x32xf32>
    %496 = math.exp %495 : vector<8x32xf32>
    %cst_135 = arith.constant 1.000000e+00 : f32
    %497 = vector.broadcast %cst_135 : f32 to vector<8x32xf32>
    %498 = arith.addf %497, %496 : vector<8x32xf32>
    %499 = arith.divf %497, %498 : vector<8x32xf32>
    %500 = vector.extract_strided_slice %493 {offsets = [0, 32], sizes = [8, 32], strides = [1, 1]} : vector<8x128xf32> to vector<8x32xf32>
    %501 = arith.negf %500 : vector<8x32xf32>
    %502 = math.exp %501 : vector<8x32xf32>
    %cst_136 = arith.constant 1.000000e+00 : f32
    %503 = vector.broadcast %cst_136 : f32 to vector<8x32xf32>
    %504 = arith.addf %503, %502 : vector<8x32xf32>
    %505 = arith.divf %503, %504 : vector<8x32xf32>
    %506 = vector.extract_strided_slice %493 {offsets = [0, 64], sizes = [8, 32], strides = [1, 1]} : vector<8x128xf32> to vector<8x32xf32>
    %507 = vector.extract_strided_slice %493 {offsets = [0, 96], sizes = [8, 32], strides = [1, 1]} : vector<8x128xf32> to vector<8x32xf32>
    %508 = arith.mulf %499, %507 : vector<8x32xf32>
    %509 = arith.addf %506, %508 : vector<8x32xf32>
    %510 = math.tanh %509 : vector<8x32xf32>
    %cst_137 = arith.constant 1.000000e+00 : f32
    %511 = vector.broadcast %cst_137 : f32 to vector<8x32xf32>
    %512 = arith.subf %511, %505 : vector<8x32xf32>
    %513 = arith.mulf %512, %510 : vector<8x32xf32>
    %514 = arith.mulf %505, %407 : vector<8x32xf32>
    %515 = arith.addf %513, %514 : vector<8x32xf32>
    %cst_138 = arith.constant dense<0.000000e+00> : vector<8x32xf32>
    %516 = tpu.matmul %515, %6, %cst_138 {dimension_numbers = #tpu.dot_dimension_numbers<[1], [0], [0], [1], [0, 0, 1, 1], [], []>} : vector<8x32xf32>, vector<32x32xf32>, vector<8x32xf32> -> vector<8x32xf32>
    %517 = vector.shape_cast %516 : vector<8x32xf32> to vector<8x1x32xf32>
    %518 = vector.broadcast %517 : vector<8x1x32xf32> to vector<8x8x32xf32>
    %519 = arith.addf %4, %518 : vector<8x8x32xf32>
    %520 = math.tanh %519 : vector<8x8x32xf32>
    %521 = vector.shape_cast %7 : vector<1x32xf32> to vector<1x1x32xf32>
    %522 = vector.broadcast %521 : vector<1x1x32xf32> to vector<8x8x32xf32>
    %523 = arith.mulf %520, %522 : vector<8x8x32xf32>
    %cst_139 = arith.constant dense<0.000000e+00> : vector<8x8xf32>
    %524 = vector.multi_reduction <add>, %523, %cst_139 [2] : vector<8x8x32xf32> to vector<8x8xf32>
    %cst_140 = arith.constant dense<0xFF800000> : vector<8xf32>
    %525 = vector.multi_reduction <maximumf>, %524, %cst_140 [1] : vector<8x8xf32> to vector<8xf32>
    %526 = vector.shape_cast %525 : vector<8xf32> to vector<8x1xf32>
    %527 = vector.broadcast %526 : vector<8x1xf32> to vector<8x8xf32>
    %528 = arith.subf %524, %527 : vector<8x8xf32>
    %529 = math.exp %528 : vector<8x8xf32>
    %cst_141 = arith.constant dense<0.000000e+00> : vector<8xf32>
    %530 = vector.multi_reduction <add>, %529, %cst_141 [1] : vector<8x8xf32> to vector<8xf32>
    %531 = vector.shape_cast %530 : vector<8xf32> to vector<8x1xf32>
    %532 = tpu.reciprocal %531 {approx = true} : vector<8x1xf32> -> vector<8x1xf32>
    %533 = vector.broadcast %532 : vector<8x1xf32> to vector<8x8xf32>
    %534 = arith.mulf %529, %533 : vector<8x8xf32>
    %535 = vector.shape_cast %534 : vector<8x8xf32> to vector<8x8x1xf32>
    %536 = vector.broadcast %535 : vector<8x8x1xf32> to vector<8x8x32xf32>
    %537 = arith.mulf %536, %0 : vector<8x8x32xf32>
    %cst_142 = arith.constant dense<0.000000e+00> : vector<8x32xf32>
    %538 = vector.multi_reduction <add>, %537, %cst_142 [1] : vector<8x8x32xf32> to vector<8x32xf32>
    %cst_143 = arith.constant dense<0.000000e+00> : vector<8x32xf32>
    %539 = tpu.matmul %515, %8, %cst_143 {dimension_numbers = #tpu.dot_dimension_numbers<[1], [0], [0], [1], [0, 0, 1, 1], [], []>} : vector<8x32xf32>, vector<32x32xf32>, vector<8x32xf32> -> vector<8x32xf32>
    %cst_144 = arith.constant dense<0.000000e+00> : vector<8x32xf32>
    %540 = tpu.matmul %538, %9, %cst_144 {dimension_numbers = #tpu.dot_dimension_numbers<[1], [0], [0], [1], [0, 0, 1, 1], [], []>} : vector<8x32xf32>, vector<32x32xf32>, vector<8x32xf32> -> vector<8x32xf32>
    %541 = arith.addf %539, %540 : vector<8x32xf32>
    %542 = vector.broadcast %10 : vector<1x32xf32> to vector<8x32xf32>
    %543 = arith.addf %541, %542 : vector<8x32xf32>
    %544 = math.tanh %543 : vector<8x32xf32>
    %cst_145 = arith.constant dense<0.000000e+00> : vector<8x128xf32>
    %545 = tpu.matmul %544, %11, %cst_145 {dimension_numbers = #tpu.dot_dimension_numbers<[1], [0], [0], [1], [0, 0, 1, 1], [], []>} : vector<8x32xf32>, vector<32x128xf32>, vector<8x128xf32> -> vector<8x128xf32>
    %546 = vector.broadcast %12 : vector<1x128xf32> to vector<8x128xf32>
    %547 = arith.addf %545, %546 : vector<8x128xf32>
    %cst_146 = arith.constant dense<0xFF800000> : vector<8xf32>
    %548 = vector.multi_reduction <maximumf>, %547, %cst_146 [1] : vector<8x128xf32> to vector<8xf32>
    %549 = vector.shape_cast %548 : vector<8xf32> to vector<8x1xf32>
    %550 = vector.broadcast %549 : vector<8x1xf32> to vector<8x128xf32>
    %551 = arith.cmpf oeq, %547, %550 : vector<8x128xf32>
    %c128_i32_147 = arith.constant 128 : i32
    %552 = vector.broadcast %c128_i32_147 : i32 to vector<8x128xi32>
    %553 = arith.select %551, %13, %552 : vector<8x128xi1>, vector<8x128xi32>
    %cst_148 = arith.constant dense<2147483647> : vector<8xi32>
    %554 = vector.multi_reduction <minsi>, %553, %cst_148 [1] : vector<8x128xi32> to vector<8xi32>
    %555 = vector.shape_cast %554 : vector<8xi32> to vector<8x1xi32>
    %556 = vector.broadcast %549 : vector<8x1xf32> to vector<8x128xf32>
    %557 = arith.subf %547, %556 : vector<8x128xf32>
    %558 = math.exp %557 : vector<8x128xf32>
    %cst_149 = arith.constant dense<0.000000e+00> : vector<8xf32>
    %559 = vector.multi_reduction <add>, %558, %cst_149 [1] : vector<8x128xf32> to vector<8xf32>
    %560 = vector.shape_cast %559 : vector<8xf32> to vector<8x1xf32>
    %561 = vector.broadcast %560 : vector<8x1xf32> to vector<8x128xf32>
    %562 = arith.divf %558, %561 : vector<8x128xf32>
    %563 = arith.index_cast %c4_i32 : i32 to index
    %c0_150 = arith.constant 0 : index
    %c0_151 = arith.constant 0 : index
    %564 = vector.load %arg13[%563, %c0_150, %c0_151] : memref<5x8x128xf32, #tpu.memory_space<vmem>>, vector<1x8x128xf32>
    %565 = vector.shape_cast %564 : vector<1x8x128xf32> to vector<8x128xf32>
    %566 = vector.shape_cast %562 : vector<8x128xf32> to vector<1x8x128xf32>
    tpu.vector_store %arg13[%563, %c0_150, %c0_151], %566 {strides = array<i32>} : memref<5x8x128xf32, #tpu.memory_space<vmem>>, vector<1x8x128xf32>,
    %c5_i32 = arith.constant 5 : i32
    return
  }
}

</mosaic_0001>

<bundles_post_ra>
// kernel: seq2seq_forward.3
= control target key start
LH: loop header
LB: loop body
LE: loop exit
PB: predicated region body
PF: predicated region fallthrough
CT: control target
= control target key end

     0   :  { %s1780_s18 = smov 0   ;;  %s2020_s0 = inlined_call_operand.vmem [shape: f32[8,8,32], index: 0, kind: input, shape index: {}]   ;;  %s2021_s1 = inlined_call_operand.vmem [shape: f32[2,32,96], index: 1, kind: input, shape index: {}]   ;;  %s2022_s2 = inlined_call_operand.vmem [shape: f32[2,32,96], index: 2, kind: input, shape index: {}]   ;;  %s2023_s3 = inlined_call_operand.vmem [shape: f32[2,1,96], index: 3, kind: input, shape index: {}]   ;;  %s2024_s4 = inlined_call_operand.vmem [shape: f32[2,1,96], index: 4, kind: input, shape index: {}]   ;;  %s2025_s5 = inlined_call_operand.vmem [shape: f32[2,8,8,32], index: 5, kind: output, shape index: {}]  }
   0x1 LB: > { %s1786_s19 = sadd.s32 4294967295, %s1744_s18   ;;  %p1455_p0 = scmp.ge.s32.totalorder %s1744_s18, 1  ;;  %s1744_s18 = sphi %s1780_s18, %s15_s18  }
   0x2   : > { %p213_p1 = scmp.lt.s32.totalorder %s1744_s18, 3 }
   0x4   : > { %p214_p2 = pnand %p1455_p0, %p213_p1 }
   0x5   : > { %p252_p3 = scmp.lt.s32.totalorder (!%p214_p2), %s1786_s19, 1  ;;  %s1748_s28 = smov (!%p214_p2), 64  }
   0x6   : > { %217 = sbr.rel (%p214_p2) target bundleno = 5441 (0x1541), region = 40  ;;  %s1749_s6 = smov (!%p214_p2), 96  }
   0x7   : > { %s1480_s14 = smul.u32 (!%p214_p2), 24, %s1786_s19  ;;  %s1486_s17 = sshll.u32 (!%p214_p2), %s1786_s19, 3 }
   0x8   : > { %s1376_s20 = scalar_lea.vmem (!%p214_p2), [#allocation2], %s1486_s17 }
   0x9   : > { %s1369_s15 = scalar_lea.vmem (!%p214_p2), [#allocation2], %s1480_s14 }
   0xb   : > { %v273_v0 = vld [vmem:[%s2020_s0] sm:$0xff]  ;;  %vm292_vm0 = vcmask 261120   ;;  %v1746_v1 = vmov 0.0   ;;  %vm1747_vm1 = vmmov 0   ;;  %s1798_s22 = scalar_select %p252_p3, %s1786_s19, 1  ;;  %v274_v10 = vld [vmem:[%s2020_s0 + $0x8] sm:$0xff] }
   0xc   : > { %1590 = vmatprep.subr.mxu1 %v1746_v1  ;;  %1598 = vmatprep.mubr.msk.f32.mxu1 %vm1747_vm1, %v1746_v1  ;;  %v275_v11 = vld [vmem:[%s2020_s0 + $0x10] sm:$0xff]  ;;  %v276_v12 = vld [vmem:[%s2020_s0 + $0x18] sm:$0xff]  ;;  %v277_v13 = vld [vmem:[%s2020_s0 + $0x20] sm:$0xff]  ;;  %vm422_vm2 = vcmask 785408  }
   0xd   : > { %1578 = vmatprep.mubr.msk.f32.mxu0 %vm292_vm0, %v273_v0  ;;  %s1515_s23 = sshll.u32 %s1798_s22, 5  ;;  %v278_v14 = vld [vmem:[%s2020_s0 + $0x28] sm:$0xff]  ;;  %v279_v15 = vld [vmem:[%s2020_s0 + $0x30] sm:$0xff]  ;;  %v280_v16 = vld [vmem:[%s2020_s0 + $0x38] sm:$0xff]  ;;  %s267_s24 = scalar_lea.vmem %s2024_s4, %s1798_s22 }
   0xe   : > { %s256_s26 = scalar_lea.vmem %s2021_s1, %s1515_s23  ;;  %s261_s29 = scalar_lea.vmem %s2022_s2, %s1515_s23  ;;  %v1882_v17 = vld [vmem:[%s267_s24] ss:$0 sm:$0xff] }
   0xf   : > { %v284_v2 = vld [vmem:[%s256_s26 + $0x18] sm:$0xff]  ;;  %v1808_v3 = vld [vmem:[%s261_s29 + $0x10] sm:$0xff]  ;;  %v282_v6 = vld [vmem:[%s256_s26 + $0x8] sm:$0xff]  ;;  %s264_s27 = scalar_lea.vmem %s2023_s3, %s1798_s22  ;;  %s1517_s7 = sshll.u32 %s1798_s22, 6 }
  0x10   : > { %1570 = vmatprep.subr.mxu0 %v284_v2  ;;  %v1810_v4 = vld [vmem:[%s261_s29 + $0x18] sm:$0xff]  ;;  %v283_v5 = vld [vmem:[%s256_s26 + $0x10] sm:$0xff]  ;;  %v1813_v7 = vld [vmem:[%s261_s29 + $0x8] sm:$0xff]  ;;  %s1902_s10 = scalar_lea.vmem %s2025_s5, %s1517_s7  ;;  %s1474_s22 = smul.u32 40, %s1786_s19 }
  0x11   : > { %1591 = vmatpush3.msra.mxu1 %v1810_v4  ;;  %1571 = vmatpush3.msra.mxu0 %v284_v2  ;;  %v281_v8 = vld [vmem:[%s256_s26] sm:$0xff]  ;;  %s1373_s16 = scalar_lea.vmem %s1902_s10, %s1480_s14  ;;  %s1379_s21 = scalar_lea.vmem %s1902_s10, %s1486_s17 }
  0x12   : > { %1592 = vmatprep.subr.mxu1 %v1746_v1  ;;  %1572 = vmatprep.subr.mxu0 %v283_v5  ;;  %v1817_v9 = vld [vmem:[%s261_s29] sm:$0xff]  ;;  %s1471_s29 = smul.u32 56, %s1786_s19  ;;  %s1361_s12 = scalar_lea.vmem [#allocation2], %s1474_s22 }
  0x13   : > { %1593 = vmatpush3.msra.mxu1 %v1808_v3  ;;  %1573 = vmatpush3.msra.mxu0 %v283_v5  ;;  %v1462_v18 = vld [vmem:[%s264_s27] ss:$0 sm:$0xff]  ;;  %s1365_s13 = scalar_lea.vmem %s1902_s10, %s1474_s22  ;;  %s877_s23 = ssub.s32 4, %s1786_s19 }
  0x14   : > { %1594 = vmatprep.subr.mxu1 %v1746_v1  ;;  %1574 = vmatprep.subr.mxu0 %v282_v6  ;;  %s438_s30 = scalar_lea.vmem [#allocation2], %s1471_s29  ;;  %s549_s11 = scalar_lea.vmem %s1902_s10, %s1471_s29 }
  0x15   : > { %1595 = vmatpush3.msra.mxu1 %v1813_v7  ;;  %1575 = vmatpush3.msra.mxu0 %v282_v6  ;;  %s1492_s24 = sshll.u32 %s877_s23, 3  ;;  %s1495_s27 = smul.u32 4294967272, %s1786_s19 }
  0x16   : > { %1596 = vmatprep.subr.mxu1 %v1746_v1  ;;  %1576 = vmatprep.subr.mxu0 %v281_v8  ;;  %s879_s25 = scalar_lea.vmem [#allocation2], %s1492_s24  ;;  %s983_s26 = scalar_lea.vmem %s1902_s10, %s1492_s24 }
  0x17   : > { %1597 = vmatpush3.msra.mxu1 %v1817_v9  ;;  %1577 = vmatpush3.msra.mxu0 %v281_v8  ;;  %s1387_s29 = scalar_lea.vmem [#allocation2], %s1495_s27  ;;  %s1501_s7 = smul.u32 4294967256, %s1786_s19 }
  0x18   : > { %1599 = vmatmul.mubr.f32.vlgmr.msra.gmra.mxu1 %v1746_v1  ;;  %1579 = vmatmul.mubr.msk.f32.vlgmr.msra.gmra.mxu0 %vm292_vm0, %v274_v10 }
  0x19   : > { %1581 = vmatprep.mubr.msk.f32.mxu0 %vm292_vm0, %v275_v11  ;;  %1601 = vmatprep.subr.mxu1 %v1746_v1  ;;  %s1395_s8 = scalar_lea.vmem [#allocation2], %s1501_s7  ;;  %s1399_s9 = scalar_lea.vmem %s1902_s10, %s1501_s7 }
  0x1a   : > { %1602 = vmatpush3.msra.mxu1 %v1810_v4  ;;  %1609 = vmatprep.mubr.msk.f32.mxu1 %vm1747_vm1, %v1746_v1 }
  0x1b   : > { %1603 = vmatprep.subr.mxu1 %v1746_v1  ;;  %1612 = vmatprep.subr.mxu0 %v1746_v1 }
  0x1c   : > { %1582 = vmatmul.mubr.msk.f32.gmra.mxu0 %vm292_vm0, %v276_v12  ;;  %1604 = vmatpush3.msra.mxu1 %v1808_v3 }
  0x1d   : > { %1584 = vmatprep.mubr.msk.f32.mxu0 %vm292_vm0, %v277_v13  ;;  %1605 = vmatprep.subr.mxu1 %v1746_v1 }
  0x1e   : > { %1606 = vmatpush3.msra.mxu1 %v1813_v7  ;;  %1613 = vmatpush3.msra.mxu0 %v1810_v4 }
  0x1f   : > { %1607 = vmatprep.subr.mxu1 %v1746_v1  ;;  %1614 = vmatprep.subr.mxu0 %v1746_v1 }
  0x20   : > { %1585 = vmatmul.mubr.msk.f32.gmra.mxu0 %vm292_vm0, %v278_v14  ;;  %1608 = vmatpush3.msra.mxu1 %v1817_v9 }
  0x21   : > { %1587 = vmatprep.mubr.msk.f32.mxu0 %vm292_vm0, %v279_v15  ;;  %1615 = vmatpush3.msra.mxu0 %v1808_v3 }
  0x22   : > { %1616 = vmatprep.subr.mxu0 %v1746_v1  ;;  %1623 = vmatprep.subr.mxu1 %v1746_v1 }
  0x23   : > { %1617 = vmatpush3.msra.mxu0 %v1813_v7 }
  0x24   : > { %1588 = vmatmul.mubr.msk.f32.gmra.mxu0 %vm292_vm0, %v280_v16  ;;  %1618 = vmatprep.subr.mxu0 %v1746_v1 }
  0x25   : > { %1619 = vmatpush3.msra.mxu0 %v1817_v9  ;;  %1620 = vmatprep.mubr.msk.f32.mxu0 %vm1747_vm1, %v1746_v1 }
  0x26   : > { %1634 = vmatprep.subr.mxu0 %v1746_v1 }
  0xd8   : > { %v515_v19 = vpop.f32.mrf.mxu1  ;;  %v1580_v20 = vpop.f32.mrf.mxu0 }
  0xd9   : > { %v516_v21 = vadd.f32 %v1882_v17, %v515_v19  ;;  %v389_v22 = vadd.f32 %v1580_v20, %v1462_v18 }
  0xda   : > { %v1600_v23 = vpop.f32.mrf.mxu1  ;;  %v383_v24 = vpop.f32.mrf.mxu0 }
  0xdb   : > { %424 = vst.msk [vmem:[#allocation2 + $0x8] sm:$0xff] %vm422_vm2, %v389_v22  ;;  %527 = vrot.lane.b32.xlu0 %v516_v21, %s1748_s28  ;;  %v384_v25 = vadd.f32 %v1462_v18, %v383_v24 }
  0xdc   : > { %v1583_v26 = vpop.f32.mrf.mxu0 }
  0xdd   : > { %423 = vst.msk [vmem:[#allocation2] sm:$0xff] %vm422_vm2, %v384_v25  ;;  %v399_v27 = vadd.f32 %v1583_v26, %v1462_v18 }
  0xde   : > { %v393_v28 = vpop.f32.mrf.mxu0 }
  0xdf   : > { %426 = vst.msk [vmem:[#allocation2 + $0x18] sm:$0xff] %vm422_vm2, %v399_v27  ;;  %v394_v29 = vadd.f32 %v1462_v18, %v393_v28 }
  0xe0   : > { %v1586_v30 = vpop.f32.mrf.mxu0 }
  0xe1   : > { %425 = vst.msk [vmem:[#allocation2 + $0x10] sm:$0xff] %vm422_vm2, %v394_v29  ;;  %v409_v31 = vadd.f32 %v1586_v30, %v1462_v18 }
  0xe2   : > { %v403_v32 = vpop.f32.mrf.mxu0 }
  0xe3   : > { %428 = vst.msk [vmem:[#allocation2 + $0x28] sm:$0xff] %vm422_vm2, %v409_v31  ;;  %v404_v33 = vadd.f32 %v1462_v18, %v403_v32 }
  0xe4   : > { %v1589_v34 = vpop.f32.mrf.mxu0 }
  0xe5   : > { %427 = vst.msk [vmem:[#allocation2 + $0x20] sm:$0xff] %vm422_vm2, %v404_v33  ;;  %v419_v35 = vadd.f32 %v1589_v34, %v1462_v18 }
  0xe6   : > { %v413_v36 = vpop.f32.mrf.mxu0 }
  0xe7   : > { %430 = vst.msk [vmem:[#allocation2 + $0x38] sm:$0xff] %vm422_vm2, %v419_v35  ;;  %v414_v37 = vadd.f32 %v1462_v18, %v413_v36 }
  0xe9   : > { %429 = vst.msk [vmem:[#allocation2 + $0x30] sm:$0xff] %vm422_vm2, %v414_v37 }
  0xf0   : > { %v439_v38 = vld [vmem:[%s438_s30] sm:$0xff]  ;;  %v1475_v58 = vld [vmem:[%s1361_s12 + $0x8] sm:$0xff]  ;;  %v1481_v20 = vld [vmem:[%s1369_s15 + $0x10] sm:$0xff]  ;;  %s1391_s30 = scalar_lea.vmem %s1902_s10, %s1495_s27 }
  0xf1   : > { %v519_v39 = vadd.f32 %v516_v21, %v439_v38 }
  0xf3   : > { %v1473_v40 = vmul.f32 -1.442695, %v519_v39 }
  0xf5   : > { %1690 = vpow2.f32 %v1473_v40  ;;  %v1487_v40 = vld [vmem:[%s1376_s20 + $0x18] sm:$0xff] }
 0x102   : > { %v1691_v41 = vpop.eup %1690 }
 0x103   : > { %v523_v42 = vadd.f32 1.0, %v1691_v41 }
 0x105   : > { %1692 = vrcp.f32 %v523_v42 }
 0x112   : > { %v1693_v43 = vpop.eup %1692 }
 0x113   : > { %v537_v49 = vsub.f32 1.0, %v1693_v43  ;;  %v543_v51 = vmul.f32 0.0, %v1693_v43 }
 0x14d   : > { %v528_v44 = vpop.permute.xlu0 %527 }
 0x14e   : > { %v530_v45 = vmul.f32 %v1693_v43, %v528_v44 }
 0x150   : > { %532 = vrot.lane.b32.xlu0 %v530_v45, %s1748_s28 }
 0x1c2   : > { %v533_v46 = vpop.permute.xlu0 %532 }
 0x1c3   : > { %v535_v47 = vadd.f32 %v533_v46, %v439_v38 }
 0x1c5   : > { %1694 = vtanh.f32 %v535_v47 }
 0x1d2   : > { %v1695_v48 = vpop.eup %1694 }
 0x1d3   : > { %539 = vrot.lane.b32.xlu1 %v1695_v48, %s1749_s6 }
 0x245   : > { %v540_v50 = vpop.permute.xlu1 %539 }
 0x246   : > { %v542_v52 = vmul.f32 %v540_v50, %v537_v49 }
 0x248   : > { %v544_v53 = vadd.f32 %v543_v51, %v542_v52 }
 0x24a   : > { %546 = vrot.lane.b32.xlu1 %v544_v53, %s1749_s6 }
 0x2bc   : > { %v547_v54 = vpop.permute.xlu1 %546 }
 0x2bd   : > { %550 = vst.msk [vmem:[%s549_s11] sm:$0xff] %vm292_vm0, %v547_v54  ;;  %1610 = vmatmul.mubr.msk.f32.vlgmr.msra.gmra.mxu1 %vm292_vm0, %v547_v54  ;;  %s1507_s11 = smul.u32 4294967240, %s1786_s19 }
 0x2be   : > { %1624 = vmatpush3.msra.mxu1 %v1810_v4  ;;  %1631 = vmatprep.mubr.msk.f32.mxu1 %vm1747_vm1, %v1746_v1 }
 0x2bf   : > { %1625 = vmatprep.subr.mxu1 %v1746_v1  ;;  %s1403_s22 = scalar_lea.vmem [#allocation2], %s1507_s11  ;;  %s1407_s19 = scalar_lea.vmem %s1902_s10, %s1507_s11 }
 0x2c0   : > { %1626 = vmatpush3.msra.mxu1 %v1808_v3 }
 0x2c1   : > { %1627 = vmatprep.subr.mxu1 %v1746_v1 }
 0x2c2   : > { %1628 = vmatpush3.msra.mxu1 %v1813_v7 }
 0x2c3   : > { %1629 = vmatprep.subr.mxu1 %v1746_v1 }
 0x2c4   : > { %1630 = vmatpush3.msra.mxu1 %v1817_v9 }
 0x2c5   : > { %1645 = vmatprep.subr.mxu1 %v1746_v1 }
 0x37d   : > { %v624_v55 = vpop.f32.mrf.mxu1 }
 0x37e   : > { %v625_v56 = vadd.f32 %v1882_v17, %v624_v55 }
 0x37f   : > { %v1611_v57 = vpop.f32.mrf.mxu1 }
 0x380   : > { %636 = vrot.lane.b32.xlu0 %v625_v56, %s1748_s28  ;;  %v628_v59 = vadd.f32 %v1475_v58, %v625_v56 }
 0x382   : > { %v1477_v60 = vmul.f32 -1.442695, %v628_v59 }
 0x384   : > { %1696 = vpow2.f32 %v1477_v60  ;;  %v880_v60 = vld [vmem:[%s879_s25] sm:$0xff] }
 0x391   : > { %v1697_v61 = vpop.eup %1696 }
 0x392   : > { %v632_v62 = vadd.f32 1.0, %v1697_v61 }
 0x394   : > { %1698 = vrcp.f32 %v632_v62 }
 0x3a1   : > { %v1699_v63 = vpop.eup %1698 }
 0x3a2   : > { %v646_v10 = vsub.f32 1.0, %v1699_v63  ;;  %v652_v12 = vmul.f32 %v1699_v63, %v544_v53 }
 0x3f2   : > { %v637_v0 = vpop.permute.xlu0 %636 }
 0x3f3   : > { %v639_v2 = vmul.f32 %v1699_v63, %v637_v0 }
 0x3f5   : > { %641 = vrot.lane.b32.xlu1 %v639_v2, %s1748_s28 }
 0x467   : > { %v642_v5 = vpop.permute.xlu1 %641 }
 0x468   : > { %v644_v6 = vadd.f32 %v1475_v58, %v642_v5 }
 0x46a   : > { %1700 = vtanh.f32 %v644_v6 }
 0x477   : > { %v1701_v8 = vpop.eup %1700 }
 0x478   : > { %648 = vrot.lane.b32.xlu0 %v1701_v8, %s1749_s6 }
 0x4ea   : > { %v649_v11 = vpop.permute.xlu0 %648 }
 0x4eb   : > { %v651_v13 = vmul.f32 %v649_v11, %v646_v10 }
 0x4ed   : > { %v653_v14 = vadd.f32 %v652_v12, %v651_v13 }
 0x4ef   : > { %655 = vrot.lane.b32.xlu1 %v653_v14, %s1749_s6 }
 0x561   : > { %v656_v15 = vpop.permute.xlu1 %655 }
 0x562   : > { %1479 = vst.msk [vmem:[%s1365_s13 + $0x8] sm:$0xff] %vm292_vm0, %v656_v15  ;;  %1621 = vmatmul.mubr.msk.f32.vlgmr.msra.gmra.mxu0 %vm292_vm0, %v656_v15 }
 0x563   : > { %1635 = vmatpush3.msra.mxu0 %v1810_v4  ;;  %1642 = vmatprep.mubr.msk.f32.mxu0 %vm1747_vm1, %v1746_v1 }
 0x564   : > { %1636 = vmatprep.subr.mxu0 %v1746_v1 }
 0x565   : > { %1637 = vmatpush3.msra.mxu0 %v1808_v3 }
 0x566   : > { %1638 = vmatprep.subr.mxu0 %v1746_v1 }
 0x567   : > { %1639 = vmatpush3.msra.mxu0 %v1813_v7 }
 0x568   : > { %1640 = vmatprep.subr.mxu0 %v1746_v1 }
 0x569   : > { %1641 = vmatpush3.msra.mxu0 %v1817_v9 }
 0x56a   : > { %1656 = vmatprep.subr.mxu0 %v1746_v1 }
 0x622   : > { %v733_v16 = vpop.f32.mrf.mxu0 }
 0x623   : > { %v734_v18 = vadd.f32 %v1882_v17, %v733_v16 }
 0x624   : > { %v1622_v19 = vpop.f32.mrf.mxu0 }
 0x625   : > { %745 = vrot.lane.b32.xlu0 %v734_v18, %s1748_s28  ;;  %v737_v21 = vadd.f32 %v1481_v20, %v734_v18 }
 0x627   : > { %v1483_v22 = vmul.f32 -1.442695, %v737_v21 }
 0x629   : > { %1702 = vpow2.f32 %v1483_v22 }
 0x636   : > { %v1703_v23 = vpop.eup %1702 }
 0x637   : > { %v741_v24 = vadd.f32 1.0, %v1703_v23 }
 0x639   : > { %1704 = vrcp.f32 %v741_v24 }
 0x646   : > { %v1705_v25 = vpop.eup %1704 }
 0x647   : > { %v755_v31 = vsub.f32 1.0, %v1705_v25  ;;  %v761_v33 = vmul.f32 %v1705_v25, %v653_v14 }
 0x697   : > { %v746_v26 = vpop.permute.xlu0 %745 }
 0x698   : > { %v748_v27 = vmul.f32 %v1705_v25, %v746_v26 }
 0x69a   : > { %750 = vrot.lane.b32.xlu1 %v748_v27, %s1748_s28 }
 0x70c   : > { %v751_v28 = vpop.permute.xlu1 %750 }
 0x70d   : > { %v753_v29 = vadd.f32 %v1481_v20, %v751_v28 }
 0x70f   : > { %1706 = vtanh.f32 %v753_v29 }
 0x71c   : > { %v1707_v30 = vpop.eup %1706 }
 0x71d   : > { %757 = vrot.lane.b32.xlu0 %v1707_v30, %s1749_s6 }
 0x78f   : > { %v758_v32 = vpop.permute.xlu0 %757 }
 0x790   : > { %v760_v34 = vmul.f32 %v758_v32, %v755_v31 }
 0x792   : > { %v762_v35 = vadd.f32 %v761_v33, %v760_v34 }
 0x794   : > { %764 = vrot.lane.b32.xlu1 %v762_v35, %s1749_s6 }
 0x806   : > { %v765_v36 = vpop.permute.xlu1 %764 }
 0x807   : > { %1485 = vst.msk [vmem:[%s1373_s16 + $0x10] sm:$0xff] %vm292_vm0, %v765_v36  ;;  %1632 = vmatmul.mubr.msk.f32.vlgmr.msra.gmra.mxu1 %vm292_vm0, %v765_v36 }
 0x808   : > { %1646 = vmatpush3.msra.mxu1 %v1810_v4  ;;  %1653 = vmatprep.mubr.msk.f32.mxu1 %vm1747_vm1, %v1746_v1 }
 0x809   : > { %1647 = vmatprep.subr.mxu1 %v1746_v1 }
 0x80a   : > { %1648 = vmatpush3.msra.mxu1 %v1808_v3 }
 0x80b   : > { %1649 = vmatprep.subr.mxu1 %v1746_v1 }
 0x80c   : > { %1650 = vmatpush3.msra.mxu1 %v1813_v7 }
 0x80d   : > { %1651 = vmatprep.subr.mxu1 %v1746_v1 }
 0x80e   : > { %1652 = vmatpush3.msra.mxu1 %v1817_v9 }
 0x80f   : > { %1667 = vmatprep.subr.mxu1 %v1746_v1 }
 0x8c7   : > { %v841_v37 = vpop.f32.mrf.mxu1 }
 0x8c8   : > { %v842_v38 = vadd.f32 %v1882_v17, %v841_v37  ;;  %v1502_v37 = vld [vmem:[%s1395_s8 + $0x30] sm:$0xff] }
 0x8c9   : > { %v1633_v39 = vpop.f32.mrf.mxu1 }
 0x8ca   : > { %853 = vrot.lane.b32.xlu0 %v842_v38, %s1748_s28  ;;  %v845_v41 = vadd.f32 %v1487_v40, %v842_v38 }
 0x8cc   : > { %v1489_v42 = vmul.f32 -1.442695, %v845_v41 }
 0x8ce   : > { %1708 = vpow2.f32 %v1489_v42 }
 0x8db   : > { %v1709_v43 = vpop.eup %1708 }
 0x8dc   : > { %v849_v44 = vadd.f32 1.0, %v1709_v43 }
 0x8de   : > { %1710 = vrcp.f32 %v849_v44 }
 0x8eb   : > { %v1711_v45 = vpop.eup %1710 }
 0x8ec   : > { %v863_v51 = vsub.f32 1.0, %v1711_v45  ;;  %v869_v53 = vmul.f32 %v1711_v45, %v762_v35 }
 0x93c   : > { %v854_v46 = vpop.permute.xlu0 %853 }
 0x93d   : > { %v856_v47 = vmul.f32 %v1711_v45, %v854_v46 }
 0x93f   : > { %858 = vrot.lane.b32.xlu1 %v856_v47, %s1748_s28 }
 0x9b1   : > { %v859_v48 = vpop.permute.xlu1 %858 }
 0x9b2   : > { %v861_v49 = vadd.f32 %v1487_v40, %v859_v48 }
 0x9b4   : > { %1712 = vtanh.f32 %v861_v49 }
 0x9c1   : > { %v1713_v50 = vpop.eup %1712 }
 0x9c2   : > { %865 = vrot.lane.b32.xlu0 %v1713_v50, %s1749_s6 }
 0xa34   : > { %v866_v52 = vpop.permute.xlu0 %865 }
 0xa35   : > { %v868_v54 = vmul.f32 %v866_v52, %v863_v51 }
 0xa37   : > { %v870_v55 = vadd.f32 %v869_v53, %v868_v54 }
 0xa39   : > { %872 = vrot.lane.b32.xlu1 %v870_v55, %s1749_s6 }
 0xaab   : > { %v873_v56 = vpop.permute.xlu1 %872 }
 0xaac   : > { %1491 = vst.msk [vmem:[%s1379_s21 + $0x18] sm:$0xff] %vm292_vm0, %v873_v56  ;;  %1643 = vmatmul.mubr.msk.f32.vlgmr.msra.gmra.mxu0 %vm292_vm0, %v873_v56 }
 0xaad   : > { %1657 = vmatpush3.msra.mxu0 %v1810_v4  ;;  %1664 = vmatprep.mubr.msk.f32.mxu0 %vm1747_vm1, %v1746_v1 }
 0xaae   : > { %1658 = vmatprep.subr.mxu0 %v1746_v1 }
 0xaaf   : > { %1659 = vmatpush3.msra.mxu0 %v1808_v3 }
 0xab0   : > { %1660 = vmatprep.subr.mxu0 %v1746_v1 }
 0xab1   : > { %1661 = vmatpush3.msra.mxu0 %v1813_v7 }
 0xab2   : > { %1662 = vmatprep.subr.mxu0 %v1746_v1 }
 0xab3   : > { %1663 = vmatpush3.msra.mxu0 %v1817_v9 }
 0xb6c   : > { %v949_v57 = vpop.f32.mrf.mxu0 }
 0xb6d   : > { %v950_v58 = vadd.f32 %v1882_v17, %v949_v57  ;;  %v1508_v57 = vld [vmem:[%s1403_s22 + $0x38] sm:$0xff] }
 0xb6e   : > { %v1644_v59 = vpop.f32.mrf.mxu0 }
 0xb6f   : > { %961 = vrot.lane.b32.xlu0 %v950_v58, %s1748_s28  ;;  %v953_v61 = vadd.f32 %v950_v58, %v880_v60 }
 0xb71   : > { %v1494_v62 = vmul.f32 -1.442695, %v953_v61 }
 0xb73   : > { %1714 = vpow2.f32 %v1494_v62 }
 0xb80   : > { %v1715_v63 = vpop.eup %1714 }
 0xb81   : > { %v957_v0 = vadd.f32 1.0, %v1715_v63 }
 0xb83   : > { %1716 = vrcp.f32 %v957_v0 }
 0xb90   : > { %v1717_v2 = vpop.eup %1716 }
 0xb91   : > { %v971_v12 = vsub.f32 1.0, %v1717_v2  ;;  %v977_v14 = vmul.f32 %v1717_v2, %v870_v55 }
 0xbe1   : > { %v962_v5 = vpop.permute.xlu0 %961 }
 0xbe2   : > { %v964_v6 = vmul.f32 %v1717_v2, %v962_v5 }
 0xbe4   : > { %966 = vrot.lane.b32.xlu1 %v964_v6, %s1748_s28 }
 0xc56   : > { %v967_v8 = vpop.permute.xlu1 %966 }
 0xc57   : > { %v969_v10 = vadd.f32 %v967_v8, %v880_v60 }
 0xc59   : > { %1718 = vtanh.f32 %v969_v10 }
 0xc66   : > { %v1719_v11 = vpop.eup %1718 }
 0xc67   : > { %973 = vrot.lane.b32.xlu0 %v1719_v11, %s1749_s6 }
 0xcd9   : > { %v974_v13 = vpop.permute.xlu0 %973 }
 0xcda   : > { %v976_v15 = vmul.f32 %v974_v13, %v971_v12 }
 0xcdc   : > { %v978_v16 = vadd.f32 %v977_v14, %v976_v15 }
 0xcde   : > { %980 = vrot.lane.b32.xlu1 %v978_v16, %s1749_s6 }
 0xd50   : > { %v981_v18 = vpop.permute.xlu1 %980 }
 0xd51   : > { %984 = vst.msk [vmem:[%s983_s26] sm:$0xff] %vm292_vm0, %v981_v18  ;;  %1654 = vmatmul.mubr.msk.f32.vlgmr.msra.gmra.mxu1 %vm292_vm0, %v981_v18 }
 0xd52   : > { %1668 = vmatpush3.msra.mxu1 %v1810_v4  ;;  %1675 = vmatprep.mubr.msk.f32.mxu1 %vm1747_vm1, %v1746_v1  ;;  %v1496_v4 = vld [vmem:[%s1387_s29 + $0x28] sm:$0xff] }
 0xd53   : > { %1669 = vmatprep.subr.mxu1 %v1746_v1 }
 0xd54   : > { %1670 = vmatpush3.msra.mxu1 %v1808_v3 }
 0xd55   : > { %1671 = vmatprep.subr.mxu1 %v1746_v1 }
 0xd56   : > { %1672 = vmatpush3.msra.mxu1 %v1813_v7 }
 0xd57   : > { %1673 = vmatprep.subr.mxu1 %v1746_v1 }
 0xd58   : > { %1674 = vmatpush3.msra.mxu1 %v1817_v9 }
 0xe11   : > { %v1058_v19 = vpop.f32.mrf.mxu1 }
 0xe12   : > { %v1059_v20 = vadd.f32 %v1882_v17, %v1058_v19 }
 0xe13   : > { %v1655_v21 = vpop.f32.mrf.mxu1 }
 0xe14   : > { %1070 = vrot.lane.b32.xlu0 %v1059_v20, %s1748_s28  ;;  %v1062_v22 = vadd.f32 %v1496_v4, %v1059_v20 }
 0xe16   : > { %v1498_v23 = vmul.f32 -1.442695, %v1062_v22 }
 0xe18   : > { %1720 = vpow2.f32 %v1498_v23 }
 0xe25   : > { %v1721_v3 = vpop.eup %1720 }
 0xe26   : > { %v1066_v24 = vadd.f32 1.0, %v1721_v3 }
 0xe28   : > { %1722 = vrcp.f32 %v1066_v24 }
 0xe35   : > { %v1723_v7 = vpop.eup %1722 }
 0xe36   : > { %v1080_v28 = vsub.f32 1.0, %v1723_v7  ;;  %v1086_v30 = vmul.f32 %v1723_v7, %v978_v16 }
 0xe86   : > { %v1071_v1 = vpop.permute.xlu0 %1070 }
 0xe87   : > { %v1073_v25 = vmul.f32 %v1723_v7, %v1071_v1 }
 0xe89   : > { %1075 = vrot.lane.b32.xlu1 %v1073_v25, %s1748_s28 }
 0xefb   : > { %v1076_v9 = vpop.permute.xlu1 %1075 }
 0xefc   : > { %v1078_v26 = vadd.f32 %v1496_v4, %v1076_v9 }
 0xefe   : > { %1724 = vtanh.f32 %v1078_v26 }
 0xf0b   : > { %v1725_v27 = vpop.eup %1724 }
 0xf0c   : > { %1082 = vrot.lane.b32.xlu0 %v1725_v27, %s1749_s6 }
 0xf7e   : > { %v1083_v29 = vpop.permute.xlu0 %1082 }
 0xf7f   : > { %v1085_v31 = vmul.f32 %v1083_v29, %v1080_v28 }
 0xf81   : > { %v1087_v32 = vadd.f32 %v1086_v30, %v1085_v31 }
 0xf83   : > { %1089 = vrot.lane.b32.xlu1 %v1087_v32, %s1749_s6 }
 0xff5   : > { %v1090_v33 = vpop.permute.xlu1 %1089 }
 0xff6   : > { %1500 = vst.msk [vmem:[%s1391_s30 + $0x28] sm:$0xff] %vm292_vm0, %v1090_v33  ;;  %1665 = vmatmul.mubr.msk.f32.vlgmr.msra.gmra.mxu0 %vm292_vm0, %v1090_v33 }
0x10b6   : > { %v1167_v34 = vpop.f32.mrf.mxu0 }
0x10b7   : > { %v1168_v35 = vadd.f32 %v1882_v17, %v1167_v34 }
0x10b8   : > { %v1666_v36 = vpop.f32.mrf.mxu0 }
0x10b9   : > { %1179 = vrot.lane.b32.xlu0 %v1168_v35, %s1748_s28  ;;  %v1171_v38 = vadd.f32 %v1502_v37, %v1168_v35 }
0x10bb   : > { %v1504_v39 = vmul.f32 -1.442695, %v1171_v38 }
0x10bd   : > { %1726 = vpow2.f32 %v1504_v39 }
0x10ca   : > { %v1727_v40 = vpop.eup %1726 }
0x10cb   : > { %v1175_v41 = vadd.f32 1.0, %v1727_v40 }
0x10cd   : > { %1728 = vrcp.f32 %v1175_v41 }
0x10da   : > { %v1729_v42 = vpop.eup %1728 }
0x10db   : > { %v1189_v48 = vsub.f32 1.0, %v1729_v42  ;;  %v1195_v50 = vmul.f32 %v1729_v42, %v1087_v32 }
0x112b   : > { %v1180_v43 = vpop.permute.xlu0 %1179 }
0x112c   : > { %v1182_v44 = vmul.f32 %v1729_v42, %v1180_v43 }
0x112e   : > { %1184 = vrot.lane.b32.xlu1 %v1182_v44, %s1748_s28 }
0x11a0   : > { %v1185_v45 = vpop.permute.xlu1 %1184 }
0x11a1   : > { %v1187_v46 = vadd.f32 %v1502_v37, %v1185_v45 }
0x11a3   : > { %1730 = vtanh.f32 %v1187_v46 }
0x11b0   : > { %v1731_v47 = vpop.eup %1730 }
0x11b1   : > { %1191 = vrot.lane.b32.xlu0 %v1731_v47, %s1749_s6 }
0x1223   : > { %v1192_v49 = vpop.permute.xlu0 %1191 }
0x1224   : > { %v1194_v51 = vmul.f32 %v1192_v49, %v1189_v48 }
0x1226   : > { %v1196_v52 = vadd.f32 %v1195_v50, %v1194_v51 }
0x1228   : > { %1198 = vrot.lane.b32.xlu1 %v1196_v52, %s1749_s6 }
0x129a   : > { %v1199_v53 = vpop.permute.xlu1 %1198 }
0x129b   : > { %1506 = vst.msk [vmem:[%s1399_s9 + $0x30] sm:$0xff] %vm292_vm0, %v1199_v53  ;;  %1676 = vmatmul.mubr.msk.f32.vlgmr.msra.gmra.mxu1 %vm292_vm0, %v1199_v53 }
0x135b   : > { %v1276_v54 = vpop.f32.mrf.mxu1 }
0x135c   : > { %v1277_v55 = vadd.f32 %v1882_v17, %v1276_v54 }
0x135d   : > { %v1677_v56 = vpop.f32.mrf.mxu1 }
0x135e   : > { %1288 = vrot.lane.b32.xlu0 %v1277_v55, %s1748_s28  ;;  %v1280_v58 = vadd.f32 %v1508_v57, %v1277_v55 }
0x1360   : > { %v1510_v59 = vmul.f32 -1.442695, %v1280_v58 }
0x1362   : > { %1732 = vpow2.f32 %v1510_v59 }
0x136f   : > { %v1733_v60 = vpop.eup %1732 }
0x1370   : > { %v1284_v61 = vadd.f32 1.0, %v1733_v60 }
0x1372   : > { %1734 = vrcp.f32 %v1284_v61 }
0x137f   : > { %v1735_v62 = vpop.eup %1734 }
0x1380   : > { %v1298_v6 = vsub.f32 1.0, %v1735_v62  ;;  %v1304_v10 = vmul.f32 %v1735_v62, %v1196_v52 }
0x13d0   : > { %v1289_v63 = vpop.permute.xlu0 %1288 }
0x13d1   : > { %v1291_v0 = vmul.f32 %v1735_v62, %v1289_v63 }
0x13d3   : > { %1293 = vrot.lane.b32.xlu1 %v1291_v0, %s1748_s28 }
0x1445   : > { %v1294_v2 = vpop.permute.xlu1 %1293 }
0x1446   : > { %v1296_v17 = vadd.f32 %v1508_v57, %v1294_v2 }
0x1448   : > { %1736 = vtanh.f32 %v1296_v17 }
0x1455   : > { %v1737_v5 = vpop.eup %1736 }
0x1456   : > { %1300 = vrot.lane.b32.xlu0 %v1737_v5, %s1749_s6 }
0x14c8   : > { %v1301_v8 = vpop.permute.xlu0 %1300 }
0x14c9   : > { %v1303_v11 = vmul.f32 %v1301_v8, %v1298_v6 }
0x14cb   : > { %v1305_v12 = vadd.f32 %v1304_v10, %v1303_v11 }
0x14cd   : > { %1307 = vrot.lane.b32.xlu1 %v1305_v12, %s1749_s6 }
0x153f   : > { %v1308_v13 = vpop.permute.xlu1 %1307 }
0x1540   : > { %1512 = vst.msk [vmem:[%s1407_s19 + $0x38] sm:$0xff] %vm292_vm0, %v1308_v13 }
0x1541 PF: > { %s15_s18 = sadd.s32 1, %s1744_s18  }
0x1542   : > { %p12_p4 = scmp.ge.s32.totalorder %s15_s18, 4  }
0x1544   :  { %14 = sbr.rel (!%p12_p4) target bundleno = 1 (0x1), region = 95 }

// kernel: seq2seq_forward.4
= control target key start
LH: loop header
LB: loop body
LE: loop exit
PB: predicated region body
PF: predicated region fallthrough
CT: control target
= control target key end

     0   :  { %s1797_s18 = smov 0   ;;  %s2051_s0 = inlined_call_operand.vmem [shape: f32[8,8,64], index: 0, kind: input, shape index: {}]   ;;  %s2052_s1 = inlined_call_operand.vmem [shape: f32[2,64,96], index: 1, kind: input, shape index: {}]   ;;  %s2053_s2 = inlined_call_operand.vmem [shape: f32[2,32,96], index: 2, kind: input, shape index: {}]   ;;  %s2054_s3 = inlined_call_operand.vmem [shape: f32[2,1,96], index: 3, kind: input, shape index: {}]   ;;  %s2055_s4 = inlined_call_operand.vmem [shape: f32[2,1,96], index: 4, kind: input, shape index: {}]   ;;  %s2056_s5 = inlined_call_operand.vmem [shape: f32[2,8,8,32], index: 5, kind: output, shape index: {}]  }
   0x1 LB: > { %s1803_s19 = sadd.s32 4294967295, %s1761_s18   ;;  %p1460_p0 = scmp.ge.s32.totalorder %s1761_s18, 1  ;;  %s1761_s18 = sphi %s1797_s18, %s15_s18  }
   0x2   : > { %p213_p1 = scmp.lt.s32.totalorder %s1761_s18, 3 }
   0x4   : > { %p214_p2 = pnand %p1460_p0, %p213_p1 }
   0x5   : > { %p252_p3 = scmp.lt.s32.totalorder (!%p214_p2), %s1803_s19, 1  ;;  %s1476_s6 = smul.u32 (!%p214_p2), 56, %s1803_s19 }
   0x6   : > { %217 = sbr.rel (%p214_p2) target bundleno = 5441 (0x1541), region = 40  ;;  %s1766_s8 = smov (!%p214_p2), 96  }
   0x7   : > { %s442_s7 = scalar_lea.vmem (!%p214_p2), [#allocation2], %s1476_s6  ;;  %s1485_s14 = smul.u32 (!%p214_p2), 24, %s1803_s19 }
   0x8   : > { %s1491_s17 = sshll.u32 (!%p214_p2), %s1803_s19, 3  ;;  %s1500_s29 = smul.u32 (!%p214_p2), 4294967272, %s1803_s19 }
   0x9   : > { %s1374_s15 = scalar_lea.vmem (!%p214_p2), [#allocation2], %s1485_s14  ;;  %s1381_s20 = scalar_lea.vmem (!%p214_p2), [#allocation2], %s1491_s17 }
   0xb   : > { %v273_v0 = vld [vmem:[%s2051_s0] sm:$0xff]  ;;  %vm296_vm0 = vcmask 523264   ;;  %v1763_v1 = vmov 0.0   ;;  %vm1764_vm1 = vmmov 0   ;;  %s1815_s22 = scalar_select %p252_p3, %s1803_s19, 1  ;;  %v274_v14 = vld [vmem:[%s2051_s0 + $0x8] sm:$0xff] }
   0xc   : > { %1607 = vmatprep.subr.mxu1 %v1763_v1  ;;  %1615 = vmatprep.mubr.msk.f32.mxu1 %vm1764_vm1, %v1763_v1  ;;  %v275_v15 = vld [vmem:[%s2051_s0 + $0x10] sm:$0xff]  ;;  %v276_v16 = vld [vmem:[%s2051_s0 + $0x18] sm:$0xff]  ;;  %v277_v17 = vld [vmem:[%s2051_s0 + $0x20] sm:$0xff]  ;;  %vm426_vm2 = vcmask 785408   ;;  %vm450_vm3 = vcmask 261120  }
   0xd   : > { %1595 = vmatprep.mubr.msk.f32.mxu0 %vm296_vm0, %v273_v0  ;;  %s1520_s23 = sshll.u32 %s1815_s22, 6  ;;  %s1521_s24 = sshll.u32 %s1815_s22, 5  ;;  %v278_v18 = vld [vmem:[%s2051_s0 + $0x28] sm:$0xff]  ;;  %v279_v19 = vld [vmem:[%s2051_s0 + $0x30] sm:$0xff]  ;;  %v280_v20 = vld [vmem:[%s2051_s0 + $0x38] sm:$0xff] }
   0xe   : > { %s1825_s27 = scalar_lea.vmem %s2052_s1, %s1520_s23  ;;  %s261_s30 = scalar_lea.vmem %s2053_s2, %s1521_s24 }
   0xf   : > { %v288_v2 = vld [vmem:[%s1825_s27 + $0x38] sm:$0xff]  ;;  %v287_v3 = vld [vmem:[%s1825_s27 + $0x30] sm:$0xff]  ;;  %v286_v6 = vld [vmem:[%s1825_s27 + $0x28] sm:$0xff]  ;;  %s267_s26 = scalar_lea.vmem %s2055_s4, %s1815_s22  ;;  %s1933_s11 = scalar_lea.vmem %s2056_s5, %s1520_s23 }
  0x10   : > { %1579 = vmatprep.subr.mxu0 %v288_v2  ;;  %v1832_v4 = vld [vmem:[%s261_s30 + $0x18] sm:$0xff]  ;;  %v1834_v5 = vld [vmem:[%s261_s30 + $0x10] sm:$0xff]  ;;  %v1839_v7 = vld [vmem:[%s261_s30 + $0x8] sm:$0xff]  ;;  %s554_s12 = scalar_lea.vmem %s1933_s11, %s1476_s6  ;;  %s1378_s16 = scalar_lea.vmem %s1933_s11, %s1485_s14 }
  0x11   : > { %1608 = vmatpush3.msra.mxu1 %v1832_v4  ;;  %1580 = vmatpush3.msra.mxu0 %v288_v2  ;;  %v285_v8 = vld [vmem:[%s1825_s27 + $0x20] sm:$0xff]  ;;  %v284_v10 = vld [vmem:[%s1825_s27 + $0x18] sm:$0xff]  ;;  %v283_v11 = vld [vmem:[%s1825_s27 + $0x10] sm:$0xff]  ;;  %s1384_s21 = scalar_lea.vmem %s1933_s11, %s1491_s17  ;;  %s882_s24 = ssub.s32 4, %s1803_s19 }
  0x12   : > { %1609 = vmatprep.subr.mxu1 %v1763_v1  ;;  %1581 = vmatprep.subr.mxu0 %v287_v3  ;;  %v1844_v9 = vld [vmem:[%s261_s30] sm:$0xff]  ;;  %v282_v12 = vld [vmem:[%s1825_s27 + $0x8] sm:$0xff]  ;;  %s264_s30 = scalar_lea.vmem %s2054_s3, %s1815_s22  ;;  %s1479_s22 = smul.u32 40, %s1803_s19 }
  0x13   : > { %1610 = vmatpush3.msra.mxu1 %v1834_v5  ;;  %1582 = vmatpush3.msra.mxu0 %v287_v3  ;;  %v281_v13 = vld [vmem:[%s1825_s27] sm:$0xff]  ;;  %s1765_s27 = smov 64   ;;  %s1497_s25 = sshll.u32 %s882_s24, 3 }
  0x14   : > { %1611 = vmatprep.subr.mxu1 %v1763_v1  ;;  %1583 = vmatprep.subr.mxu0 %v286_v6  ;;  %v1908_v21 = vld [vmem:[%s267_s26] ss:$0 sm:$0xff]  ;;  %s1366_s23 = scalar_lea.vmem [#allocation2], %s1479_s22  ;;  %s1370_s13 = scalar_lea.vmem %s1933_s11, %s1479_s22 }
  0x15   : > { %1612 = vmatpush3.msra.mxu1 %v1839_v7  ;;  %1584 = vmatpush3.msra.mxu0 %v286_v6  ;;  %v1467_v25 = vld [vmem:[%s264_s30] ss:$0 sm:$0xff]  ;;  %s884_s26 = scalar_lea.vmem [#allocation2], %s1497_s25  ;;  %s988_s28 = scalar_lea.vmem %s1933_s11, %s1497_s25 }
  0x16   : > { %1613 = vmatprep.subr.mxu1 %v1763_v1  ;;  %1585 = vmatprep.subr.mxu0 %v285_v8  ;;  %s1392_s30 = scalar_lea.vmem [#allocation2], %s1500_s29  ;;  %s1396_s6 = scalar_lea.vmem %s1933_s11, %s1500_s29 }
  0x17   : > { %1614 = vmatpush3.msra.mxu1 %v1844_v9  ;;  %1586 = vmatpush3.msra.mxu0 %v285_v8 }
  0x18   : > { %1616 = vmatmul.mubr.f32.vlgmr.msra.gmra.mxu1 %v1763_v1  ;;  %1587 = vmatprep.subr.mxu0 %v284_v10 }
  0x19   : > { %1588 = vmatpush3.msra.mxu0 %v284_v10  ;;  %1618 = vmatprep.subr.mxu1 %v1763_v1 }
  0x1a   : > { %1589 = vmatprep.subr.mxu0 %v283_v11  ;;  %1619 = vmatpush3.msra.mxu1 %v1832_v4 }
  0x1b   : > { %1590 = vmatpush3.msra.mxu0 %v283_v11  ;;  %1620 = vmatprep.subr.mxu1 %v1763_v1 }
  0x1c   : > { %1591 = vmatprep.subr.mxu0 %v282_v12  ;;  %1621 = vmatpush3.msra.mxu1 %v1834_v5 }
  0x1d   : > { %1592 = vmatpush3.msra.mxu0 %v282_v12  ;;  %1622 = vmatprep.subr.mxu1 %v1763_v1 }
  0x1e   : > { %1593 = vmatprep.subr.mxu0 %v281_v13  ;;  %1623 = vmatpush3.msra.mxu1 %v1839_v7 }
  0x1f   : > { %1594 = vmatpush3.msra.mxu0 %v281_v13  ;;  %1624 = vmatprep.subr.mxu1 %v1763_v1 }
  0x20   : > { %1596 = vmatmul.mubr.msk.f32.vlgmr.msra.gmra.mxu0 %vm296_vm0, %v274_v14  ;;  %1625 = vmatpush3.msra.mxu1 %v1844_v9 }
  0x21   : > { %1598 = vmatprep.mubr.msk.f32.mxu0 %vm296_vm0, %v275_v15  ;;  %1626 = vmatprep.mubr.msk.f32.mxu1 %vm1764_vm1, %v1763_v1 }
  0x22   : > { %1629 = vmatprep.subr.mxu1 %v1763_v1  ;;  %1640 = vmatprep.subr.mxu0 %v1763_v1 }
  0x23   : > { %1641 = vmatpush3.msra.mxu0 %v1832_v4 }
  0x24   : > { %1599 = vmatmul.mubr.msk.f32.gmra.mxu0 %vm296_vm0, %v276_v16  ;;  %1642 = vmatprep.subr.mxu0 %v1763_v1 }
  0x25   : > { %1601 = vmatprep.mubr.msk.f32.mxu0 %vm296_vm0, %v277_v17  ;;  %1643 = vmatpush3.msra.mxu0 %v1834_v5 }
  0x26   : > { %1644 = vmatprep.subr.mxu0 %v1763_v1 }
  0x27   : > { %1645 = vmatpush3.msra.mxu0 %v1839_v7 }
  0x28   : > { %1602 = vmatmul.mubr.msk.f32.gmra.mxu0 %vm296_vm0, %v278_v18  ;;  %1646 = vmatprep.subr.mxu0 %v1763_v1 }
  0x29   : > { %1604 = vmatprep.mubr.msk.f32.mxu0 %vm296_vm0, %v279_v19  ;;  %1647 = vmatpush3.msra.mxu0 %v1844_v9 }
  0x2a   : > { %1662 = vmatprep.subr.mxu0 %v1763_v1 }
  0x2c   : > { %1605 = vmatmul.mubr.msk.f32.gmra.mxu0 %vm296_vm0, %v280_v20 }
  0x2d   : > { %1648 = vmatprep.mubr.msk.f32.mxu0 %vm1764_vm1, %v1763_v1 }
  0xd8   : > { %v520_v22 = vpop.f32.mrf.mxu1 }
  0xd9   : > { %v521_v23 = vadd.f32 %v1908_v21, %v520_v22 }
  0xda   : > { %v1617_v24 = vpop.f32.mrf.mxu1 }
  0xdb   : > { %532 = vrot.lane.b32.xlu0 %v521_v23, %s1765_s27 }
  0xe0   : > { %v1597_v26 = vpop.f32.mrf.mxu0 }
  0xe1   : > { %v393_v27 = vadd.f32 %v1597_v26, %v1467_v25 }
  0xe2   : > { %v387_v28 = vpop.f32.mrf.mxu0 }
  0xe3   : > { %428 = vst.msk [vmem:[#allocation2 + $0x8] sm:$0xff] %vm426_vm2, %v393_v27  ;;  %v388_v29 = vadd.f32 %v1467_v25, %v387_v28 }
  0xe4   : > { %v1600_v30 = vpop.f32.mrf.mxu0 }
  0xe5   : > { %427 = vst.msk [vmem:[#allocation2] sm:$0xff] %vm426_vm2, %v388_v29  ;;  %v403_v31 = vadd.f32 %v1600_v30, %v1467_v25 }
  0xe6   : > { %v397_v32 = vpop.f32.mrf.mxu0 }
  0xe7   : > { %430 = vst.msk [vmem:[#allocation2 + $0x18] sm:$0xff] %vm426_vm2, %v403_v31  ;;  %v398_v33 = vadd.f32 %v1467_v25, %v397_v32 }
  0xe8   : > { %v1603_v34 = vpop.f32.mrf.mxu0 }
  0xe9   : > { %429 = vst.msk [vmem:[#allocation2 + $0x10] sm:$0xff] %vm426_vm2, %v398_v33  ;;  %v413_v35 = vadd.f32 %v1603_v34, %v1467_v25 }
  0xea   : > { %v407_v36 = vpop.f32.mrf.mxu0 }
  0xeb   : > { %432 = vst.msk [vmem:[#allocation2 + $0x28] sm:$0xff] %vm426_vm2, %v413_v35  ;;  %v408_v37 = vadd.f32 %v1467_v25, %v407_v36 }
  0xec   : > { %v1606_v38 = vpop.f32.mrf.mxu0 }
  0xed   : > { %431 = vst.msk [vmem:[#allocation2 + $0x20] sm:$0xff] %vm426_vm2, %v408_v37  ;;  %v423_v39 = vadd.f32 %v1606_v38, %v1467_v25 }
  0xee   : > { %v417_v40 = vpop.f32.mrf.mxu0 }
  0xef   : > { %434 = vst.msk [vmem:[#allocation2 + $0x38] sm:$0xff] %vm426_vm2, %v423_v39  ;;  %v418_v41 = vadd.f32 %v1467_v25, %v417_v40 }
  0xf1   : > { %433 = vst.msk [vmem:[#allocation2 + $0x30] sm:$0xff] %vm426_vm2, %v418_v41 }
  0xf8   : > { %v443_v42 = vld [vmem:[%s442_s7] sm:$0xff]  ;;  %v1480_v62 = vld [vmem:[%s1366_s23 + $0x8] sm:$0xff]  ;;  %v1486_v24 = vld [vmem:[%s1374_s15 + $0x10] sm:$0xff]  ;;  %s1506_s7 = smul.u32 4294967256, %s1803_s19 }
  0xf9   : > { %v524_v43 = vadd.f32 %v521_v23, %v443_v42 }
  0xfa   : > { %s1400_s9 = scalar_lea.vmem [#allocation2], %s1506_s7  ;;  %s1404_s10 = scalar_lea.vmem %s1933_s11, %s1506_s7 }
  0xfb   : > { %v1478_v44 = vmul.f32 -1.442695, %v524_v43 }
  0xfd   : > { %1707 = vpow2.f32 %v1478_v44  ;;  %v1492_v44 = vld [vmem:[%s1381_s20 + $0x18] sm:$0xff] }
 0x10a   : > { %v1708_v45 = vpop.eup %1707 }
 0x10b   : > { %v528_v46 = vadd.f32 1.0, %v1708_v45 }
 0x10d   : > { %1709 = vrcp.f32 %v528_v46 }
 0x11a   : > { %v1710_v47 = vpop.eup %1709 }
 0x11b   : > { %v542_v53 = vsub.f32 1.0, %v1710_v47  ;;  %v548_v55 = vmul.f32 0.0, %v1710_v47 }
 0x14d   : > { %v533_v48 = vpop.permute.xlu0 %532 }
 0x14e   : > { %v535_v49 = vmul.f32 %v1710_v47, %v533_v48 }
 0x150   : > { %537 = vrot.lane.b32.xlu0 %v535_v49, %s1765_s27 }
 0x1c2   : > { %v538_v50 = vpop.permute.xlu0 %537 }
 0x1c3   : > { %v540_v51 = vadd.f32 %v538_v50, %v443_v42 }
 0x1c5   : > { %1711 = vtanh.f32 %v540_v51 }
 0x1d2   : > { %v1712_v52 = vpop.eup %1711 }
 0x1d3   : > { %544 = vrot.lane.b32.xlu1 %v1712_v52, %s1766_s8 }
 0x245   : > { %v545_v54 = vpop.permute.xlu1 %544 }
 0x246   : > { %v547_v56 = vmul.f32 %v545_v54, %v542_v53 }
 0x248   : > { %v549_v57 = vadd.f32 %v548_v55, %v547_v56 }
 0x24a   : > { %551 = vrot.lane.b32.xlu1 %v549_v57, %s1766_s8 }
 0x2bc   : > { %v552_v58 = vpop.permute.xlu1 %551 }
 0x2bd   : > { %555 = vst.msk [vmem:[%s554_s12] sm:$0xff] %vm450_vm3, %v552_v58  ;;  %1627 = vmatmul.mubr.msk.f32.vlgmr.msra.gmra.mxu1 %vm450_vm3, %v552_v58  ;;  %s1512_s12 = smul.u32 4294967240, %s1803_s19 }
 0x2be   : > { %1630 = vmatpush3.msra.mxu1 %v1832_v4  ;;  %1637 = vmatprep.mubr.msk.f32.mxu1 %vm1764_vm1, %v1763_v1 }
 0x2bf   : > { %1631 = vmatprep.subr.mxu1 %v1763_v1  ;;  %s1408_s22 = scalar_lea.vmem [#allocation2], %s1512_s12  ;;  %s1412_s19 = scalar_lea.vmem %s1933_s11, %s1512_s12 }
 0x2c0   : > { %1632 = vmatpush3.msra.mxu1 %v1834_v5 }
 0x2c1   : > { %1633 = vmatprep.subr.mxu1 %v1763_v1 }
 0x2c2   : > { %1634 = vmatpush3.msra.mxu1 %v1839_v7 }
 0x2c3   : > { %1635 = vmatprep.subr.mxu1 %v1763_v1 }
 0x2c4   : > { %1636 = vmatpush3.msra.mxu1 %v1844_v9 }
 0x2c5   : > { %1651 = vmatprep.subr.mxu1 %v1763_v1 }
 0x37d   : > { %v629_v59 = vpop.f32.mrf.mxu1 }
 0x37e   : > { %v630_v60 = vadd.f32 %v1908_v21, %v629_v59 }
 0x37f   : > { %v1628_v61 = vpop.f32.mrf.mxu1 }
 0x380   : > { %641 = vrot.lane.b32.xlu0 %v630_v60, %s1765_s27  ;;  %v633_v63 = vadd.f32 %v1480_v62, %v630_v60 }
 0x382   : > { %v1482_v0 = vmul.f32 -1.442695, %v633_v63 }
 0x384   : > { %1713 = vpow2.f32 %v1482_v0  ;;  %v885_v0 = vld [vmem:[%s884_s26] sm:$0xff] }
 0x391   : > { %v1714_v2 = vpop.eup %1713 }
 0x392   : > { %v637_v3 = vadd.f32 1.0, %v1714_v2 }
 0x394   : > { %1715 = vrcp.f32 %v637_v3 }
 0x3a1   : > { %v1716_v6 = vpop.eup %1715 }
 0x3a2   : > { %v651_v14 = vsub.f32 1.0, %v1716_v6  ;;  %v657_v16 = vmul.f32 %v1716_v6, %v549_v57 }
 0x3f2   : > { %v642_v8 = vpop.permute.xlu0 %641 }
 0x3f3   : > { %v644_v10 = vmul.f32 %v1716_v6, %v642_v8 }
 0x3f5   : > { %646 = vrot.lane.b32.xlu1 %v644_v10, %s1765_s27 }
 0x467   : > { %v647_v11 = vpop.permute.xlu1 %646 }
 0x468   : > { %v649_v12 = vadd.f32 %v1480_v62, %v647_v11 }
 0x46a   : > { %1717 = vtanh.f32 %v649_v12 }
 0x477   : > { %v1718_v13 = vpop.eup %1717 }
 0x478   : > { %653 = vrot.lane.b32.xlu0 %v1718_v13, %s1766_s8 }
 0x4ea   : > { %v654_v15 = vpop.permute.xlu0 %653 }
 0x4eb   : > { %v656_v17 = vmul.f32 %v654_v15, %v651_v14 }
 0x4ed   : > { %v658_v18 = vadd.f32 %v657_v16, %v656_v17 }
 0x4ef   : > { %660 = vrot.lane.b32.xlu1 %v658_v18, %s1766_s8 }
 0x561   : > { %v661_v19 = vpop.permute.xlu1 %660 }
 0x562   : > { %1484 = vst.msk [vmem:[%s1370_s13 + $0x8] sm:$0xff] %vm450_vm3, %v661_v19  ;;  %1638 = vmatmul.mubr.msk.f32.vlgmr.msra.gmra.mxu1 %vm450_vm3, %v661_v19 }
 0x563   : > { %1652 = vmatpush3.msra.mxu1 %v1832_v4  ;;  %1659 = vmatprep.mubr.msk.f32.mxu1 %vm1764_vm1, %v1763_v1 }
 0x564   : > { %1653 = vmatprep.subr.mxu1 %v1763_v1 }
 0x565   : > { %1654 = vmatpush3.msra.mxu1 %v1834_v5 }
 0x566   : > { %1655 = vmatprep.subr.mxu1 %v1763_v1 }
 0x567   : > { %1656 = vmatpush3.msra.mxu1 %v1839_v7 }
 0x568   : > { %1657 = vmatprep.subr.mxu1 %v1763_v1 }
 0x569   : > { %1658 = vmatpush3.msra.mxu1 %v1844_v9 }
 0x56a   : > { %1673 = vmatprep.subr.mxu1 %v1763_v1 }
 0x622   : > { %v738_v20 = vpop.f32.mrf.mxu1 }
 0x623   : > { %v739_v22 = vadd.f32 %v1908_v21, %v738_v20 }
 0x624   : > { %v1639_v23 = vpop.f32.mrf.mxu1 }
 0x625   : > { %750 = vrot.lane.b32.xlu0 %v739_v22, %s1765_s27  ;;  %v742_v25 = vadd.f32 %v1486_v24, %v739_v22 }
 0x627   : > { %v1488_v26 = vmul.f32 -1.442695, %v742_v25 }
 0x629   : > { %1719 = vpow2.f32 %v1488_v26 }
 0x636   : > { %v1720_v27 = vpop.eup %1719 }
 0x637   : > { %v746_v28 = vadd.f32 1.0, %v1720_v27 }
 0x639   : > { %1721 = vrcp.f32 %v746_v28 }
 0x646   : > { %v1722_v29 = vpop.eup %1721 }
 0x647   : > { %v760_v35 = vsub.f32 1.0, %v1722_v29  ;;  %v766_v37 = vmul.f32 %v1722_v29, %v658_v18 }
 0x697   : > { %v751_v30 = vpop.permute.xlu0 %750 }
 0x698   : > { %v753_v31 = vmul.f32 %v1722_v29, %v751_v30 }
 0x69a   : > { %755 = vrot.lane.b32.xlu1 %v753_v31, %s1765_s27 }
 0x70c   : > { %v756_v32 = vpop.permute.xlu1 %755 }
 0x70d   : > { %v758_v33 = vadd.f32 %v1486_v24, %v756_v32 }
 0x70f   : > { %1723 = vtanh.f32 %v758_v33 }
 0x71c   : > { %v1724_v34 = vpop.eup %1723 }
 0x71d   : > { %762 = vrot.lane.b32.xlu0 %v1724_v34, %s1766_s8 }
 0x78f   : > { %v763_v36 = vpop.permute.xlu0 %762 }
 0x790   : > { %v765_v38 = vmul.f32 %v763_v36, %v760_v35 }
 0x792   : > { %v767_v39 = vadd.f32 %v766_v37, %v765_v38 }
 0x794   : > { %769 = vrot.lane.b32.xlu1 %v767_v39, %s1766_s8 }
 0x806   : > { %v770_v40 = vpop.permute.xlu1 %769 }
 0x807   : > { %1490 = vst.msk [vmem:[%s1378_s16 + $0x10] sm:$0xff] %vm450_vm3, %v770_v40  ;;  %1649 = vmatmul.mubr.msk.f32.vlgmr.msra.gmra.mxu0 %vm450_vm3, %v770_v40 }
 0x808   : > { %1663 = vmatpush3.msra.mxu0 %v1832_v4  ;;  %1670 = vmatprep.mubr.msk.f32.mxu0 %vm1764_vm1, %v1763_v1 }
 0x809   : > { %1664 = vmatprep.subr.mxu0 %v1763_v1 }
 0x80a   : > { %1665 = vmatpush3.msra.mxu0 %v1834_v5 }
 0x80b   : > { %1666 = vmatprep.subr.mxu0 %v1763_v1 }
 0x80c   : > { %1667 = vmatpush3.msra.mxu0 %v1839_v7 }
 0x80d   : > { %1668 = vmatprep.subr.mxu0 %v1763_v1 }
 0x80e   : > { %1669 = vmatpush3.msra.mxu0 %v1844_v9 }
 0x80f   : > { %1684 = vmatprep.subr.mxu0 %v1763_v1 }
 0x8c7   : > { %v846_v41 = vpop.f32.mrf.mxu0 }
 0x8c8   : > { %v847_v42 = vadd.f32 %v1908_v21, %v846_v41  ;;  %v1507_v41 = vld [vmem:[%s1400_s9 + $0x30] sm:$0xff] }
 0x8c9   : > { %v1650_v43 = vpop.f32.mrf.mxu0 }
 0x8ca   : > { %858 = vrot.lane.b32.xlu0 %v847_v42, %s1765_s27  ;;  %v850_v45 = vadd.f32 %v1492_v44, %v847_v42 }
 0x8cc   : > { %v1494_v46 = vmul.f32 -1.442695, %v850_v45 }
 0x8ce   : > { %1725 = vpow2.f32 %v1494_v46 }
 0x8db   : > { %v1726_v47 = vpop.eup %1725 }
 0x8dc   : > { %v854_v48 = vadd.f32 1.0, %v1726_v47 }
 0x8de   : > { %1727 = vrcp.f32 %v854_v48 }
 0x8eb   : > { %v1728_v49 = vpop.eup %1727 }
 0x8ec   : > { %v868_v55 = vsub.f32 1.0, %v1728_v49  ;;  %v874_v57 = vmul.f32 %v1728_v49, %v767_v39 }
 0x93c   : > { %v859_v50 = vpop.permute.xlu0 %858 }
 0x93d   : > { %v861_v51 = vmul.f32 %v1728_v49, %v859_v50 }
 0x93f   : > { %863 = vrot.lane.b32.xlu1 %v861_v51, %s1765_s27 }
 0x9b1   : > { %v864_v52 = vpop.permute.xlu1 %863 }
 0x9b2   : > { %v866_v53 = vadd.f32 %v1492_v44, %v864_v52 }
 0x9b4   : > { %1729 = vtanh.f32 %v866_v53 }
 0x9c1   : > { %v1730_v54 = vpop.eup %1729 }
 0x9c2   : > { %870 = vrot.lane.b32.xlu0 %v1730_v54, %s1766_s8 }
 0xa34   : > { %v871_v56 = vpop.permute.xlu0 %870 }
 0xa35   : > { %v873_v58 = vmul.f32 %v871_v56, %v868_v55 }
 0xa37   : > { %v875_v59 = vadd.f32 %v874_v57, %v873_v58 }
 0xa39   : > { %877 = vrot.lane.b32.xlu1 %v875_v59, %s1766_s8 }
 0xaab   : > { %v878_v60 = vpop.permute.xlu1 %877 }
 0xaac   : > { %1496 = vst.msk [vmem:[%s1384_s21 + $0x18] sm:$0xff] %vm450_vm3, %v878_v60  ;;  %1660 = vmatmul.mubr.msk.f32.vlgmr.msra.gmra.mxu1 %vm450_vm3, %v878_v60 }
 0xaad   : > { %1674 = vmatpush3.msra.mxu1 %v1832_v4  ;;  %1681 = vmatprep.mubr.msk.f32.mxu1 %vm1764_vm1, %v1763_v1 }
 0xaae   : > { %1675 = vmatprep.subr.mxu1 %v1763_v1 }
 0xaaf   : > { %1676 = vmatpush3.msra.mxu1 %v1834_v5 }
 0xab0   : > { %1677 = vmatprep.subr.mxu1 %v1763_v1 }
 0xab1   : > { %1678 = vmatpush3.msra.mxu1 %v1839_v7 }
 0xab2   : > { %1679 = vmatprep.subr.mxu1 %v1763_v1 }
 0xab3   : > { %1680 = vmatpush3.msra.mxu1 %v1844_v9 }
 0xb6c   : > { %v954_v61 = vpop.f32.mrf.mxu1 }
 0xb6d   : > { %v955_v62 = vadd.f32 %v1908_v21, %v954_v61  ;;  %v1513_v61 = vld [vmem:[%s1408_s22 + $0x38] sm:$0xff] }
 0xb6e   : > { %v1661_v63 = vpop.f32.mrf.mxu1 }
 0xb6f   : > { %966 = vrot.lane.b32.xlu0 %v955_v62, %s1765_s27  ;;  %v958_v2 = vadd.f32 %v955_v62, %v885_v0 }
 0xb71   : > { %v1499_v3 = vmul.f32 -1.442695, %v958_v2 }
 0xb73   : > { %1731 = vpow2.f32 %v1499_v3 }
 0xb80   : > { %v1732_v6 = vpop.eup %1731 }
 0xb81   : > { %v962_v8 = vadd.f32 1.0, %v1732_v6 }
 0xb83   : > { %1733 = vrcp.f32 %v962_v8 }
 0xb90   : > { %v1734_v10 = vpop.eup %1733 }
 0xb91   : > { %v976_v16 = vsub.f32 1.0, %v1734_v10  ;;  %v982_v18 = vmul.f32 %v1734_v10, %v875_v59 }
 0xbe1   : > { %v967_v11 = vpop.permute.xlu0 %966 }
 0xbe2   : > { %v969_v12 = vmul.f32 %v1734_v10, %v967_v11 }
 0xbe4   : > { %971 = vrot.lane.b32.xlu1 %v969_v12, %s1765_s27 }
 0xc56   : > { %v972_v13 = vpop.permute.xlu1 %971 }
 0xc57   : > { %v974_v14 = vadd.f32 %v972_v13, %v885_v0 }
 0xc59   : > { %1735 = vtanh.f32 %v974_v14 }
 0xc66   : > { %v1736_v15 = vpop.eup %1735 }
 0xc67   : > { %978 = vrot.lane.b32.xlu0 %v1736_v15, %s1766_s8 }
 0xcd9   : > { %v979_v17 = vpop.permute.xlu0 %978 }
 0xcda   : > { %v981_v19 = vmul.f32 %v979_v17, %v976_v16 }
 0xcdc   : > { %v983_v20 = vadd.f32 %v982_v18, %v981_v19 }
 0xcde   : > { %985 = vrot.lane.b32.xlu1 %v983_v20, %s1766_s8 }
 0xd50   : > { %v986_v22 = vpop.permute.xlu1 %985 }
 0xd51   : > { %989 = vst.msk [vmem:[%s988_s28] sm:$0xff] %vm450_vm3, %v986_v22  ;;  %1671 = vmatmul.mubr.msk.f32.vlgmr.msra.gmra.mxu0 %vm450_vm3, %v986_v22 }
 0xd52   : > { %1685 = vmatpush3.msra.mxu0 %v1832_v4  ;;  %1692 = vmatprep.mubr.msk.f32.mxu0 %vm1764_vm1, %v1763_v1  ;;  %v1501_v4 = vld [vmem:[%s1392_s30 + $0x28] sm:$0xff] }
 0xd53   : > { %1686 = vmatprep.subr.mxu0 %v1763_v1 }
 0xd54   : > { %1687 = vmatpush3.msra.mxu0 %v1834_v5 }
 0xd55   : > { %1688 = vmatprep.subr.mxu0 %v1763_v1 }
 0xd56   : > { %1689 = vmatpush3.msra.mxu0 %v1839_v7 }
 0xd57   : > { %1690 = vmatprep.subr.mxu0 %v1763_v1 }
 0xd58   : > { %1691 = vmatpush3.msra.mxu0 %v1844_v9 }
 0xe11   : > { %v1063_v23 = vpop.f32.mrf.mxu0 }
 0xe12   : > { %v1064_v24 = vadd.f32 %v1908_v21, %v1063_v23 }
 0xe13   : > { %v1672_v25 = vpop.f32.mrf.mxu0 }
 0xe14   : > { %1075 = vrot.lane.b32.xlu0 %v1064_v24, %s1765_s27  ;;  %v1067_v26 = vadd.f32 %v1501_v4, %v1064_v24 }
 0xe16   : > { %v1503_v27 = vmul.f32 -1.442695, %v1067_v26 }
 0xe18   : > { %1737 = vpow2.f32 %v1503_v27 }
 0xe25   : > { %v1738_v5 = vpop.eup %1737 }
 0xe26   : > { %v1071_v28 = vadd.f32 1.0, %v1738_v5 }
 0xe28   : > { %1739 = vrcp.f32 %v1071_v28 }
 0xe35   : > { %v1740_v7 = vpop.eup %1739 }
 0xe36   : > { %v1085_v32 = vsub.f32 1.0, %v1740_v7  ;;  %v1091_v34 = vmul.f32 %v1740_v7, %v983_v20 }
 0xe86   : > { %v1076_v1 = vpop.permute.xlu0 %1075 }
 0xe87   : > { %v1078_v29 = vmul.f32 %v1740_v7, %v1076_v1 }
 0xe89   : > { %1080 = vrot.lane.b32.xlu1 %v1078_v29, %s1765_s27 }
 0xefb   : > { %v1081_v9 = vpop.permute.xlu1 %1080 }
 0xefc   : > { %v1083_v30 = vadd.f32 %v1501_v4, %v1081_v9 }
 0xefe   : > { %1741 = vtanh.f32 %v1083_v30 }
 0xf0b   : > { %v1742_v31 = vpop.eup %1741 }
 0xf0c   : > { %1087 = vrot.lane.b32.xlu0 %v1742_v31, %s1766_s8 }
 0xf7e   : > { %v1088_v33 = vpop.permute.xlu0 %1087 }
 0xf7f   : > { %v1090_v35 = vmul.f32 %v1088_v33, %v1085_v32 }
 0xf81   : > { %v1092_v36 = vadd.f32 %v1091_v34, %v1090_v35 }
 0xf83   : > { %1094 = vrot.lane.b32.xlu1 %v1092_v36, %s1766_s8 }
 0xff5   : > { %v1095_v37 = vpop.permute.xlu1 %1094 }
 0xff6   : > { %1505 = vst.msk [vmem:[%s1396_s6 + $0x28] sm:$0xff] %vm450_vm3, %v1095_v37  ;;  %1682 = vmatmul.mubr.msk.f32.vlgmr.msra.gmra.mxu1 %vm450_vm3, %v1095_v37 }
0x10b6   : > { %v1172_v38 = vpop.f32.mrf.mxu1 }
0x10b7   : > { %v1173_v39 = vadd.f32 %v1908_v21, %v1172_v38 }
0x10b8   : > { %v1683_v40 = vpop.f32.mrf.mxu1 }
0x10b9   : > { %1184 = vrot.lane.b32.xlu0 %v1173_v39, %s1765_s27  ;;  %v1176_v42 = vadd.f32 %v1507_v41, %v1173_v39 }
0x10bb   : > { %v1509_v43 = vmul.f32 -1.442695, %v1176_v42 }
0x10bd   : > { %1743 = vpow2.f32 %v1509_v43 }
0x10ca   : > { %v1744_v44 = vpop.eup %1743 }
0x10cb   : > { %v1180_v45 = vadd.f32 1.0, %v1744_v44 }
0x10cd   : > { %1745 = vrcp.f32 %v1180_v45 }
0x10da   : > { %v1746_v46 = vpop.eup %1745 }
0x10db   : > { %v1194_v52 = vsub.f32 1.0, %v1746_v46  ;;  %v1200_v54 = vmul.f32 %v1746_v46, %v1092_v36 }
0x112b   : > { %v1185_v47 = vpop.permute.xlu0 %1184 }
0x112c   : > { %v1187_v48 = vmul.f32 %v1746_v46, %v1185_v47 }
0x112e   : > { %1189 = vrot.lane.b32.xlu1 %v1187_v48, %s1765_s27 }
0x11a0   : > { %v1190_v49 = vpop.permute.xlu1 %1189 }
0x11a1   : > { %v1192_v50 = vadd.f32 %v1507_v41, %v1190_v49 }
0x11a3   : > { %1747 = vtanh.f32 %v1192_v50 }
0x11b0   : > { %v1748_v51 = vpop.eup %1747 }
0x11b1   : > { %1196 = vrot.lane.b32.xlu0 %v1748_v51, %s1766_s8 }
0x1223   : > { %v1197_v53 = vpop.permute.xlu0 %1196 }
0x1224   : > { %v1199_v55 = vmul.f32 %v1197_v53, %v1194_v52 }
0x1226   : > { %v1201_v56 = vadd.f32 %v1200_v54, %v1199_v55 }
0x1228   : > { %1203 = vrot.lane.b32.xlu1 %v1201_v56, %s1766_s8 }
0x129a   : > { %v1204_v57 = vpop.permute.xlu1 %1203 }
0x129b   : > { %1511 = vst.msk [vmem:[%s1404_s10 + $0x30] sm:$0xff] %vm450_vm3, %v1204_v57  ;;  %1693 = vmatmul.mubr.msk.f32.vlgmr.msra.gmra.mxu0 %vm450_vm3, %v1204_v57 }
0x135b   : > { %v1281_v58 = vpop.f32.mrf.mxu0 }
0x135c   : > { %v1282_v59 = vadd.f32 %v1908_v21, %v1281_v58 }
0x135d   : > { %v1694_v60 = vpop.f32.mrf.mxu0 }
0x135e   : > { %1293 = vrot.lane.b32.xlu0 %v1282_v59, %s1765_s27  ;;  %v1285_v62 = vadd.f32 %v1513_v61, %v1282_v59 }
0x1360   : > { %v1515_v63 = vmul.f32 -1.442695, %v1285_v62 }
0x1362   : > { %1749 = vpow2.f32 %v1515_v63 }
0x136f   : > { %v1750_v0 = vpop.eup %1749 }
0x1370   : > { %v1289_v2 = vadd.f32 1.0, %v1750_v0 }
0x1372   : > { %1751 = vrcp.f32 %v1289_v2 }
0x137f   : > { %v1752_v3 = vpop.eup %1751 }
0x1380   : > { %v1303_v12 = vsub.f32 1.0, %v1752_v3  ;;  %v1309_v14 = vmul.f32 %v1752_v3, %v1201_v56 }
0x13d0   : > { %v1294_v6 = vpop.permute.xlu0 %1293 }
0x13d1   : > { %v1296_v8 = vmul.f32 %v1752_v3, %v1294_v6 }
0x13d3   : > { %1298 = vrot.lane.b32.xlu1 %v1296_v8, %s1765_s27 }
0x1445   : > { %v1299_v10 = vpop.permute.xlu1 %1298 }
0x1446   : > { %v1301_v21 = vadd.f32 %v1513_v61, %v1299_v10 }
0x1448   : > { %1753 = vtanh.f32 %v1301_v21 }
0x1455   : > { %v1754_v11 = vpop.eup %1753 }
0x1456   : > { %1305 = vrot.lane.b32.xlu0 %v1754_v11, %s1766_s8 }
0x14c8   : > { %v1306_v13 = vpop.permute.xlu0 %1305 }
0x14c9   : > { %v1308_v15 = vmul.f32 %v1306_v13, %v1303_v12 }
0x14cb   : > { %v1310_v16 = vadd.f32 %v1309_v14, %v1308_v15 }
0x14cd   : > { %1312 = vrot.lane.b32.xlu1 %v1310_v16, %s1766_s8 }
0x153f   : > { %v1313_v17 = vpop.permute.xlu1 %1312 }
0x1540   : > { %1517 = vst.msk [vmem:[%s1412_s19 + $0x38] sm:$0xff] %vm450_vm3, %v1313_v17 }
0x1541 PF: > { %s15_s18 = sadd.s32 1, %s1761_s18  }
0x1542   : > { %p12_p4 = scmp.ge.s32.totalorder %s15_s18, 4  }
0x1544   :  { %14 = sbr.rel (!%p12_p4) target bundleno = 1 (0x1), region = 95 }

// kernel: seq2seq_forward.5
= control target key start
LH: loop header
LB: loop body
LE: loop exit
PB: predicated region body
PF: predicated region fallthrough
CT: control target
= control target key end

     0   :  { %v9384_v0 = vmov 0.0   ;;  %vm7102_vm0 = vmmov 0   ;;  %s7103_s22 = smov 32   ;;  %vm56_vm1 = vcmask 261120   ;;  %v221_v24 = vlaneseq  ;;  %s7105_s17 = smov 64   ;;  %s9368_s1 = inlined_call_operand.vmem [shape: f32[128,32], index: 1, kind: input, shape index: {}]   ;;  %s9369_s2 = inlined_call_operand.vmem [shape: f32[2,8,32], index: 2, kind: input, shape index: {}]   ;;  %s9370_s6 = inlined_call_operand.vmem [shape: f32[32,32], index: 6, kind: input, shape index: {}]   ;;  %s9371_s0 = inlined_call_operand.vmem [shape: f32[8,8,32], index: 0, kind: input, shape index: {}]   ;;  %s9372_s3 = inlined_call_operand.vmem [shape: f32[2,64,128], index: 3, kind: input, shape index: {}]   ;;  %s9373_s4 = inlined_call_operand.vmem [shape: f32[2,1,128], index: 4, kind: input, shape index: {}]   ;;  %s9374_s5 = inlined_call_operand.vmem [shape: f32[32,32], index: 5, kind: input, shape index: {}]   ;;  %s9375_s8 = inlined_call_operand.vmem [shape: f32[32,32], index: 8, kind: input, shape index: {}]   ;;  %s9376_s7 = inlined_call_operand.vmem [shape: f32[1,32], index: 7, kind: input, shape index: {}]   ;;  %s9377_s9 = inlined_call_operand.vmem [shape: f32[32,32], index: 9, kind: input, shape index: {}]   ;;  %s9378_s11 = inlined_call_operand.vmem [shape: f32[32,128], index: 11, kind: input, shape index: {}]   ;;  %s9379_s10 = inlined_call_operand.vmem [shape: f32[1,32], index: 10, kind: input, shape index: {}]   ;;  %s9380_s12 = inlined_call_operand.vmem [shape: f32[1,128], index: 12, kind: input, shape index: {}]   ;;  %s9381_s13 = inlined_call_operand.vmem [shape: f32[5,8,128], index: 13, kind: output, shape index: {}]  }
   0x1   :  { %6124 = vmatprep.subr.mxu1 %v9384_v0  ;;  %v7183_v1 = vld [vmem:[%s9368_s1 + $0x78] sm:$0xff]  ;;  %v7188_v2 = vld [vmem:[%s9368_s1 + $0x70] sm:$0xff]  ;;  %6156 = vmatprep.mubr.msk.f32.mxu1 %vm7102_vm0, %v9384_v0  ;;  %v7197_v3 = vld [vmem:[%s9368_s1 + $0x68] sm:$0xff]  ;;  %v9382_v38 = vmov 1.0   ;;  %vm330_vm3 = vcmask 523264   ;;  %s7106_s30 = smov 96  }
   0x2   :  { %6125 = vmatpush3.msra.mxu1 %v7183_v1  ;;  %v7204_v4 = vld [vmem:[%s9368_s1 + $0x60] sm:$0xff]  ;;  %v55_v6 = vld [vmem:[%s9370_s6 + $0x18] sm:$0xff]  ;;  %v54_v8 = vld [vmem:[%s9370_s6 + $0x10] sm:$0xff]  ;;  %v7344_v30 = vand.u32 127, %v221_v24  ;;  %vm801_vm4 = vcmask 1041409   ;;  %vm803_vm5 = vcmask 1042434  }
   0x3   :  { %6126 = vmatprep.subr.mxu1 %v9384_v0  ;;  %v223_v5 = vld [vmem:[%s9369_s2] sm:$0xff]  ;;  %v7217_v7 = vld [vmem:[%s9368_s1 + $0x58] sm:$0xff]  ;;  %6104 = vmatprep.subr.mxu0 %v55_v6  ;;  %v7228_v9 = vld [vmem:[%s9368_s1 + $0x50] sm:$0xff]  ;;  %vm805_vm6 = vcmask 1043459   ;;  %vm807_vm7 = vcmask 1044484   ;;  %vm809_vm8 = vcmask 1045509  }
   0x4   :  { %6127 = vmatpush3.msra.mxu1 %v7188_v2  ;;  %320 = vrot.lane.b32.xlu0 %v223_v5, %s7103_s22  ;;  %v53_v10 = vld [vmem:[%s9370_s6 + $0x8] sm:$0xff]  ;;  %v52_v12 = vld [vmem:[%s9370_s6] sm:$0xff]  ;;  %v7265_v16 = vld [vmem:[%s9368_s1 + $0x38] sm:$0xff]  ;;  %vm246_vm2 = vcmp.eq.s32.totalorder %v7344_v30, 0  ;;  %vm811_vm9 = vcmask 1046534   ;;  %vm813_vm10 = vcmask 1047559  }
   0x5   :  { %6128 = vmatprep.subr.mxu1 %v9384_v0  ;;  %6105 = vmatpush3.msra.mxu0 %v55_v6  ;;  %v7238_v11 = vld [vmem:[%s9368_s1 + $0x48] sm:$0xff]  ;;  %v7248_v13 = vld [vmem:[%s9368_s1 + $0x40] sm:$0xff]  ;;  %v233_v17 = vld [vmem:[%s9372_s3 + $0x38] sm:$0xff]  ;;  %vm816_vm11 = vcmask 64512  }
   0x6   :  { %6129 = vmatpush3.msra.mxu1 %v7197_v3  ;;  %6106 = vmatprep.subr.mxu0 %v54_v8  ;;  %v7253_v14 = vld [vmem:[%s9371_s0] sm:$0xff]  ;;  %v7259_v15 = vld [vmem:[%s9371_s0 + $0x8] sm:$0xff]  ;;  %v7277_v18 = vld [vmem:[%s9368_s1 + $0x30] sm:$0xff] }
   0x7   :  { %6130 = vmatprep.subr.mxu1 %v9384_v0  ;;  %6107 = vmatpush3.msra.mxu0 %v54_v8  ;;  %v7284_v19 = vld [vmem:[%s9371_s0 + $0x10] sm:$0xff]  ;;  %v7292_v20 = vld [vmem:[%s9368_s1 + $0x28] sm:$0xff]  ;;  %v7297_v21 = vld [vmem:[%s9371_s0 + $0x18] sm:$0xff] }
   0x8   :  { %6131 = vmatpush3.msra.mxu1 %v7204_v4  ;;  %6108 = vmatprep.subr.mxu0 %v53_v10  ;;  %v232_v22 = vld [vmem:[%s9372_s3 + $0x30] sm:$0xff]  ;;  %v7309_v23 = vld [vmem:[%s9368_s1 + $0x20] sm:$0xff]  ;;  %v231_v25 = vld [vmem:[%s9372_s3 + $0x28] sm:$0xff] }
   0x9   :  { %6132 = vmatprep.subr.mxu1 %v9384_v0  ;;  %6109 = vmatpush3.msra.mxu0 %v53_v10  ;;  %v7322_v26 = vld [vmem:[%s9368_s1 + $0x18] sm:$0xff]  ;;  %v7327_v27 = vld [vmem:[%s9371_s0 + $0x20] sm:$0xff]  ;;  %v7335_v28 = vld [vmem:[%s9368_s1 + $0x10] sm:$0xff] }
   0xa   :  { %6133 = vmatpush3.msra.mxu1 %v7217_v7  ;;  %6110 = vmatprep.subr.mxu0 %v52_v12  ;;  %v7340_v29 = vld [vmem:[%s9371_s0 + $0x28] sm:$0xff]  ;;  %v230_v31 = vld [vmem:[%s9372_s3 + $0x20] sm:$0xff]  ;;  %v229_v33 = vld [vmem:[%s9372_s3 + $0x18] sm:$0xff] }
   0xb   :  { %6134 = vmatprep.subr.mxu1 %v9384_v0  ;;  %6111 = vmatpush3.msra.mxu0 %v52_v12  ;;  %v7355_v32 = vld [vmem:[%s9368_s1 + $0x8] sm:$0xff]  ;;  %v7368_v34 = vld [vmem:[%s9368_s1] sm:$0xff]  ;;  %v7373_v35 = vld [vmem:[%s9371_s0 + $0x30] sm:$0xff] }
   0xc   :  { %6135 = vmatpush3.msra.mxu1 %v7228_v9  ;;  %6112 = vmatprep.mubr.msk.f32.mxu0 %vm56_vm1, %v7253_v14  ;;  %v7382_v36 = vld [vmem:[%s9371_s0 + $0x38] sm:$0xff]  ;;  %v228_v37 = vld [vmem:[%s9372_s3 + $0x10] sm:$0xff]  ;;  %v227_v39 = vld [vmem:[%s9372_s3 + $0x8] sm:$0xff] }
   0xd   :  { %6136 = vmatprep.subr.mxu1 %v9384_v0  ;;  %6113 = vmatmul.mubr.msk.f32.vlgmr.msra.gmra.mxu0 %vm56_vm1, %v7259_v15  ;;  %v226_v40 = vld [vmem:[%s9372_s3] sm:$0xff]  ;;  %v5756_v6 = vld [vmem:[%s9372_s3 + $0x78] sm:$0xff]  ;;  %v5755_v8 = vld [vmem:[%s9372_s3 + $0x70] sm:$0xff] }
   0xe   :  { %6137 = vmatpush3.msra.mxu1 %v7238_v11  ;;  %6159 = vmatprep.subr.mxu0 %v9384_v0  ;;  %v5760_v53 = vld [vmem:[%s9373_s4] ss:$0 sm:$0xff]  ;;  %v5754_v10 = vld [vmem:[%s9372_s3 + $0x68] sm:$0xff] }
   0xf   :  { %6138 = vmatprep.subr.mxu1 %v9384_v0  ;;  %6160 = vmatpush3.msra.mxu0 %v233_v17  ;;  %v5753_v12 = vld [vmem:[%s9372_s3 + $0x60] sm:$0xff]  ;;  %v5752_v17 = vld [vmem:[%s9372_s3 + $0x58] sm:$0xff] }
  0x10   :  { %6139 = vmatpush3.msra.mxu1 %v7248_v13  ;;  %6115 = vmatprep.mubr.msk.f32.mxu0 %vm56_vm1, %v7284_v19 }
  0x11   :  { %6140 = vmatprep.subr.mxu1 %v9384_v0  ;;  %6161 = vmatprep.subr.mxu0 %v9384_v0 }
  0x12   :  { %6141 = vmatpush3.msra.mxu1 %v7265_v16  ;;  %6116 = vmatmul.mubr.msk.f32.gmra.mxu0 %vm56_vm1, %v7297_v21 }
  0x13   :  { %6142 = vmatprep.subr.mxu1 %v9384_v0  ;;  %6162 = vmatpush3.msra.mxu0 %v232_v22 }
  0x14   :  { %6143 = vmatpush3.msra.mxu1 %v7277_v18  ;;  %6163 = vmatprep.subr.mxu0 %v9384_v0 }
  0x15   :  { %6144 = vmatprep.subr.mxu1 %v9384_v0  ;;  %6164 = vmatpush3.msra.mxu0 %v231_v25  ;;  %v5751_v25 = vld [vmem:[%s9372_s3 + $0x50] sm:$0xff] }
  0x16   :  { %6145 = vmatpush3.msra.mxu1 %v7292_v20  ;;  %6118 = vmatprep.mubr.msk.f32.mxu0 %vm56_vm1, %v7327_v27 }
  0x17   :  { %6146 = vmatprep.subr.mxu1 %v9384_v0  ;;  %6165 = vmatprep.subr.mxu0 %v9384_v0 }
  0x18   :  { %6147 = vmatpush3.msra.mxu1 %v7309_v23  ;;  %6119 = vmatmul.mubr.msk.f32.gmra.mxu0 %vm56_vm1, %v7340_v29 }
  0x19   :  { %6148 = vmatprep.subr.mxu1 %v9384_v0  ;;  %6166 = vmatpush3.msra.mxu0 %v230_v31  ;;  %v5748_v31 = vld [vmem:[%s9369_s2 + $0x8] sm:$0xff] }
  0x1a   :  { %6149 = vmatpush3.msra.mxu1 %v7322_v26  ;;  %6167 = vmatprep.subr.mxu0 %v9384_v0 }
  0x1b   :  { %6150 = vmatprep.subr.mxu1 %v9384_v0  ;;  %6168 = vmatpush3.msra.mxu0 %v229_v33  ;;  %v5750_v33 = vld [vmem:[%s9372_s3 + $0x48] sm:$0xff] }
  0x1c   :  { %6151 = vmatpush3.msra.mxu1 %v7335_v28  ;;  %6121 = vmatprep.mubr.msk.f32.mxu0 %vm56_vm1, %v7373_v35 }
  0x1d   :  { %6152 = vmatprep.subr.mxu1 %v9384_v0  ;;  %6169 = vmatprep.subr.mxu0 %v9384_v0 }
  0x1e   :  { %6153 = vmatpush3.msra.mxu1 %v7355_v32  ;;  %6122 = vmatmul.mubr.msk.f32.gmra.mxu0 %vm56_vm1, %v7382_v36 }
  0x1f   :  { %6154 = vmatprep.subr.mxu1 %v9384_v0  ;;  %6170 = vmatpush3.msra.mxu0 %v228_v37  ;;  %v5749_v37 = vld [vmem:[%s9372_s3 + $0x40] sm:$0xff] }
  0x20   :  { %6155 = vmatpush3.msra.mxu1 %v7368_v34  ;;  %6175 = vmatprep.mubr.msk.f32.mxu0 %vm7102_vm0, %v9384_v0 }
  0x21   :  { %6157 = vmatmul.mubr.msk.f32.vlgmr.msra.gmra.mxu1 %vm246_vm2, %v9382_v38  ;;  %6197 = vmatprep.subr.mxu1 %v9384_v0 }
  0x22   :  { %6171 = vmatprep.subr.mxu0 %v9384_v0  ;;  %6205 = vmatprep.mubr.msk.f32.mxu1 %vm7102_vm0, %v9384_v0 }
  0x23   :  { %6172 = vmatpush3.msra.mxu0 %v227_v39 }
  0x24   :  { %6173 = vmatprep.subr.mxu0 %v9384_v0 }
  0x25   :  { %6174 = vmatpush3.msra.mxu0 %v226_v40 }
  0x26   :  { %6178 = vmatprep.subr.mxu0 %v9384_v0 }
  0x76   :  { %v7408_v41 = vpop.permute.xlu0 %320 }
  0xcd   :  { %v7415_v45 = vpop.f32.mrf.mxu0 }
  0xce   :  { %9482 = vst [vmem:[#allocation2_spill] sm:$0xff] %v7415_v45 }
  0xcf   :  { %v7417_v46 = vpop.f32.mrf.mxu0 }
  0xd0   :  { %9483 = vst [vmem:[#allocation3_spill] sm:$0xff] %v7417_v46 }
  0xd2   :  { %v7419_v47 = vpop.f32.mrf.mxu0 }
  0xd3   :  { %9484 = vst [vmem:[#allocation4_spill] sm:$0xff] %v7419_v47 }
  0xd4   :  { %v7421_v48 = vpop.f32.mrf.mxu0 }
  0xd5   :  { %9485 = vst [vmem:[#allocation5_spill] sm:$0xff] %v7421_v48 }
  0xd8   :  { %v7423_v49 = vpop.f32.mrf.mxu0 }
  0xd9   :  { %9486 = vst [vmem:[#allocation6_spill] sm:$0xff] %v7423_v49 }
  0xda   :  { %v7425_v50 = vpop.f32.mrf.mxu0 }
  0xdb   :  { %9487 = vst [vmem:[#allocation7_spill] sm:$0xff] %v7425_v50 }
  0xde   :  { %v7427_v51 = vpop.f32.mrf.mxu0 }
  0xdf   :  { %9488 = vst [vmem:[#allocation8_spill] sm:$0xff] %v7427_v51 }
  0xe0   :  { %v7429_v52 = vpop.f32.mrf.mxu0 }
  0xe1   :  { %v315_v42 = vpop.f32.mrf.mxu1  ;;  %9489 = vst [vmem:[#allocation9_spill] sm:$0xff] %v7429_v52 }
  0xe2   :  { %v323_v43 = vsel %vm56_vm1, %v315_v42, %v7408_v41 }
  0xe3   :  { %v6158_v44 = vpop.f32.mrf.mxu1  ;;  %6176 = vmatmul.mubr.msk.f32.vlgmr.msra.gmra.mxu0 %vm330_vm3, %v323_v43 }
  0xe4   :  { %6194 = vmatprep.mubr.msk.f32.mxu0 %vm7102_vm0, %v9384_v0  ;;  %6179 = vmatpush3.msra.mxu0 %v5756_v6 }
  0xe5   :  { %6180 = vmatprep.subr.mxu0 %v9384_v0 }
  0xe6   :  { %6181 = vmatpush3.msra.mxu0 %v5755_v8 }
  0xe7   :  { %6182 = vmatprep.subr.mxu0 %v9384_v0 }
  0xe8   :  { %6183 = vmatpush3.msra.mxu0 %v5754_v10  ;;  %v7490_v10 = vld [vmem:[%s9374_s5 + $0x18] sm:$0xff] }
  0xe9   :  { %6184 = vmatprep.subr.mxu0 %v9384_v0  ;;  %6198 = vmatpush3.msra.mxu1 %v7490_v10 }
  0xea   :  { %6185 = vmatpush3.msra.mxu0 %v5753_v12  ;;  %v7495_v12 = vld [vmem:[%s9374_s5 + $0x10] sm:$0xff]  ;;  %6199 = vmatprep.subr.mxu1 %v9384_v0 }
  0xeb   :  { %6186 = vmatprep.subr.mxu0 %v9384_v0  ;;  %6200 = vmatpush3.msra.mxu1 %v7495_v12 }
  0xec   :  { %6187 = vmatpush3.msra.mxu0 %v5752_v17  ;;  %v7502_v17 = vld [vmem:[%s9374_s5 + $0x8] sm:$0xff]  ;;  %6201 = vmatprep.subr.mxu1 %v9384_v0 }
  0xed   :  { %6188 = vmatprep.subr.mxu0 %v9384_v0  ;;  %6202 = vmatpush3.msra.mxu1 %v7502_v17 }
  0xee   :  { %6189 = vmatpush3.msra.mxu0 %v5751_v25  ;;  %6203 = vmatprep.subr.mxu1 %v9384_v0 }
  0xef   :  { %6190 = vmatprep.subr.mxu0 %v9384_v0 }
  0xf0   :  { %6191 = vmatpush3.msra.mxu0 %v5750_v33 }
  0xf1   :  { %6192 = vmatprep.subr.mxu0 %v9384_v0 }
  0xf2   :  { %6193 = vmatpush3.msra.mxu0 %v5749_v37 }
  0xf3   :  { %6208 = vmatprep.subr.mxu0 %v9384_v0 }
 0x1a3   :  { %v400_v54 = vpop.f32.mrf.mxu0 }
 0x1a4   :  { %v401_v55 = vadd.f32 %v5760_v53, %v400_v54 }
 0x1a5   :  { %v6177_v56 = vpop.f32.mrf.mxu0 }
 0x1a6   :  { %411 = vrot.lane.b32.xlu0 %v401_v55, %s7103_s22  ;;  %v5762_v57 = vmul.f32 -1.442695, %v401_v55  ;;  %v5763_v56 = vld [vmem:[%s9373_s4 + $0x1] ss:$0 sm:$0xff] }
 0x1a8   :  { %6719 = vpow2.f32 %v5762_v57 }
 0x1b5   :  { %v6720_v58 = vpop.eup %6719 }
 0x1b6   :  { %v407_v59 = vadd.f32 1.0, %v6720_v58 }
 0x1b8   :  { %6721 = vrcp.f32 %v407_v59 }
 0x1c5   :  { %v6722_v60 = vpop.eup %6721 }
 0x1c6   :  { %v421_v39 = vsub.f32 1.0, %v6722_v60  ;;  %v427_v42 = vmul.f32 %v6722_v60, %v7408_v41 }
 0x218   :  { %v412_v61 = vpop.permute.xlu0 %411 }
 0x219   :  { %v414_v62 = vmul.f32 %v6722_v60, %v412_v61 }
 0x21b   :  { %416 = vrot.lane.b32.xlu1 %v414_v62, %s7105_s17 }
 0x28d   :  { %v417_v63 = vpop.permute.xlu1 %416 }
 0x28e   :  { %v419_v5 = vadd.f32 %v417_v63, %v401_v55 }
 0x290   :  { %6723 = vtanh.f32 %v419_v5 }
 0x29d   :  { %v6724_v22 = vpop.eup %6723 }
 0x29e   :  { %423 = vrot.lane.b32.xlu1 %v6724_v22, %s7106_s30  ;;  %v7509_v22 = vld [vmem:[%s9374_s5] sm:$0xff] }
 0x29f   :  { %6204 = vmatpush3.msra.mxu1 %v7509_v22 }
 0x2a0   :  { %6219 = vmatprep.subr.mxu1 %v9384_v0 }
 0x2a2   :  { %434 = vrot.lane.b32.xlu1 %v5748_v31, %s7103_s22 }
 0x310   :  { %v424_v40 = vpop.permute.xlu1 %423 }
 0x311   :  { %v426_v43 = vmul.f32 %v424_v40, %v421_v39 }
 0x313   :  { %v7474_v44 = vadd.f32 %v427_v42, %v426_v43  ;;  %v210_v42 = vld [vmem:[%s9375_s8 + $0x18] sm:$0xff] }
 0x314   :  { %v435_v53 = vpop.permute.xlu1 %434 }
 0x315   :  { %430 = vrot.lane.b32.xlu0 %v7474_v44, %s7106_s30 }
 0x387   :  { %v431_v54 = vpop.permute.xlu0 %430 }
 0x388   :  { %v437_v55 = vsel %vm56_vm1, %v431_v54, %v435_v53  ;;  %v209_v54 = vld [vmem:[%s9375_s8 + $0x10] sm:$0xff] }
 0x389   :  { %6195 = vmatmul.mubr.msk.f32.vlgmr.msra.gmra.mxu0 %vm330_vm3, %v437_v55  ;;  %v207_v55 = vld [vmem:[%s9375_s8] sm:$0xff] }
 0x38a   :  { %6216 = vmatprep.mubr.msk.f32.mxu0 %vm7102_vm0, %v9384_v0 }
 0x449   :  { %v513_v41 = vpop.f32.mrf.mxu0 }
 0x44a   :  { %v514_v57 = vadd.f32 %v5763_v56, %v513_v41 }
 0x44b   :  { %v6196_v58 = vpop.f32.mrf.mxu0 }
 0x44c   :  { %524 = vrot.lane.b32.xlu0 %v514_v57, %s7103_s22  ;;  %v5765_v59 = vmul.f32 -1.442695, %v514_v57 }
 0x44e   :  { %6725 = vpow2.f32 %v5765_v59 }
 0x45b   :  { %v6726_v60 = vpop.eup %6725 }
 0x45c   :  { %v520_v61 = vadd.f32 1.0, %v6726_v60 }
 0x45e   :  { %6727 = vrcp.f32 %v520_v61 }
 0x46b   :  { %v6728_v62 = vpop.eup %6727 }
 0x46c   :  { %v534_v31 = vsub.f32 1.0, %v6728_v62  ;;  %v540_v37 = vmul.f32 %v6728_v62, %v435_v53  ;;  %v208_v53 = vld [vmem:[%s9375_s8 + $0x8] sm:$0xff] }
 0x4be   :  { %v525_v63 = vpop.permute.xlu0 %524 }
 0x4bf   :  { %v527_v5 = vmul.f32 %v6728_v62, %v525_v63 }
 0x4c1   :  { %529 = vrot.lane.b32.xlu1 %v527_v5, %s7105_s17 }
 0x533   :  { %v530_v6 = vpop.permute.xlu1 %529 }
 0x534   :  { %v532_v8 = vadd.f32 %v530_v6, %v514_v57 }
 0x536   :  { %6729 = vtanh.f32 %v532_v8 }
 0x543   :  { %v6730_v25 = vpop.eup %6729 }
 0x544   :  { %536 = vrot.lane.b32.xlu0 %v6730_v25, %s7106_s30 }
 0x5b6   :  { %v537_v33 = vpop.permute.xlu0 %536 }
 0x5b7   :  { %v539_v39 = vmul.f32 %v537_v33, %v534_v31 }
 0x5b9   :  { %v7516_v40 = vadd.f32 %v540_v37, %v539_v39 }
 0x5bb   :  { %543 = vrot.lane.b32.xlu1 %v7516_v40, %s7106_s30 }
 0x62d   :  { %v544_v43 = vpop.permute.xlu1 %543 }
 0x62e   :  { %6206 = vmatmul.mubr.msk.f32.vlgmr.msra.gmra.mxu1 %vm56_vm1, %v544_v43 }
 0x62f   :  { %6220 = vmatpush3.msra.mxu1 %v210_v42  ;;  %6227 = vmatprep.mubr.msk.f32.mxu1 %vm7102_vm0, %v9384_v0 }
 0x630   :  { %6221 = vmatprep.subr.mxu1 %v9384_v0 }
 0x631   :  { %6222 = vmatpush3.msra.mxu1 %v209_v54 }
 0x632   :  { %6223 = vmatprep.subr.mxu1 %v9384_v0 }
 0x633   :  { %6224 = vmatpush3.msra.mxu1 %v208_v53 }
 0x634   :  { %6225 = vmatprep.subr.mxu1 %v9384_v0 }
 0x635   :  { %6226 = vmatpush3.msra.mxu1 %v207_v55 }
 0x636   :  { %6228 = vmatmul.mubr.msk.f32.vlgmr.msra.gmra.mxu1 %vm56_vm1, %v544_v43  ;;  %6241 = vmatprep.subr.mxu1 %v9384_v0 }
 0x637   :  { %6242 = vmatpush3.msra.mxu1 %v7183_v1  ;;  %6273 = vmatprep.mubr.msk.f32.mxu1 %vm7102_vm0, %v9384_v0  ;;  %v7107_v1 = vmov 1966171168  }
 0x638   :  { %6243 = vmatprep.subr.mxu1 %v9384_v0 }
 0x639   :  { %6244 = vmatpush3.msra.mxu1 %v7188_v2  ;;  %v620_v2 = vunpack.c.l.s4 %v7107_v1  ;;  %v5767_v1 = vld [vmem:[%s9376_s7] ss:$0 sm:$0xff] }
 0x63a   :  { %6245 = vmatprep.subr.mxu1 %v9384_v0 }
 0x63b   :  { %6246 = vmatpush3.msra.mxu1 %v7197_v3  ;;  %v621_v3 = vunpack.c.0.s8 %v620_v2 }
 0x63c   :  { %6247 = vmatprep.subr.mxu1 %v9384_v0 }
 0x63d   :  { %6248 = vmatpush3.msra.mxu1 %v7204_v4  ;;  %v7575_v4 = vshrl.u32 %v221_v24, 7 }
 0x63e   :  { %6249 = vmatprep.subr.mxu1 %v9384_v0 }
 0x63f   :  { %6250 = vmatpush3.msra.mxu1 %v7217_v7  ;;  %v7578_v7 = vsub.s32 %v621_v3, %v7575_v4 }
 0x640   :  { %6251 = vmatprep.subr.mxu1 %v9384_v0 }
 0x641   :  { %6252 = vmatpush3.msra.mxu1 %v7228_v9  ;;  %9490 = vst [vmem:[#allocation10_spill] sm:$0xff] %v7578_v7 }
 0x642   :  { %6253 = vmatprep.subr.mxu1 %v9384_v0 }
 0x643   :  { %6254 = vmatpush3.msra.mxu1 %v7238_v11 }
 0x644   :  { %6255 = vmatprep.subr.mxu1 %v9384_v0 }
 0x645   :  { %6256 = vmatpush3.msra.mxu1 %v7248_v13 }
 0x646   :  { %6257 = vmatprep.subr.mxu1 %v9384_v0 }
 0x647   :  { %6258 = vmatpush3.msra.mxu1 %v7265_v16  ;;  %v7582_v16 = vsub.s32 0, %v7575_v4 }
 0x648   :  { %6259 = vmatprep.subr.mxu1 %v9384_v0 }
 0x649   :  { %6260 = vmatpush3.msra.mxu1 %v7277_v18 }
 0x64a   :  { %6261 = vmatprep.subr.mxu1 %v9384_v0 }
 0x64b   :  { %6262 = vmatpush3.msra.mxu1 %v7292_v20 }
 0x64c   :  { %6263 = vmatprep.subr.mxu1 %v9384_v0 }
 0x64d   :  { %6264 = vmatpush3.msra.mxu1 %v7309_v23 }
 0x64e   :  { %6265 = vmatprep.subr.mxu1 %v9384_v0 }
 0x64f   :  { %6266 = vmatpush3.msra.mxu1 %v7322_v26 }
 0x650   :  { %6267 = vmatprep.subr.mxu1 %v9384_v0 }
 0x651   :  { %6268 = vmatpush3.msra.mxu1 %v7335_v28 }
 0x652   :  { %6269 = vmatprep.subr.mxu1 %v9384_v0 }
 0x653   :  { %6270 = vmatpush3.msra.mxu1 %v7355_v32 }
 0x654   :  { %6271 = vmatprep.subr.mxu1 %v9384_v0 }
 0x655   :  { %6272 = vmatpush3.msra.mxu1 %v7368_v34 }
 0x656   :  { %6314 = vmatprep.subr.mxu1 %v9384_v0 }
 0x6ee   :  { %v613_v9 = vpop.f32.mrf.mxu1 }
 0x6ef   :  { %v618_v11 = vcombine.high %v613_v9, %v613_v9  ;;  %v625_v13 = vrot.slane %v613_v9, %v7578_v7 }
 0x6f0   :  { %v6207_v18 = vpop.f32.mrf.mxu1 }
 0x6f1   :  { %v632_v20 = vrot.slane %v618_v11, %v7578_v7  ;;  %v633_v23 = vcombine.high %v625_v13, %v625_v13  ;;  %v641_v26 = vrot.slane %v625_v13, %v7578_v7 }
 0x6f3   :  { %v634_v28 = vcombine.high %v632_v20, %v632_v20  ;;  %v648_v24 = vrot.slane %v632_v20, %v7578_v7  ;;  %v655_v32 = vrot.slane %v633_v23, %v7578_v7  ;;  %v663_v34 = vcombine.high %v641_v26, %v641_v26 }
 0x6f4   :  { %v670_v56 = vrot.slane %v641_v26, %v7582_v16 }
 0x6f5   :  { %v662_v41 = vrot.slane %v634_v28, %v7578_v7  ;;  %v664_v57 = vcombine.high %v648_v24, %v648_v24  ;;  %v665_v58 = vcombine.high %v655_v32, %v655_v32  ;;  %v674_v59 = vrot.slane %v655_v32, %v7582_v16 }
 0x6f6   :  { %v678_v60 = vrot.slane %v663_v34, %v7582_v16  ;;  %v686_v61 = vrot.slane %v648_v24, %v7582_v16  ;;  %v707_v62 = vadd.f32 %v670_v56, %v7417_v46  ;;  %v7594_v63 = vpop.f32.mrf.mxu1 }
 0x6f7   :  { %v666_v5 = vcombine.high %v662_v41, %v662_v41  ;;  %v682_v6 = vrot.slane %v665_v58, %v7582_v16  ;;  %v694_v8 = vrot.slane %v664_v57, %v7582_v16  ;;  %v690_v25 = vrot.slane %v662_v41, %v7582_v16 }
 0x6f8   :  { %v708_v31 = vadd.f32 %v7415_v45, %v674_v59  ;;  %v709_v33 = vadd.f32 %v678_v60, %v7421_v48  ;;  %6731 = vtanh.f32 %v707_v62  ;;  %v6229_v37 = vpop.f32.mrf.mxu1  ;;  %v711_v42 = vadd.f32 %v686_v61, %v7425_v50 }
 0x6f9   :  { %v710_v39 = vadd.f32 %v7419_v47, %v682_v6  ;;  %v713_v43 = vadd.f32 %v694_v8, %v7429_v52  ;;  %v698_v54 = vrot.slane %v666_v5, %v7582_v16  ;;  %v712_v53 = vadd.f32 %v7423_v49, %v690_v25 }
 0x6fa   :  { %6733 = vtanh.f32 %v708_v31  ;;  %v7620_v31 = vsub.s32 %v7344_v30, %v7575_v4 }
 0x6fb   :  { %6735 = vtanh.f32 %v709_v33  ;;  %v714_v55 = vadd.f32 %v7427_v51, %v698_v54 }
 0x6fc   :  { %6737 = vtanh.f32 %v710_v39 }
 0x6fd   :  { %6739 = vtanh.f32 %v711_v42 }
 0x6fe   :  { %6741 = vtanh.f32 %v713_v43 }
 0x6ff   :  { %6743 = vtanh.f32 %v712_v53 }
 0x700   :  { %6745 = vtanh.f32 %v714_v55 }
 0x705   :  { %v6732_v2 = vpop.eup %6731 }
 0x706   :  { %v729_v3 = vmul.f32 %v6732_v2, %v5767_v1 }
 0x707   :  { %v6734_v9 = vpop.eup %6733 }
 0x708   :  { %v6736_v11 = vpop.eup %6735  ;;  %v737_v13 = vsel %vm56_vm1, %v729_v3, 0.0  ;;  %v730_v18 = vmul.f32 %v6734_v9, %v5767_v1 }
 0x709   :  { %v6738_v20 = vpop.eup %6737  ;;  %738 = vadd.xlane.f32.xlu0 %v737_v13  ;;  %v731_v23 = vmul.f32 %v6736_v11, %v5767_v1 }
 0x70a   :  { %v6740_v26 = vpop.eup %6739  ;;  %v740_v28 = vsel %vm56_vm1, %v730_v18, 0.0  ;;  %v732_v56 = vmul.f32 %v6738_v20, %v5767_v1 }
 0x70b   :  { %741 = vadd.xlane.f32.xlu1 %v740_v28  ;;  %v733_v24 = vmul.f32 %v6740_v26, %v5767_v1  ;;  %v6742_v32 = vpop.eup %6741  ;;  %v743_v34 = vsel %vm56_vm1, %v731_v23, 0.0 }
 0x70c   :  { %v6744_v41 = vpop.eup %6743  ;;  %v735_v58 = vmul.f32 %v6742_v32, %v5767_v1  ;;  %v746_v59 = vsel %vm56_vm1, %v732_v56, 0.0 }
 0x70d   :  { %744 = vadd.xlane.f32.xlu0 %v743_v34  ;;  %v749_v57 = vsel %vm56_vm1, %v733_v24, 0.0  ;;  %v734_v60 = vmul.f32 %v6744_v41, %v5767_v1  ;;  %v6746_v61 = vpop.eup %6745  ;;  %v7108_v41 = vmov 0  }
 0x70e   :  { %v755_v62 = vsel %vm56_vm1, %v735_v58, 0.0  ;;  %v736_v6 = vmul.f32 %v6746_v61, %v5767_v1  ;;  %6718 = vset.pattern.permute.xlu1 %v7108_v41  ;;  %6717 = vset.pattern.permute.xlu0 %v7108_v41  ;;  %v7642_v58 = vsub.s32 2, %v7575_v4 }
 0x70f   :  { %750 = vadd.xlane.f32.xlu1 %v749_v57  ;;  %v752_v5 = vsel %vm56_vm1, %v734_v60, 0.0  ;;  %v7639_v57 = vsub.s32 1, %v7575_v4 }
 0x710   :  { %v758_v8 = vsel %vm56_vm1, %v736_v6, 0.0 }
 0x711   :  { %747 = vadd.xlane.f32.xlu0 %v746_v59  ;;  %v7645_v59 = vsub.s32 3, %v7575_v4 }
 0x713   :  { %756 = vadd.xlane.f32.xlu1 %v755_v62 }
 0x715   :  { %753 = vadd.xlane.f32.xlu0 %v752_v5 }
 0x719   :  { %759 = vadd.xlane.f32.xlu0 %v758_v8 }
 0x792   :  { %v739_v25 = vpop.xlane.xlu0 %738 }
 0x793   :  { %v772_v42 = vrot.slane %v739_v25, %v7620_v31 }
 0x794   :  { %v742_v33 = vpop.xlane.xlu1 %741 }
 0x795   :  { %v776_v37 = vrot.slane %v742_v33, %v7620_v31 }
 0x796   :  { %v745_v39 = vpop.xlane.xlu0 %744 }
 0x797   :  { %v780_v43 = vrot.slane %v745_v39, %v7620_v31  ;;  %v802_v54 = vsel %vm801_vm4, %v776_v37, %v772_v42  ;;  %v7651_v37 = vsub.s32 4, %v7575_v4 }
 0x798   :  { %v751_v53 = vpop.xlane.xlu1 %750 }
 0x799   :  { %v804_v2 = vsel %vm803_vm5, %v780_v43, %v802_v54  ;;  %v788_v9 = vrot.slane %v751_v53, %v7620_v31  ;;  %9491 = vst [vmem:[#allocation11_spill] sm:$0xff] %v7651_v37 }
 0x79a   :  { %v748_v55 = vpop.xlane.xlu0 %747 }
 0x79b   :  { %v784_v1 = vrot.slane %v748_v55, %v7620_v31 }
 0x79c   :  { %v757_v13 = vpop.xlane.xlu1 %756 }
 0x79d   :  { %v806_v3 = vsel %vm805_vm6, %v784_v1, %v804_v2  ;;  %v796_v26 = vrot.slane %v757_v13, %v7620_v31  ;;  %v7655_v2 = vsub.s32 5, %v7575_v4 }
 0x79e   :  { %v754_v11 = vpop.xlane.xlu0 %753  ;;  %v808_v20 = vsel %vm807_vm7, %v788_v9, %v806_v3 }
 0x79f   :  { %v792_v18 = vrot.slane %v754_v11, %v7620_v31  ;;  %9492 = vst [vmem:[#allocation12_spill] sm:$0xff] %v7655_v2 }
 0x7a1   :  { %v810_v23 = vsel %vm809_vm8, %v792_v18, %v808_v20 }
 0x7a2   :  { %v760_v28 = vpop.xlane.xlu0 %759  ;;  %v812_v32 = vsel %vm811_vm9, %v796_v26, %v810_v23 }
 0x7a3   :  { %v800_v24 = vrot.slane %v760_v28, %v7620_v31 }
 0x7a5   :  { %v814_v34 = vsel %vm813_vm10, %v800_v24, %v812_v32 }
 0x7a6   :  { %v817_v56 = vsel %vm816_vm11, %v814_v34, -inf }
 0x7a7   :  { %818 = vmax.xlane.f32.xlu1 %v817_v56 }
 0x830   :  { %v819_v60 = vpop.xlane.xlu1 %818 }
 0x831   :  { %v824_v61 = vrot.slane %v819_v60, %v7582_v16  ;;  %v828_v62 = vrot.slane %v819_v60, %v7639_v57  ;;  %v832_v5 = vrot.slane %v819_v60, %v7642_v58  ;;  %v836_v42 = vrot.slane %v819_v60, %v7645_v59 }
 0x832   :  { %v840_v3 = vrot.slane %v819_v60, %v7651_v37 }
 0x833   :  { %v861_v6 = vsub.f32 %v739_v25, %v824_v61  ;;  %v862_v8 = vsub.f32 %v742_v33, %v828_v62  ;;  %v863_v43 = vsub.f32 %v745_v39, %v832_v5  ;;  %v864_v9 = vsub.f32 %v748_v55, %v836_v42 }
 0x834   :  { %v7659_v25 = vsub.s32 6, %v7575_v4  ;;  %v844_v33 = vrot.slane %v819_v60, %v7655_v2  ;;  %v865_v20 = vsub.f32 %v751_v53, %v840_v3  ;;  %v7663_v39 = vsub.s32 7, %v7575_v4 }
 0x835   :  { %v869_v54 = vmul.f32 1.442695, %v861_v6  ;;  %v871_v1 = vmul.f32 1.442695, %v862_v8  ;;  %v873_v18 = vmul.f32 1.442695, %v863_v43 }
 0x836   :  { %9493 = vst [vmem:[#allocation13_spill] sm:$0xff] %v7659_v25  ;;  %v875_v23 = vmul.f32 1.442695, %v864_v9  ;;  %9494 = vst [vmem:[#allocation14_spill] sm:$0xff] %v7663_v39  ;;  %v848_v26 = vrot.slane %v819_v60, %v7659_v25  ;;  %v866_v24 = vsub.f32 %v754_v11, %v844_v33  ;;  %v877_v32 = vmul.f32 1.442695, %v865_v20 }
 0x837   :  { %6747 = vpow2.f32 %v869_v54  ;;  %v852_v55 = vrot.slane %v819_v60, %v7663_v39 }
 0x838   :  { %6749 = vpow2.f32 %v871_v1  ;;  %v867_v56 = vsub.f32 %v757_v13, %v848_v26  ;;  %v879_v41 = vmul.f32 1.442695, %v866_v24 }
 0x839   :  { %6751 = vpow2.f32 %v873_v18  ;;  %v868_v53 = vsub.f32 %v760_v28, %v852_v55 }
 0x83a   :  { %6753 = vpow2.f32 %v875_v23  ;;  %v881_v62 = vmul.f32 1.442695, %v867_v56 }
 0x83b   :  { %6755 = vpow2.f32 %v877_v32  ;;  %v883_v4 = vmul.f32 1.442695, %v868_v53 }
 0x83c   :  { %6757 = vpow2.f32 %v879_v41 }
 0x83d   :  { %6759 = vpow2.f32 %v881_v62 }
 0x83e   :  { %6761 = vpow2.f32 %v883_v4 }
 0x844   :  { %v6748_v34 = vpop.eup %6747 }
 0x845   :  { %v6750_v61 = vpop.eup %6749  ;;  %894 = vperm.xlu0 %6717, %v6748_v34  }
 0x846   :  { %897 = vperm.xlu1 %6718, %v6750_v61   ;;  %v6752_v5 = vpop.eup %6751 }
 0x847   :  { %v6754_v6 = vpop.eup %6753 }
 0x848   :  { %v6756_v11 = vpop.eup %6755 }
 0x849   :  { %v6758_v8 = vpop.eup %6757 }
 0x84a   :  { %900 = vperm.xlu1 %6718, %v6752_v5   ;;  %v6760_v13 = vpop.eup %6759 }
 0x84b   :  { %v6762_v60 = vpop.eup %6761 }
 0x84e   :  { %903 = vperm.xlu1 %6718, %v6754_v6  }
 0x852   :  { %906 = vperm.xlu1 %6718, %v6756_v11  }
 0x856   :  { %909 = vperm.xlu1 %6718, %v6758_v8  }
 0x85a   :  { %912 = vperm.xlu1 %6718, %v6760_v13  }
 0x85e   :  { %915 = vperm.xlu1 %6718, %v6762_v60  }
 0x8c0   :  { %v895_v1 = vpop.permute.xlu0 %894 }
 0x8c1   :  { %v898_v42 = vpop.permute.xlu1 %897  ;;  %v920_v18 = vrot.slane %v895_v1, %v7620_v31 }
 0x8c2   :  { %v924_v9 = vrot.slane %v898_v42, %v7620_v31 }
 0x8c4   :  { %v949_v24 = vsel %vm801_vm4, %v924_v9, %v920_v18 }
 0x8c5   :  { %v901_v43 = vpop.permute.xlu1 %900 }
 0x8c6   :  { %v928_v33 = vrot.slane %v901_v43, %v7620_v31 }
 0x8c8   :  { %v950_v55 = vsel %vm803_vm5, %v928_v33, %v949_v24 }
 0x8c9   :  { %v904_v28 = vpop.permute.xlu1 %903 }
 0x8ca   :  { %v932_v20 = vrot.slane %v904_v28, %v7620_v31 }
 0x8cc   :  { %v951_v41 = vsel %vm805_vm6, %v932_v20, %v950_v55 }
 0x8cd   :  { %v907_v54 = vpop.permute.xlu1 %906 }
 0x8ce   :  { %v936_v23 = vrot.slane %v907_v54, %v7620_v31 }
 0x8d0   :  { %v952_v53 = vsel %vm807_vm7, %v936_v23, %v951_v41 }
 0x8d1   :  { %v910_v3 = vpop.permute.xlu1 %909 }
 0x8d2   :  { %v940_v32 = vrot.slane %v910_v3, %v7620_v31 }
 0x8d4   :  { %v953_v42 = vsel %vm809_vm8, %v940_v32, %v952_v53 }
 0x8d5   :  { %v913_v26 = vpop.permute.xlu1 %912 }
 0x8d6   :  { %v944_v56 = vrot.slane %v913_v26, %v7620_v31 }
 0x8d8   :  { %v954_v43 = vsel %vm811_vm9, %v944_v56, %v953_v42 }
 0x8d9   :  { %v916_v62 = vpop.permute.xlu1 %915 }
 0x8da   :  { %v948_v4 = vrot.slane %v916_v62, %v7620_v31 }
 0x8dc   :  { %v955_v28 = vsel %vm813_vm10, %v948_v4, %v954_v43 }
 0x8dd   :  { %v957_v54 = vsel %vm816_vm11, %v955_v28, 0.0 }
 0x8de   :  { %958 = vadd.xlane.f32.xlu1 %v957_v54 }
 0x967   :  { %v959_v1 = vpop.xlane.xlu1 %958 }
 0x968   :  { %6763 = vrcp.f32 %v959_v1 }
 0x975   :  { %v6764_v3 = vpop.eup %6763 }
 0x976   :  { %v965_v9 = vrot.slane %v6764_v3, %v7582_v16  ;;  %v969_v33 = vrot.slane %v6764_v3, %v7639_v57  ;;  %v973_v23 = vrot.slane %v6764_v3, %v7642_v58  ;;  %v977_v24 = vrot.slane %v6764_v3, %v7645_v59 }
 0x977   :  { %v981_v55 = vrot.slane %v6764_v3, %v7651_v37  ;;  %v985_v41 = vrot.slane %v6764_v3, %v7655_v2  ;;  %v989_v53 = vrot.slane %v6764_v3, %v7659_v25  ;;  %v993_v62 = vrot.slane %v6764_v3, %v7663_v39 }
 0x978   :  { %v1002_v18 = vmul.f32 %v6748_v34, %v965_v9  ;;  %v1003_v20 = vmul.f32 %v6750_v61, %v969_v33  ;;  %v1004_v26 = vmul.f32 %v6752_v5, %v973_v23  ;;  %v1005_v32 = vmul.f32 %v6754_v6, %v977_v24  ;;  %v7694_v6 = vld [vmem:[%s9377_s9 + $0x18] sm:$0xff] }
 0x979   :  { %v1006_v56 = vmul.f32 %v6756_v11, %v981_v55  ;;  %v1007_v34 = vmul.f32 %v6758_v8, %v985_v41  ;;  %v1008_v61 = vmul.f32 %v6760_v13, %v989_v53  ;;  %v1009_v5 = vmul.f32 %v6762_v60, %v993_v62  ;;  %v7699_v11 = vld [vmem:[%s9377_s9 + $0x10] sm:$0xff]  ;;  %6209 = vmatpush3.msra.mxu0 %v7694_v6  ;;  %v7706_v8 = vld [vmem:[%s9377_s9 + $0x8] sm:$0xff]  ;;  %v7713_v13 = vld [vmem:[%s9377_s9] sm:$0xff] }
 0x97a   :  { %1012 = vperm.xlu0 %6717, %v1002_v18   ;;  %6210 = vmatprep.subr.mxu0 %v9384_v0 }
 0x97b   :  { %6211 = vmatpush3.msra.mxu0 %v7699_v11 }
 0x97c   :  { %6212 = vmatprep.subr.mxu0 %v9384_v0 }
 0x97d   :  { %6213 = vmatpush3.msra.mxu0 %v7706_v8 }
 0x97e   :  { %1017 = vperm.xlu0 %6717, %v1003_v20   ;;  %6214 = vmatprep.subr.mxu0 %v9384_v0 }
 0x97f   :  { %6215 = vmatpush3.msra.mxu0 %v7713_v13 }
 0x980   :  { %6230 = vmatprep.subr.mxu0 %v9384_v0 }
 0x982   :  { %1022 = vperm.xlu0 %6717, %v1004_v26  }
 0x986   :  { %1027 = vperm.xlu0 %6717, %v1005_v32  }
 0x98a   :  { %1032 = vperm.xlu0 %6717, %v1006_v56  }
 0x98e   :  { %1037 = vperm.xlu0 %6717, %v1007_v34  }
 0x992   :  { %1042 = vperm.xlu0 %6717, %v1008_v61  }
 0x996   :  { %1047 = vperm.xlu0 %6717, %v1009_v5  }
 0x9f5   :  { %v1013_v60 = vpop.permute.xlu0 %1012 }
 0x9f6   :  { %v1050_v28 = vmul.f32 %v1013_v60, %v7253_v14 }
 0x9f8   :  { %v1058_v18 = vsel %vm56_vm1, %v1050_v28, 0.0 }
 0x9f9   :  { %v1018_v4 = vpop.permute.xlu0 %1017  ;;  %v1059_v24 = vrot.slane %v1058_v18, 4 }
 0x9fa   :  { %v1051_v42 = vmul.f32 %v1018_v4, %v7259_v15 }
 0x9fb   :  { %v1060_v41 = vadd.f32 %v1059_v24, %v1058_v18 }
 0x9fc   :  { %v1065_v1 = vsel %vm56_vm1, %v1051_v42, 0.0 }
 0x9fd   :  { %v1023_v43 = vpop.permute.xlu0 %1022  ;;  %v1066_v20 = vrot.slane %v1065_v1, 4  ;;  %v1061_v42 = vrot.slane %v1060_v41, 2 }
 0x9fe   :  { %v1052_v54 = vmul.f32 %v1023_v43, %v7284_v19 }
 0x9ff   :  { %v1067_v55 = vadd.f32 %v1066_v20, %v1065_v1  ;;  %v1062_v20 = vadd.f32 %v1061_v42, %v1060_v41 }
 0xa00   :  { %v1072_v3 = vsel %vm56_vm1, %v1052_v54, 0.0 }
 0xa01   :  { %v1028_v9 = vpop.permute.xlu0 %1027  ;;  %v1073_v23 = vrot.slane %v1072_v3, 4 }
 0xa02   :  { %v1053_v33 = vmul.f32 %v1028_v9, %v7297_v21  ;;  %v1068_v21 = vrot.slane %v1067_v55, 2 }
 0xa03   :  { %v1074_v19 = vadd.f32 %v1073_v23, %v1072_v3 }
 0xa04   :  { %v1079_v26 = vsel %vm56_vm1, %v1053_v33, 0.0  ;;  %v1069_v3 = vadd.f32 %v1068_v21, %v1067_v55 }
 0xa05   :  { %v1080_v15 = vrot.slane %v1079_v26, 4  ;;  %v1033_v32 = vpop.permute.xlu0 %1032  ;;  %v1075_v60 = vrot.slane %v1074_v19, 2 }
 0xa06   :  { %v1054_v14 = vmul.f32 %v1033_v32, %v7327_v27 }
 0xa07   :  { %v1081_v34 = vadd.f32 %v1080_v15, %v1079_v26  ;;  %v1076_v18 = vadd.f32 %v1075_v60, %v1074_v19 }
 0xa08   :  { %v1086_v56 = vsel %vm56_vm1, %v1054_v14, 0.0  ;;  %v1070_v14 = vrot.slane %v1069_v3, 1 }
 0xa09   :  { %v1087_v53 = vrot.slane %v1086_v56, 4  ;;  %v1038_v61 = vpop.permute.xlu0 %1037  ;;  %v1082_v43 = vrot.slane %v1081_v34, 2 }
 0xa0a   :  { %v1055_v62 = vmul.f32 %v1038_v61, %v7340_v29  ;;  %v1077_v61 = vrot.slane %v1076_v18, 1 }
 0xa0b   :  { %v1088_v5 = vadd.f32 %v1087_v53, %v1086_v56  ;;  %v1083_v23 = vadd.f32 %v1082_v43, %v1081_v34 }
 0xa0c   :  { %v1093_v4 = vsel %vm56_vm1, %v1055_v62, 0.0  ;;  %v1078_v43 = vadd.f32 %v1077_v61, %v1076_v18  ;;  %v7767_v61 = vld [vmem:[%s9378_s11] sm:$0xff] }
 0xa0d   :  { %v1094_v28 = vrot.slane %v1093_v4, 4  ;;  %v1043_v54 = vpop.permute.xlu0 %1042  ;;  %v1089_v27 = vrot.slane %v1088_v5, 2  ;;  %v1084_v55 = vrot.slane %v1083_v23, 1 }
 0xa0e   :  { %v1056_v1 = vmul.f32 %v1043_v54, %v7373_v35  ;;  %v1063_v35 = vrot.slane %v1062_v20, 1 }
 0xa0f   :  { %v1095_v9 = vadd.f32 %v1094_v28, %v1093_v4  ;;  %v1090_v15 = vadd.f32 %v1089_v27, %v1088_v5  ;;  %v1071_v4 = vadd.f32 %v1070_v14, %v1069_v3  ;;  %v1085_v5 = vadd.f32 %v1084_v55, %v1083_v23 }
 0xa10   :  { %v1100_v33 = vsel %vm56_vm1, %v1056_v1, 0.0  ;;  %v1064_v28 = vadd.f32 %v1063_v35, %v1062_v20 }
 0xa11   :  { %v1096_v29 = vrot.slane %v1095_v9, 2  ;;  %v1101_v26 = vrot.slane %v1100_v33, 4  ;;  %v1048_v24 = vpop.permute.xlu0 %1047  ;;  %v1091_v60 = vrot.slane %v1090_v15, 1 }
 0xa12   :  { %v1057_v32 = vmul.f32 %v1048_v24, %v7382_v36  ;;  %v1122_v1 = vsel %vm801_vm4, %v1071_v4, %v1064_v28  ;;  %v7784_v4 = vld [vmem:[%s9372_s3 + $0x38] sm:$0xff]  ;;  %v7828_v28 = vld [vmem:[%s9372_s3 + $0x8] sm:$0xff] }
 0xa13   :  { %v1097_v56 = vadd.f32 %v1096_v29, %v1095_v9  ;;  %v1102_v53 = vadd.f32 %v1101_v26, %v1100_v33  ;;  %v1092_v27 = vadd.f32 %v1091_v60, %v1090_v15  ;;  %v1123_v29 = vsel %vm803_vm5, %v1078_v43, %v1122_v1  ;;  %v7748_v15 = vld [vmem:[%s9378_s11 + $0x18] sm:$0xff]  ;;  %v7821_v43 = vld [vmem:[%s9372_s3 + $0x10] sm:$0xff] }
 0xa14   :  { %v1107_v62 = vsel %vm56_vm1, %v1057_v32, 0.0  ;;  %v1124_v24 = vsel %vm805_vm6, %v1085_v5, %v1123_v29  ;;  %v7835_v5 = vld [vmem:[%s9372_s3] sm:$0xff] }
 0xa15   :  { %v1103_v21 = vrot.slane %v1102_v53, 2  ;;  %v1108_v19 = vrot.slane %v1107_v62, 4  ;;  %v1098_v41 = vrot.slane %v1097_v56, 1  ;;  %v1125_v3 = vsel %vm807_vm7, %v1092_v27, %v1124_v24 }
 0xa17   :  { %v1104_v34 = vadd.f32 %v1103_v21, %v1102_v53  ;;  %v1109_v42 = vadd.f32 %v1108_v19, %v1107_v62  ;;  %v1099_v9 = vadd.f32 %v1098_v41, %v1097_v56  ;;  %v7753_v56 = vld [vmem:[%s9378_s11 + $0x10] sm:$0xff]  ;;  %v7760_v53 = vld [vmem:[%s9378_s11 + $0x8] sm:$0xff]  ;;  %v7776_v62 = vld [vmem:[%s9379_s10] ss:$0 sm:$0xff] }
 0xa18   :  { %v7800_v41 = vld [vmem:[%s9372_s3 + $0x28] sm:$0xff] }
 0xa19   :  { %v1105_v54 = vrot.slane %v1104_v34, 1  ;;  %v1110_v36 = vrot.slane %v1109_v42, 2  ;;  %v1126_v18 = vsel %vm809_vm8, %v1099_v9, %v1125_v3 }
 0xa1b   :  { %v1111_v33 = vadd.f32 %v1110_v36, %v1109_v42  ;;  %v1106_v26 = vadd.f32 %v1105_v54, %v1104_v34  ;;  %v7807_v34 = vld [vmem:[%s9372_s3 + $0x20] sm:$0xff]  ;;  %v7814_v42 = vld [vmem:[%s9372_s3 + $0x18] sm:$0xff] }
 0xa1c   :  { %v7842_v54 = vld [vmem:[%s9380_s12] ss:$0 sm:$0xff] }
 0xa1d   :  { %v1112_v32 = vrot.slane %v1111_v33, 1  ;;  %v1127_v20 = vsel %vm811_vm9, %v1106_v26, %v1126_v18 }
 0xa1f   :  { %v1113_v14 = vadd.f32 %v1112_v32, %v1111_v33 }
 0xa21   :  { %v1128_v23 = vsel %vm813_vm10, %v1113_v14, %v1127_v20 }
 0xa22   :  { %6217 = vmatmul.mubr.msk.f32.vlgmr.msra.gmra.mxu0 %vm56_vm1, %v1128_v23 }
 0xa23   :  { %6238 = vmatprep.mubr.msk.f32.mxu0 %vm7102_vm0, %v9384_v0  ;;  %6231 = vmatpush3.msra.mxu0 %v7748_v15 }
 0xa24   :  { %6232 = vmatprep.subr.mxu0 %v9384_v0 }
 0xa25   :  { %6233 = vmatpush3.msra.mxu0 %v7753_v56 }
 0xa26   :  { %6234 = vmatprep.subr.mxu0 %v9384_v0 }
 0xa27   :  { %6235 = vmatpush3.msra.mxu0 %v7760_v53 }
 0xa28   :  { %6236 = vmatprep.subr.mxu0 %v9384_v0 }
 0xa29   :  { %6237 = vmatpush3.msra.mxu0 %v7767_v61 }
 0xa2a   :  { %6276 = vmatprep.subr.mxu0 %v9384_v0 }
 0xae2   :  { %v1197_v35 = vpop.f32.mrf.mxu0 }
 0xae3   :  { %v1268_v55 = vadd.f32 %v7594_v63, %v1197_v35  ;;  %v7793_v63 = vld [vmem:[%s9372_s3 + $0x30] sm:$0xff] }
 0xae4   :  { %v6218_v21 = vpop.f32.mrf.mxu0 }
 0xae5   :  { %v1277_v19 = vadd.f32 %v7776_v62, %v1268_v55 }
 0xae7   :  { %6765 = vtanh.f32 %v1277_v19 }
 0xaf4   :  { %v6766_v60 = vpop.eup %6765 }
 0xaf5   :  { %6239 = vmatmul.mubr.msk.f32.vlgmr.msra.gmra.mxu0 %vm56_vm1, %v6766_v60  ;;  %v7894_v60 = vld [vmem:[%s9372_s3 + $0x60] sm:$0xff] }
 0xaf6   :  { %6277 = vmatpush3.msra.mxu0 %v7784_v4  ;;  %6292 = vmatprep.mubr.msk.f32.mxu0 %vm7102_vm0, %v9384_v0 }
 0xaf7   :  { %6278 = vmatprep.subr.mxu0 %v9384_v0 }
 0xaf8   :  { %6279 = vmatpush3.msra.mxu0 %v7793_v63 }
 0xaf9   :  { %6280 = vmatprep.subr.mxu0 %v9384_v0 }
 0xafa   :  { %6281 = vmatpush3.msra.mxu0 %v7800_v41 }
 0xafb   :  { %6282 = vmatprep.subr.mxu0 %v9384_v0 }
 0xafc   :  { %6283 = vmatpush3.msra.mxu0 %v7807_v34 }
 0xafd   :  { %6284 = vmatprep.subr.mxu0 %v9384_v0 }
 0xafe   :  { %6285 = vmatpush3.msra.mxu0 %v7814_v42 }
 0xaff   :  { %6286 = vmatprep.subr.mxu0 %v9384_v0 }
 0xb00   :  { %6287 = vmatpush3.msra.mxu0 %v7821_v43 }
 0xb01   :  { %6288 = vmatprep.subr.mxu0 %v9384_v0 }
 0xb02   :  { %6289 = vmatpush3.msra.mxu0 %v7828_v28 }
 0xb03   :  { %6290 = vmatprep.subr.mxu0 %v9384_v0 }
 0xb04   :  { %6291 = vmatpush3.msra.mxu0 %v7835_v5 }
 0xb05   :  { %6295 = vmatprep.subr.mxu0 %v9384_v0 }
 0xbb5   :  { %v1354_v36 = vpop.f32.mrf.mxu0 }
 0xbb6   :  { %v7845_v27 = vadd.f32 %v7842_v54, %v1354_v36  ;;  %v7901_v36 = vld [vmem:[%s9372_s3 + $0x58] sm:$0xff] }
 0xbb7   :  { %v6240_v1 = vpop.f32.mrf.mxu0 }
 0xbb8   :  { %9495 = vst [vmem:[#allocation15_spill] sm:$0xff] %v7845_v27  ;;  %1358 = vmax.xlane.f32.xlu0 %v7845_v27  ;;  %v7908_v1 = vld [vmem:[%s9372_s3 + $0x50] sm:$0xff] }
 0xc41   :  { %v7848_v9 = vpop.xlane.xlu0 %1358 }
 0xc42   :  { %9496 = vst [vmem:[#allocation16_spill] sm:$0xff] %v7848_v9  ;;  %vm1360_vm12 = vcmp.eq.f32.partialorder %v7845_v27, %v7848_v9  ;;  %v8088_v27 = vld [vmem:[%s9368_s1 + $0x18] sm:$0xff]  ;;  %v8095_v9 = vld [vmem:[%s9368_s1 + $0x10] sm:$0xff] }
 0xc43   :  { %v1361_v33 = vsel %vm1360_vm12, %v7344_v30, 128  ;;  %9516 = vst [vmem:[#allocation35_spill] sm:$0xff] %v8088_v27  ;;  %9517 = vst [vmem:[#allocation36_spill] sm:$0xff] %v8095_v9 }
 0xc44   :  { %v1363_v29 = vshra.s32 %v1361_v33, 16  ;;  %v1362_v24 = vand.u32 65535, %v1361_v33  ;;  %v7915_v33 = vld [vmem:[%s9372_s3 + $0x48] sm:$0xff] }
 0xc46   :  { %v1365_v26 = vcvt.s32.f32 %v1363_v29  ;;  %v1364_v3 = vcvt.s32.f32 %v1362_v24  ;;  %v7922_v29 = vld [vmem:[%s9372_s3 + $0x40] sm:$0xff] }
 0xc47   :  { %v7929_v24 = vld [vmem:[%s9373_s4] ss:$0 sm:$0xff] }
 0xc48   :  { %1366 = vmin.xlane.f32.xlu1 %v1365_v26 }
 0xcd1   :  { %v1367_v32 = vpop.xlane.xlu1 %1366 }
 0xcd2   :  { %vm1368_vm13 = vcmp.eq.f32.partialorder %v1365_v26, %v1367_v32  ;;  %v1373_v18 = vcvt.f32.s32 %v1367_v32 }
 0xcd3   :  { %v1369_v14 = vsel %vm1368_vm13, %v1364_v3, inf }
 0xcd4   :  { %1370 = vmin.xlane.f32.xlu1 %v1369_v14  ;;  %v1374_v23 = vshll.u32 %v1373_v18, 16 }
 0xd5d   :  { %v1371_v20 = vpop.xlane.xlu1 %1370 }
 0xd5e   :  { %v1372_v35 = vcvt.f32.s32 %v1371_v20 }
 0xd60   :  { %v1375_v55 = vadd.s32 %v1374_v23, %v1372_v35 }
 0xd62   :  { %vm1384_vm14 = vcmp.eq.s32.totalorder %v7344_v30, %v1375_v55 }
 0xd63   :  { %6274 = vmatmul.mubr.msk.f32.vlgmr.msra.gmra.mxu1 %vm1384_vm14, %v9382_v38 }
 0xd64   :  { %6315 = vmatpush3.msra.mxu1 %v7490_v10  ;;  %6322 = vmatprep.mubr.msk.f32.mxu1 %vm7102_vm0, %v9384_v0 }
 0xd65   :  { %6316 = vmatprep.subr.mxu1 %v9384_v0 }
 0xd66   :  { %6317 = vmatpush3.msra.mxu1 %v7495_v12  ;;  %v7871_v12 = vld [vmem:[%s9372_s3 + $0x78] sm:$0xff] }
 0xd67   :  { %6318 = vmatprep.subr.mxu1 %v9384_v0 }
 0xd68   :  { %6319 = vmatpush3.msra.mxu1 %v7502_v17  ;;  %v7880_v17 = vld [vmem:[%s9372_s3 + $0x70] sm:$0xff] }
 0xd69   :  { %6320 = vmatprep.subr.mxu1 %v9384_v0 }
 0xd6a   :  { %6321 = vmatpush3.msra.mxu1 %v7509_v22  ;;  %v7887_v22 = vld [vmem:[%s9372_s3 + $0x68] sm:$0xff] }
 0xd6b   :  { %6336 = vmatprep.subr.mxu1 %v9384_v0 }
 0xe23   :  { %v1453_v21 = vpop.f32.mrf.mxu1 }
 0xe24   :  { %v1457_v10 = vsel %vm56_vm1, %v1453_v21, %v7474_v44 }
 0xe25   :  { %v6275_v19 = vpop.f32.mrf.mxu1  ;;  %6293 = vmatmul.mubr.msk.f32.vlgmr.msra.gmra.mxu0 %vm330_vm3, %v1457_v10 }
 0xe26   :  { %6296 = vmatpush3.msra.mxu0 %v7871_v12  ;;  %6311 = vmatprep.mubr.msk.f32.mxu0 %vm7102_vm0, %v9384_v0 }
 0xe27   :  { %6297 = vmatprep.subr.mxu0 %v9384_v0 }
 0xe28   :  { %6298 = vmatpush3.msra.mxu0 %v7880_v17 }
 0xe29   :  { %6299 = vmatprep.subr.mxu0 %v9384_v0 }
 0xe2a   :  { %6300 = vmatpush3.msra.mxu0 %v7887_v22 }
 0xe2b   :  { %6301 = vmatprep.subr.mxu0 %v9384_v0 }
 0xe2c   :  { %6302 = vmatpush3.msra.mxu0 %v7894_v60 }
 0xe2d   :  { %6303 = vmatprep.subr.mxu0 %v9384_v0 }
 0xe2e   :  { %6304 = vmatpush3.msra.mxu0 %v7901_v36 }
 0xe2f   :  { %6305 = vmatprep.subr.mxu0 %v9384_v0 }
 0xe30   :  { %6306 = vmatpush3.msra.mxu0 %v7908_v1 }
 0xe31   :  { %6307 = vmatprep.subr.mxu0 %v9384_v0 }
 0xe32   :  { %6308 = vmatpush3.msra.mxu0 %v7915_v33 }
 0xe33   :  { %6309 = vmatprep.subr.mxu0 %v9384_v0 }
 0xe34   :  { %6310 = vmatpush3.msra.mxu0 %v7922_v29 }
 0xe35   :  { %6325 = vmatprep.subr.mxu0 %v9384_v0 }
 0xee5   :  { %v1527_v26 = vpop.f32.mrf.mxu0 }
 0xee6   :  { %v1528_v32 = vadd.f32 %v7929_v24, %v1527_v26 }
 0xee7   :  { %v6294_v3 = vpop.f32.mrf.mxu0 }
 0xee8   :  { %1538 = vrot.lane.b32.xlu1 %v1528_v32, %s7103_s22  ;;  %v5776_v14 = vmul.f32 -1.442695, %v1528_v32 }
 0xeea   :  { %6767 = vpow2.f32 %v5776_v14 }
 0xef7   :  { %v6768_v18 = vpop.eup %6767 }
 0xef8   :  { %v1534_v20 = vadd.f32 1.0, %v6768_v18 }
 0xefa   :  { %6769 = vrcp.f32 %v1534_v20 }
 0xf07   :  { %v6770_v23 = vpop.eup %6769 }
 0xf08   :  { %v1548_v26 = vsub.f32 1.0, %v6770_v23  ;;  %v1554_v38 = vmul.f32 %v6770_v23, %v7474_v44 }
 0xf5a   :  { %v1539_v35 = vpop.permute.xlu1 %1538 }
 0xf5b   :  { %v1541_v55 = vmul.f32 %v6770_v23, %v1539_v35 }
 0xf5d   :  { %1543 = vrot.lane.b32.xlu1 %v1541_v55, %s7105_s17 }
 0xfcf   :  { %v1544_v21 = vpop.permute.xlu1 %1543 }
 0xfd0   :  { %v1546_v10 = vadd.f32 %v1544_v21, %v1528_v32  ;;  %v9497_v32 = vmov 0.0  }
 0xfd2   :  { %6771 = vtanh.f32 %v1546_v10 }
 0xfdf   :  { %v6772_v19 = vpop.eup %6771 }
 0xfe0   :  { %1550 = vrot.lane.b32.xlu0 %v6772_v19, %s7106_s30 }
0x1052   :  { %v1551_v3 = vpop.permute.xlu0 %1550 }
0x1053   :  { %v1553_v0 = vmul.f32 %v1551_v3, %v1548_v26 }
0x1055   :  { %v7936_v14 = vadd.f32 %v1554_v38, %v1553_v0  ;;  %v7956_v38 = vld [vmem:[%s9373_s4 + $0x1] ss:$0 sm:$0xff] }
0x1056   :  { %9498 = vst [vmem:[#allocation17_spill] sm:$0xff] %v7956_v38 }
0x1057   :  { %1557 = vrot.lane.b32.xlu1 %v7936_v14, %s7106_s30 }
0x10c9   :  { %v1558_v18 = vpop.permute.xlu1 %1557 }
0x10ca   :  { %v1560_v20 = vsel %vm56_vm1, %v1558_v18, %v7516_v40 }
0x10cb   :  { %6312 = vmatmul.mubr.msk.f32.vlgmr.msra.gmra.mxu0 %vm330_vm3, %v1560_v20 }
0x10cc   :  { %6326 = vmatpush3.msra.mxu0 %v7694_v6  ;;  %6333 = vmatprep.mubr.msk.f32.mxu0 %vm7102_vm0, %v9497_v32 }
0x10cd   :  { %6327 = vmatprep.subr.mxu0 %v9497_v32 }
0x10ce   :  { %6328 = vmatpush3.msra.mxu0 %v7699_v11 }
0x10cf   :  { %6329 = vmatprep.subr.mxu0 %v9497_v32 }
0x10d0   :  { %6330 = vmatpush3.msra.mxu0 %v7706_v8 }
0x10d1   :  { %6331 = vmatprep.subr.mxu0 %v9497_v32 }
0x10d2   :  { %6332 = vmatpush3.msra.mxu0 %v7713_v13 }
0x10d3   :  { %6347 = vmatprep.subr.mxu0 %v9497_v32 }
0x118b   :  { %v1630_v0 = vpop.f32.mrf.mxu0 }
0x118c   :  { %v1631_v44 = vadd.f32 %v7956_v38, %v1630_v0 }
0x118d   :  { %v6313_v6 = vpop.f32.mrf.mxu0 }
0x118e   :  { %1641 = vrot.lane.b32.xlu1 %v1631_v44, %s7103_s22  ;;  %v5778_v11 = vmul.f32 -1.442695, %v1631_v44 }
0x1190   :  { %6773 = vpow2.f32 %v5778_v11  ;;  %v7987_v11 = vld [vmem:[%s9375_s8 + $0x8] sm:$0xff] }
0x1191   :  { %9502 = vst [vmem:[#allocation21_spill] sm:$0xff] %v7987_v11 }
0x119d   :  { %v6774_v8 = vpop.eup %6773 }
0x119e   :  { %v1637_v23 = vadd.f32 1.0, %v6774_v8  ;;  %v7994_v8 = vld [vmem:[%s9375_s8] sm:$0xff] }
0x119f   :  { %9503 = vst [vmem:[#allocation22_spill] sm:$0xff] %v7994_v8 }
0x11a0   :  { %6775 = vrcp.f32 %v1637_v23  ;;  %v8002_v23 = vld [vmem:[%s9368_s1 + $0x78] sm:$0xff] }
0x11a1   :  { %9504 = vst [vmem:[#allocation23_spill] sm:$0xff] %v8002_v23 }
0x11ad   :  { %v6776_v35 = vpop.eup %6775 }
0x11ae   :  { %v1651_v26 = vsub.f32 1.0, %v6776_v35  ;;  %v1657_v18 = vmul.f32 %v6776_v35, %v7516_v40  ;;  %v7980_v40 = vld [vmem:[%s9375_s8 + $0x10] sm:$0xff] }
0x11af   :  { %9501 = vst [vmem:[#allocation20_spill] sm:$0xff] %v7980_v40 }
0x1200   :  { %v1642_v13 = vpop.permute.xlu1 %1641 }
0x1201   :  { %v1644_v55 = vmul.f32 %v6776_v35, %v1642_v13  ;;  %v8011_v35 = vld [vmem:[%s9368_s1 + $0x70] sm:$0xff]  ;;  %v8018_v13 = vld [vmem:[%s9368_s1 + $0x68] sm:$0xff] }
0x1202   :  { %9505 = vst [vmem:[#allocation24_spill] sm:$0xff] %v8011_v35  ;;  %9506 = vst [vmem:[#allocation25_spill] sm:$0xff] %v8018_v13 }
0x1203   :  { %1646 = vrot.lane.b32.xlu1 %v1644_v55, %s7105_s17  ;;  %v8025_v55 = vld [vmem:[%s9368_s1 + $0x60] sm:$0xff] }
0x1204   :  { %9507 = vst [vmem:[#allocation26_spill] sm:$0xff] %v8025_v55 }
0x1275   :  { %v1647_v21 = vpop.permute.xlu1 %1646 }
0x1276   :  { %v1649_v10 = vadd.f32 %v1647_v21, %v1631_v44  ;;  %v7971_v44 = vld [vmem:[%s9375_s8 + $0x18] sm:$0xff] }
0x1277   :  { %9500 = vst [vmem:[#allocation19_spill] sm:$0xff] %v7971_v44  ;;  %v8032_v21 = vld [vmem:[%s9368_s1 + $0x58] sm:$0xff] }
0x1278   :  { %6777 = vtanh.f32 %v1649_v10  ;;  %9508 = vst [vmem:[#allocation27_spill] sm:$0xff] %v8032_v21  ;;  %v8039_v10 = vld [vmem:[%s9368_s1 + $0x50] sm:$0xff] }
0x1279   :  { %9509 = vst [vmem:[#allocation28_spill] sm:$0xff] %v8039_v10 }
0x1285   :  { %v6778_v19 = vpop.eup %6777 }
0x1286   :  { %1653 = vrot.lane.b32.xlu1 %v6778_v19, %s7106_s30  ;;  %v8046_v19 = vld [vmem:[%s9368_s1 + $0x48] sm:$0xff] }
0x1287   :  { %9510 = vst [vmem:[#allocation29_spill] sm:$0xff] %v8046_v19 }
0x12f8   :  { %v1654_v3 = vpop.permute.xlu1 %1653 }
0x12f9   :  { %v1656_v20 = vmul.f32 %v1654_v3, %v1651_v26  ;;  %v8053_v26 = vld [vmem:[%s9368_s1 + $0x40] sm:$0xff]  ;;  %v8060_v3 = vld [vmem:[%s9368_s1 + $0x38] sm:$0xff] }
0x12fa   :  { %9511 = vst [vmem:[#allocation30_spill] sm:$0xff] %v8053_v26  ;;  %9512 = vst [vmem:[#allocation31_spill] sm:$0xff] %v8060_v3 }
0x12fb   :  { %v7963_v0 = vadd.f32 %v1657_v18, %v1656_v20  ;;  %v8067_v18 = vld [vmem:[%s9368_s1 + $0x30] sm:$0xff]  ;;  %v8074_v20 = vld [vmem:[%s9368_s1 + $0x28] sm:$0xff] }
0x12fc   :  { %9513 = vst [vmem:[#allocation32_spill] sm:$0xff] %v8067_v18  ;;  %9514 = vst [vmem:[#allocation33_spill] sm:$0xff] %v8074_v20 }
0x12fd   :  { %9499 = vst [vmem:[#allocation18_spill] sm:$0xff] %v7963_v0  ;;  %1660 = vrot.lane.b32.xlu1 %v7963_v0, %s7106_s30 }
0x136f   :  { %v1661_v6 = vpop.permute.xlu1 %1660 }
0x1370   :  { %6323 = vmatmul.mubr.msk.f32.vlgmr.msra.gmra.mxu1 %vm56_vm1, %v1661_v6 }
0x1371   :  { %6337 = vmatpush3.msra.mxu1 %v7971_v44  ;;  %6344 = vmatprep.mubr.msk.f32.mxu1 %vm7102_vm0, %v9497_v32 }
0x1372   :  { %6338 = vmatprep.subr.mxu1 %v9497_v32 }
0x1373   :  { %6339 = vmatpush3.msra.mxu1 %v7980_v40 }
0x1374   :  { %6340 = vmatprep.subr.mxu1 %v9497_v32 }
0x1375   :  { %6341 = vmatpush3.msra.mxu1 %v7987_v11 }
0x1376   :  { %6342 = vmatprep.subr.mxu1 %v9497_v32 }
0x1377   :  { %6343 = vmatpush3.msra.mxu1 %v7994_v8 }
0x1378   :  { %6345 = vmatmul.mubr.msk.f32.vlgmr.msra.gmra.mxu1 %vm56_vm1, %v1661_v6  ;;  %6358 = vmatprep.subr.mxu1 %v9497_v32  ;;  %v8081_v6 = vld [vmem:[%s9368_s1 + $0x20] sm:$0xff] }
0x1379   :  { %6359 = vmatpush3.msra.mxu1 %v8002_v23  ;;  %6390 = vmatprep.mubr.msk.f32.mxu1 %vm7102_vm0, %v9497_v32  ;;  %9515 = vst [vmem:[#allocation34_spill] sm:$0xff] %v8081_v6 }
0x137a   :  { %6360 = vmatprep.subr.mxu1 %v9497_v32 }
0x137b   :  { %6361 = vmatpush3.msra.mxu1 %v8011_v35 }
0x137c   :  { %6362 = vmatprep.subr.mxu1 %v9497_v32 }
0x137d   :  { %6363 = vmatpush3.msra.mxu1 %v8018_v13 }
0x137e   :  { %6364 = vmatprep.subr.mxu1 %v9497_v32 }
0x137f   :  { %6365 = vmatpush3.msra.mxu1 %v8025_v55 }
0x1380   :  { %6366 = vmatprep.subr.mxu1 %v9497_v32 }
0x1381   :  { %6367 = vmatpush3.msra.mxu1 %v8032_v21 }
0x1382   :  { %6368 = vmatprep.subr.mxu1 %v9497_v32 }
0x1383   :  { %6369 = vmatpush3.msra.mxu1 %v8039_v10 }
0x1384   :  { %6370 = vmatprep.subr.mxu1 %v9497_v32 }
0x1385   :  { %6371 = vmatpush3.msra.mxu1 %v8046_v19 }
0x1386   :  { %6372 = vmatprep.subr.mxu1 %v9497_v32 }
0x1387   :  { %6373 = vmatpush3.msra.mxu1 %v8053_v26 }
0x1388   :  { %6374 = vmatprep.subr.mxu1 %v9497_v32 }
0x1389   :  { %6375 = vmatpush3.msra.mxu1 %v8060_v3 }
0x138a   :  { %6376 = vmatprep.subr.mxu1 %v9497_v32 }
0x138b   :  { %6377 = vmatpush3.msra.mxu1 %v8067_v18 }
0x138c   :  { %6378 = vmatprep.subr.mxu1 %v9497_v32 }
0x138d   :  { %6379 = vmatpush3.msra.mxu1 %v8074_v20 }
0x138e   :  { %6380 = vmatprep.subr.mxu1 %v9497_v32 }
0x138f   :  { %6381 = vmatpush3.msra.mxu1 %v8081_v6  ;;  %v8102_v6 = vld [vmem:[%s9368_s1 + $0x8] sm:$0xff] }
0x1390   :  { %6382 = vmatprep.subr.mxu1 %v9497_v32  ;;  %9518 = vst [vmem:[#allocation37_spill] sm:$0xff] %v8102_v6 }
0x1391   :  { %6383 = vmatpush3.msra.mxu1 %v8088_v27  ;;  %v8109_v27 = vld [vmem:[%s9368_s1] sm:$0xff] }
0x1392   :  { %6384 = vmatprep.subr.mxu1 %v9497_v32  ;;  %9519 = vst [vmem:[#allocation38_spill] sm:$0xff] %v8109_v27 }
0x1393   :  { %6385 = vmatpush3.msra.mxu1 %v8095_v9 }
0x1394   :  { %6386 = vmatprep.subr.mxu1 %v9497_v32 }
0x1395   :  { %6387 = vmatpush3.msra.mxu1 %v8102_v6 }
0x1396   :  { %6388 = vmatprep.subr.mxu1 %v9497_v32 }
0x1397   :  { %6389 = vmatpush3.msra.mxu1 %v8109_v27 }
0x1398   :  { %6431 = vmatprep.subr.mxu1 %v9497_v32 }
0x1430   :  { %v1730_v9 = vpop.f32.mrf.mxu1 }
0x1431   :  { %v1735_v20 = vcombine.high %v1730_v9, %v1730_v9  ;;  %v1742_v18 = vrot.slane %v1730_v9, %v7578_v7 }
0x1432   :  { %v6324_v3 = vpop.f32.mrf.mxu1 }
0x1433   :  { %v1749_v26 = vrot.slane %v1735_v20, %v7578_v7  ;;  %v1750_v19 = vcombine.high %v1742_v18, %v1742_v18  ;;  %v1758_v6 = vrot.slane %v1742_v18, %v7578_v7 }
0x1435   :  { %v1751_v10 = vcombine.high %v1749_v26, %v1749_v26  ;;  %v1765_v21 = vrot.slane %v1749_v26, %v7578_v7  ;;  %v1772_v55 = vrot.slane %v1750_v19, %v7578_v7  ;;  %v1780_v13 = vcombine.high %v1758_v6, %v1758_v6 }
0x1436   :  { %v1787_v27 = vrot.slane %v1758_v6, %v7582_v16 }
0x1437   :  { %v1779_v35 = vrot.slane %v1751_v10, %v7578_v7  ;;  %v1782_v23 = vcombine.high %v1772_v55, %v1772_v55  ;;  %v1791_v8 = vrot.slane %v1772_v55, %v7582_v16  ;;  %v1781_v9 = vcombine.high %v1765_v21, %v1765_v21 }
0x1438   :  { %v1795_v3 = vrot.slane %v1780_v13, %v7582_v16  ;;  %v1803_v20 = vrot.slane %v1765_v21, %v7582_v16  ;;  %v1824_v18 = vadd.f32 %v1787_v27, %v7417_v46  ;;  %v8124_v11 = vpop.f32.mrf.mxu1 }
0x1439   :  { %v1783_v26 = vcombine.high %v1779_v35, %v1779_v35  ;;  %v1799_v19 = vrot.slane %v1782_v23, %v7582_v16  ;;  %v1807_v40 = vrot.slane %v1779_v35, %v7582_v16  ;;  %v1825_v6 = vadd.f32 %v7415_v45, %v1791_v8 }
0x143a   :  { %v1826_v10 = vadd.f32 %v1795_v3, %v7421_v48  ;;  %6779 = vtanh.f32 %v1824_v18  ;;  %v6346_v55 = vpop.f32.mrf.mxu1  ;;  %v1828_v21 = vadd.f32 %v1803_v20, %v7425_v50  ;;  %v1811_v27 = vrot.slane %v1781_v9, %v7582_v16  ;;  %v8140_v3 = vld [vmem:[%s9376_s7] ss:$0 sm:$0xff] }
0x143b   :  { %v1815_v7 = vrot.slane %v1783_v26, %v7582_v16  ;;  %v1827_v13 = vadd.f32 %v7419_v47, %v1799_v19  ;;  %v1829_v46 = vadd.f32 %v7423_v49, %v1807_v40  ;;  %6781 = vtanh.f32 %v1825_v6  ;;  %9520 = vst [vmem:[#allocation39_spill] sm:$0xff] %v8140_v3 }
0x143c   :  { %6783 = vtanh.f32 %v1826_v10  ;;  %v1830_v8 = vadd.f32 %v1811_v27, %v7429_v52 }
0x143d   :  { %v1831_v23 = vadd.f32 %v7427_v51, %v1815_v7  ;;  %6785 = vtanh.f32 %v1827_v13 }
0x143e   :  { %6787 = vtanh.f32 %v1828_v21 }
0x143f   :  { %6789 = vtanh.f32 %v1829_v46 }
0x1440   :  { %6791 = vtanh.f32 %v1831_v23 }
0x1441   :  { %6793 = vtanh.f32 %v1830_v8 }
0x1447   :  { %v6780_v35 = vpop.eup %6779 }
0x1448   :  { %v1840_v9 = vmul.f32 %v8140_v3, %v6780_v35  ;;  %v6782_v40 = vpop.eup %6781 }
0x1449   :  { %v6784_v20 = vpop.eup %6783  ;;  %v1841_v7 = vmul.f32 %v8140_v3, %v6782_v40 }
0x144a   :  { %v1848_v18 = vsel %vm56_vm1, %v1840_v9, 0.0  ;;  %v6786_v26 = vpop.eup %6785  ;;  %v1842_v10 = vmul.f32 %v8140_v3, %v6784_v20 }
0x144b   :  { %1849 = vadd.xlane.f32.xlu1 %v1848_v18  ;;  %v6788_v19 = vpop.eup %6787  ;;  %v1851_v46 = vsel %vm56_vm1, %v1841_v7, 0.0  ;;  %v1843_v6 = vmul.f32 %v8140_v3, %v6786_v26 }
0x144c   :  { %v6790_v55 = vpop.eup %6789  ;;  %1852 = vadd.xlane.f32.xlu0 %v1851_v46  ;;  %v1854_v23 = vsel %vm56_vm1, %v1842_v10, 0.0  ;;  %v1844_v8 = vmul.f32 %v8140_v3, %v6788_v19 }
0x144d   :  { %v1857_v13 = vsel %vm56_vm1, %v1843_v6, 0.0  ;;  %v1845_v21 = vmul.f32 %v8140_v3, %v6790_v55  ;;  %v6792_v27 = vpop.eup %6791 }
0x144e   :  { %v6794_v35 = vpop.eup %6793  ;;  %v1847_v40 = vmul.f32 %v8140_v3, %v6792_v27  ;;  %v1860_v20 = vsel %vm56_vm1, %v1844_v8, 0.0 }
0x144f   :  { %1858 = vadd.xlane.f32.xlu1 %v1857_v13  ;;  %v1863_v9 = vsel %vm56_vm1, %v1845_v21, 0.0  ;;  %v1846_v18 = vmul.f32 %v8140_v3, %v6794_v35 }
0x1450   :  { %1855 = vadd.xlane.f32.xlu0 %v1854_v23  ;;  %v1869_v7 = vsel %vm56_vm1, %v1847_v40, 0.0 }
0x1451   :  { %v1866_v26 = vsel %vm56_vm1, %v1846_v18, 0.0 }
0x1453   :  { %1864 = vadd.xlane.f32.xlu1 %v1863_v9 }
0x1454   :  { %1861 = vadd.xlane.f32.xlu0 %v1860_v20 }
0x1457   :  { %1870 = vadd.xlane.f32.xlu1 %v1869_v7 }
0x1458   :  { %1867 = vadd.xlane.f32.xlu0 %v1866_v26 }
0x14d4   :  { %v1850_v46 = vpop.xlane.xlu1 %1849 }
0x14d5   :  { %v1853_v19 = vpop.xlane.xlu0 %1852  ;;  %v1883_v55 = vrot.slane %v1850_v46, %v7620_v31 }
0x14d6   :  { %v1887_v6 = vrot.slane %v1853_v19, %v7620_v31 }
0x14d8   :  { %v1859_v10 = vpop.xlane.xlu1 %1858  ;;  %v1912_v27 = vsel %vm801_vm4, %v1887_v6, %v1883_v55 }
0x14d9   :  { %v1856_v13 = vpop.xlane.xlu0 %1855  ;;  %v1895_v35 = vrot.slane %v1859_v10, %v7620_v31 }
0x14da   :  { %v1891_v21 = vrot.slane %v1856_v13, %v7620_v31 }
0x14dc   :  { %v1865_v23 = vpop.xlane.xlu1 %1864  ;;  %v1913_v8 = vsel %vm803_vm5, %v1891_v21, %v1912_v27 }
0x14dd   :  { %v1862_v9 = vpop.xlane.xlu0 %1861  ;;  %v1914_v20 = vsel %vm805_vm6, %v1895_v35, %v1913_v8  ;;  %v1903_v26 = vrot.slane %v1865_v23, %v7620_v31 }
0x14de   :  { %v1899_v40 = vrot.slane %v1862_v9, %v7620_v31 }
0x14e0   :  { %v1915_v18 = vsel %vm807_vm7, %v1899_v40, %v1914_v20  ;;  %v1871_v7 = vpop.xlane.xlu1 %1870 }
0x14e1   :  { %v1868_v3 = vpop.xlane.xlu0 %1867  ;;  %v1911_v6 = vrot.slane %v1871_v7, %v7620_v31  ;;  %v1916_v55 = vsel %vm809_vm8, %v1903_v26, %v1915_v18 }
0x14e2   :  { %v1907_v51 = vrot.slane %v1868_v3, %v7620_v31 }
0x14e4   :  { %v1917_v21 = vsel %vm811_vm9, %v1907_v51, %v1916_v55 }
0x14e5   :  { %v1918_v27 = vsel %vm813_vm10, %v1911_v6, %v1917_v21 }
0x14e6   :  { %v1920_v49 = vsel %vm816_vm11, %v1918_v27, -inf }
0x14e7   :  { %1921 = vmax.xlane.f32.xlu0 %v1920_v49 }
0x1570   :  { %v1922_v8 = vpop.xlane.xlu0 %1921 }
0x1571   :  { %v1927_v35 = vrot.slane %v1922_v8, %v7582_v16  ;;  %v1931_v40 = vrot.slane %v1922_v8, %v7639_v57  ;;  %v1935_v20 = vrot.slane %v1922_v8, %v7642_v58  ;;  %v1943_v52 = vrot.slane %v1922_v8, %v7651_v37 }
0x1572   :  { %v1939_v50 = vrot.slane %v1922_v8, %v7645_v59  ;;  %v1951_v51 = vrot.slane %v1922_v8, %v7659_v25  ;;  %v1947_v49 = vrot.slane %v1922_v8, %v7655_v2  ;;  %v1955_v38 = vrot.slane %v1922_v8, %v7663_v39 }
0x1573   :  { %v1964_v47 = vsub.f32 %v1850_v46, %v1927_v35  ;;  %v1965_v18 = vsub.f32 %v1853_v19, %v1931_v40  ;;  %v1966_v26 = vsub.f32 %v1856_v13, %v1935_v20  ;;  %v1968_v6 = vsub.f32 %v1862_v9, %v1943_v52 }
0x1574   :  { %v1967_v27 = vsub.f32 %v1859_v10, %v1939_v50  ;;  %v1970_v45 = vsub.f32 %v1868_v3, %v1951_v51  ;;  %v1969_v0 = vsub.f32 %v1865_v23, %v1947_v49  ;;  %v1971_v13 = vsub.f32 %v1871_v7, %v1955_v38 }
0x1575   :  { %v1972_v55 = vmul.f32 1.442695, %v1964_v47  ;;  %v1974_v21 = vmul.f32 1.442695, %v1965_v18  ;;  %v1976_v48 = vmul.f32 1.442695, %v1966_v26 }
0x1576   :  { %v1980_v44 = vmul.f32 1.442695, %v1968_v6  ;;  %v1978_v46 = vmul.f32 1.442695, %v1967_v27  ;;  %v1984_v19 = vmul.f32 1.442695, %v1970_v45 }
0x1577   :  { %6795 = vpow2.f32 %v1972_v55  ;;  %v1982_v52 = vmul.f32 1.442695, %v1969_v0  ;;  %v1986_v47 = vmul.f32 1.442695, %v1971_v13 }
0x1578   :  { %6797 = vpow2.f32 %v1974_v21 }
0x1579   :  { %6799 = vpow2.f32 %v1976_v48 }
0x157a   :  { %6801 = vpow2.f32 %v1980_v44 }
0x157b   :  { %6803 = vpow2.f32 %v1978_v46 }
0x157c   :  { %6805 = vpow2.f32 %v1984_v19 }
0x157d   :  { %6807 = vpow2.f32 %v1982_v52 }
0x157e   :  { %6809 = vpow2.f32 %v1986_v47 }
0x1584   :  { %v6796_v9 = vpop.eup %6795 }
0x1585   :  { %v6798_v50 = vpop.eup %6797  ;;  %1997 = vperm.xlu1 %6718, %v6796_v9  }
0x1586   :  { %2000 = vperm.xlu0 %6717, %v6798_v50   ;;  %v6800_v3 = vpop.eup %6799 }
0x1587   :  { %v6802_v10 = vpop.eup %6801 }
0x1588   :  { %v6804_v23 = vpop.eup %6803 }
0x1589   :  { %2003 = vperm.xlu1 %6718, %v6800_v3   ;;  %v6806_v48 = vpop.eup %6805 }
0x158a   :  { %2009 = vperm.xlu0 %6717, %v6802_v10   ;;  %v6808_v45 = vpop.eup %6807 }
0x158b   :  { %v6810_v38 = vpop.eup %6809 }
0x158d   :  { %2006 = vperm.xlu1 %6718, %v6804_v23  }
0x158e   :  { %2015 = vperm.xlu0 %6717, %v6806_v48  }
0x1591   :  { %2012 = vperm.xlu1 %6718, %v6808_v45  }
0x1595   :  { %2018 = vperm.xlu1 %6718, %v6810_v38  }
0x1600   :  { %v1998_v0 = vpop.permute.xlu1 %1997 }
0x1601   :  { %v2001_v44 = vpop.permute.xlu0 %2000  ;;  %v2023_v35 = vrot.slane %v1998_v0, %v7620_v31 }
0x1602   :  { %v2027_v8 = vrot.slane %v2001_v44, %v7620_v31 }
0x1604   :  { %v2004_v7 = vpop.permute.xlu1 %2003  ;;  %v2052_v26 = vsel %vm801_vm4, %v2027_v8, %v2023_v35 }
0x1605   :  { %v2031_v40 = vrot.slane %v2004_v7, %v7620_v31  ;;  %v2010_v20 = vpop.permute.xlu0 %2009 }
0x1606   :  { %v2039_v21 = vrot.slane %v2010_v20, %v7620_v31 }
0x1607   :  { %v2053_v6 = vsel %vm803_vm5, %v2031_v40, %v2052_v26 }
0x1608   :  { %v2007_v18 = vpop.permute.xlu1 %2006 }
0x1609   :  { %v2035_v51 = vrot.slane %v2007_v18, %v7620_v31  ;;  %v2016_v27 = vpop.permute.xlu0 %2015 }
0x160a   :  { %v2047_v52 = vrot.slane %v2016_v27, %v7620_v31 }
0x160b   :  { %v2054_v55 = vsel %vm805_vm6, %v2035_v51, %v2053_v6 }
0x160c   :  { %v2013_v49 = vpop.permute.xlu1 %2012  ;;  %v2055_v19 = vsel %vm807_vm7, %v2039_v21, %v2054_v55 }
0x160d   :  { %v2043_v46 = vrot.slane %v2013_v49, %v7620_v31 }
0x160f   :  { %v2056_v13 = vsel %vm809_vm8, %v2043_v46, %v2055_v19 }
0x1610   :  { %v2019_v47 = vpop.permute.xlu1 %2018  ;;  %v2057_v44 = vsel %vm811_vm9, %v2047_v52, %v2056_v13 }
0x1611   :  { %v2051_v0 = vrot.slane %v2019_v47, %v7620_v31 }
0x1613   :  { %v2058_v7 = vsel %vm813_vm10, %v2051_v0, %v2057_v44 }
0x1614   :  { %v2060_v8 = vsel %vm816_vm11, %v2058_v7, 0.0 }
0x1615   :  { %2061 = vadd.xlane.f32.xlu0 %v2060_v8 }
0x169e   :  { %v2062_v35 = vpop.xlane.xlu0 %2061 }
0x169f   :  { %6811 = vrcp.f32 %v2062_v35 }
0x16ac   :  { %v6812_v40 = vpop.eup %6811 }
0x16ad   :  { %v2068_v20 = vrot.slane %v6812_v40, %v7582_v16  ;;  %v2072_v26 = vrot.slane %v6812_v40, %v7639_v57  ;;  %v2076_v6 = vrot.slane %v6812_v40, %v7642_v58  ;;  %v2080_v21 = vrot.slane %v6812_v40, %v7645_v59 }
0x16ae   :  { %v2084_v27 = vrot.slane %v6812_v40, %v7651_v37  ;;  %v2088_v19 = vrot.slane %v6812_v40, %v7655_v2  ;;  %v2092_v13 = vrot.slane %v6812_v40, %v7659_v25  ;;  %v2096_v52 = vrot.slane %v6812_v40, %v7663_v39 }
0x16af   :  { %v2105_v18 = vmul.f32 %v6796_v9, %v2068_v20  ;;  %v2106_v51 = vmul.f32 %v6798_v50, %v2072_v26  ;;  %v2107_v55 = vmul.f32 %v6800_v3, %v2076_v6  ;;  %v2108_v49 = vmul.f32 %v6804_v23, %v2080_v21  ;;  %v8209_v23 = vld [vmem:[%s9371_s0 + $0x8] sm:$0xff] }
0x16b0   :  { %v2109_v46 = vmul.f32 %v6802_v10, %v2084_v27  ;;  %v2110_v9 = vmul.f32 %v6808_v45, %v2088_v19  ;;  %v2111_v50 = vmul.f32 %v6806_v48, %v2092_v13  ;;  %v2112_v3 = vmul.f32 %v6810_v38, %v2096_v52  ;;  %9521 = vst [vmem:[#allocation40_spill] sm:$0xff] %v8209_v23  ;;  %v8215_v45 = vld [vmem:[%s9371_s0] sm:$0xff]  ;;  %v8221_v38 = vld [vmem:[%s9371_s0 + $0x10] sm:$0xff] }
0x16b1   :  { %2115 = vperm.xlu1 %6718, %v2105_v18   ;;  %9522 = vst [vmem:[#allocation41_spill] sm:$0xff] %v8215_v45  ;;  %9523 = vst [vmem:[#allocation42_spill] sm:$0xff] %v8221_v38  ;;  %v8230_v18 = vld [vmem:[%s9371_s0 + $0x18] sm:$0xff] }
0x16b2   :  { %9524 = vst [vmem:[#allocation43_spill] sm:$0xff] %v8230_v18 }
0x16b5   :  { %2120 = vperm.xlu1 %6718, %v2106_v51  }
0x16b9   :  { %2125 = vperm.xlu1 %6718, %v2107_v55  }
0x16bd   :  { %2130 = vperm.xlu1 %6718, %v2108_v49  }
0x16c1   :  { %2135 = vperm.xlu1 %6718, %v2109_v46   ;;  %v8237_v46 = vld [vmem:[%s9371_s0 + $0x20] sm:$0xff] }
0x16c2   :  { %9525 = vst [vmem:[#allocation44_spill] sm:$0xff] %v8237_v46 }
0x16c5   :  { %2140 = vperm.xlu1 %6718, %v2110_v9  }
0x16c9   :  { %2145 = vperm.xlu1 %6718, %v2111_v50  }
0x16cd   :  { %2150 = vperm.xlu1 %6718, %v2112_v3  }
0x172c   :  { %v2116_v47 = vpop.permute.xlu1 %2115 }
0x172d   :  { %v2153_v48 = vmul.f32 %v8215_v45, %v2116_v47 }
0x172f   :  { %v2161_v20 = vsel %vm56_vm1, %v2153_v48, 0.0 }
0x1730   :  { %v2121_v0 = vpop.permute.xlu1 %2120  ;;  %v2162_v21 = vrot.slane %v2161_v20, 4 }
0x1731   :  { %v2154_v10 = vmul.f32 %v8209_v23, %v2121_v0 }
0x1732   :  { %v2163_v52 = vadd.f32 %v2162_v21, %v2161_v20 }
0x1733   :  { %v2168_v8 = vsel %vm56_vm1, %v2154_v10, 0.0  ;;  %v8244_v10 = vld [vmem:[%s9371_s0 + $0x28] sm:$0xff] }
0x1734   :  { %v2126_v44 = vpop.permute.xlu1 %2125  ;;  %v2169_v51 = vrot.slane %v2168_v8, 4  ;;  %9526 = vst [vmem:[#allocation45_spill] sm:$0xff] %v8244_v10 }
0x1735   :  { %v2155_v7 = vmul.f32 %v8221_v38, %v2126_v44  ;;  %v8258_v38 = vld [vmem:[%s9371_s0 + $0x38] sm:$0xff] }
0x1736   :  { %v2170_v9 = vadd.f32 %v2169_v51, %v2168_v8  ;;  %v2164_v8 = vrot.slane %v2163_v52, 2  ;;  %9528 = vst [vmem:[#allocation47_spill] sm:$0xff] %v8258_v38 }
0x1737   :  { %v2175_v35 = vsel %vm56_vm1, %v2155_v7, 0.0 }
0x1738   :  { %v2131_v40 = vpop.permute.xlu1 %2130  ;;  %v2176_v6 = vrot.slane %v2175_v35, 4  ;;  %v2171_v48 = vrot.slane %v2170_v9, 2 }
0x1739   :  { %v2156_v26 = vmul.f32 %v8230_v18, %v2131_v40 }
0x173a   :  { %v2177_v13 = vadd.f32 %v2176_v6, %v2175_v35 }
0x173b   :  { %v2182_v55 = vsel %vm56_vm1, %v2156_v26, 0.0 }
0x173c   :  { %v2183_v49 = vrot.slane %v2182_v55, 4  ;;  %v2136_v27 = vpop.permute.xlu1 %2135  ;;  %v2178_v40 = vrot.slane %v2177_v13, 2 }
0x173d   :  { %v2157_v19 = vmul.f32 %v8237_v46, %v2136_v27 }
0x173e   :  { %v2184_v3 = vadd.f32 %v2183_v49, %v2182_v55  ;;  %v8251_v55 = vld [vmem:[%s9371_s0 + $0x30] sm:$0xff]  ;;  %v2172_v49 = vadd.f32 %v2171_v48, %v2170_v9 }
0x173f   :  { %v2189_v50 = vsel %vm56_vm1, %v2157_v19, 0.0  ;;  %9527 = vst [vmem:[#allocation46_spill] sm:$0xff] %v8251_v55  ;;  %v2179_v19 = vadd.f32 %v2178_v40, %v2177_v13 }
0x1740   :  { %v2190_v47 = vrot.slane %v2189_v50, 4  ;;  %v2141_v0 = vpop.permute.xlu1 %2140  ;;  %v2185_v35 = vrot.slane %v2184_v3, 2  ;;  %v2173_v23 = vrot.slane %v2172_v49, 1 }
0x1741   :  { %v2158_v44 = vmul.f32 %v8244_v10, %v2141_v0  ;;  %v2180_v48 = vrot.slane %v2179_v19, 1 }
0x1742   :  { %v2191_v7 = vadd.f32 %v2190_v47, %v2189_v50  ;;  %v2165_v47 = vadd.f32 %v2164_v8, %v2163_v52  ;;  %v2186_v0 = vadd.f32 %v2185_v35, %v2184_v3  ;;  %v2174_v35 = vadd.f32 %v2173_v23, %v2172_v49 }
0x1743   :  { %v2196_v26 = vsel %vm56_vm1, %v2158_v44, 0.0 }
0x1744   :  { %v2197_v51 = vrot.slane %v2196_v26, 4  ;;  %v2146_v6 = vpop.permute.xlu1 %2145  ;;  %v2192_v20 = vrot.slane %v2191_v7, 2  ;;  %v2166_v40 = vrot.slane %v2165_v47, 1  ;;  %v2187_v52 = vrot.slane %v2186_v0, 1 }
0x1745   :  { %v2159_v21 = vmul.f32 %v8251_v55, %v2146_v6 }
0x1746   :  { %v2198_v27 = vadd.f32 %v2197_v51, %v2196_v26  ;;  %v2193_v18 = vadd.f32 %v2192_v20, %v2191_v7  ;;  %v2167_v55 = vadd.f32 %v2166_v40, %v2165_v47  ;;  %v2188_v25 = vadd.f32 %v2187_v52, %v2186_v0 }
0x1747   :  { %v2203_v50 = vsel %vm56_vm1, %v2159_v21, 0.0  ;;  %v2181_v21 = vadd.f32 %v2180_v48, %v2179_v19  ;;  %v8331_v48 = vld [vmem:[%s9374_s5 + $0x8] sm:$0xff] }
0x1748   :  { %v2199_v44 = vrot.slane %v2198_v27, 2  ;;  %v2204_v10 = vrot.slane %v2203_v50, 4  ;;  %v2151_v46 = vpop.permute.xlu1 %2150  ;;  %v2194_v8 = vrot.slane %v2193_v18, 1 }
0x1749   :  { %v2160_v45 = vmul.f32 %v8258_v38, %v2151_v46 }
0x174a   :  { %v2200_v6 = vadd.f32 %v2199_v44, %v2198_v27  ;;  %v2205_v9 = vadd.f32 %v2204_v10, %v2203_v50  ;;  %v2195_v38 = vadd.f32 %v2194_v8, %v2193_v18  ;;  %v2225_v10 = vsel %vm801_vm4, %v2174_v35, %v2167_v55 }
0x174b   :  { %v2210_v13 = vsel %vm56_vm1, %v2160_v45, 0.0  ;;  %v2226_v45 = vsel %vm803_vm5, %v2181_v21, %v2225_v10  ;;  %v9531_v55 = vmov 1.0  }
0x174c   :  { %v2206_v3 = vrot.slane %v2205_v9, 2  ;;  %v2211_v26 = vrot.slane %v2210_v13, 4  ;;  %v2201_v7 = vrot.slane %v2200_v6, 1  ;;  %v2227_v37 = vsel %vm805_vm6, %v2188_v25, %v2226_v45  ;;  %v8378_v45 = vld [vmem:[%s9377_s9 + $0x18] sm:$0xff] }
0x174d   :  { %v2228_v23 = vsel %vm807_vm7, %v2195_v38, %v2227_v37 }
0x174e   :  { %v2207_v51 = vadd.f32 %v2206_v3, %v2205_v9  ;;  %v2212_v20 = vadd.f32 %v2211_v26, %v2210_v13  ;;  %v2202_v27 = vadd.f32 %v2201_v7, %v2200_v6  ;;  %v8315_v6 = vld [vmem:[%s9374_s5 + $0x18] sm:$0xff]  ;;  %v8324_v9 = vld [vmem:[%s9374_s5 + $0x10] sm:$0xff]  ;;  %v8338_v13 = vld [vmem:[%s9374_s5] sm:$0xff] }
0x1750   :  { %v2208_v39 = vrot.slane %v2207_v51, 1  ;;  %v2213_v46 = vrot.slane %v2212_v20, 2  ;;  %v2229_v19 = vsel %vm809_vm8, %v2202_v27, %v2228_v23  ;;  %v9532_v27 = vld [vmem:[#allocation18_spill] sm:$0xff] }
0x1751   :  { %v8401_v23 = vld [vmem:[%s9377_s9] sm:$0xff] }
0x1752   :  { %v2214_v50 = vadd.f32 %v2213_v46, %v2212_v20  ;;  %v2209_v44 = vadd.f32 %v2208_v39, %v2207_v51 }
0x1754   :  { %v2215_v2 = vrot.slane %v2214_v50, 1  ;;  %v2230_v47 = vsel %vm811_vm9, %v2209_v44, %v2229_v19  ;;  %v8394_v44 = vld [vmem:[%s9377_s9 + $0x8] sm:$0xff]  ;;  %v9533_v19 = vld [vmem:[#allocation17_spill] sm:$0xff] }
0x1756   :  { %v2216_v49 = vadd.f32 %v2215_v2, %v2214_v50 }
0x1758   :  { %v2231_v0 = vsel %vm813_vm10, %v2216_v49, %v2230_v47 }
0x1759   :  { %6334 = vmatmul.mubr.msk.f32.vlgmr.msra.gmra.mxu0 %vm56_vm1, %v2231_v0 }
0x175a   :  { %6348 = vmatpush3.msra.mxu0 %v7748_v15  ;;  %6355 = vmatprep.mubr.msk.f32.mxu0 %vm7102_vm0, %v9497_v32 }
0x175b   :  { %6349 = vmatprep.subr.mxu0 %v9497_v32 }
0x175c   :  { %6350 = vmatpush3.msra.mxu0 %v7753_v56 }
0x175d   :  { %6351 = vmatprep.subr.mxu0 %v9497_v32 }
0x175e   :  { %6352 = vmatpush3.msra.mxu0 %v7760_v53 }
0x175f   :  { %6353 = vmatprep.subr.mxu0 %v9497_v32 }
0x1760   :  { %6354 = vmatpush3.msra.mxu0 %v7767_v61 }
0x1761   :  { %6393 = vmatprep.subr.mxu0 %v9497_v32 }
0x1819   :  { %v2300_v37 = vpop.f32.mrf.mxu0 }
0x181a   :  { %v2371_v2 = vadd.f32 %v8124_v11, %v2300_v37 }
0x181b   :  { %v6335_v25 = vpop.f32.mrf.mxu0 }
0x181c   :  { %v2374_v39 = vadd.f32 %v7776_v62, %v2371_v2 }
0x181e   :  { %6813 = vtanh.f32 %v2374_v39 }
0x182b   :  { %v6814_v15 = vpop.eup %6813 }
0x182c   :  { %6356 = vmatmul.mubr.msk.f32.vlgmr.msra.gmra.mxu0 %vm56_vm1, %v6814_v15 }
0x182d   :  { %6394 = vmatpush3.msra.mxu0 %v7784_v4  ;;  %6409 = vmatprep.mubr.msk.f32.mxu0 %vm7102_vm0, %v9497_v32 }
0x182e   :  { %6395 = vmatprep.subr.mxu0 %v9497_v32 }
0x182f   :  { %6396 = vmatpush3.msra.mxu0 %v7793_v63 }
0x1830   :  { %6397 = vmatprep.subr.mxu0 %v9497_v32 }
0x1831   :  { %6398 = vmatpush3.msra.mxu0 %v7800_v41 }
0x1832   :  { %6399 = vmatprep.subr.mxu0 %v9497_v32 }
0x1833   :  { %6400 = vmatpush3.msra.mxu0 %v7807_v34 }
0x1834   :  { %6401 = vmatprep.subr.mxu0 %v9497_v32 }
0x1835   :  { %6402 = vmatpush3.msra.mxu0 %v7814_v42 }
0x1836   :  { %6403 = vmatprep.subr.mxu0 %v9497_v32 }
0x1837   :  { %6404 = vmatpush3.msra.mxu0 %v7821_v43 }
0x1838   :  { %6405 = vmatprep.subr.mxu0 %v9497_v32 }
0x1839   :  { %6406 = vmatpush3.msra.mxu0 %v7828_v28 }
0x183a   :  { %6407 = vmatprep.subr.mxu0 %v9497_v32 }
0x183b   :  { %6408 = vmatpush3.msra.mxu0 %v7835_v5 }
0x183c   :  { %6412 = vmatprep.subr.mxu0 %v9497_v32 }
0x18ec   :  { %v2445_v56 = vpop.f32.mrf.mxu0 }
0x18ed   :  { %v8302_v53 = vadd.f32 %v7842_v54, %v2445_v56 }
0x18ee   :  { %v6357_v61 = vpop.f32.mrf.mxu0 }
0x18ef   :  { %9529 = vst [vmem:[#allocation48_spill] sm:$0xff] %v8302_v53  ;;  %2449 = vmax.xlane.f32.xlu0 %v8302_v53 }
0x1978   :  { %v8305_v62 = vpop.xlane.xlu0 %2449 }
0x1979   :  { %9530 = vst [vmem:[#allocation49_spill] sm:$0xff] %v8305_v62  ;;  %vm2451_vm15 = vcmp.eq.f32.partialorder %v8302_v53, %v8305_v62 }
0x197a   :  { %v2452_v4 = vsel %vm2451_vm15, %v7344_v30, 128 }
0x197b   :  { %v2454_v63 = vshra.s32 %v2452_v4, 16  ;;  %v2453_v34 = vand.u32 65535, %v2452_v4 }
0x197d   :  { %v2456_v41 = vcvt.s32.f32 %v2454_v63  ;;  %v2455_v43 = vcvt.s32.f32 %v2453_v34 }
0x197f   :  { %2457 = vmin.xlane.f32.xlu1 %v2456_v41 }
0x1a08   :  { %v2458_v42 = vpop.xlane.xlu1 %2457 }
0x1a09   :  { %vm2459_vm2 = vcmp.eq.f32.partialorder %v2456_v41, %v2458_v42  ;;  %v2464_v5 = vcvt.f32.s32 %v2458_v42 }
0x1a0a   :  { %v2460_v28 = vsel %vm2459_vm2, %v2455_v43, inf }
0x1a0b   :  { %2461 = vmin.xlane.f32.xlu0 %v2460_v28  ;;  %v2465_v11 = vshll.u32 %v2464_v5, 16 }
0x1a94   :  { %v2462_v54 = vpop.xlane.xlu0 %2461 }
0x1a95   :  { %v2463_v38 = vcvt.f32.s32 %v2462_v54  ;;  %v9534_v54 = vld [vmem:[#allocation19_spill] sm:$0xff] }
0x1a97   :  { %v2466_v18 = vadd.s32 %v2465_v11, %v2463_v38  ;;  %v9535_v11 = vld [vmem:[#allocation20_spill] sm:$0xff]  ;;  %v9536_v38 = vld [vmem:[#allocation21_spill] sm:$0xff] }
0x1a99   :  { %vm2476_vm12 = vcmp.eq.s32.totalorder %v7344_v30, %v2466_v18  ;;  %v9537_v18 = vld [vmem:[#allocation22_spill] sm:$0xff] }
0x1a9a   :  { %6391 = vmatmul.mubr.msk.f32.vlgmr.msra.gmra.mxu1 %vm2476_vm12, %v9531_v55 }
0x1a9b   :  { %6432 = vmatpush3.msra.mxu1 %v8315_v6  ;;  %6439 = vmatprep.mubr.msk.f32.mxu1 %vm7102_vm0, %v9497_v32 }
0x1a9c   :  { %6433 = vmatprep.subr.mxu1 %v9497_v32 }
0x1a9d   :  { %6434 = vmatpush3.msra.mxu1 %v8324_v9 }
0x1a9e   :  { %6435 = vmatprep.subr.mxu1 %v9497_v32 }
0x1a9f   :  { %6436 = vmatpush3.msra.mxu1 %v8331_v48 }
0x1aa0   :  { %6437 = vmatprep.subr.mxu1 %v9497_v32 }
0x1aa1   :  { %6438 = vmatpush3.msra.mxu1 %v8338_v13 }
0x1aa2   :  { %6453 = vmatprep.subr.mxu1 %v9497_v32 }
0x1b5a   :  { %v2545_v40 = vpop.f32.mrf.mxu1 }
0x1b5b   :  { %v2549_v52 = vsel %vm56_vm1, %v2545_v40, %v7936_v14  ;;  %v9538_v40 = vld [vmem:[#allocation23_spill] sm:$0xff] }
0x1b5c   :  { %v6392_v3 = vpop.f32.mrf.mxu1  ;;  %6410 = vmatmul.mubr.msk.f32.vlgmr.msra.gmra.mxu0 %vm330_vm3, %v2549_v52  ;;  %v9539_v52 = vld [vmem:[#allocation24_spill] sm:$0xff] }
0x1b5d   :  { %6413 = vmatpush3.msra.mxu0 %v7871_v12  ;;  %6428 = vmatprep.mubr.msk.f32.mxu0 %vm7102_vm0, %v9497_v32  ;;  %v9540_v3 = vld [vmem:[#allocation25_spill] sm:$0xff] }
0x1b5e   :  { %6414 = vmatprep.subr.mxu0 %v9497_v32 }
0x1b5f   :  { %6415 = vmatpush3.msra.mxu0 %v7880_v17 }
0x1b60   :  { %6416 = vmatprep.subr.mxu0 %v9497_v32 }
0x1b61   :  { %6417 = vmatpush3.msra.mxu0 %v7887_v22 }
0x1b62   :  { %6418 = vmatprep.subr.mxu0 %v9497_v32 }
0x1b63   :  { %6419 = vmatpush3.msra.mxu0 %v7894_v60 }
0x1b64   :  { %6420 = vmatprep.subr.mxu0 %v9497_v32 }
0x1b65   :  { %6421 = vmatpush3.msra.mxu0 %v7901_v36 }
0x1b66   :  { %6422 = vmatprep.subr.mxu0 %v9497_v32 }
0x1b67   :  { %6423 = vmatpush3.msra.mxu0 %v7908_v1 }
0x1b68   :  { %6424 = vmatprep.subr.mxu0 %v9497_v32 }
0x1b69   :  { %6425 = vmatpush3.msra.mxu0 %v7915_v33 }
0x1b6a   :  { %6426 = vmatprep.subr.mxu0 %v9497_v32 }
0x1b6b   :  { %6427 = vmatpush3.msra.mxu0 %v7922_v29 }
0x1b6c   :  { %6442 = vmatprep.subr.mxu0 %v9497_v32 }
0x1c1c   :  { %v2619_v12 = vpop.f32.mrf.mxu0 }
0x1c1d   :  { %v2620_v17 = vadd.f32 %v7929_v24, %v2619_v12  ;;  %v9541_v12 = vld [vmem:[#allocation26_spill] sm:$0xff] }
0x1c1e   :  { %v6411_v22 = vpop.f32.mrf.mxu0 }
0x1c1f   :  { %2630 = vrot.lane.b32.xlu0 %v2620_v17, %s7103_s22  ;;  %v5787_v60 = vmul.f32 -1.442695, %v2620_v17  ;;  %v9543_v22 = vld [vmem:[#allocation28_spill] sm:$0xff] }
0x1c21   :  { %6815 = vpow2.f32 %v5787_v60  ;;  %v9544_v60 = vld [vmem:[#allocation29_spill] sm:$0xff] }
0x1c2e   :  { %v6816_v36 = vpop.eup %6815 }
0x1c2f   :  { %v2626_v1 = vadd.f32 1.0, %v6816_v36  ;;  %v9545_v36 = vld [vmem:[#allocation30_spill] sm:$0xff] }
0x1c31   :  { %6817 = vrcp.f32 %v2626_v1  ;;  %v9546_v1 = vld [vmem:[#allocation31_spill] sm:$0xff] }
0x1c3e   :  { %v6818_v26 = vpop.eup %6817 }
0x1c3f   :  { %v2640_v24 = vsub.f32 1.0, %v6818_v26  ;;  %v2646_v20 = vmul.f32 %v6818_v26, %v7936_v14  ;;  %v8387_v14 = vld [vmem:[%s9377_s9 + $0x10] sm:$0xff] }
0x1c91   :  { %v2631_v8 = vpop.permute.xlu0 %2630 }
0x1c92   :  { %v2633_v33 = vmul.f32 %v6818_v26, %v2631_v8  ;;  %v9547_v26 = vld [vmem:[#allocation32_spill] sm:$0xff]  ;;  %v9548_v8 = vld [vmem:[#allocation33_spill] sm:$0xff] }
0x1c94   :  { %2635 = vrot.lane.b32.xlu0 %v2633_v33, %s7105_s17  ;;  %v9549_v33 = vld [vmem:[#allocation34_spill] sm:$0xff] }
0x1d06   :  { %v2636_v35 = vpop.permute.xlu0 %2635 }
0x1d07   :  { %v2638_v29 = vadd.f32 %v2636_v35, %v2620_v17  ;;  %v9542_v17 = vld [vmem:[#allocation27_spill] sm:$0xff] }
0x1d08   :  { %v9550_v35 = vld [vmem:[#allocation35_spill] sm:$0xff] }
0x1d09   :  { %6819 = vtanh.f32 %v2638_v29  ;;  %v9551_v29 = vld [vmem:[#allocation36_spill] sm:$0xff] }
0x1d16   :  { %v6820_v7 = vpop.eup %6819 }
0x1d17   :  { %2642 = vrot.lane.b32.xlu0 %v6820_v7, %s7106_s30  ;;  %v9552_v7 = vld [vmem:[#allocation37_spill] sm:$0xff] }
0x1d89   :  { %v2643_v51 = vpop.permute.xlu0 %2642 }
0x1d8a   :  { %v2645_v21 = vmul.f32 %v2643_v51, %v2640_v24  ;;  %v9553_v24 = vld [vmem:[#allocation38_spill] sm:$0xff] }
0x1d8c   :  { %v8368_v46 = vadd.f32 %v2646_v20, %v2645_v21  ;;  %v9554_v21 = vld [vmem:[#allocation10_spill] sm:$0xff] }
0x1d8e   :  { %2649 = vrot.lane.b32.xlu0 %v8368_v46, %s7106_s30 }
0x1e00   :  { %v2650_v10 = vpop.permute.xlu0 %2649 }
0x1e01   :  { %v2652_v50 = vsel %vm56_vm1, %v2650_v10, %v9532_v27 }
0x1e02   :  { %6429 = vmatmul.mubr.msk.f32.vlgmr.msra.gmra.mxu0 %vm330_vm3, %v2652_v50 }
0x1e03   :  { %6443 = vmatpush3.msra.mxu0 %v8378_v45  ;;  %6450 = vmatprep.mubr.msk.f32.mxu0 %vm7102_vm0, %v9497_v32 }
0x1e04   :  { %6444 = vmatprep.subr.mxu0 %v9497_v32 }
0x1e05   :  { %6445 = vmatpush3.msra.mxu0 %v8387_v14 }
0x1e06   :  { %6446 = vmatprep.subr.mxu0 %v9497_v32 }
0x1e07   :  { %6447 = vmatpush3.msra.mxu0 %v8394_v44 }
0x1e08   :  { %6448 = vmatprep.subr.mxu0 %v9497_v32 }
0x1e09   :  { %6449 = vmatpush3.msra.mxu0 %v8401_v23 }
0x1e0a   :  { %6464 = vmatprep.subr.mxu0 %v9497_v32 }
0x1ec2   :  { %v2722_v49 = vpop.f32.mrf.mxu0 }
0x1ec3   :  { %v2723_v47 = vadd.f32 %v9533_v19, %v2722_v49 }
0x1ec4   :  { %v6430_v0 = vpop.f32.mrf.mxu0 }
0x1ec5   :  { %2733 = vrot.lane.b32.xlu1 %v2723_v47, %s7103_s22  ;;  %v5789_v37 = vmul.f32 -1.442695, %v2723_v47 }
0x1ec7   :  { %6821 = vpow2.f32 %v5789_v37 }
0x1ed4   :  { %v6822_v2 = vpop.eup %6821 }
0x1ed5   :  { %v2729_v25 = vadd.f32 1.0, %v6822_v2 }
0x1ed7   :  { %6823 = vrcp.f32 %v2729_v25 }
0x1ee4   :  { %v6824_v39 = vpop.eup %6823 }
0x1ee5   :  { %v2743_v41 = vsub.f32 1.0, %v6824_v39  ;;  %v2749_v42 = vmul.f32 %v6824_v39, %v9532_v27 }
0x1f37   :  { %v2734_v15 = vpop.permute.xlu1 %2733 }
0x1f38   :  { %v2736_v56 = vmul.f32 %v6824_v39, %v2734_v15 }
0x1f3a   :  { %2738 = vrot.lane.b32.xlu0 %v2736_v56, %s7105_s17 }
0x1fac   :  { %v2739_v61 = vpop.permute.xlu0 %2738 }
0x1fad   :  { %v2741_v4 = vadd.f32 %v2739_v61, %v2723_v47 }
0x1faf   :  { %6825 = vtanh.f32 %v2741_v4 }
0x1fbc   :  { %v6826_v63 = vpop.eup %6825 }
0x1fbd   :  { %2745 = vrot.lane.b32.xlu0 %v6826_v63, %s7106_s30 }
0x202f   :  { %v2746_v34 = vpop.permute.xlu0 %2745 }
0x2030   :  { %v2748_v43 = vmul.f32 %v2746_v34, %v2743_v41  ;;  %v9555_v41 = vld [vmem:[#allocation3_spill] sm:$0xff] }
0x2032   :  { %v8410_v28 = vadd.f32 %v2749_v42, %v2748_v43 }
0x2034   :  { %2752 = vrot.lane.b32.xlu0 %v8410_v28, %s7106_s30 }
0x20a6   :  { %v2753_v5 = vpop.permute.xlu0 %2752 }
0x20a7   :  { %6440 = vmatmul.mubr.msk.f32.vlgmr.msra.gmra.mxu1 %vm56_vm1, %v2753_v5 }
0x20a8   :  { %6454 = vmatpush3.msra.mxu1 %v9534_v54  ;;  %6461 = vmatprep.mubr.msk.f32.mxu1 %vm7102_vm0, %v9497_v32 }
0x20a9   :  { %6455 = vmatprep.subr.mxu1 %v9497_v32 }
0x20aa   :  { %6456 = vmatpush3.msra.mxu1 %v9535_v11 }
0x20ab   :  { %6457 = vmatprep.subr.mxu1 %v9497_v32 }
0x20ac   :  { %6458 = vmatpush3.msra.mxu1 %v9536_v38  ;;  %v9556_v38 = vld [vmem:[#allocation2_spill] sm:$0xff] }
0x20ad   :  { %6459 = vmatprep.subr.mxu1 %v9497_v32 }
0x20ae   :  { %6460 = vmatpush3.msra.mxu1 %v9537_v18 }
0x20af   :  { %6462 = vmatmul.mubr.msk.f32.vlgmr.msra.gmra.mxu1 %vm56_vm1, %v2753_v5  ;;  %6475 = vmatprep.subr.mxu1 %v9497_v32 }
0x20b0   :  { %6476 = vmatpush3.msra.mxu1 %v9538_v40  ;;  %6507 = vmatprep.mubr.msk.f32.mxu1 %vm7102_vm0, %v9497_v32  ;;  %v9557_v40 = vld [vmem:[#allocation5_spill] sm:$0xff] }
0x20b1   :  { %6477 = vmatprep.subr.mxu1 %v9497_v32 }
0x20b2   :  { %6478 = vmatpush3.msra.mxu1 %v9539_v52 }
0x20b3   :  { %6479 = vmatprep.subr.mxu1 %v9497_v32 }
0x20b4   :  { %6480 = vmatpush3.msra.mxu1 %v9540_v3 }
0x20b5   :  { %6481 = vmatprep.subr.mxu1 %v9497_v32 }
0x20b6   :  { %6482 = vmatpush3.msra.mxu1 %v9541_v12  ;;  %v9558_v12 = vld [vmem:[#allocation4_spill] sm:$0xff] }
0x20b7   :  { %6483 = vmatprep.subr.mxu1 %v9497_v32 }
0x20b8   :  { %6484 = vmatpush3.msra.mxu1 %v9542_v17 }
0x20b9   :  { %6485 = vmatprep.subr.mxu1 %v9497_v32 }
0x20ba   :  { %6486 = vmatpush3.msra.mxu1 %v9543_v22  ;;  %v9559_v22 = vld [vmem:[#allocation7_spill] sm:$0xff] }
0x20bb   :  { %6487 = vmatprep.subr.mxu1 %v9497_v32 }
0x20bc   :  { %6488 = vmatpush3.msra.mxu1 %v9544_v60 }
0x20bd   :  { %6489 = vmatprep.subr.mxu1 %v9497_v32 }
0x20be   :  { %6490 = vmatpush3.msra.mxu1 %v9545_v36  ;;  %v9560_v36 = vld [vmem:[#allocation9_spill] sm:$0xff] }
0x20bf   :  { %6491 = vmatprep.subr.mxu1 %v9497_v32 }
0x20c0   :  { %6492 = vmatpush3.msra.mxu1 %v9546_v1 }
0x20c1   :  { %6493 = vmatprep.subr.mxu1 %v9497_v32 }
0x20c2   :  { %6494 = vmatpush3.msra.mxu1 %v9547_v26 }
0x20c3   :  { %6495 = vmatprep.subr.mxu1 %v9497_v32 }
0x20c4   :  { %6496 = vmatpush3.msra.mxu1 %v9548_v8  ;;  %v9561_v8 = vld [vmem:[#allocation6_spill] sm:$0xff] }
0x20c5   :  { %6497 = vmatprep.subr.mxu1 %v9497_v32 }
0x20c6   :  { %6498 = vmatpush3.msra.mxu1 %v9549_v33 }
0x20c7   :  { %6499 = vmatprep.subr.mxu1 %v9497_v32 }
0x20c8   :  { %6500 = vmatpush3.msra.mxu1 %v9550_v35  ;;  %v9562_v35 = vld [vmem:[#allocation8_spill] sm:$0xff] }
0x20c9   :  { %6501 = vmatprep.subr.mxu1 %v9497_v32 }
0x20ca   :  { %6502 = vmatpush3.msra.mxu1 %v9551_v29 }
0x20cb   :  { %6503 = vmatprep.subr.mxu1 %v9497_v32 }
0x20cc   :  { %6504 = vmatpush3.msra.mxu1 %v9552_v7 }
0x20cd   :  { %6505 = vmatprep.subr.mxu1 %v9497_v32 }
0x20ce   :  { %6506 = vmatpush3.msra.mxu1 %v9553_v24  ;;  %v9563_v24 = vld [vmem:[#allocation39_spill] sm:$0xff] }
0x20cf   :  { %6548 = vmatprep.subr.mxu1 %v9497_v32 }
0x2167   :  { %v2822_v51 = vpop.f32.mrf.mxu1 }
0x2168   :  { %v2827_v20 = vcombine.high %v2822_v51, %v2822_v51  ;;  %v2834_v10 = vrot.slane %v2822_v51, %v9554_v21 }
0x2169   :  { %v6441_v27 = vpop.f32.mrf.mxu1 }
0x216a   :  { %v2841_v50 = vrot.slane %v2827_v20, %v9554_v21  ;;  %v2842_v49 = vcombine.high %v2834_v10, %v2834_v10  ;;  %v2850_v19 = vrot.slane %v2834_v10, %v9554_v21 }
0x216c   :  { %v2843_v47 = vcombine.high %v2841_v50, %v2841_v50  ;;  %v2857_v0 = vrot.slane %v2841_v50, %v9554_v21  ;;  %v2864_v37 = vrot.slane %v2842_v49, %v9554_v21  ;;  %v2872_v2 = vcombine.high %v2850_v19, %v2850_v19 }
0x216d   :  { %v2879_v25 = vrot.slane %v2850_v19, %v7582_v16 }
0x216e   :  { %v2871_v39 = vrot.slane %v2843_v47, %v9554_v21  ;;  %v2873_v15 = vcombine.high %v2857_v0, %v2857_v0  ;;  %v2874_v56 = vcombine.high %v2864_v37, %v2864_v37  ;;  %v2883_v61 = vrot.slane %v2864_v37, %v7582_v16 }
0x216f   :  { %v2887_v4 = vrot.slane %v2872_v2, %v7582_v16  ;;  %v2895_v63 = vrot.slane %v2857_v0, %v7582_v16  ;;  %v2916_v34 = vadd.f32 %v2879_v25, %v9555_v41  ;;  %v8471_v42 = vpop.f32.mrf.mxu1 }
0x2170   :  { %v2875_v43 = vcombine.high %v2871_v39, %v2871_v39  ;;  %v2891_v5 = vrot.slane %v2874_v56, %v7582_v16  ;;  %v2903_v54 = vrot.slane %v2873_v15, %v7582_v16  ;;  %v2899_v11 = vrot.slane %v2871_v39, %v7582_v16 }
0x2171   :  { %v2917_v18 = vadd.f32 %v9556_v38, %v2883_v61  ;;  %v2918_v52 = vadd.f32 %v2887_v4, %v9557_v40  ;;  %6827 = vtanh.f32 %v2916_v34  ;;  %v6463_v3 = vpop.f32.mrf.mxu1  ;;  %v2920_v60 = vadd.f32 %v2895_v63, %v9559_v22 }
0x2172   :  { %v2919_v17 = vadd.f32 %v9558_v12, %v2891_v5  ;;  %v2922_v1 = vadd.f32 %v2903_v54, %v9560_v36  ;;  %v2907_v26 = vrot.slane %v2875_v43, %v7582_v16  ;;  %v2921_v33 = vadd.f32 %v9561_v8, %v2899_v11 }
0x2173   :  { %6829 = vtanh.f32 %v2917_v18 }
0x2174   :  { %6831 = vtanh.f32 %v2918_v52  ;;  %v2923_v29 = vadd.f32 %v9562_v35, %v2907_v26 }
0x2175   :  { %6833 = vtanh.f32 %v2919_v17 }
0x2176   :  { %6835 = vtanh.f32 %v2920_v60 }
0x2177   :  { %6837 = vtanh.f32 %v2922_v1 }
0x2178   :  { %6839 = vtanh.f32 %v2921_v33 }
0x2179   :  { %6841 = vtanh.f32 %v2923_v29 }
0x217e   :  { %v6828_v7 = vpop.eup %6827 }
0x217f   :  { %v2932_v51 = vmul.f32 %v9563_v24, %v6828_v7 }
0x2180   :  { %v6830_v20 = vpop.eup %6829 }
0x2181   :  { %v6832_v10 = vpop.eup %6831  ;;  %v2940_v27 = vsel %vm56_vm1, %v2932_v51, 0.0  ;;  %v2933_v50 = vmul.f32 %v9563_v24, %v6830_v20 }
0x2182   :  { %v6834_v49 = vpop.eup %6833  ;;  %2941 = vadd.xlane.f32.xlu0 %v2940_v27  ;;  %v2934_v19 = vmul.f32 %v9563_v24, %v6832_v10 }
0x2183   :  { %v6836_v47 = vpop.eup %6835  ;;  %v2943_v0 = vsel %vm56_vm1, %v2933_v50, 0.0  ;;  %v2935_v39 = vmul.f32 %v9563_v24, %v6834_v49 }
0x2184   :  { %2944 = vadd.xlane.f32.xlu1 %v2943_v0  ;;  %v2936_v37 = vmul.f32 %v9563_v24, %v6836_v47  ;;  %v6838_v2 = vpop.eup %6837  ;;  %v2946_v25 = vsel %vm56_vm1, %v2934_v19, 0.0 }
0x2185   :  { %v6840_v15 = vpop.eup %6839  ;;  %v2938_v61 = vmul.f32 %v9563_v24, %v6838_v2  ;;  %v2949_v4 = vsel %vm56_vm1, %v2935_v39, 0.0 }
0x2186   :  { %2947 = vadd.xlane.f32.xlu0 %v2946_v25  ;;  %v2952_v56 = vsel %vm56_vm1, %v2936_v37, 0.0  ;;  %v2937_v63 = vmul.f32 %v9563_v24, %v6840_v15  ;;  %v6842_v34 = vpop.eup %6841 }
0x2187   :  { %v2958_v43 = vsel %vm56_vm1, %v2938_v61, 0.0  ;;  %v2939_v54 = vmul.f32 %v9563_v24, %v6842_v34  ;;  %v9564_v34 = vld [vmem:[#allocation12_spill] sm:$0xff] }
0x2188   :  { %2953 = vadd.xlane.f32.xlu1 %v2952_v56  ;;  %v2955_v5 = vsel %vm56_vm1, %v2937_v63, 0.0 }
0x2189   :  { %v2961_v11 = vsel %vm56_vm1, %v2939_v54, 0.0 }
0x218a   :  { %2950 = vadd.xlane.f32.xlu0 %v2949_v4 }
0x218c   :  { %2959 = vadd.xlane.f32.xlu1 %v2958_v43 }
0x218e   :  { %2956 = vadd.xlane.f32.xlu0 %v2955_v5 }
0x2192   :  { %2962 = vadd.xlane.f32.xlu0 %v2961_v11 }
0x220b   :  { %v2942_v18 = vpop.xlane.xlu0 %2941 }
0x220c   :  { %v2975_v60 = vrot.slane %v2942_v18, %v7620_v31 }
0x220d   :  { %v2945_v52 = vpop.xlane.xlu1 %2944 }
0x220e   :  { %v2979_v3 = vrot.slane %v2945_v52, %v7620_v31 }
0x220f   :  { %v2948_v17 = vpop.xlane.xlu0 %2947 }
0x2210   :  { %v2983_v1 = vrot.slane %v2948_v17, %v7620_v31  ;;  %v3004_v26 = vsel %vm801_vm4, %v2979_v3, %v2975_v60  ;;  %v9565_v3 = vld [vmem:[#allocation11_spill] sm:$0xff] }
0x2211   :  { %v2954_v33 = vpop.xlane.xlu1 %2953 }
0x2212   :  { %v3005_v24 = vsel %vm803_vm5, %v2983_v1, %v3004_v26  ;;  %v2991_v20 = vrot.slane %v2954_v33, %v7620_v31 }
0x2213   :  { %v2951_v29 = vpop.xlane.xlu0 %2950 }
0x2214   :  { %v2987_v7 = vrot.slane %v2951_v29, %v7620_v31 }
0x2215   :  { %v2960_v27 = vpop.xlane.xlu1 %2959 }
0x2216   :  { %v3006_v51 = vsel %vm805_vm6, %v2987_v7, %v3005_v24  ;;  %v2999_v47 = vrot.slane %v2960_v27, %v7620_v31  ;;  %v9566_v24 = vld [vmem:[#allocation14_spill] sm:$0xff] }
0x2217   :  { %v2957_v10 = vpop.xlane.xlu0 %2956  ;;  %v3007_v49 = vsel %vm807_vm7, %v2991_v20, %v3006_v51 }
0x2218   :  { %v2995_v50 = vrot.slane %v2957_v10, %v7620_v31 }
0x221a   :  { %v3008_v19 = vsel %vm809_vm8, %v2995_v50, %v3007_v49  ;;  %v9567_v49 = vld [vmem:[#allocation13_spill] sm:$0xff] }
0x221b   :  { %v2963_v0 = vpop.xlane.xlu0 %2962  ;;  %v3009_v2 = vsel %vm811_vm9, %v2999_v47, %v3008_v19 }
0x221c   :  { %v3003_v37 = vrot.slane %v2963_v0, %v7620_v31 }
0x221e   :  { %v3010_v25 = vsel %vm813_vm10, %v3003_v37, %v3009_v2 }
0x221f   :  { %v3012_v39 = vsel %vm816_vm11, %v3010_v25, -inf }
0x2220   :  { %3013 = vmax.xlane.f32.xlu1 %v3012_v39 }
0x22a9   :  { %v3014_v15 = vpop.xlane.xlu1 %3013 }
0x22aa   :  { %v3019_v56 = vrot.slane %v3014_v15, %v7582_v16  ;;  %v3023_v61 = vrot.slane %v3014_v15, %v7639_v57  ;;  %v3027_v4 = vrot.slane %v3014_v15, %v7642_v58  ;;  %v3031_v63 = vrot.slane %v3014_v15, %v7645_v59 }
0x22ab   :  { %v3039_v43 = vrot.slane %v3014_v15, %v9564_v34  ;;  %v3035_v60 = vrot.slane %v3014_v15, %v9565_v3  ;;  %v3047_v51 = vrot.slane %v3014_v15, %v9566_v24  ;;  %v3043_v19 = vrot.slane %v3014_v15, %v9567_v49 }
0x22ac   :  { %v3056_v5 = vsub.f32 %v2942_v18, %v3019_v56  ;;  %v3057_v54 = vsub.f32 %v2945_v52, %v3023_v61  ;;  %v3059_v11 = vsub.f32 %v2951_v29, %v3031_v63  ;;  %v3058_v1 = vsub.f32 %v2948_v17, %v3027_v4 }
0x22ad   :  { %v3061_v20 = vsub.f32 %v2957_v10, %v3039_v43  ;;  %v3060_v47 = vsub.f32 %v2954_v33, %v3035_v60  ;;  %v3063_v2 = vsub.f32 %v2963_v0, %v3047_v51  ;;  %v3062_v52 = vsub.f32 %v2960_v27, %v3043_v19 }
0x22ae   :  { %v3064_v26 = vmul.f32 1.442695, %v3056_v5  ;;  %v3066_v7 = vmul.f32 1.442695, %v3057_v54  ;;  %v3070_v50 = vmul.f32 1.442695, %v3059_v11 }
0x22af   :  { %v3068_v37 = vmul.f32 1.442695, %v3058_v1  ;;  %v3074_v18 = vmul.f32 1.442695, %v3061_v20  ;;  %v3072_v29 = vmul.f32 1.442695, %v3060_v47 }
0x22b0   :  { %6843 = vpow2.f32 %v3064_v26  ;;  %v3078_v17 = vmul.f32 1.442695, %v3063_v2  ;;  %v3076_v25 = vmul.f32 1.442695, %v3062_v52 }
0x22b1   :  { %6845 = vpow2.f32 %v3066_v7 }
0x22b2   :  { %6847 = vpow2.f32 %v3070_v50 }
0x22b3   :  { %6849 = vpow2.f32 %v3068_v37 }
0x22b4   :  { %6851 = vpow2.f32 %v3074_v18 }
0x22b5   :  { %6853 = vpow2.f32 %v3072_v29 }
0x22b6   :  { %6855 = vpow2.f32 %v3078_v17 }
0x22b7   :  { %6857 = vpow2.f32 %v3076_v25 }
0x22bd   :  { %v6844_v39 = vpop.eup %6843 }
0x22be   :  { %v6846_v10 = vpop.eup %6845  ;;  %3089 = vperm.xlu0 %6717, %v6844_v39  }
0x22bf   :  { %3092 = vperm.xlu1 %6718, %v6846_v10   ;;  %v6848_v15 = vpop.eup %6847 }
0x22c0   :  { %v6850_v33 = vpop.eup %6849 }
0x22c1   :  { %v6852_v0 = vpop.eup %6851 }
0x22c2   :  { %3098 = vperm.xlu0 %6717, %v6848_v15   ;;  %v6854_v56 = vpop.eup %6853 }
0x22c3   :  { %3095 = vperm.xlu1 %6718, %v6850_v33   ;;  %v6856_v27 = vpop.eup %6855 }
0x22c4   :  { %v6858_v61 = vpop.eup %6857 }
0x22c6   :  { %3104 = vperm.xlu0 %6717, %v6852_v0  }
0x22c7   :  { %3101 = vperm.xlu1 %6718, %v6854_v56  }
0x22ca   :  { %3110 = vperm.xlu0 %6717, %v6856_v27  }
0x22cb   :  { %3107 = vperm.xlu1 %6718, %v6858_v61  }
0x2339   :  { %v3090_v4 = vpop.permute.xlu0 %3089 }
0x233a   :  { %v3093_v63 = vpop.permute.xlu1 %3092  ;;  %v3115_v5 = vrot.slane %v3090_v4, %v7620_v31 }
0x233b   :  { %v3119_v43 = vrot.slane %v3093_v63, %v7620_v31 }
0x233d   :  { %v3099_v54 = vpop.permute.xlu0 %3098  ;;  %v3144_v1 = vsel %vm801_vm4, %v3119_v43, %v3115_v5 }
0x233e   :  { %v3096_v11 = vpop.permute.xlu1 %3095  ;;  %v3127_v26 = vrot.slane %v3099_v54, %v7620_v31 }
0x233f   :  { %v3123_v60 = vrot.slane %v3096_v11, %v7620_v31 }
0x2341   :  { %v3145_v7 = vsel %vm803_vm5, %v3123_v60, %v3144_v1  ;;  %v3105_v51 = vpop.permute.xlu0 %3104 }
0x2342   :  { %v3102_v20 = vpop.permute.xlu1 %3101  ;;  %v3146_v19 = vsel %vm805_vm6, %v3127_v26, %v3145_v7  ;;  %v3135_v47 = vrot.slane %v3105_v51, %v7620_v31 }
0x2343   :  { %v3131_v50 = vrot.slane %v3102_v20, %v7620_v31 }
0x2345   :  { %v3147_v37 = vsel %vm807_vm7, %v3131_v50, %v3146_v19  ;;  %v3111_v2 = vpop.permute.xlu0 %3110 }
0x2346   :  { %v3108_v18 = vpop.permute.xlu1 %3107  ;;  %v3143_v52 = vrot.slane %v3111_v2, %v7620_v31  ;;  %v3148_v17 = vsel %vm809_vm8, %v3135_v47, %v3147_v37 }
0x2347   :  { %v3139_v29 = vrot.slane %v3108_v18, %v7620_v31 }
0x2349   :  { %v3149_v25 = vsel %vm811_vm9, %v3139_v29, %v3148_v17 }
0x234a   :  { %v3150_v4 = vsel %vm813_vm10, %v3143_v52, %v3149_v25  ;;  %v9569_v25 = vld [vmem:[#allocation41_spill] sm:$0xff] }
0x234b   :  { %v3152_v63 = vsel %vm816_vm11, %v3150_v4, 0.0  ;;  %v9570_v4 = vld [vmem:[#allocation42_spill] sm:$0xff] }
0x234c   :  { %3153 = vadd.xlane.f32.xlu1 %v3152_v63 }
0x23d5   :  { %v3154_v43 = vpop.xlane.xlu1 %3153 }
0x23d6   :  { %6859 = vrcp.f32 %v3154_v43 }
0x23e3   :  { %v6860_v5 = vpop.eup %6859 }
0x23e4   :  { %v3160_v54 = vrot.slane %v6860_v5, %v7582_v16  ;;  %v3164_v60 = vrot.slane %v6860_v5, %v7639_v57  ;;  %v3168_v26 = vrot.slane %v6860_v5, %v7642_v58  ;;  %v3172_v51 = vrot.slane %v6860_v5, %v7645_v59 }
0x23e5   :  { %v3176_v50 = vrot.slane %v6860_v5, %v9565_v3  ;;  %v3180_v47 = vrot.slane %v6860_v5, %v9564_v34  ;;  %v3184_v37 = vrot.slane %v6860_v5, %v9567_v49  ;;  %v3188_v2 = vrot.slane %v6860_v5, %v9566_v24  ;;  %v9571_v5 = vld [vmem:[#allocation43_spill] sm:$0xff] }
0x23e6   :  { %v3197_v11 = vmul.f32 %v6844_v39, %v3160_v54  ;;  %v3198_v1 = vmul.f32 %v6846_v10, %v3164_v60  ;;  %v3199_v7 = vmul.f32 %v6850_v33, %v3168_v26  ;;  %v3200_v20 = vmul.f32 %v6848_v15, %v3172_v51  ;;  %v9568_v15 = vld [vmem:[#allocation40_spill] sm:$0xff] }
0x23e7   :  { %v3201_v19 = vmul.f32 %v6854_v56, %v3176_v50  ;;  %v3202_v39 = vmul.f32 %v6852_v0, %v3180_v47  ;;  %v3203_v10 = vmul.f32 %v6858_v61, %v3184_v37  ;;  %v3204_v33 = vmul.f32 %v6856_v27, %v3188_v2 }
0x23e8   :  { %3207 = vperm.xlu0 %6717, %v3197_v11  }
0x23ec   :  { %3212 = vperm.xlu0 %6717, %v3198_v1  }
0x23f0   :  { %3217 = vperm.xlu0 %6717, %v3199_v7  }
0x23f4   :  { %3222 = vperm.xlu0 %6717, %v3200_v20   ;;  %v9572_v20 = vld [vmem:[#allocation44_spill] sm:$0xff] }
0x23f8   :  { %3227 = vperm.xlu0 %6717, %v3201_v19  }
0x23fc   :  { %3232 = vperm.xlu0 %6717, %v3202_v39  }
0x2400   :  { %3237 = vperm.xlu0 %6717, %v3203_v10  }
0x2404   :  { %3242 = vperm.xlu0 %6717, %v3204_v33  }
0x2463   :  { %v3208_v18 = vpop.permute.xlu0 %3207 }
0x2464   :  { %v3245_v56 = vmul.f32 %v9569_v25, %v3208_v18  ;;  %v9573_v18 = vld [vmem:[#allocation45_spill] sm:$0xff] }
0x2466   :  { %v3253_v61 = vsel %vm56_vm1, %v3245_v56, 0.0 }
0x2467   :  { %v3213_v52 = vpop.permute.xlu0 %3212  ;;  %v3254_v26 = vrot.slane %v3253_v61, 4 }
0x2468   :  { %v3246_v29 = vmul.f32 %v9568_v15, %v3213_v52 }
0x2469   :  { %v3255_v37 = vadd.f32 %v3254_v26, %v3253_v61 }
0x246a   :  { %v3260_v0 = vsel %vm56_vm1, %v3246_v29, 0.0 }
0x246b   :  { %v3218_v17 = vpop.permute.xlu0 %3217  ;;  %v3261_v27 = vrot.slane %v3260_v0, 4  ;;  %v3256_v56 = vrot.slane %v3255_v37, 2 }
0x246c   :  { %v3247_v63 = vmul.f32 %v9570_v4, %v3218_v17 }
0x246d   :  { %v3262_v19 = vadd.f32 %v3261_v27, %v3260_v0  ;;  %v9574_v0 = vld [vmem:[#allocation46_spill] sm:$0xff] }
0x246e   :  { %v3267_v43 = vsel %vm56_vm1, %v3247_v63, 0.0 }
0x246f   :  { %v3223_v54 = vpop.permute.xlu0 %3222  ;;  %v3268_v60 = vrot.slane %v3267_v43, 4  ;;  %v3263_v15 = vrot.slane %v3262_v19, 2 }
0x2470   :  { %v3248_v11 = vmul.f32 %v9571_v5, %v3223_v54 }
0x2471   :  { %v3269_v47 = vadd.f32 %v3268_v60, %v3267_v43 }
0x2472   :  { %v3274_v1 = vsel %vm56_vm1, %v3248_v11, 0.0  ;;  %v3264_v11 = vadd.f32 %v3263_v15, %v3262_v19 }
0x2473   :  { %v3275_v7 = vrot.slane %v3274_v1, 4  ;;  %v3228_v51 = vpop.permute.xlu0 %3227  ;;  %v3270_v17 = vrot.slane %v3269_v47, 2 }
0x2474   :  { %v3249_v50 = vmul.f32 %v9572_v20, %v3228_v51 }
0x2475   :  { %v3276_v10 = vadd.f32 %v3275_v7, %v3274_v1  ;;  %v3271_v61 = vadd.f32 %v3270_v17, %v3269_v47  ;;  %v3257_v1 = vadd.f32 %v3256_v56, %v3255_v37 }
0x2476   :  { %v3281_v39 = vsel %vm56_vm1, %v3249_v50, 0.0 }
0x2477   :  { %v3282_v2 = vrot.slane %v3281_v39, 4  ;;  %v3233_v33 = vpop.permute.xlu0 %3232  ;;  %v3277_v4 = vrot.slane %v3276_v10, 2  ;;  %v3272_v53 = vrot.slane %v3271_v61, 1 }
0x2478   :  { %v3250_v52 = vmul.f32 %v9573_v18, %v3233_v33  ;;  %v3265_v33 = vrot.slane %v3264_v11, 1 }
0x2479   :  { %v3283_v29 = vadd.f32 %v3282_v2, %v3281_v39  ;;  %v3278_v26 = vadd.f32 %v3277_v4, %v3276_v10  ;;  %v9575_v39 = vld [vmem:[#allocation47_spill] sm:$0xff]  ;;  %v3273_v4 = vadd.f32 %v3272_v53, %v3271_v61 }
0x247a   :  { %v3288_v25 = vsel %vm56_vm1, %v3250_v52, 0.0 }
0x247b   :  { %v3289_v63 = vrot.slane %v3288_v25, 4  ;;  %v3238_v54 = vpop.permute.xlu0 %3237  ;;  %v3284_v5 = vrot.slane %v3283_v29, 2  ;;  %v3279_v19 = vrot.slane %v3278_v26, 1 }
0x247c   :  { %v3251_v43 = vmul.f32 %v9574_v0, %v3238_v54  ;;  %v3258_v54 = vrot.slane %v3257_v1, 1 }
0x247d   :  { %v3290_v27 = vadd.f32 %v3289_v63, %v3288_v25  ;;  %v3285_v50 = vadd.f32 %v3284_v5, %v3283_v29  ;;  %v3266_v25 = vadd.f32 %v3265_v33, %v3264_v11  ;;  %v3280_v29 = vadd.f32 %v3279_v19, %v3278_v26  ;;  %v8584_v26 = vld [vmem:[%s9378_s11 + $0x10] sm:$0xff] }
0x247e   :  { %v3295_v60 = vsel %vm56_vm1, %v3251_v43, 0.0  ;;  %v3259_v63 = vadd.f32 %v3258_v54, %v3257_v1  ;;  %v8575_v1 = vld [vmem:[%s9378_s11 + $0x18] sm:$0xff] }
0x247f   :  { %v3291_v7 = vrot.slane %v3290_v27, 2  ;;  %v3296_v51 = vrot.slane %v3295_v60, 4  ;;  %v3243_v20 = vpop.permute.xlu0 %3242  ;;  %v3286_v17 = vrot.slane %v3285_v50, 1 }
0x2480   :  { %v3252_v2 = vmul.f32 %v9575_v39, %v3243_v20 }
0x2481   :  { %v3292_v18 = vadd.f32 %v3291_v7, %v3290_v27  ;;  %v3297_v52 = vadd.f32 %v3296_v51, %v3295_v60  ;;  %v3287_v43 = vadd.f32 %v3286_v17, %v3285_v50  ;;  %v3317_v27 = vsel %vm801_vm4, %v3266_v25, %v3259_v63  ;;  %v8591_v50 = vld [vmem:[%s9378_s11 + $0x8] sm:$0xff]  ;;  %v8613_v25 = vld [vmem:[%s9372_s3 + $0x38] sm:$0xff] }
0x2482   :  { %v3302_v62 = vsel %vm56_vm1, %v3252_v2, 0.0  ;;  %v3318_v51 = vsel %vm803_vm5, %v3273_v4, %v3317_v27  ;;  %v8650_v4 = vld [vmem:[%s9372_s3 + $0x10] sm:$0xff]  ;;  %v8657_v63 = vld [vmem:[%s9372_s3 + $0x8] sm:$0xff] }
0x2483   :  { %v3298_v15 = vrot.slane %v3297_v52, 2  ;;  %v3303_v47 = vrot.slane %v3302_v62, 4  ;;  %v3293_v37 = vrot.slane %v3292_v18, 1  ;;  %v3319_v39 = vsel %vm805_vm6, %v3280_v29, %v3318_v51  ;;  %v8664_v29 = vld [vmem:[%s9372_s3] sm:$0xff] }
0x2484   :  { %v3320_v11 = vsel %vm807_vm7, %v3287_v43, %v3319_v39 }
0x2485   :  { %v3299_v10 = vadd.f32 %v3298_v15, %v3297_v52  ;;  %v3304_v56 = vadd.f32 %v3303_v47, %v3302_v62  ;;  %v3294_v60 = vadd.f32 %v3293_v37, %v3292_v18  ;;  %v8598_v18 = vld [vmem:[%s9378_s11] sm:$0xff]  ;;  %v8629_v37 = vld [vmem:[%s9372_s3 + $0x28] sm:$0xff] }
0x2486   :  { %v8606_v15 = vld [vmem:[%s9379_s10] ss:$0 sm:$0xff] }
0x2487   :  { %v3300_v5 = vrot.slane %v3299_v10, 1  ;;  %v3305_v0 = vrot.slane %v3304_v56, 2  ;;  %v3321_v53 = vsel %vm809_vm8, %v3294_v60, %v3320_v11 }
0x2489   :  { %v3306_v7 = vadd.f32 %v3305_v0, %v3304_v56  ;;  %v3301_v20 = vadd.f32 %v3300_v5, %v3299_v10  ;;  %v8636_v10 = vld [vmem:[%s9372_s3 + $0x20] sm:$0xff]  ;;  %v8643_v56 = vld [vmem:[%s9372_s3 + $0x18] sm:$0xff] }
0x248a   :  { %v8671_v0 = vld [vmem:[%s9380_s12] ss:$0 sm:$0xff] }
0x248b   :  { %v3307_v2 = vrot.slane %v3306_v7, 1  ;;  %v3322_v62 = vsel %vm811_vm9, %v3301_v20, %v3321_v53 }
0x248d   :  { %v3308_v33 = vadd.f32 %v3307_v2, %v3306_v7 }
0x248f   :  { %v3323_v61 = vsel %vm813_vm10, %v3308_v33, %v3322_v62 }
0x2490   :  { %6451 = vmatmul.mubr.msk.f32.vlgmr.msra.gmra.mxu0 %vm56_vm1, %v3323_v61 }
0x2491   :  { %6465 = vmatpush3.msra.mxu0 %v8575_v1  ;;  %6472 = vmatprep.mubr.msk.f32.mxu0 %vm7102_vm0, %v9497_v32 }
0x2492   :  { %6466 = vmatprep.subr.mxu0 %v9497_v32 }
0x2493   :  { %6467 = vmatpush3.msra.mxu0 %v8584_v26 }
0x2494   :  { %6468 = vmatprep.subr.mxu0 %v9497_v32 }
0x2495   :  { %6469 = vmatpush3.msra.mxu0 %v8591_v50 }
0x2496   :  { %6470 = vmatprep.subr.mxu0 %v9497_v32 }
0x2497   :  { %6471 = vmatpush3.msra.mxu0 %v8598_v18 }
0x2498   :  { %6510 = vmatprep.subr.mxu0 %v9497_v32 }
0x2550   :  { %v3392_v52 = vpop.f32.mrf.mxu0 }
0x2551   :  { %v3463_v54 = vadd.f32 %v8471_v42, %v3392_v52  ;;  %v8622_v42 = vld [vmem:[%s9372_s3 + $0x30] sm:$0xff] }
0x2552   :  { %v6452_v19 = vpop.f32.mrf.mxu0 }
0x2553   :  { %v3466_v47 = vadd.f32 %v8606_v15, %v3463_v54 }
0x2555   :  { %6861 = vtanh.f32 %v3466_v47 }
0x2562   :  { %v6862_v17 = vpop.eup %6861 }
0x2563   :  { %6473 = vmatmul.mubr.msk.f32.vlgmr.msra.gmra.mxu0 %vm56_vm1, %v6862_v17  ;;  %v8723_v17 = vld [vmem:[%s9372_s3 + $0x60] sm:$0xff] }
0x2564   :  { %6511 = vmatpush3.msra.mxu0 %v8613_v25  ;;  %6526 = vmatprep.mubr.msk.f32.mxu0 %vm7102_vm0, %v9497_v32 }
0x2565   :  { %6512 = vmatprep.subr.mxu0 %v9497_v32 }
0x2566   :  { %6513 = vmatpush3.msra.mxu0 %v8622_v42 }
0x2567   :  { %6514 = vmatprep.subr.mxu0 %v9497_v32 }
0x2568   :  { %6515 = vmatpush3.msra.mxu0 %v8629_v37 }
0x2569   :  { %6516 = vmatprep.subr.mxu0 %v9497_v32 }
0x256a   :  { %6517 = vmatpush3.msra.mxu0 %v8636_v10 }
0x256b   :  { %6518 = vmatprep.subr.mxu0 %v9497_v32 }
0x256c   :  { %6519 = vmatpush3.msra.mxu0 %v8643_v56 }
0x256d   :  { %6520 = vmatprep.subr.mxu0 %v9497_v32 }
0x256e   :  { %6521 = vmatpush3.msra.mxu0 %v8650_v4 }
0x256f   :  { %6522 = vmatprep.subr.mxu0 %v9497_v32 }
0x2570   :  { %6523 = vmatpush3.msra.mxu0 %v8657_v63 }
0x2571   :  { %6524 = vmatprep.subr.mxu0 %v9497_v32 }
0x2572   :  { %6525 = vmatpush3.msra.mxu0 %v8664_v29 }
0x2573   :  { %6529 = vmatprep.subr.mxu0 %v9497_v32 }
0x2623   :  { %v3537_v5 = vpop.f32.mrf.mxu0 }
0x2624   :  { %v8674_v43 = vadd.f32 %v8671_v0, %v3537_v5  ;;  %v8730_v5 = vld [vmem:[%s9372_s3 + $0x58] sm:$0xff] }
0x2625   :  { %v6474_v27 = vpop.f32.mrf.mxu0 }
0x2626   :  { %9576 = vst [vmem:[#allocation18_spill] sm:$0xff] %v8674_v43  ;;  %3541 = vmax.xlane.f32.xlu0 %v8674_v43  ;;  %v8737_v27 = vld [vmem:[%s9372_s3 + $0x50] sm:$0xff] }
0x26af   :  { %v8677_v60 = vpop.xlane.xlu0 %3541 }
0x26b0   :  { %9577 = vst [vmem:[#allocation17_spill] sm:$0xff] %v8677_v60  ;;  %vm3543_vm13 = vcmp.eq.f32.partialorder %v8674_v43, %v8677_v60 }
0x26b1   :  { %v3544_v7 = vsel %vm3543_vm13, %v7344_v30, 128 }
0x26b2   :  { %v3546_v51 = vshra.s32 %v3544_v7, 16  ;;  %v3545_v39 = vand.u32 65535, %v3544_v7  ;;  %v8744_v7 = vld [vmem:[%s9372_s3 + $0x48] sm:$0xff] }
0x26b4   :  { %v3548_v20 = vcvt.s32.f32 %v3546_v51  ;;  %v3547_v11 = vcvt.s32.f32 %v3545_v39  ;;  %v8751_v51 = vld [vmem:[%s9372_s3 + $0x40] sm:$0xff] }
0x26b5   :  { %v8758_v39 = vld [vmem:[%s9373_s4] ss:$0 sm:$0xff] }
0x26b6   :  { %3549 = vmin.xlane.f32.xlu1 %v3548_v20  ;;  %9578 = vst [vmem:[#allocation19_spill] sm:$0xff] %v8758_v39 }
0x273f   :  { %v3550_v2 = vpop.xlane.xlu1 %3549 }
0x2740   :  { %vm3551_vm14 = vcmp.eq.f32.partialorder %v3548_v20, %v3550_v2  ;;  %v3556_v53 = vcvt.f32.s32 %v3550_v2 }
0x2741   :  { %v3552_v33 = vsel %vm3551_vm14, %v3547_v11, inf }
0x2742   :  { %3553 = vmin.xlane.f32.xlu1 %v3552_v33  ;;  %v3557_v61 = vshll.u32 %v3556_v53, 16 }
0x27cb   :  { %v3554_v62 = vpop.xlane.xlu1 %3553 }
0x27cc   :  { %v3555_v52 = vcvt.f32.s32 %v3554_v62 }
0x27ce   :  { %v3558_v54 = vadd.s32 %v3557_v61, %v3555_v52 }
0x27d0   :  { %vm3568_vm15 = vcmp.eq.s32.totalorder %v7344_v30, %v3558_v54 }
0x27d1   :  { %6508 = vmatmul.mubr.msk.f32.vlgmr.msra.gmra.mxu1 %vm3568_vm15, %v9531_v55 }
0x27d2   :  { %6549 = vmatpush3.msra.mxu1 %v8315_v6  ;;  %6556 = vmatprep.mubr.msk.f32.mxu1 %vm7102_vm0, %v9497_v32 }
0x27d3   :  { %6550 = vmatprep.subr.mxu1 %v9497_v32 }
0x27d4   :  { %6551 = vmatpush3.msra.mxu1 %v8324_v9  ;;  %v8700_v9 = vld [vmem:[%s9372_s3 + $0x78] sm:$0xff] }
0x27d5   :  { %6552 = vmatprep.subr.mxu1 %v9497_v32 }
0x27d6   :  { %6553 = vmatpush3.msra.mxu1 %v8331_v48  ;;  %v8709_v48 = vld [vmem:[%s9372_s3 + $0x70] sm:$0xff] }
0x27d7   :  { %6554 = vmatprep.subr.mxu1 %v9497_v32 }
0x27d8   :  { %6555 = vmatpush3.msra.mxu1 %v8338_v13  ;;  %v8716_v13 = vld [vmem:[%s9372_s3 + $0x68] sm:$0xff] }
0x27d9   :  { %6570 = vmatprep.subr.mxu1 %v9497_v32 }
0x2891   :  { %v3637_v19 = vpop.f32.mrf.mxu1 }
0x2892   :  { %v3641_v6 = vsel %vm56_vm1, %v3637_v19, %v8368_v46 }
0x2893   :  { %v6509_v47 = vpop.f32.mrf.mxu1  ;;  %6527 = vmatmul.mubr.msk.f32.vlgmr.msra.gmra.mxu0 %vm330_vm3, %v3641_v6 }
0x2894   :  { %6530 = vmatpush3.msra.mxu0 %v8700_v9  ;;  %6545 = vmatprep.mubr.msk.f32.mxu0 %vm7102_vm0, %v9497_v32 }
0x2895   :  { %6531 = vmatprep.subr.mxu0 %v9497_v32 }
0x2896   :  { %6532 = vmatpush3.msra.mxu0 %v8709_v48 }
0x2897   :  { %6533 = vmatprep.subr.mxu0 %v9497_v32 }
0x2898   :  { %6534 = vmatpush3.msra.mxu0 %v8716_v13 }
0x2899   :  { %6535 = vmatprep.subr.mxu0 %v9497_v32 }
0x289a   :  { %6536 = vmatpush3.msra.mxu0 %v8723_v17 }
0x289b   :  { %6537 = vmatprep.subr.mxu0 %v9497_v32 }
0x289c   :  { %6538 = vmatpush3.msra.mxu0 %v8730_v5 }
0x289d   :  { %6539 = vmatprep.subr.mxu0 %v9497_v32 }
0x289e   :  { %6540 = vmatpush3.msra.mxu0 %v8737_v27 }
0x289f   :  { %6541 = vmatprep.subr.mxu0 %v9497_v32 }
0x28a0   :  { %6542 = vmatpush3.msra.mxu0 %v8744_v7 }
0x28a1   :  { %6543 = vmatprep.subr.mxu0 %v9497_v32 }
0x28a2   :  { %6544 = vmatpush3.msra.mxu0 %v8751_v51 }
0x28a3   :  { %6559 = vmatprep.subr.mxu0 %v9497_v32 }
0x2953   :  { %v3711_v20 = vpop.f32.mrf.mxu0 }
0x2954   :  { %v3712_v2 = vadd.f32 %v8758_v39, %v3711_v20 }
0x2955   :  { %v6528_v11 = vpop.f32.mrf.mxu0 }
0x2956   :  { %3722 = vrot.lane.b32.xlu1 %v3712_v2, %s7103_s22  ;;  %v5798_v33 = vmul.f32 -1.442695, %v3712_v2 }
0x2958   :  { %6863 = vpow2.f32 %v5798_v33 }
0x2965   :  { %v6864_v53 = vpop.eup %6863 }
0x2966   :  { %v3718_v62 = vadd.f32 1.0, %v6864_v53 }
0x2968   :  { %6865 = vrcp.f32 %v3718_v62 }
0x2975   :  { %v6866_v61 = vpop.eup %6865 }
0x2976   :  { %v3732_v20 = vsub.f32 1.0, %v6866_v61  ;;  %v3738_v43 = vmul.f32 %v6866_v61, %v8368_v46 }
0x29c8   :  { %v3723_v52 = vpop.permute.xlu1 %3722 }
0x29c9   :  { %v3725_v54 = vmul.f32 %v6866_v61, %v3723_v52 }
0x29cb   :  { %3727 = vrot.lane.b32.xlu1 %v3725_v54, %s7105_s17 }
0x2a3d   :  { %v3728_v19 = vpop.permute.xlu1 %3727 }
0x2a3e   :  { %v3730_v6 = vadd.f32 %v3728_v19, %v3712_v2 }
0x2a40   :  { %6867 = vtanh.f32 %v3730_v6 }
0x2a4d   :  { %v6868_v47 = vpop.eup %6867 }
0x2a4e   :  { %3734 = vrot.lane.b32.xlu0 %v6868_v47, %s7106_s30 }
0x2ac0   :  { %v3735_v11 = vpop.permute.xlu0 %3734 }
0x2ac1   :  { %v3737_v60 = vmul.f32 %v3735_v11, %v3732_v20 }
0x2ac3   :  { %v8765_v33 = vadd.f32 %v3738_v43, %v3737_v60 }
0x2ac5   :  { %3741 = vrot.lane.b32.xlu1 %v8765_v33, %s7106_s30 }
0x2b37   :  { %v3742_v53 = vpop.permute.xlu1 %3741 }
0x2b38   :  { %v3744_v62 = vsel %vm56_vm1, %v3742_v53, %v8410_v28 }
0x2b39   :  { %6546 = vmatmul.mubr.msk.f32.vlgmr.msra.gmra.mxu0 %vm330_vm3, %v3744_v62 }
0x2b3a   :  { %6560 = vmatpush3.msra.mxu0 %v8378_v45  ;;  %6567 = vmatprep.mubr.msk.f32.mxu0 %vm7102_vm0, %v9497_v32  ;;  %v8785_v45 = vld [vmem:[%s9373_s4 + $0x1] ss:$0 sm:$0xff] }
0x2b3b   :  { %6561 = vmatprep.subr.mxu0 %v9497_v32  ;;  %9579 = vst [vmem:[#allocation20_spill] sm:$0xff] %v8785_v45 }
0x2b3c   :  { %6562 = vmatpush3.msra.mxu0 %v8387_v14 }
0x2b3d   :  { %6563 = vmatprep.subr.mxu0 %v9497_v32 }
0x2b3e   :  { %6564 = vmatpush3.msra.mxu0 %v8394_v44 }
0x2b3f   :  { %6565 = vmatprep.subr.mxu0 %v9497_v32 }
0x2b40   :  { %6566 = vmatpush3.msra.mxu0 %v8401_v23 }
0x2b41   :  { %6581 = vmatprep.subr.mxu0 %v9497_v32 }
0x2bf9   :  { %v3814_v46 = vpop.f32.mrf.mxu0 }
0x2bfa   :  { %v3815_v43 = vadd.f32 %v8785_v45, %v3814_v46 }
0x2bfb   :  { %v6547_v60 = vpop.f32.mrf.mxu0 }
0x2bfc   :  { %3825 = vrot.lane.b32.xlu1 %v3815_v43, %s7103_s22  ;;  %v5800_v14 = vmul.f32 -1.442695, %v3815_v43  ;;  %v8816_v60 = vld [vmem:[%s9375_s8 + $0x8] sm:$0xff] }
0x2bfd   :  { %9583 = vst [vmem:[#allocation24_spill] sm:$0xff] %v8816_v60 }
0x2bfe   :  { %6869 = vpow2.f32 %v5800_v14  ;;  %v8823_v14 = vld [vmem:[%s9375_s8] sm:$0xff] }
0x2bff   :  { %9584 = vst [vmem:[#allocation25_spill] sm:$0xff] %v8823_v14 }
0x2c0b   :  { %v6870_v44 = vpop.eup %6869 }
0x2c0c   :  { %v3821_v2 = vadd.f32 1.0, %v6870_v44  ;;  %v7062_v44 = vld [vmem:[%s9368_s1 + $0x78] sm:$0xff] }
0x2c0e   :  { %6871 = vrcp.f32 %v3821_v2  ;;  %v7063_v2 = vld [vmem:[%s9368_s1 + $0x70] sm:$0xff] }
0x2c1b   :  { %v6872_v61 = vpop.eup %6871 }
0x2c1c   :  { %v3835_v47 = vsub.f32 1.0, %v6872_v61  ;;  %v3841_v11 = vmul.f32 %v6872_v61, %v8410_v28  ;;  %v8809_v28 = vld [vmem:[%s9375_s8 + $0x10] sm:$0xff] }
0x2c1d   :  { %9582 = vst [vmem:[#allocation23_spill] sm:$0xff] %v8809_v28 }
0x2c6e   :  { %v3826_v23 = vpop.permute.xlu1 %3825 }
0x2c6f   :  { %v3828_v52 = vmul.f32 %v6872_v61, %v3826_v23  ;;  %v7064_v61 = vld [vmem:[%s9368_s1 + $0x68] sm:$0xff]  ;;  %v7065_v23 = vld [vmem:[%s9368_s1 + $0x60] sm:$0xff] }
0x2c71   :  { %3830 = vrot.lane.b32.xlu1 %v3828_v52, %s7105_s17  ;;  %v7066_v52 = vld [vmem:[%s9368_s1 + $0x58] sm:$0xff] }
0x2ce3   :  { %v3831_v54 = vpop.permute.xlu1 %3830 }
0x2ce4   :  { %v3833_v19 = vadd.f32 %v3831_v54, %v3815_v43  ;;  %v8800_v43 = vld [vmem:[%s9375_s8 + $0x18] sm:$0xff]  ;;  %v7067_v54 = vld [vmem:[%s9368_s1 + $0x50] sm:$0xff] }
0x2ce5   :  { %9581 = vst [vmem:[#allocation22_spill] sm:$0xff] %v8800_v43 }
0x2ce6   :  { %6873 = vtanh.f32 %v3833_v19  ;;  %v7068_v19 = vld [vmem:[%s9368_s1 + $0x48] sm:$0xff] }
0x2cf3   :  { %v6874_v6 = vpop.eup %6873 }
0x2cf4   :  { %3837 = vrot.lane.b32.xlu1 %v6874_v6, %s7106_s30  ;;  %v7069_v6 = vld [vmem:[%s9368_s1 + $0x40] sm:$0xff] }
0x2d66   :  { %v3838_v20 = vpop.permute.xlu1 %3837 }
0x2d67   :  { %v3840_v53 = vmul.f32 %v3838_v20, %v3835_v47  ;;  %v7070_v47 = vld [vmem:[%s9368_s1 + $0x38] sm:$0xff]  ;;  %v7071_v20 = vld [vmem:[%s9368_s1 + $0x30] sm:$0xff] }
0x2d69   :  { %v8792_v62 = vadd.f32 %v3841_v11, %v3840_v53  ;;  %v7072_v11 = vld [vmem:[%s9368_s1 + $0x28] sm:$0xff]  ;;  %v7073_v53 = vld [vmem:[%s9368_s1 + $0x20] sm:$0xff] }
0x2d6b   :  { %9580 = vst [vmem:[#allocation21_spill] sm:$0xff] %v8792_v62  ;;  %3844 = vrot.lane.b32.xlu1 %v8792_v62, %s7106_s30 }
0x2ddd   :  { %v3845_v46 = vpop.permute.xlu1 %3844 }
0x2dde   :  { %6557 = vmatmul.mubr.msk.f32.vlgmr.msra.gmra.mxu1 %vm56_vm1, %v3845_v46 }
0x2ddf   :  { %6571 = vmatpush3.msra.mxu1 %v8800_v43  ;;  %6578 = vmatprep.mubr.msk.f32.mxu1 %vm7102_vm0, %v9497_v32 }
0x2de0   :  { %6572 = vmatprep.subr.mxu1 %v9497_v32 }
0x2de1   :  { %6573 = vmatpush3.msra.mxu1 %v8809_v28 }
0x2de2   :  { %6574 = vmatprep.subr.mxu1 %v9497_v32 }
0x2de3   :  { %6575 = vmatpush3.msra.mxu1 %v8816_v60 }
0x2de4   :  { %6576 = vmatprep.subr.mxu1 %v9497_v32 }
0x2de5   :  { %6577 = vmatpush3.msra.mxu1 %v8823_v14 }
0x2de6   :  { %6579 = vmatmul.mubr.msk.f32.vlgmr.msra.gmra.mxu1 %vm56_vm1, %v3845_v46  ;;  %6592 = vmatprep.subr.mxu1 %v9497_v32  ;;  %v7074_v46 = vld [vmem:[%s9368_s1 + $0x18] sm:$0xff] }
0x2de7   :  { %6593 = vmatpush3.msra.mxu1 %v7062_v44  ;;  %6624 = vmatprep.mubr.msk.f32.mxu1 %vm7102_vm0, %v9497_v32  ;;  %v7075_v44 = vld [vmem:[%s9368_s1 + $0x10] sm:$0xff] }
0x2de8   :  { %6594 = vmatprep.subr.mxu1 %v9497_v32 }
0x2de9   :  { %6595 = vmatpush3.msra.mxu1 %v7063_v2  ;;  %v7076_v2 = vld [vmem:[%s9368_s1 + $0x8] sm:$0xff] }
0x2dea   :  { %6596 = vmatprep.subr.mxu1 %v9497_v32 }
0x2deb   :  { %6597 = vmatpush3.msra.mxu1 %v7064_v61  ;;  %v7077_v61 = vld [vmem:[%s9368_s1] sm:$0xff] }
0x2dec   :  { %6598 = vmatprep.subr.mxu1 %v9497_v32 }
0x2ded   :  { %6599 = vmatpush3.msra.mxu1 %v7065_v23 }
0x2dee   :  { %6600 = vmatprep.subr.mxu1 %v9497_v32 }
0x2def   :  { %6601 = vmatpush3.msra.mxu1 %v7066_v52 }
0x2df0   :  { %6602 = vmatprep.subr.mxu1 %v9497_v32 }
0x2df1   :  { %6603 = vmatpush3.msra.mxu1 %v7067_v54 }
0x2df2   :  { %6604 = vmatprep.subr.mxu1 %v9497_v32 }
0x2df3   :  { %6605 = vmatpush3.msra.mxu1 %v7068_v19 }
0x2df4   :  { %6606 = vmatprep.subr.mxu1 %v9497_v32 }
0x2df5   :  { %6607 = vmatpush3.msra.mxu1 %v7069_v6 }
0x2df6   :  { %6608 = vmatprep.subr.mxu1 %v9497_v32 }
0x2df7   :  { %6609 = vmatpush3.msra.mxu1 %v7070_v47 }
0x2df8   :  { %6610 = vmatprep.subr.mxu1 %v9497_v32 }
0x2df9   :  { %6611 = vmatpush3.msra.mxu1 %v7071_v20 }
0x2dfa   :  { %6612 = vmatprep.subr.mxu1 %v9497_v32 }
0x2dfb   :  { %6613 = vmatpush3.msra.mxu1 %v7072_v11 }
0x2dfc   :  { %6614 = vmatprep.subr.mxu1 %v9497_v32 }
0x2dfd   :  { %6615 = vmatpush3.msra.mxu1 %v7073_v53 }
0x2dfe   :  { %6616 = vmatprep.subr.mxu1 %v9497_v32 }
0x2dff   :  { %6617 = vmatpush3.msra.mxu1 %v7074_v46 }
0x2e00   :  { %6618 = vmatprep.subr.mxu1 %v9497_v32 }
0x2e01   :  { %6619 = vmatpush3.msra.mxu1 %v7075_v44 }
0x2e02   :  { %6620 = vmatprep.subr.mxu1 %v9497_v32 }
0x2e03   :  { %6621 = vmatpush3.msra.mxu1 %v7076_v2 }
0x2e04   :  { %6622 = vmatprep.subr.mxu1 %v9497_v32 }
0x2e05   :  { %6623 = vmatpush3.msra.mxu1 %v7077_v61 }
0x2e06   :  { %6665 = vmatprep.subr.mxu1 %v9497_v32 }
0x2e9e   :  { %v3914_v23 = vpop.f32.mrf.mxu1 }
0x2e9f   :  { %v3919_v52 = vcombine.high %v3914_v23, %v3914_v23  ;;  %v3926_v54 = vrot.slane %v3914_v23, %v9554_v21 }
0x2ea0   :  { %v6558_v19 = vpop.f32.mrf.mxu1 }
0x2ea1   :  { %v3933_v6 = vrot.slane %v3919_v52, %v9554_v21  ;;  %v3934_v47 = vcombine.high %v3926_v54, %v3926_v54  ;;  %v3942_v20 = vrot.slane %v3926_v54, %v9554_v21 }
0x2ea3   :  { %v3935_v11 = vcombine.high %v3933_v6, %v3933_v6  ;;  %v3949_v53 = vrot.slane %v3933_v6, %v9554_v21  ;;  %v3956_v46 = vrot.slane %v3934_v47, %v9554_v21  ;;  %v3964_v44 = vcombine.high %v3942_v20, %v3942_v20 }
0x2ea4   :  { %v3971_v2 = vrot.slane %v3942_v20, %v7582_v16 }
0x2ea5   :  { %v3963_v61 = vrot.slane %v3935_v11, %v9554_v21  ;;  %v3966_v14 = vcombine.high %v3956_v46, %v3956_v46  ;;  %v3975_v60 = vrot.slane %v3956_v46, %v7582_v16  ;;  %v3965_v23 = vcombine.high %v3949_v53, %v3949_v53 }
0x2ea6   :  { %v3979_v19 = vrot.slane %v3964_v44, %v7582_v16  ;;  %v3987_v52 = vrot.slane %v3949_v53, %v7582_v16  ;;  %v4008_v54 = vadd.f32 %v3971_v2, %v9555_v41  ;;  %v8905_v28 = vpop.f32.mrf.mxu1 }
0x2ea7   :  { %v3967_v6 = vcombine.high %v3963_v61, %v3963_v61  ;;  %v3983_v47 = vrot.slane %v3966_v14, %v7582_v16  ;;  %v3991_v43 = vrot.slane %v3963_v61, %v7582_v16  ;;  %v4009_v20 = vadd.f32 %v9556_v38, %v3975_v60 }
0x2ea8   :  { %v4010_v11 = vadd.f32 %v3979_v19, %v9557_v40  ;;  %6875 = vtanh.f32 %v4008_v54  ;;  %v6580_v46 = vpop.f32.mrf.mxu1  ;;  %v4012_v53 = vadd.f32 %v3987_v52, %v9559_v22  ;;  %v3995_v2 = vrot.slane %v3965_v23, %v7582_v16  ;;  %v8921_v19 = vld [vmem:[%s9376_s7] ss:$0 sm:$0xff] }
0x2ea9   :  { %v3999_v21 = vrot.slane %v3967_v6, %v7582_v16  ;;  %v4011_v44 = vadd.f32 %v9558_v12, %v3983_v47  ;;  %v4013_v41 = vadd.f32 %v9561_v8, %v3991_v43  ;;  %6877 = vtanh.f32 %v4009_v20  ;;  %9585 = vst [vmem:[#allocation26_spill] sm:$0xff] %v8921_v19 }
0x2eaa   :  { %6879 = vtanh.f32 %v4010_v11  ;;  %v4014_v60 = vadd.f32 %v3995_v2, %v9560_v36 }
0x2eab   :  { %v4015_v14 = vadd.f32 %v9562_v35, %v3999_v21  ;;  %6881 = vtanh.f32 %v4011_v44 }
0x2eac   :  { %6883 = vtanh.f32 %v4012_v53 }
0x2ead   :  { %6885 = vtanh.f32 %v4013_v41 }
0x2eae   :  { %6887 = vtanh.f32 %v4015_v14 }
0x2eaf   :  { %6889 = vtanh.f32 %v4014_v60 }
0x2eb5   :  { %v6876_v61 = vpop.eup %6875 }
0x2eb6   :  { %v4024_v23 = vmul.f32 %v8921_v19, %v6876_v61  ;;  %v6878_v43 = vpop.eup %6877 }
0x2eb7   :  { %v6880_v52 = vpop.eup %6879  ;;  %v4025_v21 = vmul.f32 %v8921_v19, %v6878_v43 }
0x2eb8   :  { %v4032_v54 = vsel %vm56_vm1, %v4024_v23, 0.0  ;;  %v6882_v6 = vpop.eup %6881  ;;  %v4026_v11 = vmul.f32 %v8921_v19, %v6880_v52 }
0x2eb9   :  { %4033 = vadd.xlane.f32.xlu1 %v4032_v54  ;;  %v6884_v47 = vpop.eup %6883  ;;  %v4035_v41 = vsel %vm56_vm1, %v4025_v21, 0.0  ;;  %v4027_v20 = vmul.f32 %v8921_v19, %v6882_v6 }
0x2eba   :  { %v6886_v46 = vpop.eup %6885  ;;  %4036 = vadd.xlane.f32.xlu0 %v4035_v41  ;;  %v4038_v14 = vsel %vm56_vm1, %v4026_v11, 0.0  ;;  %v4028_v60 = vmul.f32 %v8921_v19, %v6884_v47 }
0x2ebb   :  { %v4041_v44 = vsel %vm56_vm1, %v4027_v20, 0.0  ;;  %v4029_v53 = vmul.f32 %v8921_v19, %v6886_v46  ;;  %v6888_v2 = vpop.eup %6887 }
0x2ebc   :  { %v6890_v61 = vpop.eup %6889  ;;  %v4031_v43 = vmul.f32 %v8921_v19, %v6888_v2  ;;  %v4044_v52 = vsel %vm56_vm1, %v4028_v60, 0.0 }
0x2ebd   :  { %4042 = vadd.xlane.f32.xlu1 %v4041_v44  ;;  %v4047_v23 = vsel %vm56_vm1, %v4029_v53, 0.0  ;;  %v4030_v54 = vmul.f32 %v8921_v19, %v6890_v61 }
0x2ebe   :  { %4039 = vadd.xlane.f32.xlu0 %v4038_v14  ;;  %v4053_v21 = vsel %vm56_vm1, %v4031_v43, 0.0 }
0x2ebf   :  { %v4050_v6 = vsel %vm56_vm1, %v4030_v54, 0.0 }
0x2ec1   :  { %4048 = vadd.xlane.f32.xlu1 %v4047_v23 }
0x2ec2   :  { %4045 = vadd.xlane.f32.xlu0 %v4044_v52 }
0x2ec5   :  { %4054 = vadd.xlane.f32.xlu1 %v4053_v21 }
0x2ec6   :  { %4051 = vadd.xlane.f32.xlu0 %v4050_v6 }
0x2f42   :  { %v4034_v41 = vpop.xlane.xlu1 %4033 }
0x2f43   :  { %v4037_v47 = vpop.xlane.xlu0 %4036  ;;  %v4067_v46 = vrot.slane %v4034_v41, %v7620_v31 }
0x2f44   :  { %v4071_v20 = vrot.slane %v4037_v47, %v7620_v31 }
0x2f46   :  { %v4043_v11 = vpop.xlane.xlu1 %4042  ;;  %v4096_v2 = vsel %vm801_vm4, %v4071_v20, %v4067_v46 }
0x2f47   :  { %v4040_v44 = vpop.xlane.xlu0 %4039  ;;  %v4079_v61 = vrot.slane %v4043_v11, %v7620_v31 }
0x2f48   :  { %v4075_v53 = vrot.slane %v4040_v44, %v7620_v31 }
0x2f4a   :  { %v4049_v14 = vpop.xlane.xlu1 %4048  ;;  %v4097_v60 = vsel %vm803_vm5, %v4075_v53, %v4096_v2 }
0x2f4b   :  { %v4046_v23 = vpop.xlane.xlu0 %4045  ;;  %v4098_v52 = vsel %vm805_vm6, %v4079_v61, %v4097_v60  ;;  %v4087_v6 = vrot.slane %v4049_v14, %v7620_v31 }
0x2f4c   :  { %v4083_v43 = vrot.slane %v4046_v23, %v7620_v31 }
0x2f4e   :  { %v4099_v54 = vsel %vm807_vm7, %v4083_v43, %v4098_v52  ;;  %v4055_v21 = vpop.xlane.xlu1 %4054 }
0x2f4f   :  { %v4052_v19 = vpop.xlane.xlu0 %4051  ;;  %v4095_v20 = vrot.slane %v4055_v21, %v7620_v31  ;;  %v4100_v46 = vsel %vm809_vm8, %v4087_v6, %v4099_v54 }
0x2f50   :  { %v4091_v35 = vrot.slane %v4052_v19, %v7620_v31 }
0x2f52   :  { %v4101_v53 = vsel %vm811_vm9, %v4091_v35, %v4100_v46 }
0x2f53   :  { %v4102_v2 = vsel %vm813_vm10, %v4095_v20, %v4101_v53 }
0x2f54   :  { %v4104_v8 = vsel %vm816_vm11, %v4102_v2, -inf }
0x2f55   :  { %4105 = vmax.xlane.f32.xlu0 %v4104_v8 }
0x2fde   :  { %v4106_v60 = vpop.xlane.xlu0 %4105 }
0x2fdf   :  { %v4111_v61 = vrot.slane %v4106_v60, %v7582_v16  ;;  %v4115_v43 = vrot.slane %v4106_v60, %v7639_v57  ;;  %v4119_v52 = vrot.slane %v4106_v60, %v7642_v58  ;;  %v4127_v36 = vrot.slane %v4106_v60, %v9565_v3 }
0x2fe0   :  { %v4123_v22 = vrot.slane %v4106_v60, %v7645_v59  ;;  %v4135_v35 = vrot.slane %v4106_v60, %v9567_v49  ;;  %v4131_v8 = vrot.slane %v4106_v60, %v9564_v34  ;;  %v4139_v62 = vrot.slane %v4106_v60, %v9566_v24 }
0x2fe1   :  { %v4148_v12 = vsub.f32 %v4034_v41, %v4111_v61  ;;  %v4149_v54 = vsub.f32 %v4037_v47, %v4115_v43  ;;  %v4150_v6 = vsub.f32 %v4040_v44, %v4119_v52  ;;  %v4152_v20 = vsub.f32 %v4046_v23, %v4127_v36 }
0x2fe2   :  { %v4151_v2 = vsub.f32 %v4043_v11, %v4123_v22  ;;  %v4154_v38 = vsub.f32 %v4052_v19, %v4135_v35  ;;  %v4153_v39 = vsub.f32 %v4049_v14, %v4131_v8  ;;  %v4155_v44 = vsub.f32 %v4055_v21, %v4139_v62 }
0x2fe3   :  { %v4156_v46 = vmul.f32 1.442695, %v4148_v12  ;;  %v4158_v53 = vmul.f32 1.442695, %v4149_v54  ;;  %v4160_v40 = vmul.f32 1.442695, %v4150_v6 }
0x2fe4   :  { %v4164_v45 = vmul.f32 1.442695, %v4152_v20  ;;  %v4162_v41 = vmul.f32 1.442695, %v4151_v2  ;;  %v4168_v47 = vmul.f32 1.442695, %v4154_v38 }
0x2fe5   :  { %6891 = vpow2.f32 %v4156_v46  ;;  %v4166_v36 = vmul.f32 1.442695, %v4153_v39  ;;  %v4170_v12 = vmul.f32 1.442695, %v4155_v44 }
0x2fe6   :  { %6893 = vpow2.f32 %v4158_v53 }
0x2fe7   :  { %6895 = vpow2.f32 %v4160_v40 }
0x2fe8   :  { %6897 = vpow2.f32 %v4164_v45 }
0x2fe9   :  { %6899 = vpow2.f32 %v4162_v41 }
0x2fea   :  { %6901 = vpow2.f32 %v4168_v47 }
0x2feb   :  { %6903 = vpow2.f32 %v4166_v36 }
0x2fec   :  { %6905 = vpow2.f32 %v4170_v12 }
0x2ff2   :  { %v6892_v23 = vpop.eup %6891 }
0x2ff3   :  { %v6894_v22 = vpop.eup %6893  ;;  %4181 = vperm.xlu1 %6718, %v6892_v23  }
0x2ff4   :  { %4184 = vperm.xlu0 %6717, %v6894_v22   ;;  %v6896_v19 = vpop.eup %6895 }
0x2ff5   :  { %v6898_v11 = vpop.eup %6897 }
0x2ff6   :  { %v6900_v14 = vpop.eup %6899 }
0x2ff7   :  { %4187 = vperm.xlu1 %6718, %v6896_v19   ;;  %v6902_v40 = vpop.eup %6901 }
0x2ff8   :  { %4193 = vperm.xlu0 %6717, %v6898_v11   ;;  %v6904_v38 = vpop.eup %6903 }
0x2ff9   :  { %v6906_v45 = vpop.eup %6905 }
0x2ffb   :  { %4190 = vperm.xlu1 %6718, %v6900_v14  }
0x2ffc   :  { %4199 = vperm.xlu0 %6717, %v6902_v40  }
0x2fff   :  { %4196 = vperm.xlu1 %6718, %v6904_v38  }
0x3003   :  { %4202 = vperm.xlu1 %6718, %v6906_v45  }
0x306e   :  { %v4182_v39 = vpop.permute.xlu1 %4181 }
0x306f   :  { %v4185_v62 = vpop.permute.xlu0 %4184  ;;  %v4207_v61 = vrot.slane %v4182_v39, %v7620_v31 }
0x3070   :  { %v4211_v60 = vrot.slane %v4185_v62, %v7620_v31 }
0x3072   :  { %v4188_v21 = vpop.permute.xlu1 %4187  ;;  %v4236_v6 = vsel %vm801_vm4, %v4211_v60, %v4207_v61 }
0x3073   :  { %v4215_v43 = vrot.slane %v4188_v21, %v7620_v31  ;;  %v4194_v52 = vpop.permute.xlu0 %4193 }
0x3074   :  { %v4223_v53 = vrot.slane %v4194_v52, %v7620_v31 }
0x3075   :  { %v4237_v20 = vsel %vm803_vm5, %v4215_v43, %v4236_v6 }
0x3076   :  { %v4191_v54 = vpop.permute.xlu1 %4190 }
0x3077   :  { %v4219_v35 = vrot.slane %v4191_v54, %v7620_v31  ;;  %v4200_v2 = vpop.permute.xlu0 %4199 }
0x3078   :  { %v4231_v36 = vrot.slane %v4200_v2, %v7620_v31 }
0x3079   :  { %v4238_v46 = vsel %vm805_vm6, %v4219_v35, %v4237_v20 }
0x307a   :  { %v4197_v8 = vpop.permute.xlu1 %4196  ;;  %v4239_v47 = vsel %vm807_vm7, %v4223_v53, %v4238_v46 }
0x307b   :  { %v4227_v41 = vrot.slane %v4197_v8, %v7620_v31 }
0x307d   :  { %v4240_v44 = vsel %vm809_vm8, %v4227_v41, %v4239_v47 }
0x307e   :  { %v4203_v12 = vpop.permute.xlu1 %4202  ;;  %v4241_v62 = vsel %vm811_vm9, %v4231_v36, %v4240_v44 }
0x307f   :  { %v4235_v39 = vrot.slane %v4203_v12, %v7620_v31 }
0x3081   :  { %v4242_v21 = vsel %vm813_vm10, %v4235_v39, %v4241_v62 }
0x3082   :  { %v4244_v60 = vsel %vm816_vm11, %v4242_v21, 0.0 }
0x3083   :  { %4245 = vadd.xlane.f32.xlu0 %v4244_v60 }
0x310c   :  { %v4246_v61 = vpop.xlane.xlu0 %4245 }
0x310d   :  { %6907 = vrcp.f32 %v4246_v61 }
0x311a   :  { %v6908_v43 = vpop.eup %6907 }
0x311b   :  { %v4252_v52 = vrot.slane %v6908_v43, %v7582_v16  ;;  %v4256_v6 = vrot.slane %v6908_v43, %v7639_v57  ;;  %v4260_v20 = vrot.slane %v6908_v43, %v7642_v58  ;;  %v4264_v53 = vrot.slane %v6908_v43, %v7645_v59 }
0x311c   :  { %v4268_v2 = vrot.slane %v6908_v43, %v9565_v3  ;;  %v4272_v47 = vrot.slane %v6908_v43, %v9564_v34  ;;  %v4276_v44 = vrot.slane %v6908_v43, %v9567_v49  ;;  %v4280_v36 = vrot.slane %v6908_v43, %v9566_v24 }
0x311d   :  { %v4289_v54 = vmul.f32 %v6892_v23, %v4252_v52  ;;  %v4290_v35 = vmul.f32 %v6894_v22, %v4256_v6  ;;  %v4291_v46 = vmul.f32 %v6896_v19, %v4260_v20  ;;  %v4292_v8 = vmul.f32 %v6900_v14, %v4264_v53  ;;  %v8990_v14 = vld [vmem:[%s9371_s0 + $0x8] sm:$0xff] }
0x311e   :  { %v4293_v41 = vmul.f32 %v6898_v11, %v4268_v2  ;;  %v4294_v23 = vmul.f32 %v6904_v38, %v4272_v47  ;;  %v4295_v22 = vmul.f32 %v6902_v40, %v4276_v44  ;;  %v4296_v19 = vmul.f32 %v6906_v45, %v4280_v36  ;;  %9586 = vst [vmem:[#allocation27_spill] sm:$0xff] %v8990_v14  ;;  %v8996_v38 = vld [vmem:[%s9371_s0] sm:$0xff]  ;;  %v9002_v45 = vld [vmem:[%s9371_s0 + $0x10] sm:$0xff] }
0x311f   :  { %4299 = vperm.xlu1 %6718, %v4289_v54   ;;  %9587 = vst [vmem:[#allocation28_spill] sm:$0xff] %v8996_v38  ;;  %9588 = vst [vmem:[#allocation29_spill] sm:$0xff] %v9002_v45  ;;  %v9011_v54 = vld [vmem:[%s9371_s0 + $0x18] sm:$0xff] }
0x3120   :  { %9589 = vst [vmem:[#allocation30_spill] sm:$0xff] %v9011_v54 }
0x3123   :  { %4304 = vperm.xlu1 %6718, %v4290_v35  }
0x3127   :  { %4309 = vperm.xlu1 %6718, %v4291_v46  }
0x312b   :  { %4314 = vperm.xlu1 %6718, %v4292_v8  }
0x312f   :  { %4319 = vperm.xlu1 %6718, %v4293_v41   ;;  %v9018_v41 = vld [vmem:[%s9371_s0 + $0x20] sm:$0xff] }
0x3130   :  { %9590 = vst [vmem:[#allocation31_spill] sm:$0xff] %v9018_v41 }
0x3133   :  { %4324 = vperm.xlu1 %6718, %v4294_v23  }
0x3137   :  { %4329 = vperm.xlu1 %6718, %v4295_v22  }
0x313b   :  { %4334 = vperm.xlu1 %6718, %v4296_v19  }
0x319a   :  { %v4300_v12 = vpop.permute.xlu1 %4299 }
0x319b   :  { %v4337_v40 = vmul.f32 %v8996_v38, %v4300_v12 }
0x319d   :  { %v4345_v52 = vsel %vm56_vm1, %v4337_v40, 0.0 }
0x319e   :  { %v4305_v39 = vpop.permute.xlu1 %4304  ;;  %v4346_v53 = vrot.slane %v4345_v52, 4 }
0x319f   :  { %v4338_v11 = vmul.f32 %v8990_v14, %v4305_v39 }
0x31a0   :  { %v4347_v36 = vadd.f32 %v4346_v53, %v4345_v52 }
0x31a1   :  { %v4352_v60 = vsel %vm56_vm1, %v4338_v11, 0.0  ;;  %v9025_v11 = vld [vmem:[%s9371_s0 + $0x28] sm:$0xff] }
0x31a2   :  { %v4310_v62 = vpop.permute.xlu1 %4309  ;;  %v4353_v35 = vrot.slane %v4352_v60, 4  ;;  %9591 = vst [vmem:[#allocation32_spill] sm:$0xff] %v9025_v11 }
0x31a3   :  { %v4339_v21 = vmul.f32 %v9002_v45, %v4310_v62  ;;  %v9039_v45 = vld [vmem:[%s9371_s0 + $0x38] sm:$0xff] }
0x31a4   :  { %v4354_v23 = vadd.f32 %v4353_v35, %v4352_v60  ;;  %v4348_v60 = vrot.slane %v4347_v36, 2  ;;  %9593 = vst [vmem:[#allocation34_spill] sm:$0xff] %v9039_v45 }
0x31a5   :  { %v4359_v61 = vsel %vm56_vm1, %v4339_v21, 0.0 }
0x31a6   :  { %v4315_v43 = vpop.permute.xlu1 %4314  ;;  %v4360_v20 = vrot.slane %v4359_v61, 4  ;;  %v4355_v40 = vrot.slane %v4354_v23, 2 }
0x31a7   :  { %v4340_v6 = vmul.f32 %v9011_v54, %v4315_v43 }
0x31a8   :  { %v4361_v44 = vadd.f32 %v4360_v20, %v4359_v61 }
0x31a9   :  { %v4366_v46 = vsel %vm56_vm1, %v4340_v6, 0.0 }
0x31aa   :  { %v4367_v8 = vrot.slane %v4366_v46, 4  ;;  %v4320_v2 = vpop.permute.xlu1 %4319  ;;  %v4362_v43 = vrot.slane %v4361_v44, 2 }
0x31ab   :  { %v4341_v47 = vmul.f32 %v9018_v41, %v4320_v2 }
0x31ac   :  { %v4368_v19 = vadd.f32 %v4367_v8, %v4366_v46  ;;  %v9032_v46 = vld [vmem:[%s9371_s0 + $0x30] sm:$0xff]  ;;  %v4356_v8 = vadd.f32 %v4355_v40, %v4354_v23 }
0x31ad   :  { %v4373_v22 = vsel %vm56_vm1, %v4341_v47, 0.0  ;;  %9592 = vst [vmem:[#allocation33_spill] sm:$0xff] %v9032_v46  ;;  %v4363_v47 = vadd.f32 %v4362_v43, %v4361_v44 }
0x31ae   :  { %v4374_v12 = vrot.slane %v4373_v22, 4  ;;  %v4325_v39 = vpop.permute.xlu1 %4324  ;;  %v4369_v61 = vrot.slane %v4368_v19, 2  ;;  %v4357_v14 = vrot.slane %v4356_v8, 1 }
0x31af   :  { %v4342_v62 = vmul.f32 %v9025_v11, %v4325_v39  ;;  %v4364_v40 = vrot.slane %v4363_v47, 1 }
0x31b0   :  { %v4375_v21 = vadd.f32 %v4374_v12, %v4373_v22  ;;  %v4349_v12 = vadd.f32 %v4348_v60, %v4347_v36  ;;  %v4370_v39 = vadd.f32 %v4369_v61, %v4368_v19  ;;  %v4358_v61 = vadd.f32 %v4357_v14, %v4356_v8 }
0x31b1   :  { %v4380_v6 = vsel %vm56_vm1, %v4342_v62, 0.0 }
0x31b2   :  { %v4381_v35 = vrot.slane %v4380_v6, 4  ;;  %v4330_v20 = vpop.permute.xlu1 %4329  ;;  %v4376_v52 = vrot.slane %v4375_v21, 2  ;;  %v4350_v43 = vrot.slane %v4349_v12, 1  ;;  %v4371_v36 = vrot.slane %v4370_v39, 1 }
0x31b3   :  { %v4343_v53 = vmul.f32 %v9032_v46, %v4330_v20 }
0x31b4   :  { %v4382_v2 = vadd.f32 %v4381_v35, %v4380_v6  ;;  %v4377_v54 = vadd.f32 %v4376_v52, %v4375_v21  ;;  %v4351_v46 = vadd.f32 %v4350_v43, %v4349_v12  ;;  %v4372_v49 = vadd.f32 %v4371_v36, %v4370_v39 }
0x31b5   :  { %v4387_v22 = vsel %vm56_vm1, %v4343_v53, 0.0  ;;  %v4365_v53 = vadd.f32 %v4364_v40, %v4363_v47 }
0x31b6   :  { %v4383_v62 = vrot.slane %v4382_v2, 2  ;;  %v4388_v11 = vrot.slane %v4387_v22, 4  ;;  %v4335_v41 = vpop.permute.xlu1 %4334  ;;  %v4378_v60 = vrot.slane %v4377_v54, 1 }
0x31b7   :  { %v4344_v38 = vmul.f32 %v9039_v45, %v4335_v41 }
0x31b8   :  { %v4384_v20 = vadd.f32 %v4383_v62, %v4382_v2  ;;  %v4389_v23 = vadd.f32 %v4388_v11, %v4387_v22  ;;  %v4379_v45 = vadd.f32 %v4378_v60, %v4377_v54  ;;  %v4409_v11 = vsel %vm801_vm4, %v4358_v61, %v4351_v46  ;;  %v7087_v46 = vld [vmem:[%s9374_s5 + $0x18] sm:$0xff] }
0x31b9   :  { %v4394_v44 = vsel %vm56_vm1, %v4344_v38, 0.0  ;;  %v4410_v38 = vsel %vm803_vm5, %v4365_v53, %v4409_v11  ;;  %v9595_v11 = vld [vmem:[#allocation21_spill] sm:$0xff] }
0x31ba   :  { %v4390_v19 = vrot.slane %v4389_v23, 2  ;;  %v4395_v6 = vrot.slane %v4394_v44, 4  ;;  %v4385_v21 = vrot.slane %v4384_v20, 1  ;;  %v4411_v3 = vsel %vm805_vm6, %v4372_v49, %v4410_v38  ;;  %v7093_v38 = vld [vmem:[%s9377_s9 + $0x8] sm:$0xff] }
0x31bb   :  { %v4412_v14 = vsel %vm807_vm7, %v4379_v45, %v4411_v3 }
0x31bc   :  { %v4391_v35 = vadd.f32 %v4390_v19, %v4389_v23  ;;  %v4396_v52 = vadd.f32 %v4395_v6, %v4394_v44  ;;  %v4386_v2 = vadd.f32 %v4385_v21, %v4384_v20  ;;  %v7088_v20 = vld [vmem:[%s9374_s5 + $0x10] sm:$0xff] }
0x31be   :  { %v4392_v24 = vrot.slane %v4391_v35, 1  ;;  %v4397_v41 = vrot.slane %v4396_v52, 2  ;;  %v4413_v47 = vsel %vm809_vm8, %v4386_v2, %v4412_v14 }
0x31c0   :  { %v4398_v22 = vadd.f32 %v4397_v41, %v4396_v52  ;;  %v4393_v62 = vadd.f32 %v4392_v24, %v4391_v35 }
0x31c2   :  { %v4399_v34 = vrot.slane %v4398_v22, 1  ;;  %v4414_v12 = vsel %vm811_vm9, %v4393_v62, %v4413_v47  ;;  %v7094_v62 = vld [vmem:[%s9377_s9] sm:$0xff] }
0x31c4   :  { %v4400_v8 = vadd.f32 %v4399_v34, %v4398_v22  ;;  %v7091_v22 = vld [vmem:[%s9377_s9 + $0x18] sm:$0xff] }
0x31c6   :  { %v4415_v39 = vsel %vm813_vm10, %v4400_v8, %v4414_v12  ;;  %v9596_v8 = vld [vmem:[#allocation20_spill] sm:$0xff] }
0x31c7   :  { %6568 = vmatmul.mubr.msk.f32.vlgmr.msra.gmra.mxu0 %vm56_vm1, %v4415_v39 }
0x31c8   :  { %6582 = vmatpush3.msra.mxu0 %v8575_v1  ;;  %6589 = vmatprep.mubr.msk.f32.mxu0 %vm7102_vm0, %v9497_v32 }
0x31c9   :  { %6583 = vmatprep.subr.mxu0 %v9497_v32 }
0x31ca   :  { %6584 = vmatpush3.msra.mxu0 %v8584_v26 }
0x31cb   :  { %6585 = vmatprep.subr.mxu0 %v9497_v32 }
0x31cc   :  { %6586 = vmatpush3.msra.mxu0 %v8591_v50 }
0x31cd   :  { %6587 = vmatprep.subr.mxu0 %v9497_v32 }
0x31ce   :  { %6588 = vmatpush3.msra.mxu0 %v8598_v18 }
0x31cf   :  { %6627 = vmatprep.subr.mxu0 %v9497_v32 }
0x3287   :  { %v4484_v34 = vpop.f32.mrf.mxu0 }
0x3288   :  { %v4555_v3 = vadd.f32 %v8905_v28, %v4484_v34 }
0x3289   :  { %v6569_v24 = vpop.f32.mrf.mxu0 }
0x328a   :  { %v4558_v49 = vadd.f32 %v8606_v15, %v4555_v3 }
0x328c   :  { %6909 = vtanh.f32 %v4558_v49 }
0x3299   :  { %v6910_v1 = vpop.eup %6909 }
0x329a   :  { %6590 = vmatmul.mubr.msk.f32.vlgmr.msra.gmra.mxu0 %vm56_vm1, %v6910_v1 }
0x329b   :  { %6628 = vmatpush3.msra.mxu0 %v8613_v25  ;;  %6643 = vmatprep.mubr.msk.f32.mxu0 %vm7102_vm0, %v9497_v32 }
0x329c   :  { %6629 = vmatprep.subr.mxu0 %v9497_v32 }
0x329d   :  { %6630 = vmatpush3.msra.mxu0 %v8622_v42 }
0x329e   :  { %6631 = vmatprep.subr.mxu0 %v9497_v32 }
0x329f   :  { %6632 = vmatpush3.msra.mxu0 %v8629_v37 }
0x32a0   :  { %6633 = vmatprep.subr.mxu0 %v9497_v32 }
0x32a1   :  { %6634 = vmatpush3.msra.mxu0 %v8636_v10 }
0x32a2   :  { %6635 = vmatprep.subr.mxu0 %v9497_v32 }
0x32a3   :  { %6636 = vmatpush3.msra.mxu0 %v8643_v56 }
0x32a4   :  { %6637 = vmatprep.subr.mxu0 %v9497_v32 }
0x32a5   :  { %6638 = vmatpush3.msra.mxu0 %v8650_v4 }
0x32a6   :  { %6639 = vmatprep.subr.mxu0 %v9497_v32 }
0x32a7   :  { %6640 = vmatpush3.msra.mxu0 %v8657_v63 }
0x32a8   :  { %6641 = vmatprep.subr.mxu0 %v9497_v32 }
0x32a9   :  { %6642 = vmatpush3.msra.mxu0 %v8664_v29 }
0x32aa   :  { %6646 = vmatprep.subr.mxu0 %v9497_v32 }
0x335a   :  { %v4629_v26 = vpop.f32.mrf.mxu0 }
0x335b   :  { %v9083_v50 = vadd.f32 %v8671_v0, %v4629_v26 }
0x335c   :  { %v6591_v18 = vpop.f32.mrf.mxu0 }
0x335d   :  { %4633 = vmax.xlane.f32.xlu0 %v9083_v50 }
0x33e6   :  { %v9086_v15 = vpop.xlane.xlu0 %4633 }
0x33e7   :  { %vm4635_vm2 = vcmp.eq.f32.partialorder %v9083_v50, %v9086_v15 }
0x33e8   :  { %v4636_v25 = vsel %vm4635_vm2, %v7344_v30, 128 }
0x33e9   :  { %v4638_v42 = vshra.s32 %v4636_v25, 16  ;;  %v4637_v10 = vand.u32 65535, %v4636_v25 }
0x33eb   :  { %v4640_v37 = vcvt.s32.f32 %v4638_v42  ;;  %v4639_v4 = vcvt.s32.f32 %v4637_v10 }
0x33ed   :  { %4641 = vmin.xlane.f32.xlu1 %v4640_v37 }
0x3476   :  { %v4642_v56 = vpop.xlane.xlu1 %4641 }
0x3477   :  { %vm4643_vm12 = vcmp.eq.f32.partialorder %v4640_v37, %v4642_v56  ;;  %v4648_v29 = vcvt.f32.s32 %v4642_v56 }
0x3478   :  { %v4644_v63 = vsel %vm4643_vm12, %v4639_v4, inf }
0x3479   :  { %4645 = vmin.xlane.f32.xlu0 %v4644_v63  ;;  %v4649_v28 = vshll.u32 %v4648_v29, 16  ;;  %v9597_v29 = vld [vmem:[#allocation22_spill] sm:$0xff] }
0x3502   :  { %v4646_v0 = vpop.xlane.xlu0 %4645 }
0x3503   :  { %v4647_v45 = vcvt.f32.s32 %v4646_v0  ;;  %v9598_v0 = vld [vmem:[#allocation23_spill] sm:$0xff] }
0x3505   :  { %v4650_v54 = vadd.s32 %v4649_v28, %v4647_v45  ;;  %v9599_v28 = vld [vmem:[#allocation24_spill] sm:$0xff]  ;;  %v9600_v45 = vld [vmem:[#allocation25_spill] sm:$0xff] }
0x3507   :  { %vm4660_vm13 = vcmp.eq.s32.totalorder %v7344_v30, %v4650_v54  ;;  %v7089_v30 = vld [vmem:[%s9374_s5 + $0x8] sm:$0xff] }
0x3508   :  { %6625 = vmatmul.mubr.msk.f32.vlgmr.msra.gmra.mxu1 %vm4660_vm13, %v9531_v55  ;;  %v7090_v55 = vld [vmem:[%s9374_s5] sm:$0xff] }
0x3509   :  { %6666 = vmatpush3.msra.mxu1 %v7087_v46  ;;  %6673 = vmatprep.mubr.msk.f32.mxu1 %vm7102_vm0, %v9497_v32 }
0x350a   :  { %6667 = vmatprep.subr.mxu1 %v9497_v32 }
0x350b   :  { %6668 = vmatpush3.msra.mxu1 %v7088_v20  ;;  %v9601_v20 = vld [vmem:[#allocation10_spill] sm:$0xff] }
0x350c   :  { %6669 = vmatprep.subr.mxu1 %v9497_v32 }
0x350d   :  { %6670 = vmatpush3.msra.mxu1 %v7089_v30 }
0x350e   :  { %6671 = vmatprep.subr.mxu1 %v9497_v32 }
0x350f   :  { %6672 = vmatpush3.msra.mxu1 %v7090_v55 }
0x3510   :  { %6687 = vmatprep.subr.mxu1 %v9497_v32 }
0x35c8   :  { %v4729_v23 = vpop.f32.mrf.mxu1 }
0x35c9   :  { %v4733_v40 = vsel %vm56_vm1, %v4729_v23, %v8765_v33 }
0x35ca   :  { %v6626_v44 = vpop.f32.mrf.mxu1  ;;  %6644 = vmatmul.mubr.msk.f32.vlgmr.msra.gmra.mxu0 %vm330_vm3, %v4733_v40 }
0x35cb   :  { %6647 = vmatpush3.msra.mxu0 %v8700_v9  ;;  %6662 = vmatprep.mubr.msk.f32.mxu0 %vm7102_vm0, %v9497_v32 }
0x35cc   :  { %6648 = vmatprep.subr.mxu0 %v9497_v32 }
0x35cd   :  { %6649 = vmatpush3.msra.mxu0 %v8709_v48  ;;  %v9594_v48 = vld [vmem:[#allocation19_spill] sm:$0xff] }
0x35ce   :  { %6650 = vmatprep.subr.mxu0 %v9497_v32 }
0x35cf   :  { %6651 = vmatpush3.msra.mxu0 %v8716_v13 }
0x35d0   :  { %6652 = vmatprep.subr.mxu0 %v9497_v32 }
0x35d1   :  { %6653 = vmatpush3.msra.mxu0 %v8723_v17 }
0x35d2   :  { %6654 = vmatprep.subr.mxu0 %v9497_v32 }
0x35d3   :  { %6655 = vmatpush3.msra.mxu0 %v8730_v5 }
0x35d4   :  { %6656 = vmatprep.subr.mxu0 %v9497_v32 }
0x35d5   :  { %6657 = vmatpush3.msra.mxu0 %v8737_v27 }
0x35d6   :  { %6658 = vmatprep.subr.mxu0 %v9497_v32 }
0x35d7   :  { %6659 = vmatpush3.msra.mxu0 %v8744_v7 }
0x35d8   :  { %6660 = vmatprep.subr.mxu0 %v9497_v32 }
0x35d9   :  { %6661 = vmatpush3.msra.mxu0 %v8751_v51 }
0x35da   :  { %6676 = vmatprep.subr.mxu0 %v9497_v32 }
0x368a   :  { %v4803_v9 = vpop.f32.mrf.mxu0 }
0x368b   :  { %v4804_v13 = vadd.f32 %v9594_v48, %v4803_v9 }
0x368c   :  { %v6645_v17 = vpop.f32.mrf.mxu0 }
0x368d   :  { %4814 = vrot.lane.b32.xlu0 %v4804_v13, %s7103_s22  ;;  %v5809_v5 = vmul.f32 -1.442695, %v4804_v13 }
0x368f   :  { %6911 = vpow2.f32 %v5809_v5 }
0x369c   :  { %v6912_v43 = vpop.eup %6911 }
0x369d   :  { %v4810_v27 = vadd.f32 1.0, %v6912_v43 }
0x369f   :  { %6913 = vrcp.f32 %v4810_v27 }
0x36ac   :  { %v6914_v36 = vpop.eup %6913 }
0x36ad   :  { %v4824_v61 = vsub.f32 1.0, %v6914_v36  ;;  %v4830_v35 = vmul.f32 %v6914_v36, %v8765_v33  ;;  %v7092_v33 = vld [vmem:[%s9377_s9 + $0x10] sm:$0xff] }
0x36ff   :  { %v4815_v19 = vpop.permute.xlu0 %4814 }
0x3700   :  { %v4817_v7 = vmul.f32 %v6914_v36, %v4815_v19 }
0x3702   :  { %4819 = vrot.lane.b32.xlu0 %v4817_v7, %s7105_s17 }
0x3774   :  { %v4820_v6 = vpop.permute.xlu0 %4819 }
0x3775   :  { %v4822_v51 = vadd.f32 %v4820_v6, %v4804_v13 }
0x3777   :  { %6915 = vtanh.f32 %v4822_v51  ;;  %v9602_v51 = vld [vmem:[#allocation3_spill] sm:$0xff] }
0x3784   :  { %v6916_v60 = vpop.eup %6915 }
0x3785   :  { %4826 = vrot.lane.b32.xlu0 %v6916_v60, %s7106_s30 }
0x37f7   :  { %v4827_v21 = vpop.permute.xlu0 %4826 }
0x37f8   :  { %v4829_v52 = vmul.f32 %v4827_v21, %v4824_v61 }
0x37fa   :  { %v4831_v53 = vadd.f32 %v4830_v35, %v4829_v52 }
0x37fc   :  { %4833 = vrot.lane.b32.xlu0 %v4831_v53, %s7106_s30 }
0x386e   :  { %v4834_v41 = vpop.permute.xlu0 %4833 }
0x386f   :  { %v4836_v2 = vsel %vm56_vm1, %v4834_v41, %v9595_v11  ;;  %v9603_v41 = vld [vmem:[#allocation2_spill] sm:$0xff] }
0x3870   :  { %6663 = vmatmul.mubr.msk.f32.vlgmr.msra.gmra.mxu0 %vm330_vm3, %v4836_v2  ;;  %v9604_v2 = vld [vmem:[#allocation5_spill] sm:$0xff] }
0x3871   :  { %6677 = vmatpush3.msra.mxu0 %v7091_v22  ;;  %6684 = vmatprep.mubr.msk.f32.mxu0 %vm7102_vm0, %v9497_v32 }
0x3872   :  { %6678 = vmatprep.subr.mxu0 %v9497_v32 }
0x3873   :  { %6679 = vmatpush3.msra.mxu0 %v7092_v33 }
0x3874   :  { %6680 = vmatprep.subr.mxu0 %v9497_v32 }
0x3875   :  { %6681 = vmatpush3.msra.mxu0 %v7093_v38  ;;  %v9605_v38 = vld [vmem:[#allocation4_spill] sm:$0xff] }
0x3876   :  { %6682 = vmatprep.subr.mxu0 %v9497_v32 }
0x3877   :  { %6683 = vmatpush3.msra.mxu0 %v7094_v62 }
0x3878   :  { %6698 = vmatprep.subr.mxu0 %v9497_v32 }
0x3930   :  { %v4906_v14 = vpop.f32.mrf.mxu0 }
0x3931   :  { %v4907_v47 = vadd.f32 %v9596_v8, %v4906_v14  ;;  %v9606_v14 = vld [vmem:[#allocation7_spill] sm:$0xff] }
0x3932   :  { %v6664_v12 = vpop.f32.mrf.mxu0 }
0x3933   :  { %4917 = vrot.lane.b32.xlu1 %v4907_v47, %s7103_s22  ;;  %v5811_v39 = vmul.f32 -1.442695, %v4907_v47 }
0x3935   :  { %6917 = vpow2.f32 %v5811_v39 }
0x3942   :  { %v6918_v34 = vpop.eup %6917 }
0x3943   :  { %v4913_v3 = vadd.f32 1.0, %v6918_v34  ;;  %v9608_v34 = vld [vmem:[#allocation6_spill] sm:$0xff] }
0x3945   :  { %6919 = vrcp.f32 %v4913_v3 }
0x3952   :  { %v6920_v24 = vpop.eup %6919 }
0x3953   :  { %v4927_v42 = vsub.f32 1.0, %v6920_v24  ;;  %v4933_v10 = vmul.f32 %v6920_v24, %v9595_v11 }
0x39a5   :  { %v4918_v49 = vpop.permute.xlu1 %4917 }
0x39a6   :  { %v4920_v1 = vmul.f32 %v6920_v24, %v4918_v49  ;;  %v9609_v24 = vld [vmem:[#allocation8_spill] sm:$0xff] }
0x39a8   :  { %4922 = vrot.lane.b32.xlu0 %v4920_v1, %s7105_s17 }
0x3a1a   :  { %v4923_v26 = vpop.permute.xlu0 %4922 }
0x3a1b   :  { %v4925_v18 = vadd.f32 %v4923_v26, %v4907_v47  ;;  %v9607_v47 = vld [vmem:[#allocation9_spill] sm:$0xff]  ;;  %v9610_v26 = vld [vmem:[#allocation26_spill] sm:$0xff] }
0x3a1d   :  { %6921 = vtanh.f32 %v4925_v18 }
0x3a2a   :  { %v6922_v25 = vpop.eup %6921 }
0x3a2b   :  { %4929 = vrot.lane.b32.xlu0 %v6922_v25, %s7106_s30 }
0x3a9d   :  { %v4930_v37 = vpop.permute.xlu0 %4929 }
0x3a9e   :  { %v4932_v56 = vmul.f32 %v4930_v37, %v4927_v42 }
0x3aa0   :  { %v4934_v4 = vadd.f32 %v4933_v10, %v4932_v56 }
0x3aa2   :  { %4936 = vrot.lane.b32.xlu0 %v4934_v4, %s7106_s30 }
0x3b14   :  { %v4937_v63 = vpop.permute.xlu0 %4936 }
0x3b15   :  { %6674 = vmatmul.mubr.msk.f32.vlgmr.msra.gmra.mxu1 %vm56_vm1, %v4937_v63 }
0x3b16   :  { %6688 = vmatpush3.msra.mxu1 %v9597_v29  ;;  %6695 = vmatprep.mubr.msk.f32.mxu1 %vm7102_vm0, %v9497_v32 }
0x3b17   :  { %6689 = vmatprep.subr.mxu1 %v9497_v32 }
0x3b18   :  { %6690 = vmatpush3.msra.mxu1 %v9598_v0 }
0x3b19   :  { %6691 = vmatprep.subr.mxu1 %v9497_v32 }
0x3b1a   :  { %6692 = vmatpush3.msra.mxu1 %v9599_v28 }
0x3b1b   :  { %6693 = vmatprep.subr.mxu1 %v9497_v32 }
0x3b1c   :  { %6694 = vmatpush3.msra.mxu1 %v9600_v45 }
0x3b1d   :  { %6696 = vmatmul.mubr.msk.f32.vlgmr.msra.gmra.mxu1 %vm56_vm1, %v4937_v63 }
0x3bd5   :  { %v5006_v54 = vpop.f32.mrf.mxu1 }
0x3bd6   :  { %v5011_v46 = vcombine.high %v5006_v54, %v5006_v54  ;;  %v5018_v30 = vrot.slane %v5006_v54, %v9601_v20 }
0x3bd7   :  { %v6675_v55 = vpop.f32.mrf.mxu1 }
0x3bd8   :  { %v5025_v23 = vrot.slane %v5011_v46, %v9601_v20  ;;  %v5026_v40 = vcombine.high %v5018_v30, %v5018_v30  ;;  %v5034_v44 = vrot.slane %v5018_v30, %v9601_v20 }
0x3bda   :  { %v5027_v9 = vcombine.high %v5025_v23, %v5025_v23  ;;  %v5041_v48 = vrot.slane %v5025_v23, %v9601_v20  ;;  %v5048_v13 = vrot.slane %v5026_v40, %v9601_v20  ;;  %v5056_v17 = vcombine.high %v5034_v44, %v5034_v44 }
0x3bdb   :  { %v5063_v5 = vrot.slane %v5034_v44, %v7582_v16 }
0x3bdc   :  { %v5055_v43 = vrot.slane %v5027_v9, %v9601_v20  ;;  %v5057_v27 = vcombine.high %v5041_v48, %v5041_v48  ;;  %v5058_v36 = vcombine.high %v5048_v13, %v5048_v13  ;;  %v5067_v19 = vrot.slane %v5048_v13, %v7582_v16 }
0x3bdd   :  { %v5071_v7 = vrot.slane %v5056_v17, %v7582_v16  ;;  %v5079_v6 = vrot.slane %v5041_v48, %v7582_v16  ;;  %v5100_v60 = vadd.f32 %v5063_v5, %v9602_v51  ;;  %v9187_v61 = vpop.f32.mrf.mxu1 }
0x3bde   :  { %v5059_v21 = vcombine.high %v5055_v43, %v5055_v43  ;;  %v5075_v35 = vrot.slane %v5058_v36, %v7582_v16  ;;  %v5087_v52 = vrot.slane %v5057_v27, %v7582_v16  ;;  %v5083_v53 = vrot.slane %v5055_v43, %v7582_v16 }
0x3bdf   :  { %v5101_v11 = vadd.f32 %v9603_v41, %v5067_v19  ;;  %v5102_v22 = vadd.f32 %v5071_v7, %v9604_v2  ;;  %6923 = vtanh.f32 %v5100_v60  ;;  %v6697_v33 = vpop.f32.mrf.mxu1  ;;  %v5104_v8 = vadd.f32 %v5079_v6, %v9606_v14 }
0x3be0   :  { %v5103_v62 = vadd.f32 %v9605_v38, %v5075_v35  ;;  %v5106_v12 = vadd.f32 %v5087_v52, %v9607_v47  ;;  %v5091_v39 = vrot.slane %v5059_v21, %v7582_v16  ;;  %v5105_v3 = vadd.f32 %v9608_v34, %v5083_v53 }
0x3be1   :  { %6925 = vtanh.f32 %v5101_v11 }
0x3be2   :  { %6927 = vtanh.f32 %v5102_v22  ;;  %v5107_v49 = vadd.f32 %v9609_v24, %v5091_v39 }
0x3be3   :  { %6929 = vtanh.f32 %v5103_v62 }
0x3be4   :  { %6931 = vtanh.f32 %v5104_v8 }
0x3be5   :  { %6933 = vtanh.f32 %v5106_v12 }
0x3be6   :  { %6935 = vtanh.f32 %v5105_v3 }
0x3be7   :  { %6937 = vtanh.f32 %v5107_v49  ;;  %v9611_v49 = vld [vmem:[#allocation12_spill] sm:$0xff] }
0x3bec   :  { %v6924_v1 = vpop.eup %6923 }
0x3bed   :  { %v5116_v18 = vmul.f32 %v9610_v26, %v6924_v1 }
0x3bee   :  { %v6926_v25 = vpop.eup %6925 }
0x3bef   :  { %v6928_v42 = vpop.eup %6927  ;;  %v5124_v37 = vsel %vm56_vm1, %v5116_v18, 0.0  ;;  %v5117_v10 = vmul.f32 %v9610_v26, %v6926_v25 }
0x3bf0   :  { %v6930_v56 = vpop.eup %6929  ;;  %5125 = vadd.xlane.f32.xlu0 %v5124_v37  ;;  %v5118_v4 = vmul.f32 %v9610_v26, %v6928_v42  ;;  %v9612_v42 = vld [vmem:[#allocation11_spill] sm:$0xff] }
0x3bf1   :  { %v6932_v63 = vpop.eup %6931  ;;  %v5127_v29 = vsel %vm56_vm1, %v5117_v10, 0.0  ;;  %v5119_v54 = vmul.f32 %v9610_v26, %v6930_v56 }
0x3bf2   :  { %5128 = vadd.xlane.f32.xlu1 %v5127_v29  ;;  %v5120_v0 = vmul.f32 %v9610_v26, %v6932_v63  ;;  %v6934_v28 = vpop.eup %6933  ;;  %v5130_v45 = vsel %vm56_vm1, %v5118_v4, 0.0  ;;  %v9613_v63 = vld [vmem:[#allocation14_spill] sm:$0xff] }
0x3bf3   :  { %v6936_v46 = vpop.eup %6935  ;;  %v5122_v30 = vmul.f32 %v9610_v26, %v6934_v28  ;;  %v5133_v55 = vsel %vm56_vm1, %v5119_v54, 0.0 }
0x3bf4   :  { %5131 = vadd.xlane.f32.xlu0 %v5130_v45  ;;  %v5136_v20 = vsel %vm56_vm1, %v5120_v0, 0.0  ;;  %v5121_v23 = vmul.f32 %v9610_v26, %v6936_v46  ;;  %v6938_v40 = vpop.eup %6937  ;;  %v9614_v45 = vld [vmem:[#allocation13_spill] sm:$0xff] }
0x3bf5   :  { %v5142_v44 = vsel %vm56_vm1, %v5122_v30, 0.0  ;;  %v5123_v48 = vmul.f32 %v9610_v26, %v6938_v40 }
0x3bf6   :  { %5137 = vadd.xlane.f32.xlu1 %v5136_v20  ;;  %v5139_v9 = vsel %vm56_vm1, %v5121_v23, 0.0 }
0x3bf7   :  { %v5145_v13 = vsel %vm56_vm1, %v5123_v48, 0.0 }
0x3bf8   :  { %5134 = vadd.xlane.f32.xlu0 %v5133_v55 }
0x3bfa   :  { %5143 = vadd.xlane.f32.xlu1 %v5142_v44 }
0x3bfc   :  { %5140 = vadd.xlane.f32.xlu0 %v5139_v9 }
0x3c00   :  { %5146 = vadd.xlane.f32.xlu0 %v5145_v13 }
0x3c79   :  { %v5126_v17 = vpop.xlane.xlu0 %5125 }
0x3c7a   :  { %v5159_v36 = vrot.slane %v5126_v17, %v7620_v31 }
0x3c7b   :  { %v5129_v5 = vpop.xlane.xlu1 %5128 }
0x3c7c   :  { %v5163_v43 = vrot.slane %v5129_v5, %v7620_v31 }
0x3c7d   :  { %v5132_v27 = vpop.xlane.xlu0 %5131 }
0x3c7e   :  { %v5167_v19 = vrot.slane %v5132_v27, %v7620_v31  ;;  %v5188_v7 = vsel %vm801_vm4, %v5163_v43, %v5159_v36 }
0x3c7f   :  { %v5138_v6 = vpop.xlane.xlu1 %5137 }
0x3c80   :  { %v5189_v21 = vsel %vm803_vm5, %v5167_v19, %v5188_v7  ;;  %v5175_v52 = vrot.slane %v5138_v6, %v7620_v31 }
0x3c81   :  { %v5135_v51 = vpop.xlane.xlu0 %5134 }
0x3c82   :  { %v5171_v60 = vrot.slane %v5135_v51, %v7620_v31 }
0x3c83   :  { %v5144_v41 = vpop.xlane.xlu1 %5143 }
0x3c84   :  { %v5190_v35 = vsel %vm805_vm6, %v5171_v60, %v5189_v21  ;;  %v5183_v33 = vrot.slane %v5144_v41, %v7620_v31 }
0x3c85   :  { %v5141_v53 = vpop.xlane.xlu0 %5140  ;;  %v5191_v2 = vsel %vm807_vm7, %v5175_v52, %v5190_v35 }
0x3c86   :  { %v5179_v11 = vrot.slane %v5141_v53, %v7620_v31 }
0x3c88   :  { %v5192_v22 = vsel %vm809_vm8, %v5179_v11, %v5191_v2  ;;  %v9617_v11 = vld [vmem:[#allocation49_spill] sm:$0xff]  ;;  %v9618_v2 = vld [vmem:[#allocation48_spill] sm:$0xff] }
0x3c89   :  { %v5147_v38 = vpop.xlane.xlu0 %5146  ;;  %v5193_v14 = vsel %vm811_vm9, %v5183_v33, %v5192_v22  ;;  %v2467_v22 = vsub.f32 %v9618_v2, %v9617_v11 }
0x3c8a   :  { %v5187_v62 = vrot.slane %v5147_v38, %v7620_v31 }
0x3c8c   :  { %v5194_v8 = vsel %vm813_vm10, %v5187_v62, %v5193_v14 }
0x3c8d   :  { %v5196_v47 = vsel %vm816_vm11, %v5194_v8, -inf }
0x3c8e   :  { %5197 = vmax.xlane.f32.xlu1 %v5196_v47 }
0x3d17   :  { %v5198_v12 = vpop.xlane.xlu1 %5197 }
0x3d18   :  { %v5203_v39 = vrot.slane %v5198_v12, %v7582_v16  ;;  %v5207_v34 = vrot.slane %v5198_v12, %v7639_v57  ;;  %v5211_v3 = vrot.slane %v5198_v12, %v7642_v58  ;;  %v5215_v24 = vrot.slane %v5198_v12, %v7645_v59 }
0x3d19   :  { %v5223_v1 = vrot.slane %v5198_v12, %v9611_v49  ;;  %v5219_v37 = vrot.slane %v5198_v12, %v9612_v42  ;;  %v5231_v29 = vrot.slane %v5198_v12, %v9613_v63  ;;  %v5227_v54 = vrot.slane %v5198_v12, %v9614_v45 }
0x3d1a   :  { %v5240_v26 = vsub.f32 %v5126_v17, %v5203_v39  ;;  %v5241_v18 = vsub.f32 %v5129_v5, %v5207_v34  ;;  %v5243_v25 = vsub.f32 %v5135_v51, %v5215_v24  ;;  %v5242_v10 = vsub.f32 %v5132_v27, %v5211_v3  ;;  %v9616_v51 = vld [vmem:[#allocation15_spill] sm:$0xff]  ;;  %v9619_v39 = vld [vmem:[#allocation17_spill] sm:$0xff]  ;;  %v9620_v34 = vld [vmem:[#allocation18_spill] sm:$0xff] }
0x3d1b   :  { %v5245_v0 = vsub.f32 %v5141_v53, %v5223_v1  ;;  %v5244_v46 = vsub.f32 %v5138_v6, %v5219_v37  ;;  %v5247_v30 = vsub.f32 %v5147_v38, %v5231_v29  ;;  %v5246_v23 = vsub.f32 %v5144_v41, %v5227_v54  ;;  %v9615_v6 = vld [vmem:[#allocation16_spill] sm:$0xff] }
0x3d1c   :  { %v5248_v56 = vmul.f32 1.442695, %v5240_v26  ;;  %v5250_v4 = vmul.f32 1.442695, %v5241_v18  ;;  %v5254_v28 = vmul.f32 1.442695, %v5243_v25  ;;  %v1376_v60 = vsub.f32 %v9616_v51, %v9615_v6 }
0x3d1d   :  { %v5252_v20 = vmul.f32 1.442695, %v5242_v10  ;;  %v5258_v55 = vmul.f32 1.442695, %v5245_v0  ;;  %v5256_v40 = vmul.f32 1.442695, %v5244_v46  ;;  %v3559_v3 = vsub.f32 %v9620_v34, %v9619_v39 }
0x3d1e   :  { %6939 = vpow2.f32 %v5248_v56  ;;  %v5262_v44 = vmul.f32 1.442695, %v5247_v30  ;;  %v5260_v9 = vmul.f32 1.442695, %v5246_v23  ;;  %v1377_v41 = vmul.f32 1.442695, %v1376_v60 }
0x3d1f   :  { %6941 = vpow2.f32 %v5250_v4  ;;  %v2468_v12 = vmul.f32 1.442695, %v2467_v22  ;;  %v3560_v10 = vmul.f32 1.442695, %v3559_v3  ;;  %v4651_v56 = vsub.f32 %v9083_v50, %v9086_v15  ;;  %v9621_v39 = vld [vmem:[#allocation27_spill] sm:$0xff] }
0x3d20   :  { %6943 = vpow2.f32 %v5254_v28 }
0x3d21   :  { %6945 = vpow2.f32 %v5252_v20  ;;  %v4652_v46 = vmul.f32 1.442695, %v4651_v56 }
0x3d22   :  { %6947 = vpow2.f32 %v5258_v55 }
0x3d23   :  { %6949 = vpow2.f32 %v5256_v40 }
0x3d24   :  { %6951 = vpow2.f32 %v5262_v44 }
0x3d25   :  { %6953 = vpow2.f32 %v5260_v9 }
0x3d26   :  { %6955 = vpow2.f32 %v1377_v41 }
0x3d27   :  { %6957 = vpow2.f32 %v2468_v12 }
0x3d28   :  { %6959 = vpow2.f32 %v3560_v10 }
0x3d29   :  { %6961 = vpow2.f32 %v4652_v46 }
0x3d2b   :  { %v9240_v48 = vpop.eup %6939 }
0x3d2c   :  { %v9242_v13 = vpop.eup %6941  ;;  %5273 = vperm.xlu0 %6717, %v9240_v48  }
0x3d2d   :  { %5276 = vperm.xlu1 %6718, %v9242_v13   ;;  %v9246_v17 = vpop.eup %6943 }
0x3d2e   :  { %v9248_v5 = vpop.eup %6945 }
0x3d2f   :  { %v9252_v43 = vpop.eup %6947 }
0x3d30   :  { %5282 = vperm.xlu0 %6717, %v9246_v17   ;;  %v9254_v27 = vpop.eup %6949 }
0x3d31   :  { %5279 = vperm.xlu1 %6718, %v9248_v5   ;;  %v9258_v36 = vpop.eup %6951 }
0x3d32   :  { %v9260_v19 = vpop.eup %6953 }
0x3d33   :  { %v6956_v55 = vpop.eup %6955 }
0x3d34   :  { %5288 = vperm.xlu0 %6717, %v9252_v43   ;;  %v6958_v50 = vpop.eup %6957 }
0x3d35   :  { %5285 = vperm.xlu1 %6718, %v9254_v27   ;;  %v6960_v15 = vpop.eup %6959 }
0x3d36   :  { %v6962_v23 = vpop.eup %6961 }
0x3d38   :  { %5294 = vperm.xlu0 %6717, %v9258_v36  }
0x3d39   :  { %5291 = vperm.xlu1 %6718, %v9260_v19  }
0x3da7   :  { %v5274_v7 = vpop.permute.xlu0 %5273 }
0x3da8   :  { %v5277_v21 = vpop.permute.xlu1 %5276  ;;  %v5299_v52 = vrot.slane %v5274_v7, %v7620_v31 }
0x3da9   :  { %v5303_v35 = vrot.slane %v5277_v21, %v7620_v31 }
0x3dab   :  { %v5283_v53 = vpop.permute.xlu0 %5282  ;;  %v5328_v62 = vsel %vm801_vm4, %v5303_v35, %v5299_v52 }
0x3dac   :  { %v5280_v33 = vpop.permute.xlu1 %5279  ;;  %v5311_v14 = vrot.slane %v5283_v53, %v7620_v31 }
0x3dad   :  { %v5307_v38 = vrot.slane %v5280_v33, %v7620_v31 }
0x3daf   :  { %v5329_v8 = vsel %vm803_vm5, %v5307_v38, %v5328_v62  ;;  %v5289_v47 = vpop.permute.xlu0 %5288 }
0x3db0   :  { %v5286_v24 = vpop.permute.xlu1 %5285  ;;  %v5330_v26 = vsel %vm805_vm6, %v5311_v14, %v5329_v8  ;;  %v5319_v18 = vrot.slane %v5289_v47, %v7620_v31 }
0x3db1   :  { %v5315_v1 = vrot.slane %v5286_v24, %v7620_v31  ;;  %v9623_v24 = vld [vmem:[#allocation29_spill] sm:$0xff] }
0x3db3   :  { %v5331_v25 = vsel %vm807_vm7, %v5315_v1, %v5330_v26  ;;  %v5295_v37 = vpop.permute.xlu0 %5294  ;;  %v9624_v26 = vld [vmem:[#allocation30_spill] sm:$0xff] }
0x3db4   :  { %v5292_v4 = vpop.permute.xlu1 %5291  ;;  %v5327_v29 = vrot.slane %v5295_v37, %v7620_v31  ;;  %v5332_v28 = vsel %vm809_vm8, %v5319_v18, %v5331_v25 }
0x3db5   :  { %v5323_v0 = vrot.slane %v5292_v4, %v7620_v31 }
0x3db7   :  { %v5333_v54 = vsel %vm811_vm9, %v5323_v0, %v5332_v28 }
0x3db8   :  { %v5334_v20 = vsel %vm813_vm10, %v5327_v29, %v5333_v54  ;;  %v9625_v29 = vld [vmem:[#allocation31_spill] sm:$0xff] }
0x3db9   :  { %v5336_v30 = vsel %vm816_vm11, %v5334_v20, 0.0 }
0x3dba   :  { %5337 = vadd.xlane.f32.xlu1 %v5336_v30 }
0x3dbe   :  { %1379 = vadd.xlane.f32.xlu1 %v6956_v55 }
0x3dc2   :  { %2470 = vadd.xlane.f32.xlu1 %v6958_v50 }
0x3dc6   :  { %3562 = vadd.xlane.f32.xlu1 %v6960_v15 }
0x3dca   :  { %4654 = vadd.xlane.f32.xlu1 %v6962_v23 }
0x3e43   :  { %v5338_v31 = vpop.xlane.xlu1 %5337 }
0x3e44   :  { %6963 = vrcp.f32 %v5338_v31 }
0x3e47   :  { %v1380_v40 = vpop.xlane.xlu1 %1379 }
0x3e48   :  { %6965 = vrcp.f32 %v1380_v40 }
0x3e4b   :  { %v2471_v44 = vpop.xlane.xlu1 %2470 }
0x3e4c   :  { %6967 = vrcp.f32 %v2471_v44 }
0x3e4f   :  { %v3563_v9 = vpop.xlane.xlu1 %3562 }
0x3e50   :  { %6969 = vrcp.f32 %v3563_v9 }
0x3e51   :  { %v6964_v7 = vpop.eup %6963 }
0x3e52   :  { %v5344_v6 = vrot.slane %v6964_v7, %v7582_v16  ;;  %v5348_v21 = vrot.slane %v6964_v7, %v7639_v57  ;;  %v5352_v41 = vrot.slane %v6964_v7, %v7642_v58  ;;  %v5356_v57 = vrot.slane %v6964_v7, %v7645_v59 }
0x3e53   :  { %v4655_v51 = vpop.xlane.xlu1 %4654  ;;  %v5368_v14 = vrot.slane %v6964_v7, %v9614_v45 }
0x3e54   :  { %6971 = vrcp.f32 %v4655_v51  ;;  %v5381_v60 = vmul.f32 %v9240_v48, %v5344_v6  ;;  %v5382_v53 = vmul.f32 %v9242_v13, %v5348_v21  ;;  %v5383_v16 = vmul.f32 %v9248_v5, %v5352_v41 }
0x3e55   :  { %v6966_v35 = vpop.eup %6965  ;;  %v5384_v58 = vmul.f32 %v9246_v17, %v5356_v57  ;;  %v5360_v13 = vrot.slane %v6964_v7, %v9612_v42  ;;  %v5364_v5 = vrot.slane %v6964_v7, %v9611_v49  ;;  %v5387_v17 = vmul.f32 %v9260_v19, %v5368_v14  ;;  %v9622_v49 = vld [vmem:[#allocation28_spill] sm:$0xff] }
0x3e56   :  { %v1382_v52 = vmul.f32 %v6966_v35, %v6956_v55  ;;  %5391 = vperm.xlu0 %6717, %v5381_v60   ;;  %v5372_v42 = vrot.slane %v6964_v7, %v9613_v63  ;;  %v9627_v35 = vld [vmem:[#allocation33_spill] sm:$0xff] }
0x3e57   :  { %v5385_v59 = vmul.f32 %v9254_v27, %v5360_v13  ;;  %v5386_v62 = vmul.f32 %v9252_v43, %v5364_v5 }
0x3e58   :  { %1383 = vst [vmem:[%s9381_s13] sm:$0xff] %v1382_v52  ;;  %v5388_v8 = vmul.f32 %v9258_v36, %v5372_v42 }
0x3e59   :  { %v6968_v11 = vpop.eup %6967 }
0x3e5a   :  { %v2473_v2 = vmul.f32 %v6968_v11, %v6958_v50  ;;  %5396 = vperm.xlu0 %6717, %v5382_v53  }
0x3e5c   :  { %5783 = vst [vmem:[%s9381_s13 + $0x8] sm:$0xff] %v2473_v2 }
0x3e5d   :  { %v6970_v48 = vpop.eup %6969 }
0x3e5e   :  { %v3565_v22 = vmul.f32 %v6970_v48, %v6960_v15  ;;  %5401 = vperm.xlu0 %6717, %v5383_v16   ;;  %v9626_v15 = vld [vmem:[#allocation32_spill] sm:$0xff] }
0x3e60   :  { %5794 = vst [vmem:[%s9381_s13 + $0x10] sm:$0xff] %v3565_v22 }
0x3e61   :  { %v6972_v33 = vpop.eup %6971 }
0x3e62   :  { %v4657_v38 = vmul.f32 %v6972_v33, %v6962_v23  ;;  %5406 = vperm.xlu0 %6717, %v5384_v58   ;;  %v9628_v33 = vld [vmem:[#allocation34_spill] sm:$0xff] }
0x3e64   :  { %5805 = vst [vmem:[%s9381_s13 + $0x18] sm:$0xff] %v4657_v38 }
0x3e66   :  { %5411 = vperm.xlu0 %6717, %v5385_v59  }
0x3e6a   :  { %5416 = vperm.xlu0 %6717, %v5386_v62  }
0x3e6e   :  { %5421 = vperm.xlu0 %6717, %v5387_v17  }
0x3e72   :  { %5426 = vperm.xlu0 %6717, %v5388_v8  }
0x3ed1   :  { %v5392_v47 = vpop.permute.xlu0 %5391 }
0x3ed2   :  { %v5429_v3 = vmul.f32 %v9622_v49, %v5392_v47 }
0x3ed4   :  { %v5437_v63 = vsel %vm56_vm1, %v5429_v3, 0.0 }
0x3ed5   :  { %v5397_v12 = vpop.permute.xlu0 %5396  ;;  %v5438_v10 = vrot.slane %v5437_v63, 4 }
0x3ed6   :  { %v5430_v27 = vmul.f32 %v9621_v39, %v5397_v12 }
0x3ed7   :  { %v5439_v20 = vadd.f32 %v5438_v10, %v5437_v63 }
0x3ed8   :  { %v5444_v45 = vsel %vm56_vm1, %v5430_v27, 0.0 }
0x3ed9   :  { %v5402_v34 = vpop.permute.xlu0 %5401  ;;  %v5445_v36 = vrot.slane %v5444_v45, 4  ;;  %v5440_v7 = vrot.slane %v5439_v20, 2 }
0x3eda   :  { %v5431_v43 = vmul.f32 %v9623_v24, %v5402_v34 }
0x3edb   :  { %v5446_v28 = vadd.f32 %v5445_v36, %v5444_v45  ;;  %v5441_v16 = vadd.f32 %v5440_v7, %v5439_v20  ;;  %v7096_v20 = vld [vmem:[%s9378_s11 + $0x10] sm:$0xff] }
0x3edc   :  { %v5451_v1 = vsel %vm56_vm1, %v5431_v43, 0.0 }
0x3edd   :  { %v5407_v19 = vpop.permute.xlu0 %5406  ;;  %v5452_v25 = vrot.slane %v5451_v1, 4  ;;  %v5447_v31 = vrot.slane %v5446_v28, 2  ;;  %v5442_v42 = vrot.slane %v5441_v16, 1 }
0x3ede   :  { %v5432_v18 = vmul.f32 %v9624_v26, %v5407_v19 }
0x3edf   :  { %v5453_v54 = vadd.f32 %v5452_v25, %v5451_v1  ;;  %v5448_v53 = vadd.f32 %v5447_v31, %v5446_v28  ;;  %v5443_v43 = vadd.f32 %v5442_v42, %v5441_v16  ;;  %v7099_v31 = vld [vmem:[%s9379_s10] ss:$0 sm:$0xff] }
0x3ee0   :  { %v5458_v37 = vsel %vm56_vm1, %v5432_v18, 0.0 }
0x3ee1   :  { %v5459_v56 = vrot.slane %v5458_v37, 4  ;;  %v5412_v4 = vpop.permute.xlu0 %5411  ;;  %v5454_v44 = vrot.slane %v5453_v54, 2  ;;  %v5449_v59 = vrot.slane %v5448_v53, 1 }
0x3ee2   :  { %v5433_v0 = vmul.f32 %v9625_v29, %v5412_v4 }
0x3ee3   :  { %v5460_v30 = vadd.f32 %v5459_v56, %v5458_v37  ;;  %v5455_v11 = vadd.f32 %v5454_v44, %v5453_v54  ;;  %v5450_v27 = vadd.f32 %v5449_v59, %v5448_v53 }
0x3ee4   :  { %v5465_v46 = vsel %vm56_vm1, %v5433_v0, 0.0 }
0x3ee5   :  { %v5466_v55 = vrot.slane %v5465_v46, 4  ;;  %v5417_v50 = vpop.permute.xlu0 %5416  ;;  %v5461_v6 = vrot.slane %v5460_v30, 2  ;;  %v5456_v14 = vrot.slane %v5455_v11, 1  ;;  %v5501_v26 = vsel %vm801_vm4, %v5450_v27, %v5443_v43 }
0x3ee6   :  { %v5434_v23 = vmul.f32 %v9626_v15, %v5417_v50 }
0x3ee7   :  { %v5467_v40 = vadd.f32 %v5466_v55, %v5465_v46  ;;  %v5462_v57 = vadd.f32 %v5461_v6, %v5460_v30  ;;  %v5457_v24 = vadd.f32 %v5456_v14, %v5455_v11  ;;  %v7095_v46 = vld [vmem:[%s9378_s11 + $0x18] sm:$0xff]  ;;  %v7097_v30 = vld [vmem:[%s9378_s11 + $0x8] sm:$0xff]  ;;  %v7098_v55 = vld [vmem:[%s9378_s11] sm:$0xff] }
0x3ee8   :  { %v5472_v9 = vsel %vm56_vm1, %v5434_v23, 0.0 }
0x3ee9   :  { %v5473_v51 = vrot.slane %v5472_v9, 4  ;;  %v5422_v60 = vpop.permute.xlu0 %5421  ;;  %v5468_v21 = vrot.slane %v5467_v40, 2  ;;  %v5463_v8 = vrot.slane %v5462_v57, 1  ;;  %v5502_v25 = vsel %vm803_vm5, %v5457_v24, %v5501_v26 }
0x3eea   :  { %v5435_v52 = vmul.f32 %v9627_v35, %v5422_v60 }
0x3eeb   :  { %v5474_v41 = vadd.f32 %v5473_v51, %v5472_v9  ;;  %v5469_v13 = vadd.f32 %v5468_v21, %v5467_v40  ;;  %v5464_v45 = vadd.f32 %v5463_v8, %v5462_v57 }
0x3eec   :  { %v5479_v2 = vsel %vm56_vm1, %v5435_v52, 0.0 }
0x3eed   :  { %v5475_v48 = vrot.slane %v5474_v41, 2  ;;  %v5480_v22 = vrot.slane %v5479_v2, 4  ;;  %v5427_v58 = vpop.permute.xlu0 %5426  ;;  %v5470_v39 = vrot.slane %v5469_v13, 1  ;;  %v5503_v10 = vsel %vm805_vm6, %v5464_v45, %v5502_v25 }
0x3eee   :  { %v5436_v38 = vmul.f32 %v9628_v33, %v5427_v58 }
0x3eef   :  { %v5476_v5 = vadd.f32 %v5475_v48, %v5474_v41  ;;  %v5481_v62 = vadd.f32 %v5480_v22, %v5479_v2  ;;  %v5471_v63 = vadd.f32 %v5470_v39, %v5469_v13 }
0x3ef0   :  { %v5486_v17 = vsel %vm56_vm1, %v5436_v38, 0.0 }
0x3ef1   :  { %v5482_v47 = vrot.slane %v5481_v62, 2  ;;  %v5487_v12 = vrot.slane %v5486_v17, 4  ;;  %v5477_v34 = vrot.slane %v5476_v5, 1  ;;  %v5504_v4 = vsel %vm807_vm7, %v5471_v63, %v5503_v10 }
0x3ef3   :  { %v5483_v49 = vadd.f32 %v5482_v47, %v5481_v62  ;;  %v5488_v3 = vadd.f32 %v5487_v12, %v5486_v17  ;;  %v5478_v18 = vadd.f32 %v5477_v34, %v5476_v5 }
0x3ef5   :  { %v5484_v1 = vrot.slane %v5483_v49, 1  ;;  %v5489_v19 = vrot.slane %v5488_v3, 2  ;;  %v5505_v0 = vsel %vm809_vm8, %v5478_v18, %v5504_v4 }
0x3ef7   :  { %v5490_v36 = vadd.f32 %v5489_v19, %v5488_v3  ;;  %v5485_v37 = vadd.f32 %v5484_v1, %v5483_v49 }
0x3ef9   :  { %v5491_v56 = vrot.slane %v5490_v36, 1  ;;  %v5506_v28 = vsel %vm811_vm9, %v5485_v37, %v5505_v0 }
0x3efb   :  { %v5492_v29 = vadd.f32 %v5491_v56, %v5490_v36 }
0x3efd   :  { %v5507_v54 = vsel %vm813_vm10, %v5492_v29, %v5506_v28 }
0x3efe   :  { %6685 = vmatmul.mubr.msk.f32.vlgmr.msra.gmra.mxu0 %vm56_vm1, %v5507_v54 }
0x3eff   :  { %6699 = vmatpush3.msra.mxu0 %v7095_v46  ;;  %6706 = vmatprep.mubr.msk.f32.mxu0 %vm7102_vm0, %v9497_v32 }
0x3f00   :  { %6700 = vmatprep.subr.mxu0 %v9497_v32 }
0x3f01   :  { %6701 = vmatpush3.msra.mxu0 %v7096_v20 }
0x3f02   :  { %6702 = vmatprep.subr.mxu0 %v9497_v32 }
0x3f03   :  { %6703 = vmatpush3.msra.mxu0 %v7097_v30 }
0x3f04   :  { %6704 = vmatprep.subr.mxu0 %v9497_v32  ;;  %v7100_v32 = vld [vmem:[%s9380_s12] ss:$0 sm:$0xff] }
0x3f05   :  { %6705 = vmatpush3.msra.mxu0 %v7098_v55 }
0x3fbe   :  { %v5576_v50 = vpop.f32.mrf.mxu0 }
0x3fbf   :  { %v5647_v15 = vadd.f32 %v9187_v61, %v5576_v50 }
0x3fc0   :  { %v6686_v23 = vpop.f32.mrf.mxu0 }
0x3fc1   :  { %v5650_v40 = vadd.f32 %v7099_v31, %v5647_v15 }
0x3fc3   :  { %6973 = vtanh.f32 %v5650_v40 }
0x3fd0   :  { %v6974_v44 = vpop.eup %6973 }
0x3fd1   :  { %6707 = vmatmul.mubr.msk.f32.vlgmr.msra.gmra.mxu0 %vm56_vm1, %v6974_v44 }
0x4091   :  { %v5721_v9 = vpop.f32.mrf.mxu0 }
0x4092   :  { %v5722_v7 = vadd.f32 %v7100_v32, %v5721_v9 }
0x4093   :  { %v6708_v6 = vpop.f32.mrf.mxu0 }
0x4094   :  { %5725 = vmax.xlane.f32.xlu0 %v5722_v7 }
0x411d   :  { %v5726_v51 = vpop.xlane.xlu0 %5725 }
0x411e   :  { %v5727_v61 = vsub.f32 %v5722_v7, %v5726_v51 }
0x4120   :  { %v5728_v60 = vmul.f32 1.442695, %v5727_v61 }
0x4122   :  { %6975 = vpow2.f32 %v5728_v60 }
0x412f   :  { %v6976_v21 = vpop.eup %6975 }
0x4130   :  { %5730 = vadd.xlane.f32.xlu1 %v6976_v21 }
0x41b9   :  { %v5731_v35 = vpop.xlane.xlu1 %5730 }
0x41ba   :  { %6977 = vrcp.f32 %v5731_v35 }
0x41c7   :  { %v6978_v52 = vpop.eup %6977 }
0x41c8   :  { %v5733_v53 = vmul.f32 %v6978_v52, %v6976_v21 }
0x41ca   :  { %5816 = vst [vmem:[%s9381_s13 + $0x20] sm:$0xff] %v5733_v53 }

</bundles_post_ra>
